<compile_context>
chip_gen: v6e
topology: v6e:2x2x1
jax: 0.10.0
libtpu: 0.0.40
codegen_flags: <defaults>
</compile_context>

<pallas_src>
import functools

import jax
import jax.numpy as jnp
from jax.experimental import pallas as pl
from jax.experimental.pallas import tpu as pltpu


def _rup(x, m):
    return (x + m - 1) // m * m


# ----------------------------------------------------------------------------
# Pallas kernel: tap-accumulated conv matmul + folded bias/BN + act [+ residual]
# with manual double-buffered DMA of the overlapping activation row window.
# ----------------------------------------------------------------------------
def _conv_kernel(x_hbm, w_ref, b_ref, *rest, tap_offsets, tm, tin, act, has_res):
    if has_res:
        r_ref, o_ref, xbuf, sem = rest
    else:
        o_ref, xbuf, sem = rest

    i = pl.program_id(0)            # row-tile index (sequential, carries DMA state)
    j = pl.program_id(1)            # Cout-tile index
    n_i = pl.num_programs(0)
    slot = i % 2

    # ---- overlapping-window activation DMA (double buffered across i) ----
    @pl.when((i == 0) & (j == 0))
    def _():
        pltpu.make_async_copy(x_hbm.at[pl.ds(0, tin)], xbuf.at[0], sem.at[0]).start()

    @pl.when(j == 0)
    def _():
        # Wait for the window of tile i (started at step i-1, or just above).
        pltpu.make_async_copy(x_hbm.at[pl.ds(0, tin)], xbuf.at[slot],
                              sem.at[slot]).wait()

        # Prefetch tile i+1 while we compute tile i.
        @pl.when(i + 1 < n_i)
        def _():
            pltpu.make_async_copy(x_hbm.at[pl.ds((i + 1) * tm, tin)],
                                  xbuf.at[1 - slot], sem.at[1 - slot]).start()

    # ---- tap-accumulated matmul (static unroll, f32 MXU accumulation) ----
    tn = o_ref.shape[-1]
    acc = jnp.zeros((tm, tn), jnp.float32)
    for t, off in enumerate(tap_offsets):          # off is a static row offset
        xt = xbuf[slot, pl.ds(off, tm), :]          # (tm, Kp) bf16
        acc = acc + jnp.dot(xt, w_ref[t], preferred_element_type=jnp.float32)

    y = acc + b_ref[...]                            # f32 epilogue (bias + BN shift)
    if act == "relu":
        y = jnp.maximum(y, 0.0)
    elif act == "tanh":
        y = jnp.tanh(y)
    if has_res:
        y = y + r_ref[...].astype(jnp.float32)      # fused skip connection
    o_ref[...] = y.astype(o_ref.dtype)


def conv2d_s1(xp, cin, w_hwio, b_eff, act, residual=None, tm_target=512):
    """Valid stride-1 conv as one Pallas kernel.

    xp:       (N, Hp, Wp0, C>=cin) bf16, already spatially padded; channels past
              `cin` (lane padding) are ignored.
    w_hwio:   (kh, kw, cin, cout) f32, BN scale already folded in.
    b_eff:    (cout,) f32 (= bias*scale + shift).
    residual: optional (N, Ho, Wo, >=cout) bf16 added after the activation.
    Returns   (N, Ho, Wo, rup(cout,128)) bf16 (lane-dense, channel-padded).
    """
    N, Hp, Wp0, _ = xp.shape
    kh, kw, _, cout = w_hwio.shape

    # Pad W so the row stride (and hence every static tap offset) is 8-aligned.
    Wp = _rup(Wp0, 8)
    if Wp != Wp0:
        xp = jnp.pad(xp, ((0, 0), (0, 0), (0, Wp - Wp0), (0, 0)))
    Ho, Wo = Hp - kh + 1, Wp0 - kw + 1

    cout_p = _rup(cout, 128)

    # Tap K-packing decision: fold kw*cin into K when cin is narrow, otherwise
    # keep per-tap K=cin matmuls (wide layers are already lane-dense in K).
    pack_w = kw > 1 and _rup(kw * cin, 128) <= 2 * _rup(cin, 128)
    if pack_w:
        k_real, n_taps = kw * cin, kh
        tap_offsets = tuple(di * Wp for di in range(kh))
    else:
        k_real, n_taps = cin, kh * kw
        tap_offsets = tuple(di * Wp + dj for di in range(kh) for dj in range(kw))
    kp = _rup(k_real, 128)

    # Row tiling (tm multiple of 16 for bf16 sublane packing).
    M = N * Hp * Wp
    halo = (kh - 1) * Wp + (0 if pack_w else kw - 1)
    halo_p = _rup(halo, 16)
    n_tiles = max(1, -(-M // tm_target))
    tm = _rup(-(-M // n_tiles), 16)
    n_tiles = -(-M // tm)
    m_pad = n_tiles * tm
    tin = tm + halo_p
    r_total = m_pad + halo_p

    # Flat activation rows (r_total, kp) bf16, left in HBM (pl.ANY); the kernel
    # DMAs overlapping [i*tm, i*tm+tin) windows itself (no jnp.take gather).
    xr = xp[..., :cin].reshape(M, cin)
    if pack_w:
        xe = jnp.pad(xr, ((0, kw - 1), (0, 0)))
        xr = jnp.concatenate([xe[d:d + M] for d in range(kw)], axis=1)  # (M, kw*cin)
    x_rows = jnp.pad(xr, ((0, r_total - M), (0, kp - k_real))).astype(jnp.bfloat16)

    # Weights (n_taps, kp, cout_p) bf16; folded bias (1, cout_p) f32.
    if pack_w:
        w_flat = w_hwio.reshape(kh, kw * cin, cout)
    else:
        w_flat = w_hwio.reshape(kh * kw, cin, cout)
    w_p = jnp.zeros((n_taps, kp, cout_p), jnp.float32)
    w_p = w_p.at[:, :k_real, :cout].set(w_flat).astype(jnp.bfloat16)
    b_p = jnp.zeros((1, cout_p), jnp.float32).at[0, :cout].set(b_eff)

    # Cout tiling: bounds weight-block + accumulator VMEM; 256-wide N blocks
    # where possible for the v6e/v7x MXU.
    tn = 256 if cout_p % 256 == 0 else 128
    n_j = cout_p // tn

    in_specs = [
        pl.BlockSpec(memory_space=pl.ANY),                          # activation rows (HBM)
        pl.BlockSpec((n_taps, kp, tn), lambda i, j: (0, 0, j)),     # weights
        pl.BlockSpec((1, tn), lambda i, j: (0, j)),                 # folded bias
    ]
    args = [x_rows, w_p, b_p]

    if residual is not None:
        r = jnp.pad(residual, ((0, 0),
                               (0, Hp - residual.shape[1]),
                               (0, Wp - residual.shape[2]),
                               (0, cout_p - residual.shape[3])))
        r = jnp.pad(r.reshape(M, cout_p), ((0, m_pad - M), (0, 0))).astype(jnp.bfloat16)
        args.append(r)
        in_specs.append(pl.BlockSpec((tm, tn), lambda i, j: (i, j)))

    kernel = functools.partial(_conv_kernel, tap_offsets=tap_offsets, tm=tm,
                               tin=tin, act=act, has_res=residual is not None)

    out = pl.pallas_call(
        kernel,
        grid_spec=pltpu.PrefetchScalarGridSpec(
            num_scalar_prefetch=0,
            grid=(n_tiles, n_j),
            in_specs=in_specs,
            out_specs=pl.BlockSpec((tm, tn), lambda i, j: (i, j)),
            scratch_shapes=[pltpu.VMEM((2, tin, kp), jnp.bfloat16),
                            pltpu.SemaphoreType.DMA((2,))]),
        out_shape=jax.ShapeDtypeStruct((m_pad, cout_p), jnp.bfloat16),
        compiler_params=pltpu.CompilerParams(
            # Row axis carries the manual double-buffer state -> sequential.
            dimension_semantics=("arbitrary", "arbitrary"),
            vmem_limit_bytes=48 * 1024 * 1024),
    )(*args)

    # Valid region of the padded grid, kept bf16 + lane-padded channels so the
    # next layer consumes it without a re-pad/cast pass.
    return out[:M].reshape(N, Hp, Wp, cout_p)[:, :Ho, :Wo, :]


# ----------------------------------------------------------------------------
# BN folding + layer wrappers (constant transforms / cheap data movement)
# ----------------------------------------------------------------------------
def fold_bn(bn, cout, eps=1e-5):
    if bn is None:
        return jnp.ones((cout,), jnp.float32), jnp.zeros((cout,), jnp.float32)
    inv = 1.0 / jnp.sqrt(bn["var"] + eps)
    scale = bn["gamma"] * inv
    shift = bn["beta"] - bn["mean"] * scale
    return scale, shift


def run_conv(x, cin, w_oihw, b, bn, pad, pad_mode, act, residual=None):
    """Stride-1 Conv2d (+ folded BN + activation [+ fused residual])."""
    cout = w_oihw.shape[0]
    scale, shift = fold_bn(bn, cout)
    w_hwio = jnp.transpose(w_oihw, (2, 3, 1, 0)) * scale       # fold BN scale into W
    bias = b if b is not None else jnp.zeros((cout,), jnp.float32)
    b_eff = bias * scale + shift
    if pad > 0:
        mode = "reflect" if pad_mode == "reflect" else "constant"
        x = jnp.pad(x, ((0, 0), (pad, pad), (pad, pad), (0, 0)), mode=mode)
    return conv2d_s1(x, cin, w_hwio, b_eff, act, residual=residual), cout


def run_conv_down(x, cin, w_oihw, b, bn, act):
    """Conv2d(cin, cout, 3, stride=2, padding=1) + BN + act via space-to-depth."""
    cout = w_oihw.shape[0]
    scale, shift = fold_bn(bn, cout)
    N, H, W, _ = x.shape
    xp = jnp.pad(x[..., :cin], ((0, 0), (1, 1), (1, 1), (0, 0)))
    Hp, Wp = H + 2, W + 2
    if Hp % 2:
        xp = jnp.pad(xp, ((0, 0), (0, 1), (0, 0), (0, 0))); Hp += 1
    if Wp % 2:
        xp = jnp.pad(xp, ((0, 0), (0, 0), (0, 1), (0, 0))); Wp += 1
    # space-to-depth, channel order (p_h, p_w, ci)
    xs = xp.reshape(N, Hp // 2, 2, Wp // 2, 2, cin)
    xs = xs.transpose(0, 1, 3, 2, 4, 5).reshape(N, Hp // 2, Wp // 2, 4 * cin)
    # equivalent 2x2 stride-1 kernel over the phase-stacked input
    w_hwio = jnp.transpose(w_oihw, (2, 3, 1, 0))                # (3, 3, cin, cout)
    w2 = jnp.zeros((2, 2, 2, 2, cin, cout), jnp.float32)        # (a_h, a_w, p_h, p_w, ci, co)
    for a_h in range(2):
        for p_h in range(2):
            di = 2 * a_h + p_h
            if di > 2:
                continue
            for a_w in range(2):
                for p_w in range(2):
                    dj = 2 * a_w + p_w
                    if dj > 2:
                        continue
                    w2 = w2.at[a_h, a_w, p_h, p_w].set(w_hwio[di, dj])
    w2 = w2.reshape(2, 2, 4 * cin, cout) * scale
    b_eff = b * scale + shift
    y = conv2d_s1(xs, 4 * cin, w2, b_eff, act)                  # (N, Hp//2-1, Wp//2-1, cp)
    ho = (H - 1) // 2 + 1
    wo = (W - 1) // 2 + 1
    return y[:, :ho, :wo, :], cout


_T_TAP = {(0, 0): 1, (1, 0): 2, (1, 1): 0}   # (output phase r, tap a) -> kernel index d


def run_convT_up(x, cin, w_iohw, b, bn, act):
    """ConvTranspose2d(cin, cout, 3, stride=2, padding=1, output_padding=1) + BN + act,
    lowered sub-pixel style: 2x2 stride-1 conv producing 4*cout phase channels +
    depth-to-space (no zero-dilated input)."""
    cout = w_iohw.shape[1]
    scale, shift = fold_bn(bn, cout)
    N, H, W, _ = x.shape
    xp = jnp.pad(x[..., :cin], ((0, 0), (0, 1), (0, 1), (0, 0)))   # bottom/right halo
    w2 = jnp.zeros((2, 2, cin, 2, 2, cout), jnp.float32)           # (a_h, a_w, ci, r_h, r_w, co)
    for r_h in range(2):
        for a_h in range(2):
            if (r_h, a_h) not in _T_TAP:
                continue
            di = _T_TAP[(r_h, a_h)]
            for r_w in range(2):
                for a_w in range(2):
                    if (r_w, a_w) not in _T_TAP:
                        continue
                    dj = _T_TAP[(r_w, a_w)]
                    w2 = w2.at[a_h, a_w, :, r_h, r_w, :].set(w_iohw[:, :, di, dj])
    w2 = (w2 * scale).reshape(2, 2, cin, 4 * cout)
    b_eff = jnp.broadcast_to(b * scale + shift, (2, 2, cout)).reshape(4 * cout)
    y = conv2d_s1(xp, cin, w2, b_eff, act)                         # (N, H, W, rup(4*cout,128))
    y = y[..., :4 * cout].reshape(N, H, W, 2, 2, cout).transpose(0, 1, 3, 2, 4, 5)
    y = y.reshape(N, 2 * H, 2 * W, cout)
    y = jnp.pad(y, ((0, 0), (0, 0), (0, 0), (0, _rup(cout, 128) - cout)))
    return y, cout


def run_resblock(x, dim, p):
    # ReflectionPad2d(1) -> Conv2d(dim, dim, 3, bias=False) -> BN -> ReLU
    h, _ = run_conv(x, dim, p["w1"], None, p["bn1"], pad=1, pad_mode="reflect", act="relu")
    # Dropout(0.5): identity in eval mode.
    # ReflectionPad2d(1) -> Conv2d -> BN; skip-add fused in the kernel epilogue.
    y, _ = run_conv(h, dim, p["w2"], None, p["bn2"], pad=1, pad_mode="reflect",
                    act="none", residual=x)
    return y, dim


# ----------------------------------------------------------------------------
# GlobalGenerator: architecture spec, deterministic parameter init, forward
# ----------------------------------------------------------------------------
def build_layer_specs(input_nc, output_nc, ngf, n_downsampling, n_blocks):
    specs = [dict(kind="stem", cin=input_nc, cout=ngf)]
    for i in range(n_downsampling):
        mult = 2 ** i
        specs.append(dict(kind="down", cin=ngf * mult, cout=ngf * mult * 2))
    mult = 2 ** n_downsampling
    for _ in range(n_blocks):
        specs.append(dict(kind="resblock", dim=ngf * mult))
    for i in range(n_downsampling):
        mult = 2 ** (n_downsampling - i)
        specs.append(dict(kind="up", cin=ngf * mult, cout=ngf * mult // 2))
    specs.append(dict(kind="final", cin=ngf, cout=output_nc))
    return specs


def init_bn(key, c):
    k1, k2, k3, k4 = jax.random.split(key, 4)
    return dict(
        gamma=1.0 + 0.1 * jax.random.normal(k1, (c,), jnp.float32),
        beta=0.1 * jax.random.normal(k2, (c,), jnp.float32),
        mean=0.05 * jax.random.normal(k3, (c,), jnp.float32),
        var=1.0 + 0.1 * jax.random.uniform(k4, (c,), jnp.float32),
    )


def init_params(key, specs):
    params = []
    for spec in specs:
        key, k0, k1, k2, k3 = jax.random.split(key, 5)
        kind = spec["kind"]
        if kind in ("stem", "final"):
            cin, cout = spec["cin"], spec["cout"]
            p = dict(w=0.1 * jax.random.normal(k0, (cout, cin, 7, 7), jnp.float32),
                     b=0.1 * jax.random.normal(k1, (cout,), jnp.float32))
            if kind == "stem":
                p["bn"] = init_bn(k2, cout)
            params.append(p)
        elif kind == "down":
            cin, cout = spec["cin"], spec["cout"]
            params.append(dict(
                w=0.1 * jax.random.normal(k0, (cout, cin, 3, 3), jnp.float32),
                b=0.1 * jax.random.normal(k1, (cout,), jnp.float32),
                bn=init_bn(k2, cout)))
        elif kind == "up":
            cin, cout = spec["cin"], spec["cout"]
            params.append(dict(
                w=0.1 * jax.random.normal(k0, (cin, cout, 3, 3), jnp.float32),  # torch ConvT layout
                b=0.1 * jax.random.normal(k1, (cout,), jnp.float32),
                bn=init_bn(k2, cout)))
        else:  # resblock (use_bias=False)
            dim = spec["dim"]
            params.append(dict(
                w1=0.1 * jax.random.normal(k0, (dim, dim, 3, 3), jnp.float32),
                w2=0.1 * jax.random.normal(k1, (dim, dim, 3, 3), jnp.float32),
                bn1=init_bn(k2, dim), bn2=init_bn(k3, dim)))
    return params


def global_generator_forward(x_nchw, specs, params):
    # NCHW -> NHWC, channel-pad to a lane multiple, carry bf16 between layers.
    x = jnp.transpose(x_nchw, (0, 2, 3, 1)).astype(jnp.float32)
    c = x.shape[-1]
    x = jnp.pad(x, ((0, 0), (0, 0), (0, 0), (0, _rup(c, 128) - c))).astype(jnp.bfloat16)
    for spec, p in zip(specs, params):
        kind = spec["kind"]
        if kind == "stem":
            x, c = run_conv(x, c, p["w"], p["b"], p["bn"], pad=3, pad_mode="reflect", act="relu")
        elif kind == "down":
            x, c = run_conv_down(x, c, p["w"], p["b"], p["bn"], act="relu")
        elif kind == "resblock":
            x, c = run_resblock(x, spec["dim"], p)
        elif kind == "up":
            x, c = run_convT_up(x, c, p["w"], p["b"], p["bn"], act="relu")
        else:  # final: ReflectionPad2d(3) + Conv2d(ngf, output_nc, 7) + Tanh (no norm)
            x, c = run_conv(x, c, p["w"], p["b"], None, pad=3, pad_mode="reflect", act="tanh")
    x = x[..., :c].astype(jnp.float32)
    return jnp.transpose(x, (0, 3, 1, 2))                          # NHWC -> NCHW


# ----------------------------------------------------------------------------
# Driver
# ----------------------------------------------------------------------------
if __name__ == "__main__":
    # GlobalGenerator(input_nc=4, output_nc=3, ngf=8, n_downsampling=2, n_blocks=2)
    # on an NCHW input of shape (2, 4, 16, 16).
    input_nc, output_nc, ngf, n_down, n_blocks = 4, 3, 8, 2, 2
    N, H, W = 2, 16, 16

    key = jax.random.PRNGKey(0)
    k_in, k_par = jax.random.split(key)
    x = jax.random.normal(k_in, (N, input_nc, H, W), jnp.float32)

    specs = build_layer_specs(input_nc, output_nc, ngf, n_down, n_blocks)
    params = init_params(k_par, specs)

    fwd = jax.jit(functools.partial(global_generator_forward, specs=specs, params=params))
    out = jax.block_until_ready(fwd(x))

    assert out.shape == (N, output_nc, H, W), out.shape
    assert bool(jnp.all(jnp.isfinite(out)))
    assert bool(jnp.all(jnp.abs(out) <= 1.0 + 1e-6))   # tanh output range
    print("KERNEL_OK")
</pallas_src>

<mosaic_0001>
module attributes {stable_mosaic.version = 11 : i64} {
  func.func @_conv_kernel(%arg0: i32, %arg1: i32, %arg2: memref<1200x128xbf16, #tpu.memory_space<any>>, %arg3: memref<7x128x128xbf16, #tpu.memory_space<vmem>>, %arg4: memref<1x128xf32, #tpu.memory_space<vmem>>, %arg5: memref<352x128xbf16, #tpu.memory_space<vmem>>, %arg6: memref<2x496x128xbf16, #tpu.memory_space<vmem>>, %arg7: memref<2x!tpu.dma_semaphore, #tpu.memory_space<semaphore_mem>>) attributes {dimension_semantics = [#tpu.dimension_semantics<arbitrary>, #tpu.dimension_semantics<arbitrary>], iteration_bounds = array<i64: 3, 1>, scalar_prefetch = 0 : i64, scratch_operands = 2 : i64, tpu.core_type = #tpu.core_type<tc>, window_params = [{}, {transform_indices = @transform_1, window_bounds = array<i64: 7, 128, 128>}, {transform_indices = @transform_2, window_bounds = array<i64: 1, 128>}, {transform_indices = @transform_3, window_bounds = array<i64: 352, 128>}]} {
    %c2_i32 = arith.constant 2 : i32
    %c0_i32 = arith.constant 0 : i32
    %0 = arith.cmpi eq, %c2_i32, %c0_i32 : i32
    %c1_i32 = arith.constant 1 : i32
    %1 = arith.select %0, %c1_i32, %c2_i32 : i32
    %2 = arith.remsi %arg0, %1 : i32
    %c0_i32_0 = arith.constant 0 : i32
    %3 = arith.cmpi ne, %2, %c0_i32_0 : i32
    %c0_i32_1 = arith.constant 0 : i32
    %4 = arith.cmpi slt, %2, %c0_i32_1 : i32
    %c0_i32_2 = arith.constant 0 : i32
    %5 = arith.cmpi slt, %1, %c0_i32_2 : i32
    %6 = arith.xori %4, %5 : i1
    %7 = arith.andi %6, %3 : i1
    %8 = arith.addi %2, %1 : i32
    %9 = arith.select %7, %8, %2 : i32
    %c0_i32_3 = arith.constant 0 : i32
    %10 = arith.cmpi eq, %arg0, %c0_i32_3 : i32
    %c0_i32_4 = arith.constant 0 : i32
    %11 = arith.cmpi eq, %arg1, %c0_i32_4 : i32
    %12 = arith.andi %10, %11 : i1
    %13 = arith.extui %12 : i1 to i32
    %c0_i32_5 = arith.constant 0 : i32
    %14 = arith.cmpi ne, %13, %c0_i32_5 : i32
    scf.if %14 {
      %c0_i32_42 = arith.constant 0 : i32
      %c0_i32_43 = arith.constant 0 : i32
      %c0_i32_44 = arith.constant 0 : i32
      %c0_i32_45 = arith.constant 0 : i32
      %75 = tpu.memref_slice %arg2[%c0_i32_44, %c0_i32_45] : memref<1200x128xbf16, #tpu.memory_space<any>> -> memref<496x128xbf16, #tpu.memory_space<any>>
      %c0_i32_46 = arith.constant 0 : i32
      %c0_i32_47 = arith.constant 0 : i32
      %76 = tpu.memref_slice %arg6[%c0_i32_42, %c0_i32_46, %c0_i32_47] : memref<2x496x128xbf16, #tpu.memory_space<vmem>> -> memref<1x496x128xbf16, #tpu.memory_space<vmem>>
      %77 = tpu.memref_squeeze %76 : memref<1x496x128xbf16, #tpu.memory_space<vmem>> -> memref<496x128xbf16, #tpu.memory_space<vmem>>
      %78 = tpu.memref_slice %arg7[%c0_i32_43] : memref<2x!tpu.dma_semaphore, #tpu.memory_space<semaphore_mem>> -> memref<1x!tpu.dma_semaphore, #tpu.memory_space<semaphore_mem>>
      %79 = tpu.memref_squeeze %78 : memref<1x!tpu.dma_semaphore, #tpu.memory_space<semaphore_mem>> -> memref<!tpu.dma_semaphore, #tpu.memory_space<semaphore_mem>>
      tpu.enqueue_dma source(%75 : memref<496x128xbf16, #tpu.memory_space<any>>) target(%77 : memref<496x128xbf16, #tpu.memory_space<vmem>>) target_semaphore(%79 : memref<!tpu.dma_semaphore, #tpu.memory_space<semaphore_mem>>)
    } else {
    }
    %c0_i32_6 = arith.constant 0 : i32
    %15 = arith.cmpi eq, %arg1, %c0_i32_6 : i32
    %16 = arith.extui %15 : i1 to i32
    %c0_i32_7 = arith.constant 0 : i32
    %17 = arith.cmpi ne, %16, %c0_i32_7 : i32
    scf.if %17 {
      %c0_i32_42 = arith.constant 0 : i32
      %c0_i32_43 = arith.constant 0 : i32
      %75 = tpu.memref_slice %arg2[%c0_i32_42, %c0_i32_43] : memref<1200x128xbf16, #tpu.memory_space<any>> -> memref<496x128xbf16, #tpu.memory_space<any>>
      %c0_i32_44 = arith.constant 0 : i32
      %c0_i32_45 = arith.constant 0 : i32
      %76 = tpu.memref_slice %arg6[%9, %c0_i32_44, %c0_i32_45] : memref<2x496x128xbf16, #tpu.memory_space<vmem>> -> memref<1x496x128xbf16, #tpu.memory_space<vmem>>
      %77 = tpu.memref_squeeze %76 : memref<1x496x128xbf16, #tpu.memory_space<vmem>> -> memref<496x128xbf16, #tpu.memory_space<vmem>>
      %78 = tpu.memref_slice %arg7[%9] : memref<2x!tpu.dma_semaphore, #tpu.memory_space<semaphore_mem>> -> memref<1x!tpu.dma_semaphore, #tpu.memory_space<semaphore_mem>>
      %79 = tpu.memref_squeeze %78 : memref<1x!tpu.dma_semaphore, #tpu.memory_space<semaphore_mem>> -> memref<!tpu.dma_semaphore, #tpu.memory_space<semaphore_mem>>
      tpu.wait_dma2 semaphore(%79 : memref<!tpu.dma_semaphore, #tpu.memory_space<semaphore_mem>>) src(%75 : memref<496x128xbf16, #tpu.memory_space<any>>) dst(%77 : memref<496x128xbf16, #tpu.memory_space<vmem>>)
      %c1_i32_46 = arith.constant 1 : i32
      %80 = arith.addi %arg0, %c1_i32_46 : i32
      %c3_i32 = arith.constant 3 : i32
      %81 = arith.cmpi slt, %80, %c3_i32 : i32
      %82 = arith.extui %81 : i1 to i32
      %c0_i32_47 = arith.constant 0 : i32
      %83 = arith.cmpi ne, %82, %c0_i32_47 : i32
      scf.if %83 {
        %c1_i32_48 = arith.constant 1 : i32
        %84 = arith.addi %arg0, %c1_i32_48 : i32
        %c352_i32 = arith.constant 352 : i32
        %85 = arith.muli %84, %c352_i32 : i32
        %c1_i32_49 = arith.constant 1 : i32
        %86 = arith.subi %c1_i32_49, %9 : i32
        %c1_i32_50 = arith.constant 1 : i32
        %87 = arith.subi %c1_i32_50, %9 : i32
        %c0_i32_51 = arith.constant 0 : i32
        %88 = tpu.memref_slice %arg2[%85, %c0_i32_51] : memref<1200x128xbf16, #tpu.memory_space<any>> -> memref<496x128xbf16, #tpu.memory_space<any>>
        %c0_i32_52 = arith.constant 0 : i32
        %c0_i32_53 = arith.constant 0 : i32
        %89 = tpu.memref_slice %arg6[%86, %c0_i32_52, %c0_i32_53] : memref<2x496x128xbf16, #tpu.memory_space<vmem>> -> memref<1x496x128xbf16, #tpu.memory_space<vmem>>
        %90 = tpu.memref_squeeze %89 : memref<1x496x128xbf16, #tpu.memory_space<vmem>> -> memref<496x128xbf16, #tpu.memory_space<vmem>>
        %91 = tpu.memref_slice %arg7[%87] : memref<2x!tpu.dma_semaphore, #tpu.memory_space<semaphore_mem>> -> memref<1x!tpu.dma_semaphore, #tpu.memory_space<semaphore_mem>>
        %92 = tpu.memref_squeeze %91 : memref<1x!tpu.dma_semaphore, #tpu.memory_space<semaphore_mem>> -> memref<!tpu.dma_semaphore, #tpu.memory_space<semaphore_mem>>
        tpu.enqueue_dma source(%88 : memref<496x128xbf16, #tpu.memory_space<any>>) target(%90 : memref<496x128xbf16, #tpu.memory_space<vmem>>) target_semaphore(%92 : memref<!tpu.dma_semaphore, #tpu.memory_space<semaphore_mem>>)
      } else {
      }
    } else {
    }
    %cst = arith.constant 0.000000e+00 : f32
    %18 = vector.broadcast %cst : f32 to vector<352x128xf32>
    %19 = arith.index_cast %9 : i32 to index
    %c0 = arith.constant 0 : index
    %c0_8 = arith.constant 0 : index
    %20 = vector.load %arg6[%19, %c0, %c0_8] : memref<2x496x128xbf16, #tpu.memory_space<vmem>>, vector<1x352x128xbf16>
    %21 = vector.shape_cast %20 : vector<1x352x128xbf16> to vector<352x128xbf16>
    %c0_9 = arith.constant 0 : index
    %c0_10 = arith.constant 0 : index
    %c0_11 = arith.constant 0 : index
    %22 = vector.load %arg3[%c0_9, %c0_10, %c0_11] : memref<7x128x128xbf16, #tpu.memory_space<vmem>>, vector<1x128x128xbf16>
    %23 = vector.shape_cast %22 : vector<1x128x128xbf16> to vector<128x128xbf16>
    %cst_12 = arith.constant dense<0.000000e+00> : vector<352x128xf32>
    %24 = tpu.matmul %21, %23, %cst_12 {dimension_numbers = #tpu.dot_dimension_numbers<[1], [0], [0], [1], [0, 0, 1, 1], [], []>} : vector<352x128xbf16>, vector<128x128xbf16>, vector<352x128xf32> -> vector<352x128xf32>
    %25 = arith.addf %18, %24 : vector<352x128xf32>
    %26 = arith.index_cast %9 : i32 to index
    %c24 = arith.constant 24 : index
    %c0_13 = arith.constant 0 : index
    %27 = vector.load %arg6[%26, %c24, %c0_13] : memref<2x496x128xbf16, #tpu.memory_space<vmem>>, vector<1x352x128xbf16>
    %28 = vector.shape_cast %27 : vector<1x352x128xbf16> to vector<352x128xbf16>
    %c1 = arith.constant 1 : index
    %c0_14 = arith.constant 0 : index
    %c0_15 = arith.constant 0 : index
    %29 = vector.load %arg3[%c1, %c0_14, %c0_15] : memref<7x128x128xbf16, #tpu.memory_space<vmem>>, vector<1x128x128xbf16>
    %30 = vector.shape_cast %29 : vector<1x128x128xbf16> to vector<128x128xbf16>
    %cst_16 = arith.constant dense<0.000000e+00> : vector<352x128xf32>
    %31 = tpu.matmul %28, %30, %cst_16 {dimension_numbers = #tpu.dot_dimension_numbers<[1], [0], [0], [1], [0, 0, 1, 1], [], []>} : vector<352x128xbf16>, vector<128x128xbf16>, vector<352x128xf32> -> vector<352x128xf32>
    %32 = arith.addf %25, %31 : vector<352x128xf32>
    %33 = arith.index_cast %9 : i32 to index
    %c48 = arith.constant 48 : index
    %c0_17 = arith.constant 0 : index
    %34 = vector.load %arg6[%33, %c48, %c0_17] : memref<2x496x128xbf16, #tpu.memory_space<vmem>>, vector<1x352x128xbf16>
    %35 = vector.shape_cast %34 : vector<1x352x128xbf16> to vector<352x128xbf16>
    %c2 = arith.constant 2 : index
    %c0_18 = arith.constant 0 : index
    %c0_19 = arith.constant 0 : index
    %36 = vector.load %arg3[%c2, %c0_18, %c0_19] : memref<7x128x128xbf16, #tpu.memory_space<vmem>>, vector<1x128x128xbf16>
    %37 = vector.shape_cast %36 : vector<1x128x128xbf16> to vector<128x128xbf16>
    %cst_20 = arith.constant dense<0.000000e+00> : vector<352x128xf32>
    %38 = tpu.matmul %35, %37, %cst_20 {dimension_numbers = #tpu.dot_dimension_numbers<[1], [0], [0], [1], [0, 0, 1, 1], [], []>} : vector<352x128xbf16>, vector<128x128xbf16>, vector<352x128xf32> -> vector<352x128xf32>
    %39 = arith.addf %32, %38 : vector<352x128xf32>
    %40 = arith.index_cast %9 : i32 to index
    %c72 = arith.constant 72 : index
    %c0_21 = arith.constant 0 : index
    %41 = vector.load %arg6[%40, %c72, %c0_21] : memref<2x496x128xbf16, #tpu.memory_space<vmem>>, vector<1x352x128xbf16>
    %42 = vector.shape_cast %41 : vector<1x352x128xbf16> to vector<352x128xbf16>
    %c3 = arith.constant 3 : index
    %c0_22 = arith.constant 0 : index
    %c0_23 = arith.constant 0 : index
    %43 = vector.load %arg3[%c3, %c0_22, %c0_23] : memref<7x128x128xbf16, #tpu.memory_space<vmem>>, vector<1x128x128xbf16>
    %44 = vector.shape_cast %43 : vector<1x128x128xbf16> to vector<128x128xbf16>
    %cst_24 = arith.constant dense<0.000000e+00> : vector<352x128xf32>
    %45 = tpu.matmul %42, %44, %cst_24 {dimension_numbers = #tpu.dot_dimension_numbers<[1], [0], [0], [1], [0, 0, 1, 1], [], []>} : vector<352x128xbf16>, vector<128x128xbf16>, vector<352x128xf32> -> vector<352x128xf32>
    %46 = arith.addf %39, %45 : vector<352x128xf32>
    %47 = arith.index_cast %9 : i32 to index
    %c96 = arith.constant 96 : index
    %c0_25 = arith.constant 0 : index
    %48 = vector.load %arg6[%47, %c96, %c0_25] : memref<2x496x128xbf16, #tpu.memory_space<vmem>>, vector<1x352x128xbf16>
    %49 = vector.shape_cast %48 : vector<1x352x128xbf16> to vector<352x128xbf16>
    %c4 = arith.constant 4 : index
    %c0_26 = arith.constant 0 : index
    %c0_27 = arith.constant 0 : index
    %50 = vector.load %arg3[%c4, %c0_26, %c0_27] : memref<7x128x128xbf16, #tpu.memory_space<vmem>>, vector<1x128x128xbf16>
    %51 = vector.shape_cast %50 : vector<1x128x128xbf16> to vector<128x128xbf16>
    %cst_28 = arith.constant dense<0.000000e+00> : vector<352x128xf32>
    %52 = tpu.matmul %49, %51, %cst_28 {dimension_numbers = #tpu.dot_dimension_numbers<[1], [0], [0], [1], [0, 0, 1, 1], [], []>} : vector<352x128xbf16>, vector<128x128xbf16>, vector<352x128xf32> -> vector<352x128xf32>
    %53 = arith.addf %46, %52 : vector<352x128xf32>
    %54 = arith.index_cast %9 : i32 to index
    %c120 = arith.constant 120 : index
    %c0_29 = arith.constant 0 : index
    %55 = vector.load %arg6[%54, %c120, %c0_29] : memref<2x496x128xbf16, #tpu.memory_space<vmem>>, vector<1x352x128xbf16>
    %56 = vector.shape_cast %55 : vector<1x352x128xbf16> to vector<352x128xbf16>
    %c5 = arith.constant 5 : index
    %c0_30 = arith.constant 0 : index
    %c0_31 = arith.constant 0 : index
    %57 = vector.load %arg3[%c5, %c0_30, %c0_31] : memref<7x128x128xbf16, #tpu.memory_space<vmem>>, vector<1x128x128xbf16>
    %58 = vector.shape_cast %57 : vector<1x128x128xbf16> to vector<128x128xbf16>
    %cst_32 = arith.constant dense<0.000000e+00> : vector<352x128xf32>
    %59 = tpu.matmul %56, %58, %cst_32 {dimension_numbers = #tpu.dot_dimension_numbers<[1], [0], [0], [1], [0, 0, 1, 1], [], []>} : vector<352x128xbf16>, vector<128x128xbf16>, vector<352x128xf32> -> vector<352x128xf32>
    %60 = arith.addf %53, %59 : vector<352x128xf32>
    %61 = arith.index_cast %9 : i32 to index
    %c144 = arith.constant 144 : index
    %c0_33 = arith.constant 0 : index
    %62 = vector.load %arg6[%61, %c144, %c0_33] : memref<2x496x128xbf16, #tpu.memory_space<vmem>>, vector<1x352x128xbf16>
    %63 = vector.shape_cast %62 : vector<1x352x128xbf16> to vector<352x128xbf16>
    %c6 = arith.constant 6 : index
    %c0_34 = arith.constant 0 : index
    %c0_35 = arith.constant 0 : index
    %64 = vector.load %arg3[%c6, %c0_34, %c0_35] : memref<7x128x128xbf16, #tpu.memory_space<vmem>>, vector<1x128x128xbf16>
    %65 = vector.shape_cast %64 : vector<1x128x128xbf16> to vector<128x128xbf16>
    %cst_36 = arith.constant dense<0.000000e+00> : vector<352x128xf32>
    %66 = tpu.matmul %63, %65, %cst_36 {dimension_numbers = #tpu.dot_dimension_numbers<[1], [0], [0], [1], [0, 0, 1, 1], [], []>} : vector<352x128xbf16>, vector<128x128xbf16>, vector<352x128xf32> -> vector<352x128xf32>
    %67 = arith.addf %60, %66 : vector<352x128xf32>
    %c0_37 = arith.constant 0 : index
    %c0_38 = arith.constant 0 : index
    %68 = vector.load %arg4[%c0_37, %c0_38] : memref<1x128xf32, #tpu.memory_space<vmem>>, vector<1x128xf32>
    %69 = vector.broadcast %68 : vector<1x128xf32> to vector<352x128xf32>
    %70 = arith.addf %67, %69 : vector<352x128xf32>
    %cst_39 = arith.constant 0.000000e+00 : f32
    %71 = vector.broadcast %cst_39 : f32 to vector<352x128xf32>
    %72 = arith.maximumf %70, %71 : vector<352x128xf32>
    %73 = arith.truncf %72 : vector<352x128xf32> to vector<352x128xbf16>
    %c0_40 = arith.constant 0 : index
    %c0_41 = arith.constant 0 : index
    %74 = vector.load %arg5[%c0_40, %c0_41] : memref<352x128xbf16, #tpu.memory_space<vmem>>, vector<352x128xbf16>
    tpu.vector_store %arg5[%c0_40, %c0_41], %73 {strides = array<i32>} : memref<352x128xbf16, #tpu.memory_space<vmem>>, vector<352x128xbf16>,
    return
  }
  func.func @transform_1(%arg0: i32, %arg1: i32) -> (i32, i32, i32) {
    %c0_i32 = arith.constant 0 : i32
    %c0_i32_0 = arith.constant 0 : i32
    %c0_i32_1 = arith.constant 0 : i32
    return %c0_i32, %c0_i32_0, %arg1 : i32, i32, i32
  }
  func.func @transform_2(%arg0: i32, %arg1: i32) -> (i32, i32) {
    %c0_i32 = arith.constant 0 : i32
    %c0_i32_0 = arith.constant 0 : i32
    return %c0_i32, %arg1 : i32, i32
  }
  func.func @transform_3(%arg0: i32, %arg1: i32) -> (i32, i32) {
    %c0_i32 = arith.constant 0 : i32
    return %arg0, %arg1 : i32, i32
  }
}

module attributes {stable_mosaic.version = 11 : i64} {
  func.func @_conv_kernel(%arg0: i32, %arg1: i32, %arg2: memref<304x128xbf16, #tpu.memory_space<any>>, %arg3: memref<2x128x128xbf16, #tpu.memory_space<vmem>>, %arg4: memref<1x128xf32, #tpu.memory_space<vmem>>, %arg5: memref<288x128xbf16, #tpu.memory_space<vmem>>, %arg6: memref<2x304x128xbf16, #tpu.memory_space<vmem>>, %arg7: memref<2x!tpu.dma_semaphore, #tpu.memory_space<semaphore_mem>>) attributes {dimension_semantics = [#tpu.dimension_semantics<arbitrary>, #tpu.dimension_semantics<arbitrary>], iteration_bounds = array<i64: 1, 1>, scalar_prefetch = 0 : i64, scratch_operands = 2 : i64, tpu.core_type = #tpu.core_type<tc>, window_params = [{}, {transform_indices = @transform_1, window_bounds = array<i64: 2, 128, 128>}, {transform_indices = @transform_2, window_bounds = array<i64: 1, 128>}, {transform_indices = @transform_3, window_bounds = array<i64: 288, 128>}]} {
    %c2_i32 = arith.constant 2 : i32
    %c0_i32 = arith.constant 0 : i32
    %0 = arith.cmpi eq, %c2_i32, %c0_i32 : i32
    %c1_i32 = arith.constant 1 : i32
    %1 = arith.select %0, %c1_i32, %c2_i32 : i32
    %2 = arith.remsi %arg0, %1 : i32
    %c0_i32_0 = arith.constant 0 : i32
    %3 = arith.cmpi ne, %2, %c0_i32_0 : i32
    %c0_i32_1 = arith.constant 0 : i32
    %4 = arith.cmpi slt, %2, %c0_i32_1 : i32
    %c0_i32_2 = arith.constant 0 : i32
    %5 = arith.cmpi slt, %1, %c0_i32_2 : i32
    %6 = arith.xori %4, %5 : i1
    %7 = arith.andi %6, %3 : i1
    %8 = arith.addi %2, %1 : i32
    %9 = arith.select %7, %8, %2 : i32
    %c0_i32_3 = arith.constant 0 : i32
    %10 = arith.cmpi eq, %arg0, %c0_i32_3 : i32
    %c0_i32_4 = arith.constant 0 : i32
    %11 = arith.cmpi eq, %arg1, %c0_i32_4 : i32
    %12 = arith.andi %10, %11 : i1
    %13 = arith.extui %12 : i1 to i32
    %c0_i32_5 = arith.constant 0 : i32
    %14 = arith.cmpi ne, %13, %c0_i32_5 : i32
    scf.if %14 {
      %c0_i32_22 = arith.constant 0 : i32
      %c0_i32_23 = arith.constant 0 : i32
      %c0_i32_24 = arith.constant 0 : i32
      %c0_i32_25 = arith.constant 0 : i32
      %40 = tpu.memref_slice %arg2[%c0_i32_24, %c0_i32_25] : memref<304x128xbf16, #tpu.memory_space<any>> -> memref<304x128xbf16, #tpu.memory_space<any>>
      %c0_i32_26 = arith.constant 0 : i32
      %c0_i32_27 = arith.constant 0 : i32
      %41 = tpu.memref_slice %arg6[%c0_i32_22, %c0_i32_26, %c0_i32_27] : memref<2x304x128xbf16, #tpu.memory_space<vmem>> -> memref<1x304x128xbf16, #tpu.memory_space<vmem>>
      %42 = tpu.memref_squeeze %41 : memref<1x304x128xbf16, #tpu.memory_space<vmem>> -> memref<304x128xbf16, #tpu.memory_space<vmem>>
      %43 = tpu.memref_slice %arg7[%c0_i32_23] : memref<2x!tpu.dma_semaphore, #tpu.memory_space<semaphore_mem>> -> memref<1x!tpu.dma_semaphore, #tpu.memory_space<semaphore_mem>>
      %44 = tpu.memref_squeeze %43 : memref<1x!tpu.dma_semaphore, #tpu.memory_space<semaphore_mem>> -> memref<!tpu.dma_semaphore, #tpu.memory_space<semaphore_mem>>
      tpu.enqueue_dma source(%40 : memref<304x128xbf16, #tpu.memory_space<any>>) target(%42 : memref<304x128xbf16, #tpu.memory_space<vmem>>) target_semaphore(%44 : memref<!tpu.dma_semaphore, #tpu.memory_space<semaphore_mem>>)
    } else {
    }
    %c0_i32_6 = arith.constant 0 : i32
    %15 = arith.cmpi eq, %arg1, %c0_i32_6 : i32
    %16 = arith.extui %15 : i1 to i32
    %c0_i32_7 = arith.constant 0 : i32
    %17 = arith.cmpi ne, %16, %c0_i32_7 : i32
    scf.if %17 {
      %c0_i32_22 = arith.constant 0 : i32
      %c0_i32_23 = arith.constant 0 : i32
      %40 = tpu.memref_slice %arg2[%c0_i32_22, %c0_i32_23] : memref<304x128xbf16, #tpu.memory_space<any>> -> memref<304x128xbf16, #tpu.memory_space<any>>
      %c0_i32_24 = arith.constant 0 : i32
      %c0_i32_25 = arith.constant 0 : i32
      %41 = tpu.memref_slice %arg6[%9, %c0_i32_24, %c0_i32_25] : memref<2x304x128xbf16, #tpu.memory_space<vmem>> -> memref<1x304x128xbf16, #tpu.memory_space<vmem>>
      %42 = tpu.memref_squeeze %41 : memref<1x304x128xbf16, #tpu.memory_space<vmem>> -> memref<304x128xbf16, #tpu.memory_space<vmem>>
      %43 = tpu.memref_slice %arg7[%9] : memref<2x!tpu.dma_semaphore, #tpu.memory_space<semaphore_mem>> -> memref<1x!tpu.dma_semaphore, #tpu.memory_space<semaphore_mem>>
      %44 = tpu.memref_squeeze %43 : memref<1x!tpu.dma_semaphore, #tpu.memory_space<semaphore_mem>> -> memref<!tpu.dma_semaphore, #tpu.memory_space<semaphore_mem>>
      tpu.wait_dma2 semaphore(%44 : memref<!tpu.dma_semaphore, #tpu.memory_space<semaphore_mem>>) src(%40 : memref<304x128xbf16, #tpu.memory_space<any>>) dst(%42 : memref<304x128xbf16, #tpu.memory_space<vmem>>)
      %c1_i32_26 = arith.constant 1 : i32
      %45 = arith.addi %arg0, %c1_i32_26 : i32
      %c1_i32_27 = arith.constant 1 : i32
      %46 = arith.cmpi slt, %45, %c1_i32_27 : i32
      %47 = arith.extui %46 : i1 to i32
      %c0_i32_28 = arith.constant 0 : i32
      %48 = arith.cmpi ne, %47, %c0_i32_28 : i32
      scf.if %48 {
        %c1_i32_29 = arith.constant 1 : i32
        %49 = arith.addi %arg0, %c1_i32_29 : i32
        %c288_i32 = arith.constant 288 : i32
        %50 = arith.muli %49, %c288_i32 : i32
        %c1_i32_30 = arith.constant 1 : i32
        %51 = arith.subi %c1_i32_30, %9 : i32
        %c1_i32_31 = arith.constant 1 : i32
        %52 = arith.subi %c1_i32_31, %9 : i32
        %c0_i32_32 = arith.constant 0 : i32
        %53 = tpu.memref_slice %arg2[%50, %c0_i32_32] : memref<304x128xbf16, #tpu.memory_space<any>> -> memref<304x128xbf16, #tpu.memory_space<any>>
        %c0_i32_33 = arith.constant 0 : i32
        %c0_i32_34 = arith.constant 0 : i32
        %54 = tpu.memref_slice %arg6[%51, %c0_i32_33, %c0_i32_34] : memref<2x304x128xbf16, #tpu.memory_space<vmem>> -> memref<1x304x128xbf16, #tpu.memory_space<vmem>>
        %55 = tpu.memref_squeeze %54 : memref<1x304x128xbf16, #tpu.memory_space<vmem>> -> memref<304x128xbf16, #tpu.memory_space<vmem>>
        %56 = tpu.memref_slice %arg7[%52] : memref<2x!tpu.dma_semaphore, #tpu.memory_space<semaphore_mem>> -> memref<1x!tpu.dma_semaphore, #tpu.memory_space<semaphore_mem>>
        %57 = tpu.memref_squeeze %56 : memref<1x!tpu.dma_semaphore, #tpu.memory_space<semaphore_mem>> -> memref<!tpu.dma_semaphore, #tpu.memory_space<semaphore_mem>>
        tpu.enqueue_dma source(%53 : memref<304x128xbf16, #tpu.memory_space<any>>) target(%55 : memref<304x128xbf16, #tpu.memory_space<vmem>>) target_semaphore(%57 : memref<!tpu.dma_semaphore, #tpu.memory_space<semaphore_mem>>)
      } else {
      }
    } else {
    }
    %cst = arith.constant 0.000000e+00 : f32
    %18 = vector.broadcast %cst : f32 to vector<288x128xf32>
    %19 = arith.index_cast %9 : i32 to index
    %c0 = arith.constant 0 : index
    %c0_8 = arith.constant 0 : index
    %20 = vector.load %arg6[%19, %c0, %c0_8] : memref<2x304x128xbf16, #tpu.memory_space<vmem>>, vector<1x288x128xbf16>
    %21 = vector.shape_cast %20 : vector<1x288x128xbf16> to vector<288x128xbf16>
    %c0_9 = arith.constant 0 : index
    %c0_10 = arith.constant 0 : index
    %c0_11 = arith.constant 0 : index
    %22 = vector.load %arg3[%c0_9, %c0_10, %c0_11] : memref<2x128x128xbf16, #tpu.memory_space<vmem>>, vector<1x128x128xbf16>
    %23 = vector.shape_cast %22 : vector<1x128x128xbf16> to vector<128x128xbf16>
    %cst_12 = arith.constant dense<0.000000e+00> : vector<288x128xf32>
    %24 = tpu.matmul %21, %23, %cst_12 {dimension_numbers = #tpu.dot_dimension_numbers<[1], [0], [0], [1], [0, 0, 1, 1], [], []>} : vector<288x128xbf16>, vector<128x128xbf16>, vector<288x128xf32> -> vector<288x128xf32>
    %25 = arith.addf %18, %24 : vector<288x128xf32>
    %26 = arith.index_cast %9 : i32 to index
    %c16 = arith.constant 16 : index
    %c0_13 = arith.constant 0 : index
    %27 = vector.load %arg6[%26, %c16, %c0_13] : memref<2x304x128xbf16, #tpu.memory_space<vmem>>, vector<1x288x128xbf16>
    %28 = vector.shape_cast %27 : vector<1x288x128xbf16> to vector<288x128xbf16>
    %c1 = arith.constant 1 : index
    %c0_14 = arith.constant 0 : index
    %c0_15 = arith.constant 0 : index
    %29 = vector.load %arg3[%c1, %c0_14, %c0_15] : memref<2x128x128xbf16, #tpu.memory_space<vmem>>, vector<1x128x128xbf16>
    %30 = vector.shape_cast %29 : vector<1x128x128xbf16> to vector<128x128xbf16>
    %cst_16 = arith.constant dense<0.000000e+00> : vector<288x128xf32>
    %31 = tpu.matmul %28, %30, %cst_16 {dimension_numbers = #tpu.dot_dimension_numbers<[1], [0], [0], [1], [0, 0, 1, 1], [], []>} : vector<288x128xbf16>, vector<128x128xbf16>, vector<288x128xf32> -> vector<288x128xf32>
    %32 = arith.addf %25, %31 : vector<288x128xf32>
    %c0_17 = arith.constant 0 : index
    %c0_18 = arith.constant 0 : index
    %33 = vector.load %arg4[%c0_17, %c0_18] : memref<1x128xf32, #tpu.memory_space<vmem>>, vector<1x128xf32>
    %34 = vector.broadcast %33 : vector<1x128xf32> to vector<288x128xf32>
    %35 = arith.addf %32, %34 : vector<288x128xf32>
    %cst_19 = arith.constant 0.000000e+00 : f32
    %36 = vector.broadcast %cst_19 : f32 to vector<288x128xf32>
    %37 = arith.maximumf %35, %36 : vector<288x128xf32>
    %38 = arith.truncf %37 : vector<288x128xf32> to vector<288x128xbf16>
    %c0_20 = arith.constant 0 : index
    %c0_21 = arith.constant 0 : index
    %39 = vector.load %arg5[%c0_20, %c0_21] : memref<288x128xbf16, #tpu.memory_space<vmem>>, vector<288x128xbf16>
    tpu.vector_store %arg5[%c0_20, %c0_21], %38 {strides = array<i32>} : memref<288x128xbf16, #tpu.memory_space<vmem>>, vector<288x128xbf16>,
    return
  }
  func.func @transform_1(%arg0: i32, %arg1: i32) -> (i32, i32, i32) {
    %c0_i32 = arith.constant 0 : i32
    %c0_i32_0 = arith.constant 0 : i32
    %c0_i32_1 = arith.constant 0 : i32
    return %c0_i32, %c0_i32_0, %arg1 : i32, i32, i32
  }
  func.func @transform_2(%arg0: i32, %arg1: i32) -> (i32, i32) {
    %c0_i32 = arith.constant 0 : i32
    %c0_i32_0 = arith.constant 0 : i32
    return %c0_i32, %arg1 : i32, i32
  }
  func.func @transform_3(%arg0: i32, %arg1: i32) -> (i32, i32) {
    %c0_i32 = arith.constant 0 : i32
    return %arg0, %arg1 : i32, i32
  }
}

module attributes {stable_mosaic.version = 11 : i64} {
  func.func @_conv_kernel(%arg0: i32, %arg1: i32, %arg2: memref<96x128xbf16, #tpu.memory_space<any>>, %arg3: memref<2x128x128xbf16, #tpu.memory_space<vmem>>, %arg4: memref<1x128xf32, #tpu.memory_space<vmem>>, %arg5: memref<80x128xbf16, #tpu.memory_space<vmem>>, %arg6: memref<2x96x128xbf16, #tpu.memory_space<vmem>>, %arg7: memref<2x!tpu.dma_semaphore, #tpu.memory_space<semaphore_mem>>) attributes {dimension_semantics = [#tpu.dimension_semantics<arbitrary>, #tpu.dimension_semantics<arbitrary>], iteration_bounds = array<i64: 1, 1>, scalar_prefetch = 0 : i64, scratch_operands = 2 : i64, tpu.core_type = #tpu.core_type<tc>, window_params = [{}, {transform_indices = @transform_1, window_bounds = array<i64: 2, 128, 128>}, {transform_indices = @transform_2, window_bounds = array<i64: 1, 128>}, {transform_indices = @transform_3, window_bounds = array<i64: 80, 128>}]} {
    %c2_i32 = arith.constant 2 : i32
    %c0_i32 = arith.constant 0 : i32
    %0 = arith.cmpi eq, %c2_i32, %c0_i32 : i32
    %c1_i32 = arith.constant 1 : i32
    %1 = arith.select %0, %c1_i32, %c2_i32 : i32
    %2 = arith.remsi %arg0, %1 : i32
    %c0_i32_0 = arith.constant 0 : i32
    %3 = arith.cmpi ne, %2, %c0_i32_0 : i32
    %c0_i32_1 = arith.constant 0 : i32
    %4 = arith.cmpi slt, %2, %c0_i32_1 : i32
    %c0_i32_2 = arith.constant 0 : i32
    %5 = arith.cmpi slt, %1, %c0_i32_2 : i32
    %6 = arith.xori %4, %5 : i1
    %7 = arith.andi %6, %3 : i1
    %8 = arith.addi %2, %1 : i32
    %9 = arith.select %7, %8, %2 : i32
    %c0_i32_3 = arith.constant 0 : i32
    %10 = arith.cmpi eq, %arg0, %c0_i32_3 : i32
    %c0_i32_4 = arith.constant 0 : i32
    %11 = arith.cmpi eq, %arg1, %c0_i32_4 : i32
    %12 = arith.andi %10, %11 : i1
    %13 = arith.extui %12 : i1 to i32
    %c0_i32_5 = arith.constant 0 : i32
    %14 = arith.cmpi ne, %13, %c0_i32_5 : i32
    scf.if %14 {
      %c0_i32_22 = arith.constant 0 : i32
      %c0_i32_23 = arith.constant 0 : i32
      %c0_i32_24 = arith.constant 0 : i32
      %c0_i32_25 = arith.constant 0 : i32
      %40 = tpu.memref_slice %arg2[%c0_i32_24, %c0_i32_25] : memref<96x128xbf16, #tpu.memory_space<any>> -> memref<96x128xbf16, #tpu.memory_space<any>>
      %c0_i32_26 = arith.constant 0 : i32
      %c0_i32_27 = arith.constant 0 : i32
      %41 = tpu.memref_slice %arg6[%c0_i32_22, %c0_i32_26, %c0_i32_27] : memref<2x96x128xbf16, #tpu.memory_space<vmem>> -> memref<1x96x128xbf16, #tpu.memory_space<vmem>>
      %42 = tpu.memref_squeeze %41 : memref<1x96x128xbf16, #tpu.memory_space<vmem>> -> memref<96x128xbf16, #tpu.memory_space<vmem>>
      %43 = tpu.memref_slice %arg7[%c0_i32_23] : memref<2x!tpu.dma_semaphore, #tpu.memory_space<semaphore_mem>> -> memref<1x!tpu.dma_semaphore, #tpu.memory_space<semaphore_mem>>
      %44 = tpu.memref_squeeze %43 : memref<1x!tpu.dma_semaphore, #tpu.memory_space<semaphore_mem>> -> memref<!tpu.dma_semaphore, #tpu.memory_space<semaphore_mem>>
      tpu.enqueue_dma source(%40 : memref<96x128xbf16, #tpu.memory_space<any>>) target(%42 : memref<96x128xbf16, #tpu.memory_space<vmem>>) target_semaphore(%44 : memref<!tpu.dma_semaphore, #tpu.memory_space<semaphore_mem>>)
    } else {
    }
    %c0_i32_6 = arith.constant 0 : i32
    %15 = arith.cmpi eq, %arg1, %c0_i32_6 : i32
    %16 = arith.extui %15 : i1 to i32
    %c0_i32_7 = arith.constant 0 : i32
    %17 = arith.cmpi ne, %16, %c0_i32_7 : i32
    scf.if %17 {
      %c0_i32_22 = arith.constant 0 : i32
      %c0_i32_23 = arith.constant 0 : i32
      %40 = tpu.memref_slice %arg2[%c0_i32_22, %c0_i32_23] : memref<96x128xbf16, #tpu.memory_space<any>> -> memref<96x128xbf16, #tpu.memory_space<any>>
      %c0_i32_24 = arith.constant 0 : i32
      %c0_i32_25 = arith.constant 0 : i32
      %41 = tpu.memref_slice %arg6[%9, %c0_i32_24, %c0_i32_25] : memref<2x96x128xbf16, #tpu.memory_space<vmem>> -> memref<1x96x128xbf16, #tpu.memory_space<vmem>>
      %42 = tpu.memref_squeeze %41 : memref<1x96x128xbf16, #tpu.memory_space<vmem>> -> memref<96x128xbf16, #tpu.memory_space<vmem>>
      %43 = tpu.memref_slice %arg7[%9] : memref<2x!tpu.dma_semaphore, #tpu.memory_space<semaphore_mem>> -> memref<1x!tpu.dma_semaphore, #tpu.memory_space<semaphore_mem>>
      %44 = tpu.memref_squeeze %43 : memref<1x!tpu.dma_semaphore, #tpu.memory_space<semaphore_mem>> -> memref<!tpu.dma_semaphore, #tpu.memory_space<semaphore_mem>>
      tpu.wait_dma2 semaphore(%44 : memref<!tpu.dma_semaphore, #tpu.memory_space<semaphore_mem>>) src(%40 : memref<96x128xbf16, #tpu.memory_space<any>>) dst(%42 : memref<96x128xbf16, #tpu.memory_space<vmem>>)
      %c1_i32_26 = arith.constant 1 : i32
      %45 = arith.addi %arg0, %c1_i32_26 : i32
      %c1_i32_27 = arith.constant 1 : i32
      %46 = arith.cmpi slt, %45, %c1_i32_27 : i32
      %47 = arith.extui %46 : i1 to i32
      %c0_i32_28 = arith.constant 0 : i32
      %48 = arith.cmpi ne, %47, %c0_i32_28 : i32
      scf.if %48 {
        %c1_i32_29 = arith.constant 1 : i32
        %49 = arith.addi %arg0, %c1_i32_29 : i32
        %c80_i32 = arith.constant 80 : i32
        %50 = arith.muli %49, %c80_i32 : i32
        %c1_i32_30 = arith.constant 1 : i32
        %51 = arith.subi %c1_i32_30, %9 : i32
        %c1_i32_31 = arith.constant 1 : i32
        %52 = arith.subi %c1_i32_31, %9 : i32
        %c0_i32_32 = arith.constant 0 : i32
        %53 = tpu.memref_slice %arg2[%50, %c0_i32_32] : memref<96x128xbf16, #tpu.memory_space<any>> -> memref<96x128xbf16, #tpu.memory_space<any>>
        %c0_i32_33 = arith.constant 0 : i32
        %c0_i32_34 = arith.constant 0 : i32
        %54 = tpu.memref_slice %arg6[%51, %c0_i32_33, %c0_i32_34] : memref<2x96x128xbf16, #tpu.memory_space<vmem>> -> memref<1x96x128xbf16, #tpu.memory_space<vmem>>
        %55 = tpu.memref_squeeze %54 : memref<1x96x128xbf16, #tpu.memory_space<vmem>> -> memref<96x128xbf16, #tpu.memory_space<vmem>>
        %56 = tpu.memref_slice %arg7[%52] : memref<2x!tpu.dma_semaphore, #tpu.memory_space<semaphore_mem>> -> memref<1x!tpu.dma_semaphore, #tpu.memory_space<semaphore_mem>>
        %57 = tpu.memref_squeeze %56 : memref<1x!tpu.dma_semaphore, #tpu.memory_space<semaphore_mem>> -> memref<!tpu.dma_semaphore, #tpu.memory_space<semaphore_mem>>
        tpu.enqueue_dma source(%53 : memref<96x128xbf16, #tpu.memory_space<any>>) target(%55 : memref<96x128xbf16, #tpu.memory_space<vmem>>) target_semaphore(%57 : memref<!tpu.dma_semaphore, #tpu.memory_space<semaphore_mem>>)
      } else {
      }
    } else {
    }
    %cst = arith.constant 0.000000e+00 : f32
    %18 = vector.broadcast %cst : f32 to vector<80x128xf32>
    %19 = arith.index_cast %9 : i32 to index
    %c0 = arith.constant 0 : index
    %c0_8 = arith.constant 0 : index
    %20 = vector.load %arg6[%19, %c0, %c0_8] : memref<2x96x128xbf16, #tpu.memory_space<vmem>>, vector<1x80x128xbf16>
    %21 = vector.shape_cast %20 : vector<1x80x128xbf16> to vector<80x128xbf16>
    %c0_9 = arith.constant 0 : index
    %c0_10 = arith.constant 0 : index
    %c0_11 = arith.constant 0 : index
    %22 = vector.load %arg3[%c0_9, %c0_10, %c0_11] : memref<2x128x128xbf16, #tpu.memory_space<vmem>>, vector<1x128x128xbf16>
    %23 = vector.shape_cast %22 : vector<1x128x128xbf16> to vector<128x128xbf16>
    %cst_12 = arith.constant dense<0.000000e+00> : vector<80x128xf32>
    %24 = tpu.matmul %21, %23, %cst_12 {dimension_numbers = #tpu.dot_dimension_numbers<[1], [0], [0], [1], [0, 0, 1, 1], [], []>} : vector<80x128xbf16>, vector<128x128xbf16>, vector<80x128xf32> -> vector<80x128xf32>
    %25 = arith.addf %18, %24 : vector<80x128xf32>
    %26 = arith.index_cast %9 : i32 to index
    %c8 = arith.constant 8 : index
    %c0_13 = arith.constant 0 : index
    %27 = vector.load %arg6[%26, %c8, %c0_13] : memref<2x96x128xbf16, #tpu.memory_space<vmem>>, vector<1x80x128xbf16>
    %28 = vector.shape_cast %27 : vector<1x80x128xbf16> to vector<80x128xbf16>
    %c1 = arith.constant 1 : index
    %c0_14 = arith.constant 0 : index
    %c0_15 = arith.constant 0 : index
    %29 = vector.load %arg3[%c1, %c0_14, %c0_15] : memref<2x128x128xbf16, #tpu.memory_space<vmem>>, vector<1x128x128xbf16>
    %30 = vector.shape_cast %29 : vector<1x128x128xbf16> to vector<128x128xbf16>
    %cst_16 = arith.constant dense<0.000000e+00> : vector<80x128xf32>
    %31 = tpu.matmul %28, %30, %cst_16 {dimension_numbers = #tpu.dot_dimension_numbers<[1], [0], [0], [1], [0, 0, 1, 1], [], []>} : vector<80x128xbf16>, vector<128x128xbf16>, vector<80x128xf32> -> vector<80x128xf32>
    %32 = arith.addf %25, %31 : vector<80x128xf32>
    %c0_17 = arith.constant 0 : index
    %c0_18 = arith.constant 0 : index
    %33 = vector.load %arg4[%c0_17, %c0_18] : memref<1x128xf32, #tpu.memory_space<vmem>>, vector<1x128xf32>
    %34 = vector.broadcast %33 : vector<1x128xf32> to vector<80x128xf32>
    %35 = arith.addf %32, %34 : vector<80x128xf32>
    %cst_19 = arith.constant 0.000000e+00 : f32
    %36 = vector.broadcast %cst_19 : f32 to vector<80x128xf32>
    %37 = arith.maximumf %35, %36 : vector<80x128xf32>
    %38 = arith.truncf %37 : vector<80x128xf32> to vector<80x128xbf16>
    %c0_20 = arith.constant 0 : index
    %c0_21 = arith.constant 0 : index
    %39 = vector.load %arg5[%c0_20, %c0_21] : memref<80x128xbf16, #tpu.memory_space<vmem>>, vector<80x128xbf16>
    tpu.vector_store %arg5[%c0_20, %c0_21], %38 {strides = array<i32>} : memref<80x128xbf16, #tpu.memory_space<vmem>>, vector<80x128xbf16>,
    return
  }
  func.func @transform_1(%arg0: i32, %arg1: i32) -> (i32, i32, i32) {
    %c0_i32 = arith.constant 0 : i32
    %c0_i32_0 = arith.constant 0 : i32
    %c0_i32_1 = arith.constant 0 : i32
    return %c0_i32, %c0_i32_0, %arg1 : i32, i32, i32
  }
  func.func @transform_2(%arg0: i32, %arg1: i32) -> (i32, i32) {
    %c0_i32 = arith.constant 0 : i32
    %c0_i32_0 = arith.constant 0 : i32
    return %c0_i32, %arg1 : i32, i32
  }
  func.func @transform_3(%arg0: i32, %arg1: i32) -> (i32, i32) {
    %c0_i32 = arith.constant 0 : i32
    return %arg0, %arg1 : i32, i32
  }
}

module attributes {stable_mosaic.version = 11 : i64} {
  func.func @_conv_kernel(%arg0: i32, %arg1: i32, %arg2: memref<112x128xbf16, #tpu.memory_space<any>>, %arg3: memref<3x128x128xbf16, #tpu.memory_space<vmem>>, %arg4: memref<1x128xf32, #tpu.memory_space<vmem>>, %arg5: memref<96x128xbf16, #tpu.memory_space<vmem>>, %arg6: memref<2x112x128xbf16, #tpu.memory_space<vmem>>, %arg7: memref<2x!tpu.dma_semaphore, #tpu.memory_space<semaphore_mem>>) attributes {dimension_semantics = [#tpu.dimension_semantics<arbitrary>, #tpu.dimension_semantics<arbitrary>], iteration_bounds = array<i64: 1, 1>, scalar_prefetch = 0 : i64, scratch_operands = 2 : i64, tpu.core_type = #tpu.core_type<tc>, window_params = [{}, {transform_indices = @transform_1, window_bounds = array<i64: 3, 128, 128>}, {transform_indices = @transform_2, window_bounds = array<i64: 1, 128>}, {transform_indices = @transform_3, window_bounds = array<i64: 96, 128>}]} {
    %c2_i32 = arith.constant 2 : i32
    %c0_i32 = arith.constant 0 : i32
    %0 = arith.cmpi eq, %c2_i32, %c0_i32 : i32
    %c1_i32 = arith.constant 1 : i32
    %1 = arith.select %0, %c1_i32, %c2_i32 : i32
    %2 = arith.remsi %arg0, %1 : i32
    %c0_i32_0 = arith.constant 0 : i32
    %3 = arith.cmpi ne, %2, %c0_i32_0 : i32
    %c0_i32_1 = arith.constant 0 : i32
    %4 = arith.cmpi slt, %2, %c0_i32_1 : i32
    %c0_i32_2 = arith.constant 0 : i32
    %5 = arith.cmpi slt, %1, %c0_i32_2 : i32
    %6 = arith.xori %4, %5 : i1
    %7 = arith.andi %6, %3 : i1
    %8 = arith.addi %2, %1 : i32
    %9 = arith.select %7, %8, %2 : i32
    %c0_i32_3 = arith.constant 0 : i32
    %10 = arith.cmpi eq, %arg0, %c0_i32_3 : i32
    %c0_i32_4 = arith.constant 0 : i32
    %11 = arith.cmpi eq, %arg1, %c0_i32_4 : i32
    %12 = arith.andi %10, %11 : i1
    %13 = arith.extui %12 : i1 to i32
    %c0_i32_5 = arith.constant 0 : i32
    %14 = arith.cmpi ne, %13, %c0_i32_5 : i32
    scf.if %14 {
      %c0_i32_26 = arith.constant 0 : i32
      %c0_i32_27 = arith.constant 0 : i32
      %c0_i32_28 = arith.constant 0 : i32
      %c0_i32_29 = arith.constant 0 : i32
      %47 = tpu.memref_slice %arg2[%c0_i32_28, %c0_i32_29] : memref<112x128xbf16, #tpu.memory_space<any>> -> memref<112x128xbf16, #tpu.memory_space<any>>
      %c0_i32_30 = arith.constant 0 : i32
      %c0_i32_31 = arith.constant 0 : i32
      %48 = tpu.memref_slice %arg6[%c0_i32_26, %c0_i32_30, %c0_i32_31] : memref<2x112x128xbf16, #tpu.memory_space<vmem>> -> memref<1x112x128xbf16, #tpu.memory_space<vmem>>
      %49 = tpu.memref_squeeze %48 : memref<1x112x128xbf16, #tpu.memory_space<vmem>> -> memref<112x128xbf16, #tpu.memory_space<vmem>>
      %50 = tpu.memref_slice %arg7[%c0_i32_27] : memref<2x!tpu.dma_semaphore, #tpu.memory_space<semaphore_mem>> -> memref<1x!tpu.dma_semaphore, #tpu.memory_space<semaphore_mem>>
      %51 = tpu.memref_squeeze %50 : memref<1x!tpu.dma_semaphore, #tpu.memory_space<semaphore_mem>> -> memref<!tpu.dma_semaphore, #tpu.memory_space<semaphore_mem>>
      tpu.enqueue_dma source(%47 : memref<112x128xbf16, #tpu.memory_space<any>>) target(%49 : memref<112x128xbf16, #tpu.memory_space<vmem>>) target_semaphore(%51 : memref<!tpu.dma_semaphore, #tpu.memory_space<semaphore_mem>>)
    } else {
    }
    %c0_i32_6 = arith.constant 0 : i32
    %15 = arith.cmpi eq, %arg1, %c0_i32_6 : i32
    %16 = arith.extui %15 : i1 to i32
    %c0_i32_7 = arith.constant 0 : i32
    %17 = arith.cmpi ne, %16, %c0_i32_7 : i32
    scf.if %17 {
      %c0_i32_26 = arith.constant 0 : i32
      %c0_i32_27 = arith.constant 0 : i32
      %47 = tpu.memref_slice %arg2[%c0_i32_26, %c0_i32_27] : memref<112x128xbf16, #tpu.memory_space<any>> -> memref<112x128xbf16, #tpu.memory_space<any>>
      %c0_i32_28 = arith.constant 0 : i32
      %c0_i32_29 = arith.constant 0 : i32
      %48 = tpu.memref_slice %arg6[%9, %c0_i32_28, %c0_i32_29] : memref<2x112x128xbf16, #tpu.memory_space<vmem>> -> memref<1x112x128xbf16, #tpu.memory_space<vmem>>
      %49 = tpu.memref_squeeze %48 : memref<1x112x128xbf16, #tpu.memory_space<vmem>> -> memref<112x128xbf16, #tpu.memory_space<vmem>>
      %50 = tpu.memref_slice %arg7[%9] : memref<2x!tpu.dma_semaphore, #tpu.memory_space<semaphore_mem>> -> memref<1x!tpu.dma_semaphore, #tpu.memory_space<semaphore_mem>>
      %51 = tpu.memref_squeeze %50 : memref<1x!tpu.dma_semaphore, #tpu.memory_space<semaphore_mem>> -> memref<!tpu.dma_semaphore, #tpu.memory_space<semaphore_mem>>
      tpu.wait_dma2 semaphore(%51 : memref<!tpu.dma_semaphore, #tpu.memory_space<semaphore_mem>>) src(%47 : memref<112x128xbf16, #tpu.memory_space<any>>) dst(%49 : memref<112x128xbf16, #tpu.memory_space<vmem>>)
      %c1_i32_30 = arith.constant 1 : i32
      %52 = arith.addi %arg0, %c1_i32_30 : i32
      %c1_i32_31 = arith.constant 1 : i32
      %53 = arith.cmpi slt, %52, %c1_i32_31 : i32
      %54 = arith.extui %53 : i1 to i32
      %c0_i32_32 = arith.constant 0 : i32
      %55 = arith.cmpi ne, %54, %c0_i32_32 : i32
      scf.if %55 {
        %c1_i32_33 = arith.constant 1 : i32
        %56 = arith.addi %arg0, %c1_i32_33 : i32
        %c96_i32 = arith.constant 96 : i32
        %57 = arith.muli %56, %c96_i32 : i32
        %c1_i32_34 = arith.constant 1 : i32
        %58 = arith.subi %c1_i32_34, %9 : i32
        %c1_i32_35 = arith.constant 1 : i32
        %59 = arith.subi %c1_i32_35, %9 : i32
        %c0_i32_36 = arith.constant 0 : i32
        %60 = tpu.memref_slice %arg2[%57, %c0_i32_36] : memref<112x128xbf16, #tpu.memory_space<any>> -> memref<112x128xbf16, #tpu.memory_space<any>>
        %c0_i32_37 = arith.constant 0 : i32
        %c0_i32_38 = arith.constant 0 : i32
        %61 = tpu.memref_slice %arg6[%58, %c0_i32_37, %c0_i32_38] : memref<2x112x128xbf16, #tpu.memory_space<vmem>> -> memref<1x112x128xbf16, #tpu.memory_space<vmem>>
        %62 = tpu.memref_squeeze %61 : memref<1x112x128xbf16, #tpu.memory_space<vmem>> -> memref<112x128xbf16, #tpu.memory_space<vmem>>
        %63 = tpu.memref_slice %arg7[%59] : memref<2x!tpu.dma_semaphore, #tpu.memory_space<semaphore_mem>> -> memref<1x!tpu.dma_semaphore, #tpu.memory_space<semaphore_mem>>
        %64 = tpu.memref_squeeze %63 : memref<1x!tpu.dma_semaphore, #tpu.memory_space<semaphore_mem>> -> memref<!tpu.dma_semaphore, #tpu.memory_space<semaphore_mem>>
        tpu.enqueue_dma source(%60 : memref<112x128xbf16, #tpu.memory_space<any>>) target(%62 : memref<112x128xbf16, #tpu.memory_space<vmem>>) target_semaphore(%64 : memref<!tpu.dma_semaphore, #tpu.memory_space<semaphore_mem>>)
      } else {
      }
    } else {
    }
    %cst = arith.constant 0.000000e+00 : f32
    %18 = vector.broadcast %cst : f32 to vector<96x128xf32>
    %19 = arith.index_cast %9 : i32 to index
    %c0 = arith.constant 0 : index
    %c0_8 = arith.constant 0 : index
    %20 = vector.load %arg6[%19, %c0, %c0_8] : memref<2x112x128xbf16, #tpu.memory_space<vmem>>, vector<1x96x128xbf16>
    %21 = vector.shape_cast %20 : vector<1x96x128xbf16> to vector<96x128xbf16>
    %c0_9 = arith.constant 0 : index
    %c0_10 = arith.constant 0 : index
    %c0_11 = arith.constant 0 : index
    %22 = vector.load %arg3[%c0_9, %c0_10, %c0_11] : memref<3x128x128xbf16, #tpu.memory_space<vmem>>, vector<1x128x128xbf16>
    %23 = vector.shape_cast %22 : vector<1x128x128xbf16> to vector<128x128xbf16>
    %cst_12 = arith.constant dense<0.000000e+00> : vector<96x128xf32>
    %24 = tpu.matmul %21, %23, %cst_12 {dimension_numbers = #tpu.dot_dimension_numbers<[1], [0], [0], [1], [0, 0, 1, 1], [], []>} : vector<96x128xbf16>, vector<128x128xbf16>, vector<96x128xf32> -> vector<96x128xf32>
    %25 = arith.addf %18, %24 : vector<96x128xf32>
    %26 = arith.index_cast %9 : i32 to index
    %c8 = arith.constant 8 : index
    %c0_13 = arith.constant 0 : index
    %27 = vector.load %arg6[%26, %c8, %c0_13] : memref<2x112x128xbf16, #tpu.memory_space<vmem>>, vector<1x96x128xbf16>
    %28 = vector.shape_cast %27 : vector<1x96x128xbf16> to vector<96x128xbf16>
    %c1 = arith.constant 1 : index
    %c0_14 = arith.constant 0 : index
    %c0_15 = arith.constant 0 : index
    %29 = vector.load %arg3[%c1, %c0_14, %c0_15] : memref<3x128x128xbf16, #tpu.memory_space<vmem>>, vector<1x128x128xbf16>
    %30 = vector.shape_cast %29 : vector<1x128x128xbf16> to vector<128x128xbf16>
    %cst_16 = arith.constant dense<0.000000e+00> : vector<96x128xf32>
    %31 = tpu.matmul %28, %30, %cst_16 {dimension_numbers = #tpu.dot_dimension_numbers<[1], [0], [0], [1], [0, 0, 1, 1], [], []>} : vector<96x128xbf16>, vector<128x128xbf16>, vector<96x128xf32> -> vector<96x128xf32>
    %32 = arith.addf %25, %31 : vector<96x128xf32>
    %33 = arith.index_cast %9 : i32 to index
    %c16 = arith.constant 16 : index
    %c0_17 = arith.constant 0 : index
    %34 = vector.load %arg6[%33, %c16, %c0_17] : memref<2x112x128xbf16, #tpu.memory_space<vmem>>, vector<1x96x128xbf16>
    %35 = vector.shape_cast %34 : vector<1x96x128xbf16> to vector<96x128xbf16>
    %c2 = arith.constant 2 : index
    %c0_18 = arith.constant 0 : index
    %c0_19 = arith.constant 0 : index
    %36 = vector.load %arg3[%c2, %c0_18, %c0_19] : memref<3x128x128xbf16, #tpu.memory_space<vmem>>, vector<1x128x128xbf16>
    %37 = vector.shape_cast %36 : vector<1x128x128xbf16> to vector<128x128xbf16>
    %cst_20 = arith.constant dense<0.000000e+00> : vector<96x128xf32>
    %38 = tpu.matmul %35, %37, %cst_20 {dimension_numbers = #tpu.dot_dimension_numbers<[1], [0], [0], [1], [0, 0, 1, 1], [], []>} : vector<96x128xbf16>, vector<128x128xbf16>, vector<96x128xf32> -> vector<96x128xf32>
    %39 = arith.addf %32, %38 : vector<96x128xf32>
    %c0_21 = arith.constant 0 : index
    %c0_22 = arith.constant 0 : index
    %40 = vector.load %arg4[%c0_21, %c0_22] : memref<1x128xf32, #tpu.memory_space<vmem>>, vector<1x128xf32>
    %41 = vector.broadcast %40 : vector<1x128xf32> to vector<96x128xf32>
    %42 = arith.addf %39, %41 : vector<96x128xf32>
    %cst_23 = arith.constant 0.000000e+00 : f32
    %43 = vector.broadcast %cst_23 : f32 to vector<96x128xf32>
    %44 = arith.maximumf %42, %43 : vector<96x128xf32>
    %45 = arith.truncf %44 : vector<96x128xf32> to vector<96x128xbf16>
    %c0_24 = arith.constant 0 : index
    %c0_25 = arith.constant 0 : index
    %46 = vector.load %arg5[%c0_24, %c0_25] : memref<96x128xbf16, #tpu.memory_space<vmem>>, vector<96x128xbf16>
    tpu.vector_store %arg5[%c0_24, %c0_25], %45 {strides = array<i32>} : memref<96x128xbf16, #tpu.memory_space<vmem>>, vector<96x128xbf16>,
    return
  }
  func.func @transform_1(%arg0: i32, %arg1: i32) -> (i32, i32, i32) {
    %c0_i32 = arith.constant 0 : i32
    %c0_i32_0 = arith.constant 0 : i32
    %c0_i32_1 = arith.constant 0 : i32
    return %c0_i32, %c0_i32_0, %arg1 : i32, i32, i32
  }
  func.func @transform_2(%arg0: i32, %arg1: i32) -> (i32, i32) {
    %c0_i32 = arith.constant 0 : i32
    %c0_i32_0 = arith.constant 0 : i32
    return %c0_i32, %arg1 : i32, i32
  }
  func.func @transform_3(%arg0: i32, %arg1: i32) -> (i32, i32) {
    %c0_i32 = arith.constant 0 : i32
    return %arg0, %arg1 : i32, i32
  }
}

module attributes {stable_mosaic.version = 11 : i64} {
  func.func @_conv_kernel(%arg0: i32, %arg1: i32, %arg2: memref<112x128xbf16, #tpu.memory_space<any>>, %arg3: memref<3x128x128xbf16, #tpu.memory_space<vmem>>, %arg4: memref<1x128xf32, #tpu.memory_space<vmem>>, %arg5: memref<96x128xbf16, #tpu.memory_space<vmem>>, %arg6: memref<96x128xbf16, #tpu.memory_space<vmem>>, %arg7: memref<2x112x128xbf16, #tpu.memory_space<vmem>>, %arg8: memref<2x!tpu.dma_semaphore, #tpu.memory_space<semaphore_mem>>) attributes {dimension_semantics = [#tpu.dimension_semantics<arbitrary>, #tpu.dimension_semantics<arbitrary>], iteration_bounds = array<i64: 1, 1>, scalar_prefetch = 0 : i64, scratch_operands = 2 : i64, tpu.core_type = #tpu.core_type<tc>, window_params = [{}, {transform_indices = @transform_1, window_bounds = array<i64: 3, 128, 128>}, {transform_indices = @transform_2, window_bounds = array<i64: 1, 128>}, {transform_indices = @transform_3, window_bounds = array<i64: 96, 128>}, {transform_indices = @transform_4, window_bounds = array<i64: 96, 128>}]} {
    %c2_i32 = arith.constant 2 : i32
    %c0_i32 = arith.constant 0 : i32
    %0 = arith.cmpi eq, %c2_i32, %c0_i32 : i32
    %c1_i32 = arith.constant 1 : i32
    %1 = arith.select %0, %c1_i32, %c2_i32 : i32
    %2 = arith.remsi %arg0, %1 : i32
    %c0_i32_0 = arith.constant 0 : i32
    %3 = arith.cmpi ne, %2, %c0_i32_0 : i32
    %c0_i32_1 = arith.constant 0 : i32
    %4 = arith.cmpi slt, %2, %c0_i32_1 : i32
    %c0_i32_2 = arith.constant 0 : i32
    %5 = arith.cmpi slt, %1, %c0_i32_2 : i32
    %6 = arith.xori %4, %5 : i1
    %7 = arith.andi %6, %3 : i1
    %8 = arith.addi %2, %1 : i32
    %9 = arith.select %7, %8, %2 : i32
    %c0_i32_3 = arith.constant 0 : i32
    %10 = arith.cmpi eq, %arg0, %c0_i32_3 : i32
    %c0_i32_4 = arith.constant 0 : i32
    %11 = arith.cmpi eq, %arg1, %c0_i32_4 : i32
    %12 = arith.andi %10, %11 : i1
    %13 = arith.extui %12 : i1 to i32
    %c0_i32_5 = arith.constant 0 : i32
    %14 = arith.cmpi ne, %13, %c0_i32_5 : i32
    scf.if %14 {
      %c0_i32_27 = arith.constant 0 : i32
      %c0_i32_28 = arith.constant 0 : i32
      %c0_i32_29 = arith.constant 0 : i32
      %c0_i32_30 = arith.constant 0 : i32
      %48 = tpu.memref_slice %arg2[%c0_i32_29, %c0_i32_30] : memref<112x128xbf16, #tpu.memory_space<any>> -> memref<112x128xbf16, #tpu.memory_space<any>>
      %c0_i32_31 = arith.constant 0 : i32
      %c0_i32_32 = arith.constant 0 : i32
      %49 = tpu.memref_slice %arg7[%c0_i32_27, %c0_i32_31, %c0_i32_32] : memref<2x112x128xbf16, #tpu.memory_space<vmem>> -> memref<1x112x128xbf16, #tpu.memory_space<vmem>>
      %50 = tpu.memref_squeeze %49 : memref<1x112x128xbf16, #tpu.memory_space<vmem>> -> memref<112x128xbf16, #tpu.memory_space<vmem>>
      %51 = tpu.memref_slice %arg8[%c0_i32_28] : memref<2x!tpu.dma_semaphore, #tpu.memory_space<semaphore_mem>> -> memref<1x!tpu.dma_semaphore, #tpu.memory_space<semaphore_mem>>
      %52 = tpu.memref_squeeze %51 : memref<1x!tpu.dma_semaphore, #tpu.memory_space<semaphore_mem>> -> memref<!tpu.dma_semaphore, #tpu.memory_space<semaphore_mem>>
      tpu.enqueue_dma source(%48 : memref<112x128xbf16, #tpu.memory_space<any>>) target(%50 : memref<112x128xbf16, #tpu.memory_space<vmem>>) target_semaphore(%52 : memref<!tpu.dma_semaphore, #tpu.memory_space<semaphore_mem>>)
    } else {
    }
    %c0_i32_6 = arith.constant 0 : i32
    %15 = arith.cmpi eq, %arg1, %c0_i32_6 : i32
    %16 = arith.extui %15 : i1 to i32
    %c0_i32_7 = arith.constant 0 : i32
    %17 = arith.cmpi ne, %16, %c0_i32_7 : i32
    scf.if %17 {
      %c0_i32_27 = arith.constant 0 : i32
      %c0_i32_28 = arith.constant 0 : i32
      %48 = tpu.memref_slice %arg2[%c0_i32_27, %c0_i32_28] : memref<112x128xbf16, #tpu.memory_space<any>> -> memref<112x128xbf16, #tpu.memory_space<any>>
      %c0_i32_29 = arith.constant 0 : i32
      %c0_i32_30 = arith.constant 0 : i32
      %49 = tpu.memref_slice %arg7[%9, %c0_i32_29, %c0_i32_30] : memref<2x112x128xbf16, #tpu.memory_space<vmem>> -> memref<1x112x128xbf16, #tpu.memory_space<vmem>>
      %50 = tpu.memref_squeeze %49 : memref<1x112x128xbf16, #tpu.memory_space<vmem>> -> memref<112x128xbf16, #tpu.memory_space<vmem>>
      %51 = tpu.memref_slice %arg8[%9] : memref<2x!tpu.dma_semaphore, #tpu.memory_space<semaphore_mem>> -> memref<1x!tpu.dma_semaphore, #tpu.memory_space<semaphore_mem>>
      %52 = tpu.memref_squeeze %51 : memref<1x!tpu.dma_semaphore, #tpu.memory_space<semaphore_mem>> -> memref<!tpu.dma_semaphore, #tpu.memory_space<semaphore_mem>>
      tpu.wait_dma2 semaphore(%52 : memref<!tpu.dma_semaphore, #tpu.memory_space<semaphore_mem>>) src(%48 : memref<112x128xbf16, #tpu.memory_space<any>>) dst(%50 : memref<112x128xbf16, #tpu.memory_space<vmem>>)
      %c1_i32_31 = arith.constant 1 : i32
      %53 = arith.addi %arg0, %c1_i32_31 : i32
      %c1_i32_32 = arith.constant 1 : i32
      %54 = arith.cmpi slt, %53, %c1_i32_32 : i32
      %55 = arith.extui %54 : i1 to i32
      %c0_i32_33 = arith.constant 0 : i32
      %56 = arith.cmpi ne, %55, %c0_i32_33 : i32
      scf.if %56 {
        %c1_i32_34 = arith.constant 1 : i32
        %57 = arith.addi %arg0, %c1_i32_34 : i32
        %c96_i32 = arith.constant 96 : i32
        %58 = arith.muli %57, %c96_i32 : i32
        %c1_i32_35 = arith.constant 1 : i32
        %59 = arith.subi %c1_i32_35, %9 : i32
        %c1_i32_36 = arith.constant 1 : i32
        %60 = arith.subi %c1_i32_36, %9 : i32
        %c0_i32_37 = arith.constant 0 : i32
        %61 = tpu.memref_slice %arg2[%58, %c0_i32_37] : memref<112x128xbf16, #tpu.memory_space<any>> -> memref<112x128xbf16, #tpu.memory_space<any>>
        %c0_i32_38 = arith.constant 0 : i32
        %c0_i32_39 = arith.constant 0 : i32
        %62 = tpu.memref_slice %arg7[%59, %c0_i32_38, %c0_i32_39] : memref<2x112x128xbf16, #tpu.memory_space<vmem>> -> memref<1x112x128xbf16, #tpu.memory_space<vmem>>
        %63 = tpu.memref_squeeze %62 : memref<1x112x128xbf16, #tpu.memory_space<vmem>> -> memref<112x128xbf16, #tpu.memory_space<vmem>>
        %64 = tpu.memref_slice %arg8[%60] : memref<2x!tpu.dma_semaphore, #tpu.memory_space<semaphore_mem>> -> memref<1x!tpu.dma_semaphore, #tpu.memory_space<semaphore_mem>>
        %65 = tpu.memref_squeeze %64 : memref<1x!tpu.dma_semaphore, #tpu.memory_space<semaphore_mem>> -> memref<!tpu.dma_semaphore, #tpu.memory_space<semaphore_mem>>
        tpu.enqueue_dma source(%61 : memref<112x128xbf16, #tpu.memory_space<any>>) target(%63 : memref<112x128xbf16, #tpu.memory_space<vmem>>) target_semaphore(%65 : memref<!tpu.dma_semaphore, #tpu.memory_space<semaphore_mem>>)
      } else {
      }
    } else {
    }
    %cst = arith.constant 0.000000e+00 : f32
    %18 = vector.broadcast %cst : f32 to vector<96x128xf32>
    %19 = arith.index_cast %9 : i32 to index
    %c0 = arith.constant 0 : index
    %c0_8 = arith.constant 0 : index
    %20 = vector.load %arg7[%19, %c0, %c0_8] : memref<2x112x128xbf16, #tpu.memory_space<vmem>>, vector<1x96x128xbf16>
    %21 = vector.shape_cast %20 : vector<1x96x128xbf16> to vector<96x128xbf16>
    %c0_9 = arith.constant 0 : index
    %c0_10 = arith.constant 0 : index
    %c0_11 = arith.constant 0 : index
    %22 = vector.load %arg3[%c0_9, %c0_10, %c0_11] : memref<3x128x128xbf16, #tpu.memory_space<vmem>>, vector<1x128x128xbf16>
    %23 = vector.shape_cast %22 : vector<1x128x128xbf16> to vector<128x128xbf16>
    %cst_12 = arith.constant dense<0.000000e+00> : vector<96x128xf32>
    %24 = tpu.matmul %21, %23, %cst_12 {dimension_numbers = #tpu.dot_dimension_numbers<[1], [0], [0], [1], [0, 0, 1, 1], [], []>} : vector<96x128xbf16>, vector<128x128xbf16>, vector<96x128xf32> -> vector<96x128xf32>
    %25 = arith.addf %18, %24 : vector<96x128xf32>
    %26 = arith.index_cast %9 : i32 to index
    %c8 = arith.constant 8 : index
    %c0_13 = arith.constant 0 : index
    %27 = vector.load %arg7[%26, %c8, %c0_13] : memref<2x112x128xbf16, #tpu.memory_space<vmem>>, vector<1x96x128xbf16>
    %28 = vector.shape_cast %27 : vector<1x96x128xbf16> to vector<96x128xbf16>
    %c1 = arith.constant 1 : index
    %c0_14 = arith.constant 0 : index
    %c0_15 = arith.constant 0 : index
    %29 = vector.load %arg3[%c1, %c0_14, %c0_15] : memref<3x128x128xbf16, #tpu.memory_space<vmem>>, vector<1x128x128xbf16>
    %30 = vector.shape_cast %29 : vector<1x128x128xbf16> to vector<128x128xbf16>
    %cst_16 = arith.constant dense<0.000000e+00> : vector<96x128xf32>
    %31 = tpu.matmul %28, %30, %cst_16 {dimension_numbers = #tpu.dot_dimension_numbers<[1], [0], [0], [1], [0, 0, 1, 1], [], []>} : vector<96x128xbf16>, vector<128x128xbf16>, vector<96x128xf32> -> vector<96x128xf32>
    %32 = arith.addf %25, %31 : vector<96x128xf32>
    %33 = arith.index_cast %9 : i32 to index
    %c16 = arith.constant 16 : index
    %c0_17 = arith.constant 0 : index
    %34 = vector.load %arg7[%33, %c16, %c0_17] : memref<2x112x128xbf16, #tpu.memory_space<vmem>>, vector<1x96x128xbf16>
    %35 = vector.shape_cast %34 : vector<1x96x128xbf16> to vector<96x128xbf16>
    %c2 = arith.constant 2 : index
    %c0_18 = arith.constant 0 : index
    %c0_19 = arith.constant 0 : index
    %36 = vector.load %arg3[%c2, %c0_18, %c0_19] : memref<3x128x128xbf16, #tpu.memory_space<vmem>>, vector<1x128x128xbf16>
    %37 = vector.shape_cast %36 : vector<1x128x128xbf16> to vector<128x128xbf16>
    %cst_20 = arith.constant dense<0.000000e+00> : vector<96x128xf32>
    %38 = tpu.matmul %35, %37, %cst_20 {dimension_numbers = #tpu.dot_dimension_numbers<[1], [0], [0], [1], [0, 0, 1, 1], [], []>} : vector<96x128xbf16>, vector<128x128xbf16>, vector<96x128xf32> -> vector<96x128xf32>
    %39 = arith.addf %32, %38 : vector<96x128xf32>
    %c0_21 = arith.constant 0 : index
    %c0_22 = arith.constant 0 : index
    %40 = vector.load %arg4[%c0_21, %c0_22] : memref<1x128xf32, #tpu.memory_space<vmem>>, vector<1x128xf32>
    %41 = vector.broadcast %40 : vector<1x128xf32> to vector<96x128xf32>
    %42 = arith.addf %39, %41 : vector<96x128xf32>
    %c0_23 = arith.constant 0 : index
    %c0_24 = arith.constant 0 : index
    %43 = vector.load %arg5[%c0_23, %c0_24] : memref<96x128xbf16, #tpu.memory_space<vmem>>, vector<96x128xbf16>
    %44 = arith.extf %43 : vector<96x128xbf16> to vector<96x128xf32>
    %45 = arith.addf %42, %44 : vector<96x128xf32>
    %46 = arith.truncf %45 : vector<96x128xf32> to vector<96x128xbf16>
    %c0_25 = arith.constant 0 : index
    %c0_26 = arith.constant 0 : index
    %47 = vector.load %arg6[%c0_25, %c0_26] : memref<96x128xbf16, #tpu.memory_space<vmem>>, vector<96x128xbf16>
    tpu.vector_store %arg6[%c0_25, %c0_26], %46 {strides = array<i32>} : memref<96x128xbf16, #tpu.memory_space<vmem>>, vector<96x128xbf16>,
    return
  }
  func.func @transform_1(%arg0: i32, %arg1: i32) -> (i32, i32, i32) {
    %c0_i32 = arith.constant 0 : i32
    %c0_i32_0 = arith.constant 0 : i32
    %c0_i32_1 = arith.constant 0 : i32
    return %c0_i32, %c0_i32_0, %arg1 : i32, i32, i32
  }
  func.func @transform_2(%arg0: i32, %arg1: i32) -> (i32, i32) {
    %c0_i32 = arith.constant 0 : i32
    %c0_i32_0 = arith.constant 0 : i32
    return %c0_i32, %arg1 : i32, i32
  }
  func.func @transform_3(%arg0: i32, %arg1: i32) -> (i32, i32) {
    %c0_i32 = arith.constant 0 : i32
    return %arg0, %arg1 : i32, i32
  }
  func.func @transform_4(%arg0: i32, %arg1: i32) -> (i32, i32) {
    %c0_i32 = arith.constant 0 : i32
    return %arg0, %arg1 : i32, i32
  }
}

module attributes {stable_mosaic.version = 11 : i64} {
  func.func @_conv_kernel(%arg0: i32, %arg1: i32, %arg2: memref<1200x128xbf16, #tpu.memory_space<any>>, %arg3: memref<7x128x128xbf16, #tpu.memory_space<vmem>>, %arg4: memref<1x128xf32, #tpu.memory_space<vmem>>, %arg5: memref<352x128xbf16, #tpu.memory_space<vmem>>, %arg6: memref<2x496x128xbf16, #tpu.memory_space<vmem>>, %arg7: memref<2x!tpu.dma_semaphore, #tpu.memory_space<semaphore_mem>>) attributes {dimension_semantics = [#tpu.dimension_semantics<arbitrary>, #tpu.dimension_semantics<arbitrary>], iteration_bounds = array<i64: 3, 1>, scalar_prefetch = 0 : i64, scratch_operands = 2 : i64, tpu.core_type = #tpu.core_type<tc>, window_params = [{}, {transform_indices = @transform_1, window_bounds = array<i64: 7, 128, 128>}, {transform_indices = @transform_2, window_bounds = array<i64: 1, 128>}, {transform_indices = @transform_3, window_bounds = array<i64: 352, 128>}]} {
    %c2_i32 = arith.constant 2 : i32
    %c0_i32 = arith.constant 0 : i32
    %0 = arith.cmpi eq, %c2_i32, %c0_i32 : i32
    %c1_i32 = arith.constant 1 : i32
    %1 = arith.select %0, %c1_i32, %c2_i32 : i32
    %2 = arith.remsi %arg0, %1 : i32
    %c0_i32_0 = arith.constant 0 : i32
    %3 = arith.cmpi ne, %2, %c0_i32_0 : i32
    %c0_i32_1 = arith.constant 0 : i32
    %4 = arith.cmpi slt, %2, %c0_i32_1 : i32
    %c0_i32_2 = arith.constant 0 : i32
    %5 = arith.cmpi slt, %1, %c0_i32_2 : i32
    %6 = arith.xori %4, %5 : i1
    %7 = arith.andi %6, %3 : i1
    %8 = arith.addi %2, %1 : i32
    %9 = arith.select %7, %8, %2 : i32
    %c0_i32_3 = arith.constant 0 : i32
    %10 = arith.cmpi eq, %arg0, %c0_i32_3 : i32
    %c0_i32_4 = arith.constant 0 : i32
    %11 = arith.cmpi eq, %arg1, %c0_i32_4 : i32
    %12 = arith.andi %10, %11 : i1
    %13 = arith.extui %12 : i1 to i32
    %c0_i32_5 = arith.constant 0 : i32
    %14 = arith.cmpi ne, %13, %c0_i32_5 : i32
    scf.if %14 {
      %c0_i32_41 = arith.constant 0 : i32
      %c0_i32_42 = arith.constant 0 : i32
      %c0_i32_43 = arith.constant 0 : i32
      %c0_i32_44 = arith.constant 0 : i32
      %74 = tpu.memref_slice %arg2[%c0_i32_43, %c0_i32_44] : memref<1200x128xbf16, #tpu.memory_space<any>> -> memref<496x128xbf16, #tpu.memory_space<any>>
      %c0_i32_45 = arith.constant 0 : i32
      %c0_i32_46 = arith.constant 0 : i32
      %75 = tpu.memref_slice %arg6[%c0_i32_41, %c0_i32_45, %c0_i32_46] : memref<2x496x128xbf16, #tpu.memory_space<vmem>> -> memref<1x496x128xbf16, #tpu.memory_space<vmem>>
      %76 = tpu.memref_squeeze %75 : memref<1x496x128xbf16, #tpu.memory_space<vmem>> -> memref<496x128xbf16, #tpu.memory_space<vmem>>
      %77 = tpu.memref_slice %arg7[%c0_i32_42] : memref<2x!tpu.dma_semaphore, #tpu.memory_space<semaphore_mem>> -> memref<1x!tpu.dma_semaphore, #tpu.memory_space<semaphore_mem>>
      %78 = tpu.memref_squeeze %77 : memref<1x!tpu.dma_semaphore, #tpu.memory_space<semaphore_mem>> -> memref<!tpu.dma_semaphore, #tpu.memory_space<semaphore_mem>>
      tpu.enqueue_dma source(%74 : memref<496x128xbf16, #tpu.memory_space<any>>) target(%76 : memref<496x128xbf16, #tpu.memory_space<vmem>>) target_semaphore(%78 : memref<!tpu.dma_semaphore, #tpu.memory_space<semaphore_mem>>)
    } else {
    }
    %c0_i32_6 = arith.constant 0 : i32
    %15 = arith.cmpi eq, %arg1, %c0_i32_6 : i32
    %16 = arith.extui %15 : i1 to i32
    %c0_i32_7 = arith.constant 0 : i32
    %17 = arith.cmpi ne, %16, %c0_i32_7 : i32
    scf.if %17 {
      %c0_i32_41 = arith.constant 0 : i32
      %c0_i32_42 = arith.constant 0 : i32
      %74 = tpu.memref_slice %arg2[%c0_i32_41, %c0_i32_42] : memref<1200x128xbf16, #tpu.memory_space<any>> -> memref<496x128xbf16, #tpu.memory_space<any>>
      %c0_i32_43 = arith.constant 0 : i32
      %c0_i32_44 = arith.constant 0 : i32
      %75 = tpu.memref_slice %arg6[%9, %c0_i32_43, %c0_i32_44] : memref<2x496x128xbf16, #tpu.memory_space<vmem>> -> memref<1x496x128xbf16, #tpu.memory_space<vmem>>
      %76 = tpu.memref_squeeze %75 : memref<1x496x128xbf16, #tpu.memory_space<vmem>> -> memref<496x128xbf16, #tpu.memory_space<vmem>>
      %77 = tpu.memref_slice %arg7[%9] : memref<2x!tpu.dma_semaphore, #tpu.memory_space<semaphore_mem>> -> memref<1x!tpu.dma_semaphore, #tpu.memory_space<semaphore_mem>>
      %78 = tpu.memref_squeeze %77 : memref<1x!tpu.dma_semaphore, #tpu.memory_space<semaphore_mem>> -> memref<!tpu.dma_semaphore, #tpu.memory_space<semaphore_mem>>
      tpu.wait_dma2 semaphore(%78 : memref<!tpu.dma_semaphore, #tpu.memory_space<semaphore_mem>>) src(%74 : memref<496x128xbf16, #tpu.memory_space<any>>) dst(%76 : memref<496x128xbf16, #tpu.memory_space<vmem>>)
      %c1_i32_45 = arith.constant 1 : i32
      %79 = arith.addi %arg0, %c1_i32_45 : i32
      %c3_i32 = arith.constant 3 : i32
      %80 = arith.cmpi slt, %79, %c3_i32 : i32
      %81 = arith.extui %80 : i1 to i32
      %c0_i32_46 = arith.constant 0 : i32
      %82 = arith.cmpi ne, %81, %c0_i32_46 : i32
      scf.if %82 {
        %c1_i32_47 = arith.constant 1 : i32
        %83 = arith.addi %arg0, %c1_i32_47 : i32
        %c352_i32 = arith.constant 352 : i32
        %84 = arith.muli %83, %c352_i32 : i32
        %c1_i32_48 = arith.constant 1 : i32
        %85 = arith.subi %c1_i32_48, %9 : i32
        %c1_i32_49 = arith.constant 1 : i32
        %86 = arith.subi %c1_i32_49, %9 : i32
        %c0_i32_50 = arith.constant 0 : i32
        %87 = tpu.memref_slice %arg2[%84, %c0_i32_50] : memref<1200x128xbf16, #tpu.memory_space<any>> -> memref<496x128xbf16, #tpu.memory_space<any>>
        %c0_i32_51 = arith.constant 0 : i32
        %c0_i32_52 = arith.constant 0 : i32
        %88 = tpu.memref_slice %arg6[%85, %c0_i32_51, %c0_i32_52] : memref<2x496x128xbf16, #tpu.memory_space<vmem>> -> memref<1x496x128xbf16, #tpu.memory_space<vmem>>
        %89 = tpu.memref_squeeze %88 : memref<1x496x128xbf16, #tpu.memory_space<vmem>> -> memref<496x128xbf16, #tpu.memory_space<vmem>>
        %90 = tpu.memref_slice %arg7[%86] : memref<2x!tpu.dma_semaphore, #tpu.memory_space<semaphore_mem>> -> memref<1x!tpu.dma_semaphore, #tpu.memory_space<semaphore_mem>>
        %91 = tpu.memref_squeeze %90 : memref<1x!tpu.dma_semaphore, #tpu.memory_space<semaphore_mem>> -> memref<!tpu.dma_semaphore, #tpu.memory_space<semaphore_mem>>
        tpu.enqueue_dma source(%87 : memref<496x128xbf16, #tpu.memory_space<any>>) target(%89 : memref<496x128xbf16, #tpu.memory_space<vmem>>) target_semaphore(%91 : memref<!tpu.dma_semaphore, #tpu.memory_space<semaphore_mem>>)
      } else {
      }
    } else {
    }
    %cst = arith.constant 0.000000e+00 : f32
    %18 = vector.broadcast %cst : f32 to vector<352x128xf32>
    %19 = arith.index_cast %9 : i32 to index
    %c0 = arith.constant 0 : index
    %c0_8 = arith.constant 0 : index
    %20 = vector.load %arg6[%19, %c0, %c0_8] : memref<2x496x128xbf16, #tpu.memory_space<vmem>>, vector<1x352x128xbf16>
    %21 = vector.shape_cast %20 : vector<1x352x128xbf16> to vector<352x128xbf16>
    %c0_9 = arith.constant 0 : index
    %c0_10 = arith.constant 0 : index
    %c0_11 = arith.constant 0 : index
    %22 = vector.load %arg3[%c0_9, %c0_10, %c0_11] : memref<7x128x128xbf16, #tpu.memory_space<vmem>>, vector<1x128x128xbf16>
    %23 = vector.shape_cast %22 : vector<1x128x128xbf16> to vector<128x128xbf16>
    %cst_12 = arith.constant dense<0.000000e+00> : vector<352x128xf32>
    %24 = tpu.matmul %21, %23, %cst_12 {dimension_numbers = #tpu.dot_dimension_numbers<[1], [0], [0], [1], [0, 0, 1, 1], [], []>} : vector<352x128xbf16>, vector<128x128xbf16>, vector<352x128xf32> -> vector<352x128xf32>
    %25 = arith.addf %18, %24 : vector<352x128xf32>
    %26 = arith.index_cast %9 : i32 to index
    %c24 = arith.constant 24 : index
    %c0_13 = arith.constant 0 : index
    %27 = vector.load %arg6[%26, %c24, %c0_13] : memref<2x496x128xbf16, #tpu.memory_space<vmem>>, vector<1x352x128xbf16>
    %28 = vector.shape_cast %27 : vector<1x352x128xbf16> to vector<352x128xbf16>
    %c1 = arith.constant 1 : index
    %c0_14 = arith.constant 0 : index
    %c0_15 = arith.constant 0 : index
    %29 = vector.load %arg3[%c1, %c0_14, %c0_15] : memref<7x128x128xbf16, #tpu.memory_space<vmem>>, vector<1x128x128xbf16>
    %30 = vector.shape_cast %29 : vector<1x128x128xbf16> to vector<128x128xbf16>
    %cst_16 = arith.constant dense<0.000000e+00> : vector<352x128xf32>
    %31 = tpu.matmul %28, %30, %cst_16 {dimension_numbers = #tpu.dot_dimension_numbers<[1], [0], [0], [1], [0, 0, 1, 1], [], []>} : vector<352x128xbf16>, vector<128x128xbf16>, vector<352x128xf32> -> vector<352x128xf32>
    %32 = arith.addf %25, %31 : vector<352x128xf32>
    %33 = arith.index_cast %9 : i32 to index
    %c48 = arith.constant 48 : index
    %c0_17 = arith.constant 0 : index
    %34 = vector.load %arg6[%33, %c48, %c0_17] : memref<2x496x128xbf16, #tpu.memory_space<vmem>>, vector<1x352x128xbf16>
    %35 = vector.shape_cast %34 : vector<1x352x128xbf16> to vector<352x128xbf16>
    %c2 = arith.constant 2 : index
    %c0_18 = arith.constant 0 : index
    %c0_19 = arith.constant 0 : index
    %36 = vector.load %arg3[%c2, %c0_18, %c0_19] : memref<7x128x128xbf16, #tpu.memory_space<vmem>>, vector<1x128x128xbf16>
    %37 = vector.shape_cast %36 : vector<1x128x128xbf16> to vector<128x128xbf16>
    %cst_20 = arith.constant dense<0.000000e+00> : vector<352x128xf32>
    %38 = tpu.matmul %35, %37, %cst_20 {dimension_numbers = #tpu.dot_dimension_numbers<[1], [0], [0], [1], [0, 0, 1, 1], [], []>} : vector<352x128xbf16>, vector<128x128xbf16>, vector<352x128xf32> -> vector<352x128xf32>
    %39 = arith.addf %32, %38 : vector<352x128xf32>
    %40 = arith.index_cast %9 : i32 to index
    %c72 = arith.constant 72 : index
    %c0_21 = arith.constant 0 : index
    %41 = vector.load %arg6[%40, %c72, %c0_21] : memref<2x496x128xbf16, #tpu.memory_space<vmem>>, vector<1x352x128xbf16>
    %42 = vector.shape_cast %41 : vector<1x352x128xbf16> to vector<352x128xbf16>
    %c3 = arith.constant 3 : index
    %c0_22 = arith.constant 0 : index
    %c0_23 = arith.constant 0 : index
    %43 = vector.load %arg3[%c3, %c0_22, %c0_23] : memref<7x128x128xbf16, #tpu.memory_space<vmem>>, vector<1x128x128xbf16>
    %44 = vector.shape_cast %43 : vector<1x128x128xbf16> to vector<128x128xbf16>
    %cst_24 = arith.constant dense<0.000000e+00> : vector<352x128xf32>
    %45 = tpu.matmul %42, %44, %cst_24 {dimension_numbers = #tpu.dot_dimension_numbers<[1], [0], [0], [1], [0, 0, 1, 1], [], []>} : vector<352x128xbf16>, vector<128x128xbf16>, vector<352x128xf32> -> vector<352x128xf32>
    %46 = arith.addf %39, %45 : vector<352x128xf32>
    %47 = arith.index_cast %9 : i32 to index
    %c96 = arith.constant 96 : index
    %c0_25 = arith.constant 0 : index
    %48 = vector.load %arg6[%47, %c96, %c0_25] : memref<2x496x128xbf16, #tpu.memory_space<vmem>>, vector<1x352x128xbf16>
    %49 = vector.shape_cast %48 : vector<1x352x128xbf16> to vector<352x128xbf16>
    %c4 = arith.constant 4 : index
    %c0_26 = arith.constant 0 : index
    %c0_27 = arith.constant 0 : index
    %50 = vector.load %arg3[%c4, %c0_26, %c0_27] : memref<7x128x128xbf16, #tpu.memory_space<vmem>>, vector<1x128x128xbf16>
    %51 = vector.shape_cast %50 : vector<1x128x128xbf16> to vector<128x128xbf16>
    %cst_28 = arith.constant dense<0.000000e+00> : vector<352x128xf32>
    %52 = tpu.matmul %49, %51, %cst_28 {dimension_numbers = #tpu.dot_dimension_numbers<[1], [0], [0], [1], [0, 0, 1, 1], [], []>} : vector<352x128xbf16>, vector<128x128xbf16>, vector<352x128xf32> -> vector<352x128xf32>
    %53 = arith.addf %46, %52 : vector<352x128xf32>
    %54 = arith.index_cast %9 : i32 to index
    %c120 = arith.constant 120 : index
    %c0_29 = arith.constant 0 : index
    %55 = vector.load %arg6[%54, %c120, %c0_29] : memref<2x496x128xbf16, #tpu.memory_space<vmem>>, vector<1x352x128xbf16>
    %56 = vector.shape_cast %55 : vector<1x352x128xbf16> to vector<352x128xbf16>
    %c5 = arith.constant 5 : index
    %c0_30 = arith.constant 0 : index
    %c0_31 = arith.constant 0 : index
    %57 = vector.load %arg3[%c5, %c0_30, %c0_31] : memref<7x128x128xbf16, #tpu.memory_space<vmem>>, vector<1x128x128xbf16>
    %58 = vector.shape_cast %57 : vector<1x128x128xbf16> to vector<128x128xbf16>
    %cst_32 = arith.constant dense<0.000000e+00> : vector<352x128xf32>
    %59 = tpu.matmul %56, %58, %cst_32 {dimension_numbers = #tpu.dot_dimension_numbers<[1], [0], [0], [1], [0, 0, 1, 1], [], []>} : vector<352x128xbf16>, vector<128x128xbf16>, vector<352x128xf32> -> vector<352x128xf32>
    %60 = arith.addf %53, %59 : vector<352x128xf32>
    %61 = arith.index_cast %9 : i32 to index
    %c144 = arith.constant 144 : index
    %c0_33 = arith.constant 0 : index
    %62 = vector.load %arg6[%61, %c144, %c0_33] : memref<2x496x128xbf16, #tpu.memory_space<vmem>>, vector<1x352x128xbf16>
    %63 = vector.shape_cast %62 : vector<1x352x128xbf16> to vector<352x128xbf16>
    %c6 = arith.constant 6 : index
    %c0_34 = arith.constant 0 : index
    %c0_35 = arith.constant 0 : index
    %64 = vector.load %arg3[%c6, %c0_34, %c0_35] : memref<7x128x128xbf16, #tpu.memory_space<vmem>>, vector<1x128x128xbf16>
    %65 = vector.shape_cast %64 : vector<1x128x128xbf16> to vector<128x128xbf16>
    %cst_36 = arith.constant dense<0.000000e+00> : vector<352x128xf32>
    %66 = tpu.matmul %63, %65, %cst_36 {dimension_numbers = #tpu.dot_dimension_numbers<[1], [0], [0], [1], [0, 0, 1, 1], [], []>} : vector<352x128xbf16>, vector<128x128xbf16>, vector<352x128xf32> -> vector<352x128xf32>
    %67 = arith.addf %60, %66 : vector<352x128xf32>
    %c0_37 = arith.constant 0 : index
    %c0_38 = arith.constant 0 : index
    %68 = vector.load %arg4[%c0_37, %c0_38] : memref<1x128xf32, #tpu.memory_space<vmem>>, vector<1x128xf32>
    %69 = vector.broadcast %68 : vector<1x128xf32> to vector<352x128xf32>
    %70 = arith.addf %67, %69 : vector<352x128xf32>
    %71 = math.tanh %70 : vector<352x128xf32>
    %72 = arith.truncf %71 : vector<352x128xf32> to vector<352x128xbf16>
    %c0_39 = arith.constant 0 : index
    %c0_40 = arith.constant 0 : index
    %73 = vector.load %arg5[%c0_39, %c0_40] : memref<352x128xbf16, #tpu.memory_space<vmem>>, vector<352x128xbf16>
    tpu.vector_store %arg5[%c0_39, %c0_40], %72 {strides = array<i32>} : memref<352x128xbf16, #tpu.memory_space<vmem>>, vector<352x128xbf16>,
    return
  }
  func.func @transform_1(%arg0: i32, %arg1: i32) -> (i32, i32, i32) {
    %c0_i32 = arith.constant 0 : i32
    %c0_i32_0 = arith.constant 0 : i32
    %c0_i32_1 = arith.constant 0 : i32
    return %c0_i32, %c0_i32_0, %arg1 : i32, i32, i32
  }
  func.func @transform_2(%arg0: i32, %arg1: i32) -> (i32, i32) {
    %c0_i32 = arith.constant 0 : i32
    %c0_i32_0 = arith.constant 0 : i32
    return %c0_i32, %arg1 : i32, i32
  }
  func.func @transform_3(%arg0: i32, %arg1: i32) -> (i32, i32) {
    %c0_i32 = arith.constant 0 : i32
    return %arg0, %arg1 : i32, i32
  }
}

</mosaic_0001>

<bundles_post_ra>
// kernel: global_generator_forward.10
= control target key start
LH: loop header
LB: loop body
LE: loop exit
PB: predicated region body
PF: predicated region fallthrough
CT: control target
= control target key end

     0   :  { %s5590_s12 = smov 0   ;;  %s5592_s13 = smov 0   ;;  %s6789_s0 = inlined_call_operand.vmem [shape: bf16[1200,128], index: 0, kind: input, shape index: {}]   ;;  %s6790_s1 = inlined_call_operand.vmem [shape: bf16[7,128,128], index: 1, kind: input, shape index: {}]   ;;  %s6791_s2 = inlined_call_operand.vmem [shape: f32[1,128], index: 2, kind: input, shape index: {}]   ;;  %s6792_s3 = inlined_call_operand.vmem [shape: bf16[1056,128], index: 3, kind: output, shape index: {}]  }
   0x1   :  { %s5594_s14 = smov 0  }
   0x2 LB: > { %s25_s15 = sadd.s32 1, %s5564_s13  ;;  %p4121_p0 = scmp.ge.s32.totalorder %s5568_s14, 1  ;;  %s5568_s14 = sphi %s5594_s14, %s13_s14   ;;  %s5564_s13 = sphi %s5592_s13, %s6794_s13   ;;  %s5560_s12 = sphi %s5590_s12, %s6793_s12  }
   0x3   : > { %p27_p1 = scmp.ge.s32.totalorder %s25_s15, 3  ;;  %p134_p2 = scmp.lt.s32.totalorder %s5568_s14, 4 }
   0x5   : > { %s6796_s15 = smov (%p27_p1, %s25_s15), 0  ;;  %p135_p3 = pnand %p4121_p0, %p134_p2 }
   0x6   : > { %s168_s16 = smul.u32 (!%p135_p3), 44, %s5560_s12  ;;  %s179_s17 = ssub.s32 (!%p135_p3), 0, %s5560_s12 }
   0x7   : > { %138 = sbr.rel (%p135_p3) target bundleno = 603 (0x25b), region = 28  ;;  %p190_p4 = scmp.eq.s32.totalorder (!%p135_p3), %s5560_s12, 0 }
   0x8   : > { %p169_p5 = scmp.lt.s32.totalorder (!%p135_p3), %s168_s16, 131  ;;  %s4123_s18 = smin.u32 (!%p135_p3), %s5560_s12, %s179_s17 }
   0x9   : > { %p178_p6 = scmp.lt.s32.totalorder (!%p135_p3), %s5560_s12, 0  ;;  %s181_s19 = sand.u32 (!%p135_p3), 1, %s4123_s18  }
   0xa   : > { %s182_s20 = ssub.s32 (!%p135_p3), 0, %s181_s19 }
   0xc   : > { %s6798_s16 = smov (!%p169_p5, %s168_s16), 131  ;;  %s6800_s20 = smov (!%p178_p6, %s182_s20), %s181_s19  ;;  %v229_v0 = vld [vmem:[%s6789_s0] sm:$0xff] (%p190_p4)  ;;  %v231_v1 = vld [vmem:[%s6789_s0 + $0x8] sm:$0xff] (%p190_p4)  ;;  %v233_v2 = vld [vmem:[%s6789_s0 + $0x10] sm:$0xff] (%p190_p4) }
   0xd   : > { %s4122_s21 = sshll.u32 %s6798_s16, 2  ;;  %p4125_p7 = scmp.lt.s32.totalorder %s6800_s20, 0  ;;  %230 = vst [vmem:[#allocation2] sm:$0xff] (%p190_p4), %v229_v0  ;;  %232 = vst [vmem:[#allocation2 + $0x8] sm:$0xff] (%p190_p4), %v231_v1  ;;  %v235_v3 = vld [vmem:[%s6789_s0 + $0x18] sm:$0xff] (%p190_p4)  ;;  %v237_v4 = vld [vmem:[%s6789_s0 + $0x20] sm:$0xff] (%p190_p4) }
   0xe   : > { %s5618_s24 = scalar_lea.vmem %s6792_s3, %s4122_s21  ;;  %s188_s25 = sadd.s32 2, %s6800_s20  ;;  %234 = vst [vmem:[#allocation2 + $0x10] sm:$0xff] (%p190_p4), %v233_v2  ;;  %v239_v5 = vld [vmem:[%s6789_s0 + $0x28] sm:$0xff] (%p190_p4)  ;;  %236 = vst [vmem:[#allocation2 + $0x18] sm:$0xff] (%p190_p4), %v235_v3  ;;  %v241_v6 = vld [vmem:[%s6789_s0 + $0x30] sm:$0xff] (%p190_p4) }
   0xf   : > { %s6802_s25 = smov (!%p4125_p7, %s188_s25), %s6800_s20  ;;  %195 = sbr.rel (!%p190_p4) target bundleno = 30 (0x1e), region = 32  ;;  %238 = vst [vmem:[#allocation2 + $0x20] sm:$0xff] (%p190_p4), %v237_v4  ;;  %240 = vst [vmem:[#allocation2 + $0x28] sm:$0xff] (%p190_p4), %v239_v5  ;;  %v243_v7 = vld [vmem:[%s6789_s0 + $0x38] sm:$0xff] (%p190_p4)  ;;  %v245_v8 = vld [vmem:[%s6789_s0 + $0x40] sm:$0xff] (%p190_p4) }
  0x10   : > { %242 = vst [vmem:[#allocation2 + $0x30] sm:$0xff] (%p190_p4), %v241_v6  ;;  %244 = vst [vmem:[#allocation2 + $0x38] sm:$0xff] (%p190_p4), %v243_v7  ;;  %v247_v9 = vld [vmem:[%s6789_s0 + $0x48] sm:$0xff] (%p190_p4)  ;;  %v249_v10 = vld [vmem:[%s6789_s0 + $0x50] sm:$0xff] (%p190_p4) }
  0x11   : > { %246 = vst [vmem:[#allocation2 + $0x40] sm:$0xff] (%p190_p4), %v245_v8  ;;  %v251_v11 = vld [vmem:[%s6789_s0 + $0x58] sm:$0xff] (%p190_p4)  ;;  %248 = vst [vmem:[#allocation2 + $0x48] sm:$0xff] (%p190_p4), %v247_v9  ;;  %v253_v12 = vld [vmem:[%s6789_s0 + $0x60] sm:$0xff] (%p190_p4) }
  0x12   : > { %250 = vst [vmem:[#allocation2 + $0x50] sm:$0xff] (%p190_p4), %v249_v10  ;;  %252 = vst [vmem:[#allocation2 + $0x58] sm:$0xff] (%p190_p4), %v251_v11  ;;  %v255_v13 = vld [vmem:[%s6789_s0 + $0x68] sm:$0xff] (%p190_p4)  ;;  %v257_v14 = vld [vmem:[%s6789_s0 + $0x70] sm:$0xff] (%p190_p4) }
  0x13   : > { %254 = vst [vmem:[#allocation2 + $0x60] sm:$0xff] (%p190_p4), %v253_v12  ;;  %256 = vst [vmem:[#allocation2 + $0x68] sm:$0xff] (%p190_p4), %v255_v13  ;;  %v259_v15 = vld [vmem:[%s6789_s0 + $0x78] sm:$0xff] (%p190_p4)  ;;  %v261_v16 = vld [vmem:[%s6789_s0 + $0x80] sm:$0xff] (%p190_p4) }
  0x14   : > { %258 = vst [vmem:[#allocation2 + $0x70] sm:$0xff] %v257_v14  ;;  %v263_v17 = vld [vmem:[%s6789_s0 + $0x88] sm:$0xff]  ;;  %260 = vst [vmem:[#allocation2 + $0x78] sm:$0xff] %v259_v15  ;;  %v265_v18 = vld [vmem:[%s6789_s0 + $0x90] sm:$0xff] }
  0x15   : > { %262 = vst [vmem:[#allocation2 + $0x80] sm:$0xff] %v261_v16  ;;  %264 = vst [vmem:[#allocation2 + $0x88] sm:$0xff] %v263_v17  ;;  %v267_v19 = vld [vmem:[%s6789_s0 + $0x98] sm:$0xff]  ;;  %v269_v20 = vld [vmem:[%s6789_s0 + $0xa0] sm:$0xff] }
  0x16   : > { %266 = vst [vmem:[#allocation2 + $0x90] sm:$0xff] %v265_v18  ;;  %268 = vst [vmem:[#allocation2 + $0x98] sm:$0xff] %v267_v19  ;;  %v271_v21 = vld [vmem:[%s6789_s0 + $0xa8] sm:$0xff]  ;;  %v273_v22 = vld [vmem:[%s6789_s0 + $0xb0] sm:$0xff] }
  0x17   : > { %270 = vst [vmem:[#allocation2 + $0xa0] sm:$0xff] %v269_v20  ;;  %v275_v23 = vld [vmem:[%s6789_s0 + $0xb8] sm:$0xff]  ;;  %272 = vst [vmem:[#allocation2 + $0xa8] sm:$0xff] %v271_v21  ;;  %v277_v24 = vld [vmem:[%s6789_s0 + $0xc0] sm:$0xff] }
  0x18   : > { %274 = vst [vmem:[#allocation2 + $0xb0] sm:$0xff] %v273_v22  ;;  %276 = vst [vmem:[#allocation2 + $0xb8] sm:$0xff] %v275_v23  ;;  %v279_v25 = vld [vmem:[%s6789_s0 + $0xc8] sm:$0xff]  ;;  %v281_v26 = vld [vmem:[%s6789_s0 + $0xd0] sm:$0xff] }
  0x19   : > { %278 = vst [vmem:[#allocation2 + $0xc0] sm:$0xff] %v277_v24  ;;  %280 = vst [vmem:[#allocation2 + $0xc8] sm:$0xff] %v279_v25  ;;  %v283_v27 = vld [vmem:[%s6789_s0 + $0xd8] sm:$0xff]  ;;  %v285_v28 = vld [vmem:[%s6789_s0 + $0xe0] sm:$0xff] }
  0x1a   : > { %282 = vst [vmem:[#allocation2 + $0xd0] sm:$0xff] %v281_v26  ;;  %v287_v29 = vld [vmem:[%s6789_s0 + $0xe8] sm:$0xff]  ;;  %284 = vst [vmem:[#allocation2 + $0xd8] sm:$0xff] %v283_v27  ;;  %v289_v30 = vld [vmem:[%s6789_s0 + $0xf0] sm:$0xff] }
  0x1b   : > { %286 = vst [vmem:[#allocation2 + $0xe0] sm:$0xff] %v285_v28  ;;  %288 = vst [vmem:[#allocation2 + $0xe8] sm:$0xff] %v287_v29 }
  0x1c   : > { %290 = vst [vmem:[#allocation2 + $0xf0] sm:$0xff] %v289_v30 }
  0x1d   : > { %298 = vsyncadd [#allocation3], 3968 }
  0x1e PF: > { %s302_s23 = scalar_lea.sflag [#allocation3], %s6802_s25 }
  0x1f   : > { %5556 = dma.done.wait %s302_s23, 3968 }
  0x20   : > { %5557 = vsyncadd %s302_s23, 4294963328  ;;  %s307_s26 = sadd.s32 1, %s5560_s12 }
  0x21   : > { %p4127_p8 = scmp.ge.s32.totalorder %s307_s26, 3 }
  0x22   : > { %s312_s27 = smul.u32 (!%p4127_p8), 352, %s307_s26  ;;  %s313_s28 = ssub.s32 (!%p4127_p8), 1, %s6802_s25 }
  0x23   : > { %311 = sbr.rel (%p4127_p8) target bundleno = 58 (0x3a), region = 74  ;;  %s321_s8 = scalar_lea.sflag (!%p4127_p8), [#allocation3], %s313_s28 }
  0x24   : > { %s4487_s29 = smul.u32 (!%p4127_p8), 248, %s313_s28  ;;  %s314_s30 = sshra.s32 (!%p4127_p8), %s312_s27, 3 }
  0x25   : > { %s4128_s4 = sshll.u32 (!%p4127_p8), %s314_s30, 2 }
  0x26   : > { %s5723_s7 = scalar_lea.vmem (!%p4127_p8), %s6789_s0, %s4128_s4  ;;  %s5728_s12 = scalar_lea.vmem (!%p4127_p8), [#allocation2], %s4487_s29 }
  0x28   : > { %v355_v31 = vld [vmem:[%s5723_s7] sm:$0xff]  ;;  %v357_v32 = vld [vmem:[%s5723_s7 + $0x8] sm:$0xff]  ;;  %v359_v33 = vld [vmem:[%s5723_s7 + $0x10] sm:$0xff] }
  0x29   : > { %356 = vst [vmem:[%s5728_s12] sm:$0xff] %v355_v31  ;;  %358 = vst [vmem:[%s5728_s12 + $0x8] sm:$0xff] %v357_v32  ;;  %v361_v34 = vld [vmem:[%s5723_s7 + $0x18] sm:$0xff]  ;;  %v363_v35 = vld [vmem:[%s5723_s7 + $0x20] sm:$0xff] }
  0x2a   : > { %360 = vst [vmem:[%s5728_s12 + $0x10] sm:$0xff] %v359_v33  ;;  %v365_v36 = vld [vmem:[%s5723_s7 + $0x28] sm:$0xff]  ;;  %362 = vst [vmem:[%s5728_s12 + $0x18] sm:$0xff] %v361_v34  ;;  %v367_v37 = vld [vmem:[%s5723_s7 + $0x30] sm:$0xff] }
  0x2b   : > { %364 = vst [vmem:[%s5728_s12 + $0x20] sm:$0xff] %v363_v35  ;;  %366 = vst [vmem:[%s5728_s12 + $0x28] sm:$0xff] %v365_v36  ;;  %v369_v38 = vld [vmem:[%s5723_s7 + $0x38] sm:$0xff]  ;;  %v371_v39 = vld [vmem:[%s5723_s7 + $0x40] sm:$0xff] }
  0x2c   : > { %368 = vst [vmem:[%s5728_s12 + $0x30] sm:$0xff] %v367_v37  ;;  %370 = vst [vmem:[%s5728_s12 + $0x38] sm:$0xff] %v369_v38  ;;  %v373_v40 = vld [vmem:[%s5723_s7 + $0x48] sm:$0xff]  ;;  %v375_v41 = vld [vmem:[%s5723_s7 + $0x50] sm:$0xff] }
  0x2d   : > { %372 = vst [vmem:[%s5728_s12 + $0x40] sm:$0xff] %v371_v39  ;;  %v377_v42 = vld [vmem:[%s5723_s7 + $0x58] sm:$0xff]  ;;  %374 = vst [vmem:[%s5728_s12 + $0x48] sm:$0xff] %v373_v40  ;;  %v379_v43 = vld [vmem:[%s5723_s7 + $0x60] sm:$0xff] }
  0x2e   : > { %376 = vst [vmem:[%s5728_s12 + $0x50] sm:$0xff] %v375_v41  ;;  %378 = vst [vmem:[%s5728_s12 + $0x58] sm:$0xff] %v377_v42  ;;  %v381_v44 = vld [vmem:[%s5723_s7 + $0x68] sm:$0xff]  ;;  %v383_v45 = vld [vmem:[%s5723_s7 + $0x70] sm:$0xff] }
  0x2f   : > { %380 = vst [vmem:[%s5728_s12 + $0x60] sm:$0xff] %v379_v43  ;;  %382 = vst [vmem:[%s5728_s12 + $0x68] sm:$0xff] %v381_v44  ;;  %v385_v46 = vld [vmem:[%s5723_s7 + $0x78] sm:$0xff]  ;;  %v387_v47 = vld [vmem:[%s5723_s7 + $0x80] sm:$0xff] }
  0x30   : > { %384 = vst [vmem:[%s5728_s12 + $0x70] sm:$0xff] %v383_v45  ;;  %v389_v48 = vld [vmem:[%s5723_s7 + $0x88] sm:$0xff]  ;;  %386 = vst [vmem:[%s5728_s12 + $0x78] sm:$0xff] %v385_v46  ;;  %v391_v49 = vld [vmem:[%s5723_s7 + $0x90] sm:$0xff] }
  0x31   : > { %388 = vst [vmem:[%s5728_s12 + $0x80] sm:$0xff] %v387_v47  ;;  %390 = vst [vmem:[%s5728_s12 + $0x88] sm:$0xff] %v389_v48  ;;  %v393_v50 = vld [vmem:[%s5723_s7 + $0x98] sm:$0xff]  ;;  %v395_v51 = vld [vmem:[%s5723_s7 + $0xa0] sm:$0xff] }
  0x32   : > { %392 = vst [vmem:[%s5728_s12 + $0x90] sm:$0xff] %v391_v49  ;;  %394 = vst [vmem:[%s5728_s12 + $0x98] sm:$0xff] %v393_v50  ;;  %v397_v52 = vld [vmem:[%s5723_s7 + $0xa8] sm:$0xff]  ;;  %v399_v53 = vld [vmem:[%s5723_s7 + $0xb0] sm:$0xff] }
  0x33   : > { %396 = vst [vmem:[%s5728_s12 + $0xa0] sm:$0xff] %v395_v51  ;;  %v401_v54 = vld [vmem:[%s5723_s7 + $0xb8] sm:$0xff]  ;;  %398 = vst [vmem:[%s5728_s12 + $0xa8] sm:$0xff] %v397_v52  ;;  %v403_v55 = vld [vmem:[%s5723_s7 + $0xc0] sm:$0xff] }
  0x34   : > { %400 = vst [vmem:[%s5728_s12 + $0xb0] sm:$0xff] %v399_v53  ;;  %402 = vst [vmem:[%s5728_s12 + $0xb8] sm:$0xff] %v401_v54  ;;  %v405_v56 = vld [vmem:[%s5723_s7 + $0xc8] sm:$0xff]  ;;  %v407_v57 = vld [vmem:[%s5723_s7 + $0xd0] sm:$0xff] }
  0x35   : > { %404 = vst [vmem:[%s5728_s12 + $0xc0] sm:$0xff] %v403_v55  ;;  %406 = vst [vmem:[%s5728_s12 + $0xc8] sm:$0xff] %v405_v56  ;;  %v409_v58 = vld [vmem:[%s5723_s7 + $0xd8] sm:$0xff]  ;;  %v411_v59 = vld [vmem:[%s5723_s7 + $0xe0] sm:$0xff] }
  0x36   : > { %408 = vst [vmem:[%s5728_s12 + $0xd0] sm:$0xff] %v407_v57  ;;  %v413_v60 = vld [vmem:[%s5723_s7 + $0xe8] sm:$0xff]  ;;  %410 = vst [vmem:[%s5728_s12 + $0xd8] sm:$0xff] %v409_v58  ;;  %v415_v61 = vld [vmem:[%s5723_s7 + $0xf0] sm:$0xff] }
  0x37   : > { %412 = vst [vmem:[%s5728_s12 + $0xe0] sm:$0xff] %v411_v59  ;;  %414 = vst [vmem:[%s5728_s12 + $0xe8] sm:$0xff] %v413_v60 }
  0x38   : > { %416 = vst [vmem:[%s5728_s12 + $0xf0] sm:$0xff] %v415_v61 }
  0x39   : > { %424 = vsyncadd %s321_s8, 3968 }
  0x3a PF: > { %v5334_v62 = vld [vmem:[%s6790_s1 + $0x78] sm:$0xff]   ;;  %v5335_v63 = vld [vmem:[%s6790_s1 + $0x70] sm:$0xff]   ;;  %s4488_s17 = smul.u32 248, %s6802_s25  ;;  %v5336_v0 = vld [vmem:[%s6790_s1 + $0x68] sm:$0xff]  }
  0x3b   : > { %4874 = vmatprep.subr.bf16.mxu0 %v5334_v62  ;;  %5294 = vmatprep.subr.bf16.mxu1 %v5334_v62  ;;  %v5337_v1 = vld [vmem:[%s6790_s1 + $0x60] sm:$0xff]   ;;  %v5338_v10 = vld [vmem:[%s6790_s1 + $0x58] sm:$0xff]   ;;  %v5339_v13 = vld [vmem:[%s6790_s1 + $0x50] sm:$0xff]  }
  0x3c   : > { %4875 = vmatpush3.bf16.msra.mxu0 %v5334_v62  ;;  %5302 = vmatpush3.bf16.msra.mxu1 %v5334_v62  ;;  %s5804_s22 = scalar_lea.vmem [#allocation2], %s4488_s17  ;;  %v5340_v20 = vld [vmem:[%s6790_s1 + $0x48] sm:$0xff]   ;;  %v5341_v25 = vld [vmem:[%s6790_s1 + $0x40] sm:$0xff]   ;;  %v5350_v30 = vld [vmem:[%s6790_s1 + $0xb8] sm:$0xff]  }
  0x3d   : > { %4876 = vmatprep.subr.bf16.mxu0 %v5335_v63  ;;  %5295 = vmatprep.subr.bf16.mxu1 %v5335_v63  ;;  %v5351_v31 = vld [vmem:[%s6790_s1 + $0x38] sm:$0xff]   ;;  %v5352_v41 = vld [vmem:[%s6790_s1 + $0xb0] sm:$0xff]   ;;  %v5358_v49 = vld [vmem:[%s6790_s1 + $0xa8] sm:$0xff]  }
  0x3e   : > { %v5357_v47 = vld [vmem:[%s6790_s1 + $0x30] sm:$0xff]   ;;  %v5363_v55 = vld [vmem:[%s6790_s1 + $0x28] sm:$0xff]   ;;  %v5364_v57 = vld [vmem:[%s6790_s1 + $0xa0] sm:$0xff]  }
  0x3f   : > { %v5807_v2 = vld [vmem:[%s5804_s22 + $0xc] sm:$0xf]  ;;  %v5810_v3 = vld [vmem:[%s5804_s22 + $0x10] sm:$0xf]  ;;  %v5821_v7 = vld [vmem:[%s5804_s22 + $0x74] sm:$0xf] }
  0x40   : > { %4877 = vmatpush3.bf16.msra.mxu0 %v5335_v63  ;;  %5303 = vmatpush3.bf16.msra.mxu1 %v5335_v63  ;;  %v4147_v4 = vcombine.low %v5807_v2, %v5810_v3  ;;  %v5815_v5 = vld [vmem:[%s5804_s22 + $0x6c] sm:$0xf]  ;;  %v5818_v6 = vld [vmem:[%s5804_s22 + $0x70] sm:$0xf]  ;;  %v5831_v11 = vld [vmem:[%s5804_s22 + $0x78] sm:$0xf] }
  0x41   : > { %4878 = vmatprep.subr.bf16.mxu0 %v5336_v0  ;;  %5296 = vmatprep.subr.bf16.mxu1 %v5336_v0  ;;  %v4159_v8 = vcombine.low %v5815_v5, %v5818_v6  ;;  %v4191_v9 = vcombine.low %v5818_v6, %v5821_v7  ;;  %v5834_v12 = vld [vmem:[%s5804_s22 + $0x7c] sm:$0xf]  ;;  %v5840_v14 = vld [vmem:[%s5804_s22 + $0x80] sm:$0xf]  ;;  %v5843_v15 = vld [vmem:[%s5804_s22 + $0x84] sm:$0xf]  ;;  %v4160_v39 = vcombine.low %v5821_v7, %v5831_v11 }
  0x42   : > { %4890 = vmatprep.mubr.bf16.mxu0 %v4147_v4  ;;  %v4192_v16 = vcombine.low %v5831_v11, %v5834_v12  ;;  %v4193_v17 = vcombine.low %v5840_v14, %v5843_v15  ;;  %v5850_v18 = vld [vmem:[%s5804_s22 + $0x88] sm:$0xf]  ;;  %v5853_v19 = vld [vmem:[%s5804_s22 + $0x8c] sm:$0xf]  ;;  %v5861_v22 = vld [vmem:[%s5804_s22 + $0x90] sm:$0xf]  ;;  %v4161_v42 = vcombine.low %v5834_v12, %v5840_v14 }
  0x43   : > { %4914 = vmatprep.mubr.bf16.mxu1 %v4159_v8  ;;  %v4194_v21 = vcombine.low %v5850_v18, %v5853_v19  ;;  %v5864_v23 = vld [vmem:[%s5804_s22 + $0x94] sm:$0xf]  ;;  %v5875_v27 = vld [vmem:[%s5804_s22 + $0x18] sm:$0xf]  ;;  %v5881_v29 = vld [vmem:[%s5804_s22 + $0x9c] sm:$0xf]  ;;  %v4162_v53 = vcombine.low %v5843_v15, %v5850_v18  ;;  %v4163_v56 = vcombine.low %v5853_v19, %v5861_v22 }
  0x44   : > { %4879 = vmatpush3.bf16.msra.mxu0 %v5336_v0  ;;  %5304 = vmatpush3.bf16.msra.mxu1 %v5336_v0  ;;  %v4195_v24 = vcombine.low %v5861_v22, %v5864_v23  ;;  %v5872_v26 = vld [vmem:[%s5804_s22 + $0x14] sm:$0xf]  ;;  %v5878_v28 = vld [vmem:[%s5804_s22 + $0x98] sm:$0xf]  ;;  %v5890_v32 = vld [vmem:[%s5804_s22 + $0xa0] sm:$0xf] }
  0x45   : > { %4880 = vmatprep.subr.bf16.mxu0 %v5337_v1  ;;  %5297 = vmatprep.subr.bf16.mxu1 %v5337_v1  ;;  %v5893_v33 = vld [vmem:[%s5804_s22 + $0xa4] sm:$0xf]  ;;  %v4196_v34 = vcombine.low %v5878_v28, %v5881_v29  ;;  %v5898_v35 = vld [vmem:[%s5804_s22 + $0x1c] sm:$0xf]  ;;  %v5903_v37 = vld [vmem:[%s5804_s22 + $0x20] sm:$0xf]  ;;  %v4148_v38 = vcombine.low %v5872_v26, %v5875_v27  ;;  %v4165_v8 = vcombine.low %v5881_v29, %v5890_v32 }
  0x46   : > { %v4197_v36 = vcombine.low %v5890_v32, %v5893_v33  ;;  %v4149_v40 = vcombine.low %v5898_v35, %v5903_v37  ;;  %v5917_v43 = vld [vmem:[%s5804_s22 + $0xa8] sm:$0xf]  ;;  %v5920_v44 = vld [vmem:[%s5804_s22 + $0xac] sm:$0xf]  ;;  %v5923_v45 = vld [vmem:[%s5804_s22 + $0x24] sm:$0xf] }
  0x47   : > { %v5926_v46 = vld [vmem:[%s5804_s22 + $0x28] sm:$0xf]  ;;  %v4198_v48 = vcombine.low %v5917_v43, %v5920_v44  ;;  %v5937_v50 = vld [vmem:[%s5804_s22 + $0x2c] sm:$0xf]  ;;  %v5940_v51 = vld [vmem:[%s5804_s22 + $0x30] sm:$0xf] }
  0x48   : > { %4881 = vmatpush3.bf16.msra.mxu0 %v5337_v1  ;;  %5305 = vmatpush3.bf16.msra.mxu1 %v5337_v1  ;;  %v4150_v52 = vcombine.low %v5923_v45, %v5926_v46  ;;  %v4151_v54 = vcombine.low %v5937_v50, %v5940_v51  ;;  %v5957_v58 = vld [vmem:[%s5804_s22 + $0x34] sm:$0xf]  ;;  %v5960_v59 = vld [vmem:[%s5804_s22 + $0x38] sm:$0xf]  ;;  %v5365_v60 = vld [vmem:[%s6790_s1 + $0x20] sm:$0xff]   ;;  %v4164_v1 = vcombine.low %v5864_v23, %v5878_v28 }
  0x49   : > { %4882 = vmatprep.subr.bf16.mxu0 %v5338_v10  ;;  %5298 = vmatprep.subr.bf16.mxu1 %v5338_v10  ;;  %v5966_v61 = vld [vmem:[%s5804_s22 + $0x3c] sm:$0xf]  ;;  %v5969_v62 = vld [vmem:[%s5804_s22 + $0x40] sm:$0xf]  ;;  %v4152_v0 = vcombine.low %v5957_v58, %v5960_v59  ;;  %v5435_v11 = vld [vmem:[%s5804_s22 + $0xb0] sm:$0xff]  }
  0x4a   : > { %v5371_v63 = vld [vmem:[%s6790_s1 + $0x98] sm:$0xff]   ;;  %v4153_v4 = vcombine.low %v5966_v61, %v5969_v62  ;;  %v5444_v18 = vld [vmem:[%s5804_s22 + $0x30] sm:$0xff]   ;;  %v5466_v32 = vld [vmem:[%s6790_s1 + $0x160] sm:$0xff]  }
  0x4b   : > { %v5427_v6 = vld [vmem:[%s5804_s22 + $0x98] sm:$0xff]   ;;  %v5429_v7 = vld [vmem:[%s5804_s22 + $0xa0] sm:$0xff]  }
  0x4c   : > { %4883 = vmatpush3.bf16.msra.mxu0 %v5338_v10  ;;  %5306 = vmatpush3.bf16.msra.mxu1 %v5338_v10  ;;  %v5370_v10 = vld [vmem:[%s6790_s1 + $0x18] sm:$0xff]   ;;  %v5452_v19 = vld [vmem:[%s6790_s1 + $0x170] sm:$0xff]  }
  0x4d   : > { %4884 = vmatprep.subr.bf16.mxu0 %v5339_v13  ;;  %5299 = vmatprep.subr.bf16.mxu1 %v5339_v13  ;;  %v5438_v12 = vld [vmem:[%s5804_s22 + $0xb8] sm:$0xff]   ;;  %v5439_v14 = vld [vmem:[%s5804_s22 + $0x24] sm:$0xff]  }
  0x4e   : > { %v5440_v15 = vld [vmem:[%s5804_s22 + $0xc0] sm:$0xff]   ;;  %v5446_v23 = vld [vmem:[%s5804_s22 + $0x38] sm:$0xff]  }
  0x4f   : > { %v5445_v22 = vld [vmem:[%s5804_s22 + $0x3c] sm:$0xff]  }
  0x50   : > { %4885 = vmatpush3.bf16.msra.mxu0 %v5339_v13  ;;  %5307 = vmatpush3.bf16.msra.mxu1 %v5339_v13  ;;  %v5372_v13 = vld [vmem:[%s6790_s1 + $0x10] sm:$0xff]   ;;  %v5449_v28 = vld [vmem:[%s5804_s22 + $0x40] sm:$0xff]  }
  0x51   : > { %4886 = vmatprep.subr.bf16.mxu0 %v5340_v20  ;;  %5300 = vmatprep.subr.bf16.mxu1 %v5340_v20  ;;  %v5453_v29 = vld [vmem:[%s6790_s1 + $0x1b0] sm:$0xff]  }
  0x54   : > { %4887 = vmatpush3.bf16.msra.mxu0 %v5340_v20  ;;  %5308 = vmatpush3.bf16.msra.mxu1 %v5340_v20  ;;  %v5989_v20 = vld [vmem:[%s5804_s22 + $0x44] sm:$0xf] }
  0x55   : > { %4888 = vmatprep.subr.bf16.mxu0 %v5341_v25  ;;  %5301 = vmatprep.subr.bf16.mxu1 %v5341_v25 }
  0x58   : > { %4889 = vmatpush3.bf16.msra.mxu0 %v5341_v25  ;;  %5309 = vmatpush3.bf16.msra.mxu1 %v5341_v25  ;;  %v5992_v25 = vld [vmem:[%s5804_s22 + $0x48] sm:$0xf] }
  0x59   : > { %4994 = vmatprep.subr.bf16.mxu0 %v5350_v30  ;;  %4934 = vmatprep.subr.bf16.mxu1 %v5351_v31 }
  0x5b   : > { %4891 = vmatmul.mubr.bf16.vlgmr.msra.gmra.mxu0 %v4148_v38  ;;  %4915 = vmatmul.mubr.bf16.vlgmr.msra.gmra.mxu1 %v4160_v39  ;;  %v6001_v38 = vld [vmem:[%s5804_s22 + $0x50] sm:$0xf] }
  0x5c   : > { %4995 = vmatpush3.bf16.msra.mxu0 %v5350_v30  ;;  %4894 = vmatprep.mubr.bf16.mxu0 %v4149_v40  ;;  %v5373_v30 = vld [vmem:[%s6790_s1 + $0x90] sm:$0xff]   ;;  %v5380_v40 = vld [vmem:[%s6790_s1 + $0x88] sm:$0xff]  }
  0x5d   : > { %4996 = vmatprep.subr.bf16.mxu0 %v5352_v41  ;;  %4918 = vmatprep.mubr.bf16.mxu1 %v4161_v42  ;;  %v488_v39 = vld [vmem:[%s5804_s22 + $0xb0] sm:$0xf]  ;;  %v4166_v42 = vcombine.low %v5893_v33, %v5917_v43  ;;  %v5454_v43 = vld [vmem:[%s5804_s22 + $0x54] sm:$0xff]  }
  0x5e   : > { %4935 = vmatpush3.bf16.msra.mxu1 %v5351_v31  ;;  %v5998_v31 = vld [vmem:[%s5804_s22 + $0x4c] sm:$0xf] }
  0x5f   : > { %4936 = vmatprep.subr.bf16.mxu1 %v5357_v47  ;;  %v5459_v33 = vld [vmem:[%s6790_s1 + $0x1a8] sm:$0xff]  }
  0x60   : > { %4997 = vmatpush3.bf16.msra.mxu0 %v5352_v41  ;;  %v4154_v41 = vcombine.low %v5989_v20, %v5992_v25 }
  0x61   : > { %4998 = vmatprep.subr.bf16.mxu0 %v5358_v49 }
  0x62   : > { %4937 = vmatpush3.bf16.msra.mxu1 %v5357_v47  ;;  %v4155_v47 = vcombine.low %v5998_v31, %v6001_v38 }
  0x63   : > { %4895 = vmatmul.mubr.bf16.gmra.mxu0 %v4150_v52  ;;  %4919 = vmatmul.mubr.bf16.gmra.mxu1 %v4162_v53  ;;  %v5378_v52 = vld [vmem:[%s6790_s1 + $0x8] sm:$0xff]  }
  0x64   : > { %4999 = vmatpush3.bf16.msra.mxu0 %v5358_v49  ;;  %4898 = vmatprep.mubr.bf16.mxu0 %v4151_v54  ;;  %v4167_v49 = vcombine.low %v5920_v44, %v488_v39  ;;  %v6018_v53 = vld [vmem:[%s5804_s22 + $0x54] sm:$0xf]  ;;  %v6021_v54 = vld [vmem:[%s5804_s22 + $0x58] sm:$0xf]  ;;  %v6052_v39 = vld [vmem:[%s5804_s22 + $0x64] sm:$0xf] }
  0x65   : > { %4922 = vmatprep.mubr.bf16.mxu1 %v4163_v56  ;;  %4938 = vmatprep.subr.bf16.mxu1 %v5363_v55  ;;  %v5379_v56 = vld [vmem:[%s6790_s1] sm:$0xff]   ;;  %v5455_v44 = vld [vmem:[%s5804_s22 + $0x50] sm:$0xff]  }
  0x66   : > { %4939 = vmatpush3.bf16.msra.mxu1 %v5363_v55  ;;  %5000 = vmatprep.subr.bf16.mxu0 %v5364_v57  ;;  %v5384_v55 = vld [vmem:[%s6790_s1 + $0x80] sm:$0xff]  }
  0x67   : > { %4940 = vmatprep.subr.bf16.mxu1 %v5365_v60 }
  0x68   : > { %5001 = vmatpush3.bf16.msra.mxu0 %v5364_v57  ;;  %v6030_v57 = vld [vmem:[%s5804_s22 + $0x5c] sm:$0xf] }
  0x69   : > { %5002 = vmatprep.subr.bf16.mxu0 %v5371_v63 }
  0x6a   : > { %4941 = vmatpush3.bf16.msra.mxu1 %v5365_v60  ;;  %v6033_v60 = vld [vmem:[%s5804_s22 + $0x60] sm:$0xf] }
  0x6b   : > { %4899 = vmatmul.mubr.bf16.gmra.mxu0 %v4152_v0  ;;  %4923 = vmatmul.mubr.bf16.gmra.mxu1 %v4164_v1  ;;  %v4156_v0 = vcombine.low %v6018_v53, %v6021_v54  ;;  %v5377_v1 = vld [vmem:[%s5804_s22 + $0xb4] sm:$0xff]  }
  0x6c   : > { %4902 = vmatprep.mubr.bf16.mxu0 %v4153_v4  ;;  %4926 = vmatprep.mubr.bf16.mxu1 %v4165_v8  ;;  %v4157_v4 = vcombine.low %v6030_v57, %v6033_v60  ;;  %v5382_v8 = vld [vmem:[%s5804_s22] sm:$0xff]  }
  0x6d   : > { %4942 = vmatprep.subr.bf16.mxu1 %v5370_v10  ;;  %5003 = vmatpush3.bf16.msra.mxu0 %v5371_v63  ;;  %v5389_v63 = vld [vmem:[%s6790_s1 + $0x138] sm:$0xff]  }
  0x6e   : > { %4943 = vmatpush3.bf16.msra.mxu1 %v5370_v10  ;;  %5004 = vmatprep.subr.bf16.mxu0 %v5373_v30  ;;  %v5385_v10 = vld [vmem:[%s6790_s1 + $0xf8] sm:$0xff]  }
  0x6f   : > { %4944 = vmatprep.subr.bf16.mxu1 %v5372_v13 }
  0x71   : > { %5005 = vmatpush3.bf16.msra.mxu0 %v5373_v30  ;;  %v6049_v30 = vld [vmem:[%s5804_s22 + $0x68] sm:$0xf] }
  0x72   : > { %4945 = vmatpush3.bf16.msra.mxu1 %v5372_v13  ;;  %5006 = vmatprep.subr.bf16.mxu0 %v5380_v40  ;;  %v430_v13 = vld [vmem:[%s5804_s22 + $0x8] sm:$0xf] }
  0x73   : > { %4903 = vmatmul.mubr.bf16.gmra.mxu0 %v4154_v41  ;;  %4927 = vmatmul.mubr.bf16.gmra.mxu1 %v4166_v42  ;;  %v4158_v41 = vcombine.low %v6052_v39, %v6049_v30  ;;  %v4179_v42 = vcombine.low %v5810_v3, %v5872_v26  ;;  %v4181_v3 = vcombine.low %v5903_v37, %v5923_v45  ;;  %v5391_v26 = vld [vmem:[%s5804_s22 + $0x28] sm:$0xff]   ;;  %v5393_v37 = vld [vmem:[%s5804_s22 + $0x30] sm:$0xff]  }
  0x74   : > { %4906 = vmatprep.mubr.bf16.mxu0 %v4155_v47  ;;  %4930 = vmatprep.mubr.bf16.mxu1 %v4167_v49  ;;  %v5386_v47 = vld [vmem:[%s5804_s22 + $0x18] sm:$0xff]   ;;  %v4183_v45 = vcombine.low %v5940_v51, %v5957_v58  ;;  %v4184_v51 = vcombine.low %v5960_v59, %v5966_v61  ;;  %v5399_v58 = vld [vmem:[%s5804_s22 + $0x40] sm:$0xff]   ;;  %v5431_v61 = vld [vmem:[%s6790_s1 + $0x108] sm:$0xff]  }
  0x75   : > { %4946 = vmatprep.subr.bf16.mxu1 %v5378_v52  ;;  %5007 = vmatpush3.bf16.msra.mxu0 %v5380_v40  ;;  %v4178_v40 = vcombine.low %v430_v13, %v5807_v2  ;;  %v5394_v49 = vld [vmem:[%s6790_s1 + $0xf0] sm:$0xff]   ;;  %v5400_v2 = vld [vmem:[%s6790_s1 + $0xe8] sm:$0xff]   ;;  %v5436_v59 = vld [vmem:[%s6790_s1 + $0xc0] sm:$0xff]  }
  0x76   : > { %4947 = vmatpush3.bf16.msra.mxu1 %v5378_v52  ;;  %5008 = vmatprep.subr.bf16.mxu0 %v5384_v55  ;;  %v4180_v52 = vcombine.low %v5875_v27, %v5898_v35  ;;  %v5401_v27 = vld [vmem:[%s6790_s1 + $0x128] sm:$0xff]   ;;  %v4182_v35 = vcombine.low %v5926_v46, %v5937_v50  ;;  %v5420_v46 = vld [vmem:[%s6790_s1 + $0xd0] sm:$0xff]   ;;  %v5416_v50 = vld [vmem:[%s6790_s1 + $0x118] sm:$0xff]  }
  0x77   : > { %4948 = vmatprep.subr.bf16.mxu1 %v5379_v56  ;;  %v5430_v13 = vld [vmem:[%s6790_s1 + $0xc8] sm:$0xff]  }
  0x79   : > { %5009 = vmatpush3.bf16.msra.mxu0 %v5384_v55  ;;  %v5388_v55 = vld [vmem:[%s5804_s22 + $0x20] sm:$0xff]  }
  0x7a   : > { %4949 = vmatpush3.bf16.msra.mxu1 %v5379_v56  ;;  %5114 = vmatprep.subr.bf16.mxu0 %v5389_v63  ;;  %v5395_v56 = vld [vmem:[%s6790_s1 + $0x130] sm:$0xff]  }
  0x7b   : > { %4907 = vmatmul.mubr.bf16.gmra.mxu0 %v4156_v0  ;;  %4931 = vmatmul.mubr.bf16.gmra.mxu1 %v5377_v1  ;;  %v5408_v0 = vld [vmem:[%s6790_s1 + $0xe0] sm:$0xff]   ;;  %v5397_v1 = vld [vmem:[%s5804_s22 + $0x38] sm:$0xff]  }
  0x7c   : > { %4910 = vmatprep.mubr.bf16.mxu0 %v4157_v4  ;;  %4950 = vmatprep.mubr.bf16.mxu1 %v5382_v8  ;;  %v5411_v4 = vld [vmem:[%s6790_s1 + $0x120] sm:$0xff]   ;;  %v4185_v8 = vcombine.low %v5969_v62, %v5989_v20  ;;  %v4186_v62 = vcombine.low %v5992_v25, %v5998_v31  ;;  %v5405_v20 = vld [vmem:[%s5804_s22 + $0x50] sm:$0xff]   ;;  %v6135_v31 = vld [vmem:[%s6790_s1 + $0x1b8] sm:$0xff]  }
  0x7d   : > { %5054 = vmatprep.subr.bf16.mxu1 %v5385_v10  ;;  %v5437_v25 = vld [vmem:[%s6790_s1 + $0x100] sm:$0xff]  }
  0x83   : > { %4911 = vmatmul.mubr.bf16.gmra.mxu0 %v4158_v41  ;;  %4951 = vmatmul.mubr.bf16.vlgmr.msra.gmra.mxu1 %v4178_v40  ;;  %v5423_v40 = vld [vmem:[%s6790_s1 + $0x110] sm:$0xff]   ;;  %v4187_v41 = vcombine.low %v6001_v38, %v6018_v53  ;;  %v4188_v38 = vcombine.low %v6021_v54, %v6030_v57  ;;  %v5410_v53 = vld [vmem:[%s5804_s22 + $0x60] sm:$0xff]  }
  0x84   : > { %4954 = vmatprep.mubr.bf16.mxu1 %v4179_v42  ;;  %5010 = vmatprep.mubr.bf16.mxu0 %v5386_v47  ;;  %v5407_v42 = vld [vmem:[%s5804_s22 + $0x58] sm:$0xff]   ;;  %v5414_v54 = vld [vmem:[%s5804_s22 + $0x70] sm:$0xff]  }
  0x85   : > { %5055 = vmatpush3.bf16.msra.mxu1 %v5385_v10  ;;  %v5403_v10 = vld [vmem:[%s5804_s22 + $0x48] sm:$0xff]   ;;  %v6126_v47 = vld [vmem:[%s6790_s1 + $0x178] sm:$0xff]  }
  0x86   : > { %5056 = vmatprep.subr.bf16.mxu1 %v5394_v49  ;;  %v5417_v57 = vld [vmem:[%s5804_s22 + $0x78] sm:$0xff]  }
  0x89   : > { %5057 = vmatpush3.bf16.msra.mxu1 %v5394_v49  ;;  %v4189_v49 = vcombine.low %v6033_v60, %v6052_v39  ;;  %v5419_v60 = vld [vmem:[%s5804_s22 + $0x80] sm:$0xff]   ;;  %v5422_v39 = vld [vmem:[%s5804_s22 + $0x88] sm:$0xff]  }
  0x8a   : > { %5058 = vmatprep.subr.bf16.mxu1 %v5400_v2 }
  0x8b   : > { %4955 = vmatmul.mubr.bf16.gmra.mxu1 %v4180_v52  ;;  %5011 = vmatmul.mubr.bf16.vlgmr.msra.gmra.mxu0 %v5388_v55  ;;  %v4190_v52 = vcombine.low %v6049_v30, %v5815_v5  ;;  %v5425_v5 = vld [vmem:[%s5804_s22 + $0x90] sm:$0xff]   ;;  %v5469_v30 = vld [vmem:[%s6790_s1 + $0x1a0] sm:$0xff]  }
  0x8c   : > { %5115 = vmatpush3.bf16.msra.mxu0 %v5389_v63  ;;  %4958 = vmatprep.mubr.bf16.mxu1 %v4181_v3  ;;  %v5415_v63 = vld [vmem:[%s6790_s1 + $0xd8] sm:$0xff]   ;;  %v5480_v55 = vld [vmem:[%s6790_s1 + $0x150] sm:$0xff]  }
  0x8d   : > { %5014 = vmatprep.mubr.bf16.mxu0 %v5391_v26  ;;  %5116 = vmatprep.subr.bf16.mxu0 %v5395_v56  ;;  %v5475_v3 = vld [vmem:[%s6790_s1 + $0x198] sm:$0xff]  }
  0x8e   : > { %5059 = vmatpush3.bf16.msra.mxu1 %v5400_v2  ;;  %v5413_v2 = vld [vmem:[%s5804_s22 + $0x68] sm:$0xff]   ;;  %v5456_v26 = vld [vmem:[%s5804_s22 + $0x5c] sm:$0xff]  }
  0x8f   : > { %5060 = vmatprep.subr.bf16.mxu1 %v5408_v0 }
  0x90   : > { %5117 = vmatpush3.bf16.msra.mxu0 %v5395_v56  ;;  %v5457_v56 = vld [vmem:[%s5804_s22 + $0x58] sm:$0xff]  }
  0x91   : > { %5118 = vmatprep.subr.bf16.mxu0 %v5401_v27 }
  0x92   : > { %5061 = vmatpush3.bf16.msra.mxu1 %v5408_v0  ;;  %v5460_v0 = vld [vmem:[%s5804_s22 + $0x64] sm:$0xff]  }
  0x93   : > { %4959 = vmatmul.mubr.bf16.gmra.mxu1 %v4182_v35  ;;  %5015 = vmatmul.mubr.bf16.gmra.mxu0 %v5393_v37  ;;  %v5490_v35 = vld [vmem:[%s6790_s1 + $0x148] sm:$0xff]   ;;  %v5483_v37 = vld [vmem:[%s6790_s1 + $0x190] sm:$0xff]  }
  0x94   : > { %4962 = vmatprep.mubr.bf16.mxu1 %v4183_v45  ;;  %5018 = vmatprep.mubr.bf16.mxu0 %v5397_v1  ;;  %v5496_v45 = vld [vmem:[%s6790_s1 + $0x140] sm:$0xff]   ;;  %v5491_v1 = vld [vmem:[%s6790_s1 + $0x188] sm:$0xff]  }
  0x95   : > { %5119 = vmatpush3.bf16.msra.mxu0 %v5401_v27  ;;  %5062 = vmatprep.subr.bf16.mxu1 %v5415_v63  ;;  %v5461_v27 = vld [vmem:[%s5804_s22 + $0x60] sm:$0xff]  }
  0x96   : > { %5120 = vmatprep.subr.bf16.mxu0 %v5411_v4  ;;  %5063 = vmatpush3.bf16.msra.mxu1 %v5415_v63  ;;  %v5462_v63 = vld [vmem:[%s5804_s22 + $0x6c] sm:$0xff]  }
  0x97   : > { %5064 = vmatprep.subr.bf16.mxu1 %v5420_v46 }
  0x99   : > { %5121 = vmatpush3.bf16.msra.mxu0 %v5411_v4  ;;  %v5463_v4 = vld [vmem:[%s5804_s22 + $0x68] sm:$0xff]  }
  0x9a   : > { %5122 = vmatprep.subr.bf16.mxu0 %v5416_v50  ;;  %5065 = vmatpush3.bf16.msra.mxu1 %v5420_v46  ;;  %v5464_v46 = vld [vmem:[%s5804_s22 + $0x74] sm:$0xff]  }
  0x9b   : > { %4963 = vmatmul.mubr.bf16.gmra.mxu1 %v4184_v51  ;;  %5019 = vmatmul.mubr.bf16.gmra.mxu0 %v5399_v58  ;;  %v5497_v51 = vld [vmem:[%s6790_s1 + $0x180] sm:$0xff]  }
  0x9c   : > { %4966 = vmatprep.mubr.bf16.mxu1 %v4185_v8  ;;  %5022 = vmatprep.mubr.bf16.mxu0 %v5403_v10  ;;  %v5467_v58 = vld [vmem:[%s5804_s22 + $0x7c] sm:$0xff]   ;;  %v5470_v10 = vld [vmem:[%s5804_s22 + $0x84] sm:$0xff]  }
  0x9d   : > { %5123 = vmatpush3.bf16.msra.mxu0 %v5416_v50  ;;  %5066 = vmatprep.subr.bf16.mxu1 %v5430_v13  ;;  %v5465_v50 = vld [vmem:[%s5804_s22 + $0x70] sm:$0xff]   ;;  %v5468_v8 = vld [vmem:[%s5804_s22 + $0x78] sm:$0xff]  }
  0x9e   : > { %5124 = vmatprep.subr.bf16.mxu0 %v5423_v40  ;;  %5067 = vmatpush3.bf16.msra.mxu1 %v5430_v13  ;;  %v5471_v13 = vld [vmem:[%s5804_s22 + $0x80] sm:$0xff]  }
  0x9f   : > { %5068 = vmatprep.subr.bf16.mxu1 %v5436_v59 }
  0xa1   : > { %5125 = vmatpush3.bf16.msra.mxu0 %v5423_v40  ;;  %v5472_v40 = vld [vmem:[%s5804_s22 + $0x8c] sm:$0xff]  }
  0xa2   : > { %5126 = vmatprep.subr.bf16.mxu0 %v5431_v61  ;;  %5069 = vmatpush3.bf16.msra.mxu1 %v5436_v59  ;;  %v5473_v59 = vld [vmem:[%s5804_s22 + $0x88] sm:$0xff]  }
  0xa3   : > { %4967 = vmatmul.mubr.bf16.gmra.mxu1 %v4186_v62  ;;  %5023 = vmatmul.mubr.bf16.gmra.mxu0 %v5405_v20  ;;  %v5477_v62 = vld [vmem:[%s5804_s22 + $0x90] sm:$0xff]   ;;  %v5478_v20 = vld [vmem:[%s5804_s22 + $0x9c] sm:$0xff]  }
  0xa4   : > { %4970 = vmatprep.mubr.bf16.mxu1 %v4187_v41  ;;  %5026 = vmatprep.mubr.bf16.mxu0 %v5407_v42  ;;  %v5479_v41 = vld [vmem:[%s5804_s22 + $0x98] sm:$0xff]   ;;  %v5481_v42 = vld [vmem:[%s5804_s22 + $0xa4] sm:$0xff]  }
  0xa5   : > { %5127 = vmatpush3.bf16.msra.mxu0 %v5431_v61  ;;  %5174 = vmatprep.subr.bf16.mxu1 %v6126_v47  ;;  %v5476_v61 = vld [vmem:[%s5804_s22 + $0x94] sm:$0xff]  }
  0xa6   : > { %5128 = vmatprep.subr.bf16.mxu0 %v5437_v25 }
  0xa9   : > { %5129 = vmatpush3.bf16.msra.mxu0 %v5437_v25  ;;  %v5484_v25 = vld [vmem:[%s5804_s22 + $0xac] sm:$0xff]  }
  0xaa   : > { %5234 = vmatprep.subr.bf16.mxu0 %v6135_v31 }
  0xab   : > { %4971 = vmatmul.mubr.bf16.gmra.mxu1 %v4188_v38  ;;  %5027 = vmatmul.mubr.bf16.gmra.mxu0 %v5410_v53  ;;  %v5486_v38 = vld [vmem:[%s5804_s22 + $0xb4] sm:$0xff]  }
  0xac   : > { %4974 = vmatprep.mubr.bf16.mxu1 %v4189_v49  ;;  %5030 = vmatprep.mubr.bf16.mxu0 %v5413_v2  ;;  %v5487_v53 = vld [vmem:[%s5804_s22 + $0xb0] sm:$0xff]  }
  0xb3   : > { %4975 = vmatmul.mubr.bf16.gmra.mxu1 %v4190_v52  ;;  %5031 = vmatmul.mubr.bf16.gmra.mxu0 %v5414_v54 }
  0xb4   : > { %4978 = vmatprep.mubr.bf16.mxu1 %v4191_v9  ;;  %5034 = vmatprep.mubr.bf16.mxu0 %v5417_v57  ;;  %v5433_v9 = vld [vmem:[%s5804_s22 + $0xa8] sm:$0xff]  }
  0xbb   : > { %4979 = vmatmul.mubr.bf16.gmra.mxu1 %v4192_v16  ;;  %5035 = vmatmul.mubr.bf16.gmra.mxu0 %v5419_v60  ;;  %v5441_v16 = vld [vmem:[%s5804_s22 + $0x2c] sm:$0xff]  }
  0xbc   : > { %4982 = vmatprep.mubr.bf16.mxu1 %v4193_v17  ;;  %5038 = vmatprep.mubr.bf16.mxu0 %v5422_v39  ;;  %v5443_v17 = vld [vmem:[%s5804_s22 + $0x34] sm:$0xff]   ;;  %v5488_v39 = vld [vmem:[%s5804_s22 + $0xbc] sm:$0xff]  }
  0xc3   : > { %4983 = vmatmul.mubr.bf16.gmra.mxu1 %v4194_v21  ;;  %5039 = vmatmul.mubr.bf16.gmra.mxu0 %v5425_v5  ;;  %v5458_v21 = vld [vmem:[%s6790_s1 + $0x168] sm:$0xff]   ;;  %v5489_v5 = vld [vmem:[%s5804_s22 + $0xb8] sm:$0xff]  }
  0xc4   : > { %4986 = vmatprep.mubr.bf16.mxu1 %v4195_v24  ;;  %5042 = vmatprep.mubr.bf16.mxu0 %v5427_v6  ;;  %v5448_v24 = vld [vmem:[%s5804_s22 + $0x44] sm:$0xff]  }
  0xc5   : > { %v5492_v6 = vld [vmem:[%s5804_s22 + $0xc4] sm:$0xff]  }
  0xcb   : > { %4987 = vmatmul.mubr.bf16.gmra.mxu1 %v4196_v34  ;;  %5043 = vmatmul.mubr.bf16.gmra.mxu0 %v5429_v7  ;;  %v5450_v34 = vld [vmem:[%s5804_s22 + $0x4c] sm:$0xff]   ;;  %v5493_v7 = vld [vmem:[%s5804_s22 + $0xc0] sm:$0xff]  }
  0xcc   : > { %4990 = vmatprep.mubr.bf16.mxu1 %v4197_v36  ;;  %5046 = vmatprep.mubr.bf16.mxu0 %v5433_v9  ;;  %v5451_v36 = vld [vmem:[%s5804_s22 + $0x48] sm:$0xff]  }
  0xd3   : > { %4991 = vmatmul.mubr.bf16.gmra.mxu1 %v4198_v48  ;;  %5047 = vmatmul.mubr.bf16.gmra.mxu0 %v5435_v11  ;;  %v5474_v48 = vld [vmem:[%s6790_s1 + $0x158] sm:$0xff]  }
  0xd4   : > { %5050 = vmatprep.mubr.bf16.mxu0 %v5438_v12  ;;  %5070 = vmatprep.mubr.bf16.mxu1 %v5439_v14 }
  0xdb   : > { %5051 = vmatmul.mubr.bf16.gmra.mxu0 %v5440_v15  ;;  %5071 = vmatmul.mubr.bf16.vlgmr.msra.gmra.mxu1 %v5441_v16 }
  0xdc   : > { %5074 = vmatprep.mubr.bf16.mxu1 %v5443_v17  ;;  %5130 = vmatprep.mubr.bf16.mxu0 %v5444_v18 }
  0xdd   : > { %5175 = vmatpush3.bf16.msra.mxu1 %v6126_v47  ;;  %v5482_v47 = vld [vmem:[%s5804_s22 + $0xa0] sm:$0xff]  }
  0xde   : > { %5176 = vmatprep.subr.bf16.mxu1 %v5452_v19 }
  0xe1   : > { %5177 = vmatpush3.bf16.msra.mxu1 %v5452_v19  ;;  %v5494_v19 = vld [vmem:[%s5804_s22 + $0xcc] sm:$0xff]  }
  0xe2   : > { %5178 = vmatprep.subr.bf16.mxu1 %v5458_v21 }
  0xe3   : > { %5075 = vmatmul.mubr.bf16.gmra.mxu1 %v5445_v22  ;;  %5131 = vmatmul.mubr.bf16.vlgmr.msra.gmra.mxu0 %v5446_v23  ;;  %v5498_v22 = vld [vmem:[%s5804_s22 + $0xd0] sm:$0xff]   ;;  %v5499_v23 = vld [vmem:[%s5804_s22 + $0x3c] sm:$0xff]  }
  0xe4   : > { %5235 = vmatpush3.bf16.msra.mxu0 %v6135_v31  ;;  %5078 = vmatprep.mubr.bf16.mxu1 %v5448_v24  ;;  %v5485_v31 = vld [vmem:[%s5804_s22 + $0xa8] sm:$0xff]  }
  0xe5   : > { %5134 = vmatprep.mubr.bf16.mxu0 %v5449_v28  ;;  %5236 = vmatprep.subr.bf16.mxu0 %v5453_v29 }
  0xe6   : > { %5179 = vmatpush3.bf16.msra.mxu1 %v5458_v21  ;;  %v5495_v21 = vld [vmem:[%s5804_s22 + $0xc8] sm:$0xff]  }
  0xe7   : > { %5180 = vmatprep.subr.bf16.mxu1 %v5466_v32 }
  0xe8   : > { %5237 = vmatpush3.bf16.msra.mxu0 %v5453_v29 }
  0xe9   : > { %5238 = vmatprep.subr.bf16.mxu0 %v5459_v33 }
  0xea   : > { %5181 = vmatpush3.bf16.msra.mxu1 %v5466_v32 }
  0xeb   : > { %5079 = vmatmul.mubr.bf16.gmra.mxu1 %v5450_v34  ;;  %5135 = vmatmul.mubr.bf16.gmra.mxu0 %v5451_v36 }
  0xec   : > { %5082 = vmatprep.mubr.bf16.mxu1 %v5454_v43  ;;  %5138 = vmatprep.mubr.bf16.mxu0 %v5455_v44  ;;  %v5500_v44 = vld [vmem:[%s5804_s22 + $0xd8] sm:$0xff]  }
  0xed   : > { %5239 = vmatpush3.bf16.msra.mxu0 %v5459_v33  ;;  %5182 = vmatprep.subr.bf16.mxu1 %v5474_v48 }
  0xee   : > { %5240 = vmatprep.subr.bf16.mxu0 %v5469_v30  ;;  %5183 = vmatpush3.bf16.msra.mxu1 %v5474_v48  ;;  %v5501_v48 = vld [vmem:[%s5804_s22 + $0x44] sm:$0xff]  }
  0xef   : > { %5184 = vmatprep.subr.bf16.mxu1 %v5480_v55 }
  0xf1   : > { %5241 = vmatpush3.bf16.msra.mxu0 %v5469_v30  ;;  %v5502_v30 = vld [vmem:[%s5804_s22 + $0x4c] sm:$0xff]  }
  0xf2   : > { %5242 = vmatprep.subr.bf16.mxu0 %v5475_v3  ;;  %5185 = vmatpush3.bf16.msra.mxu1 %v5480_v55  ;;  %v5503_v55 = vld [vmem:[%s5804_s22 + $0x48] sm:$0xff]  }
  0xf3   : > { %5083 = vmatmul.mubr.bf16.gmra.mxu1 %v5456_v26  ;;  %5139 = vmatmul.mubr.bf16.gmra.mxu0 %v5457_v56 }
  0xf4   : > { %5086 = vmatprep.mubr.bf16.mxu1 %v5460_v0  ;;  %5142 = vmatprep.mubr.bf16.mxu0 %v5461_v27 }
  0xf5   : > { %5243 = vmatpush3.bf16.msra.mxu0 %v5475_v3  ;;  %5186 = vmatprep.subr.bf16.mxu1 %v5490_v35 }
  0xf6   : > { %5244 = vmatprep.subr.bf16.mxu0 %v5483_v37  ;;  %5187 = vmatpush3.bf16.msra.mxu1 %v5490_v35 }
  0xf7   : > { %5188 = vmatprep.subr.bf16.mxu1 %v5496_v45 }
  0xf9   : > { %5245 = vmatpush3.bf16.msra.mxu0 %v5483_v37 }
  0xfa   : > { %5246 = vmatprep.subr.bf16.mxu0 %v5491_v1  ;;  %5189 = vmatpush3.bf16.msra.mxu1 %v5496_v45 }
  0xfb   : > { %5087 = vmatmul.mubr.bf16.gmra.mxu1 %v5462_v63  ;;  %5143 = vmatmul.mubr.bf16.gmra.mxu0 %v5463_v4  ;;  %v5505_v63 = vld [vmem:[%s5804_s22 + $0x50] sm:$0xff]   ;;  %v5506_v4 = vld [vmem:[%s5804_s22 + $0x5c] sm:$0xff]  }
  0xfc   : > { %5090 = vmatprep.mubr.bf16.mxu1 %v5464_v46  ;;  %5146 = vmatprep.mubr.bf16.mxu0 %v5465_v50  ;;  %v5507_v46 = vld [vmem:[%s5804_s22 + $0x58] sm:$0xff]  }
  0xfd   : > { %5247 = vmatpush3.bf16.msra.mxu0 %v5491_v1  ;;  %v5504_v1 = vld [vmem:[%s5804_s22 + $0x54] sm:$0xff]  }
  0xfe   : > { %5248 = vmatprep.subr.bf16.mxu0 %v5497_v51 }
 0x101   : > { %5249 = vmatpush3.bf16.msra.mxu0 %v5497_v51 }
 0x103   : > { %5091 = vmatmul.mubr.bf16.gmra.mxu1 %v5467_v58  ;;  %5147 = vmatmul.mubr.bf16.gmra.mxu0 %v5468_v8 }
 0x104   : > { %5094 = vmatprep.mubr.bf16.mxu1 %v5470_v10  ;;  %5150 = vmatprep.mubr.bf16.mxu0 %v5471_v13 }
 0x10b   : > { %5095 = vmatmul.mubr.bf16.gmra.mxu1 %v5472_v40  ;;  %5151 = vmatmul.mubr.bf16.gmra.mxu0 %v5473_v59 }
 0x10c   : > { %5098 = vmatprep.mubr.bf16.mxu1 %v5476_v61  ;;  %5154 = vmatprep.mubr.bf16.mxu0 %v5477_v62  ;;  %v5508_v61 = vld [vmem:[%s5804_s22 + $0x64] sm:$0xff]  }
 0x10d   : > { %v5509_v62 = vld [vmem:[%s5804_s22 + $0x60] sm:$0xff]  }
 0x113   : > { %5099 = vmatmul.mubr.bf16.gmra.mxu1 %v5478_v20  ;;  %5155 = vmatmul.mubr.bf16.gmra.mxu0 %v5479_v41  ;;  %v5510_v20 = vld [vmem:[%s5804_s22 + $0x6c] sm:$0xff]  }
 0x114   : > { %5102 = vmatprep.mubr.bf16.mxu1 %v5481_v42  ;;  %5158 = vmatprep.mubr.bf16.mxu0 %v5482_v47  ;;  %v5511_v41 = vld [vmem:[%s5804_s22 + $0x68] sm:$0xff]  }
 0x11b   : > { %v6261_v49 = vpop.f32.mrf.mxu0  ;;  %v6263_v2 = vpop.f32.mrf.mxu1  ;;  %5103 = vmatmul.mubr.bf16.gmra.mxu1 %v5484_v25  ;;  %5159 = vmatmul.mubr.bf16.gmra.mxu0 %v5485_v31 }
 0x11c   : > { %5106 = vmatprep.mubr.bf16.mxu1 %v5486_v38  ;;  %5162 = vmatprep.mubr.bf16.mxu0 %v5487_v53 }
 0x11d   : > { %v6265_v52 = vpop.f32.mrf.mxu0  ;;  %v6267_v54 = vpop.f32.mrf.mxu1 }
 0x11f   : > { %v6269_v57 = vpop.f32.mrf.mxu0  ;;  %v6271_v60 = vpop.f32.mrf.mxu1 }
 0x121   : > { %v6277_v9 = vpop.f32.mrf.mxu0  ;;  %v6279_v11 = vpop.f32.mrf.mxu1 }
 0x123   : > { %v6281_v12 = vpop.f32.mrf.mxu0  ;;  %v6283_v14 = vpop.f32.mrf.mxu1  ;;  %5107 = vmatmul.mubr.bf16.gmra.mxu1 %v5488_v39  ;;  %5163 = vmatmul.mubr.bf16.gmra.mxu0 %v5489_v5 }
 0x124   : > { %5110 = vmatprep.mubr.bf16.mxu1 %v5492_v6  ;;  %5166 = vmatprep.mubr.bf16.mxu0 %v5493_v7 }
 0x125   : > { %v6285_v15 = vpop.f32.mrf.mxu0  ;;  %v6287_v16 = vpop.f32.mrf.mxu1 }
 0x127   : > { %v6289_v17 = vpop.f32.mrf.mxu0  ;;  %v6291_v18 = vpop.f32.mrf.mxu1 }
 0x129   : > { %v6297_v24 = vpop.f32.mrf.mxu0  ;;  %v6299_v28 = vpop.f32.mrf.mxu1 }
 0x12b   : > { %v6301_v29 = vpop.f32.mrf.mxu0  ;;  %v6303_v32 = vpop.f32.mrf.mxu1  ;;  %5111 = vmatmul.mubr.bf16.gmra.mxu1 %v5494_v19  ;;  %5167 = vmatmul.mubr.bf16.gmra.mxu0 %v5495_v21  ;;  %v5512_v19 = vld [vmem:[%s5804_s22 + $0x74] sm:$0xff]  }
 0x12c   : > { %5170 = vmatprep.mubr.bf16.mxu0 %v5498_v22  ;;  %5190 = vmatprep.mubr.bf16.mxu1 %v5499_v23  ;;  %v5513_v21 = vld [vmem:[%s5804_s22 + $0x70] sm:$0xff]   ;;  %v5514_v23 = vld [vmem:[%s5804_s22 + $0x7c] sm:$0xff]  }
 0x12d   : > { %v6305_v33 = vpop.f32.mrf.mxu0  ;;  %v6307_v34 = vpop.f32.mrf.mxu1 }
 0x12f   : > { %v6309_v36 = vpop.f32.mrf.mxu0  ;;  %v6311_v43 = vpop.f32.mrf.mxu1 }
 0x131   : > { %v6317_v3 = vpop.f32.mrf.mxu0  ;;  %v6319_v26 = vpop.f32.mrf.mxu1 }
 0x133   : > { %v6321_v56 = vpop.f32.mrf.mxu0  ;;  %v6323_v0 = vpop.f32.mrf.mxu1  ;;  %5171 = vmatmul.mubr.bf16.gmra.mxu0 %v5500_v44  ;;  %5191 = vmatmul.mubr.bf16.vlgmr.msra.gmra.mxu1 %v5501_v48  ;;  %v5515_v44 = vld [vmem:[%s5804_s22 + $0x78] sm:$0xff]  }
 0x134   : > { %5194 = vmatprep.mubr.bf16.mxu1 %v5502_v30  ;;  %5250 = vmatprep.mubr.bf16.mxu0 %v5503_v55 }
 0x135   : > { %v6325_v27 = vpop.f32.mrf.mxu0  ;;  %v6327_v35 = vpop.f32.mrf.mxu1 }
 0x137   : > { %v6329_v37 = vpop.f32.mrf.mxu0  ;;  %v6331_v45 = vpop.f32.mrf.mxu1 }
 0x139   : > { %v6337_v50 = vpop.f32.mrf.mxu0  ;;  %v6339_v51 = vpop.f32.mrf.mxu1 }
 0x13b   : > { %v6341_v58 = vpop.f32.mrf.mxu0  ;;  %v6343_v8 = vpop.f32.mrf.mxu1  ;;  %5195 = vmatmul.mubr.bf16.gmra.mxu1 %v5504_v1  ;;  %5251 = vmatmul.mubr.bf16.vlgmr.msra.gmra.mxu0 %v5505_v63 }
 0x13c   : > { %5198 = vmatprep.mubr.bf16.mxu1 %v5506_v4  ;;  %5254 = vmatprep.mubr.bf16.mxu0 %v5507_v46 }
 0x13d   : > { %v6345_v10 = vpop.f32.mrf.mxu0  ;;  %v6347_v13 = vpop.f32.mrf.mxu1 }
 0x13f   : > { %v6349_v40 = vpop.f32.mrf.mxu0  ;;  %v6351_v59 = vpop.f32.mrf.mxu1 }
 0x141   : > { %v6357_v42 = vpop.f32.mrf.mxu0  ;;  %v6359_v47 = vpop.f32.mrf.mxu1 }
 0x143   : > { %v6361_v25 = vpop.f32.mrf.mxu0  ;;  %v4952_v31 = vpop.f32.mrf.mxu1  ;;  %5199 = vmatmul.mubr.bf16.gmra.mxu1 %v5508_v61  ;;  %5255 = vmatmul.mubr.bf16.gmra.mxu0 %v5509_v62 }
 0x144   : > { %v1038_v38 = vadd.f32 %v4952_v31, %v6261_v49  ;;  %5202 = vmatprep.mubr.bf16.mxu1 %v5510_v20  ;;  %5258 = vmatprep.mubr.bf16.mxu0 %v5511_v41  ;;  %v5516_v20 = vld [vmem:[%s5804_s22 + $0x84] sm:$0xff]  }
 0x145   : > { %v6364_v53 = vpop.f32.mrf.mxu0  ;;  %v1029_v39 = vpop.f32.mrf.mxu1  ;;  %v5517_v41 = vld [vmem:[%s5804_s22 + $0x80] sm:$0xff]  }
 0x146   : > { %v1030_v5 = vadd.f32 %v1029_v39, %v6265_v52 }
 0x147   : > { %v6367_v6 = vpop.f32.mrf.mxu0  ;;  %v4953_v7 = vpop.f32.mrf.mxu1 }
 0x148   : > { %v1041_v22 = vadd.f32 %v4953_v7, %v6269_v57  ;;  %v5518_v7 = vld [vmem:[%s5804_s22 + $0x8c] sm:$0xff]  }
 0x149   : > { %v6374_v48 = vpop.f32.mrf.mxu0  ;;  %v1032_v30 = vpop.f32.mrf.mxu1 }
 0x14a   : > { %v1033_v49 = vadd.f32 %v1032_v30, %v6277_v9 }
 0x14b   : > { %v4956_v55 = vpop.f32.mrf.mxu1  ;;  %v5012_v1 = vpop.f32.mrf.mxu0  ;;  %5203 = vmatmul.mubr.bf16.gmra.mxu1 %v5512_v19  ;;  %5259 = vmatmul.mubr.bf16.gmra.mxu0 %v5513_v21 }
 0x14c   : > { %v1054_v52 = vadd.f32 %v4956_v55, %v6281_v12  ;;  %v6378_v63 = vadd.f32 %v5012_v1, %v1038_v38  ;;  %5206 = vmatprep.mubr.bf16.mxu1 %v5514_v23  ;;  %5262 = vmatprep.mubr.bf16.mxu0 %v5515_v44  ;;  %v5519_v12 = vld [vmem:[%s5804_s22 + $0x88] sm:$0xff]  }
 0x14d   : > { %v1045_v57 = vpop.f32.mrf.mxu1  ;;  %v1479_v4 = vpop.f32.mrf.mxu0 }
 0x14e   : > { %v1046_v46 = vadd.f32 %v1045_v57, %v6285_v15  ;;  %v6381_v61 = vadd.f32 %v1479_v4, %v1030_v5  ;;  %v5520_v57 = vld [vmem:[%s5804_s22 + $0x94] sm:$0xff]  }
 0x14f   : > { %v4957_v9 = vpop.f32.mrf.mxu1  ;;  %v5013_v62 = vpop.f32.mrf.mxu0  ;;  %v5521_v4 = vld [vmem:[%s5804_s22 + $0x90] sm:$0xff]  }
 0x150   : > { %v1057_v31 = vadd.f32 %v4957_v9, %v6289_v17  ;;  %v6386_v39 = vadd.f32 %v5013_v62, %v1041_v22 }
 0x151   : > { %v1048_v38 = vpop.f32.mrf.mxu1  ;;  %v1482_v19 = vpop.f32.mrf.mxu0 }
 0x152   : > { %v1049_v21 = vadd.f32 %v1048_v38, %v6297_v24  ;;  %v6391_v23 = vadd.f32 %v1482_v19, %v1033_v49 }
 0x153   : > { %v4960_v15 = vpop.f32.mrf.mxu1  ;;  %v5016_v5 = vpop.f32.mrf.mxu0  ;;  %5207 = vmatmul.mubr.bf16.gmra.mxu1 %v5516_v20  ;;  %5263 = vmatmul.mubr.bf16.gmra.mxu0 %v5517_v41  ;;  %v5522_v20 = vld [vmem:[%s5804_s22 + $0x9c] sm:$0xff]  }
 0x154   : > { %v1070_v17 = vadd.f32 %v4960_v15, %v6301_v29  ;;  %v6394_v22 = vadd.f32 %v5016_v5, %v1054_v52  ;;  %5210 = vmatprep.mubr.bf16.mxu1 %v5518_v7  ;;  %5266 = vmatprep.mubr.bf16.mxu0 %v5519_v12  ;;  %v5523_v29 = vld [vmem:[%s5804_s22 + $0x98] sm:$0xff]  }
 0x155   : > { %v1061_v44 = vpop.f32.mrf.mxu1  ;;  %v1495_v30 = vpop.f32.mrf.mxu0 }
 0x156   : > { %v1062_v24 = vadd.f32 %v1061_v44, %v6305_v33  ;;  %v6397_v55 = vadd.f32 %v1495_v30, %v1046_v46  ;;  %v5524_v44 = vld [vmem:[%s5804_s22 + $0xa4] sm:$0xff]  }
 0x157   : > { %v4961_v49 = vpop.f32.mrf.mxu1  ;;  %v5017_v1 = vpop.f32.mrf.mxu0  ;;  %v5525_v30 = vld [vmem:[%s5804_s22 + $0xa0] sm:$0xff]  }
 0x158   : > { %v1073_v9 = vadd.f32 %v4961_v49, %v6309_v36  ;;  %v6402_v62 = vadd.f32 %v5017_v1, %v1057_v31 }
 0x159   : > { %v1064_v52 = vpop.f32.mrf.mxu1  ;;  %v1498_v41 = vpop.f32.mrf.mxu0 }
 0x15a   : > { %v1065_v7 = vadd.f32 %v1064_v52, %v6317_v3  ;;  %v6407_v12 = vadd.f32 %v1498_v41, %v1049_v21 }
 0x15b   : > { %v4964_v33 = vpop.f32.mrf.mxu1  ;;  %v5020_v46 = vpop.f32.mrf.mxu0  ;;  %5211 = vmatmul.mubr.bf16.gmra.mxu1 %v5520_v57  ;;  %5267 = vmatmul.mubr.bf16.gmra.mxu0 %v5521_v4  ;;  %v5526_v57 = vld [vmem:[%s5804_s22 + $0xac] sm:$0xff]  }
 0x15c   : > { %v1086_v36 = vadd.f32 %v4964_v33, %v6321_v56  ;;  %v6410_v31 = vadd.f32 %v5020_v46, %v1070_v17  ;;  %5214 = vmatprep.mubr.bf16.mxu1 %v5522_v20  ;;  %5270 = vmatprep.mubr.bf16.mxu0 %v5523_v29  ;;  %v5527_v56 = vld [vmem:[%s5804_s22 + $0xa8] sm:$0xff]  }
 0x15d   : > { %v1077_v38 = vpop.f32.mrf.mxu1  ;;  %v1511_v19 = vpop.f32.mrf.mxu0 }
 0x15e   : > { %v1078_v3 = vadd.f32 %v1077_v38, %v6325_v27  ;;  %v6413_v15 = vadd.f32 %v1511_v19, %v1062_v24  ;;  %v5528_v38 = vld [vmem:[%s5804_s22 + $0xb4] sm:$0xff]  }
 0x15f   : > { %v4965_v21 = vpop.f32.mrf.mxu1  ;;  %v5021_v5 = vpop.f32.mrf.mxu0  ;;  %v5529_v19 = vld [vmem:[%s5804_s22 + $0xb0] sm:$0xff]  }
 0x160   : > { %v1089_v49 = vadd.f32 %v4965_v21, %v6329_v37  ;;  %v6418_v1 = vadd.f32 %v5021_v5, %v1073_v9 }
 0x161   : > { %v1080_v17 = vpop.f32.mrf.mxu1  ;;  %v1514_v4 = vpop.f32.mrf.mxu0 }
 0x162   : > { %v1081_v20 = vadd.f32 %v1080_v17, %v6337_v50  ;;  %v6423_v29 = vadd.f32 %v1514_v4, %v1065_v7 }
 0x163   : > { %v4968_v27 = vpop.f32.mrf.mxu1  ;;  %v5024_v24 = vpop.f32.mrf.mxu0  ;;  %5215 = vmatmul.mubr.bf16.gmra.mxu1 %v5524_v44  ;;  %5271 = vmatmul.mubr.bf16.gmra.mxu0 %v5525_v30  ;;  %v5530_v44 = vld [vmem:[%s5804_s22 + $0xbc] sm:$0xff]  }
 0x164   : > { %v1102_v37 = vadd.f32 %v4968_v27, %v6341_v58  ;;  %v6426_v9 = vadd.f32 %v5024_v24, %v1086_v36  ;;  %5218 = vmatprep.mubr.bf16.mxu1 %v5526_v57  ;;  %5274 = vmatprep.mubr.bf16.mxu0 %v5527_v56  ;;  %v5531_v58 = vld [vmem:[%s5804_s22 + $0xb8] sm:$0xff]  }
 0x165   : > { %v1093_v52 = vpop.f32.mrf.mxu1  ;;  %v1527_v41 = vpop.f32.mrf.mxu0 }
 0x166   : > { %v1094_v50 = vadd.f32 %v1093_v52, %v6345_v10  ;;  %v6429_v33 = vadd.f32 %v1527_v41, %v1078_v3  ;;  %v5532_v52 = vld [vmem:[%s5804_s22 + $0xc4] sm:$0xff]  }
 0x167   : > { %v4969_v7 = vpop.f32.mrf.mxu1  ;;  %v5025_v46 = vpop.f32.mrf.mxu0  ;;  %v5533_v41 = vld [vmem:[%s5804_s22 + $0xc0] sm:$0xff]  }
 0x168   : > { %v1105_v21 = vadd.f32 %v4969_v7, %v6349_v40  ;;  %v6434_v5 = vadd.f32 %v5025_v46, %v1089_v49 }
 0x169   : > { %v1096_v36 = vpop.f32.mrf.mxu1  ;;  %v1530_v30 = vpop.f32.mrf.mxu0 }
 0x16a   : > { %v1097_v57 = vadd.f32 %v1096_v36, %v6357_v42  ;;  %v6439_v56 = vadd.f32 %v1530_v30, %v1081_v20 }
 0x16b   : > { %v4972_v10 = vpop.f32.mrf.mxu1  ;;  %v5028_v3 = vpop.f32.mrf.mxu0  ;;  %5219 = vmatmul.mubr.bf16.gmra.mxu1 %v5528_v38  ;;  %5275 = vmatmul.mubr.bf16.gmra.mxu0 %v5529_v19  ;;  %v5534_v38 = vld [vmem:[%s5804_s22 + $0xcc] sm:$0xff]  }
 0x16c   : > { %v1118_v40 = vadd.f32 %v4972_v10, %v6361_v25  ;;  %v6442_v49 = vadd.f32 %v5028_v3, %v1102_v37  ;;  %5222 = vmatprep.mubr.bf16.mxu1 %v5530_v44  ;;  %5278 = vmatprep.mubr.bf16.mxu0 %v5531_v58  ;;  %v5535_v25 = vld [vmem:[%s5804_s22 + $0xc8] sm:$0xff]  }
 0x16d   : > { %v1109_v17 = vpop.f32.mrf.mxu1  ;;  %v1543_v4 = vpop.f32.mrf.mxu0 }
 0x16e   : > { %v1110_v42 = vadd.f32 %v1109_v17, %v6364_v53  ;;  %v6445_v27 = vadd.f32 %v1543_v4, %v1094_v50  ;;  %v5536_v17 = vld [vmem:[%s5804_s22 + $0xd4] sm:$0xff]   ;;  %v5538_v4 = vld [vmem:[%s5804_s22 + $0xdc] sm:$0xff]  }
 0x16f   : > { %v4973_v20 = vpop.f32.mrf.mxu1  ;;  %v5029_v24 = vpop.f32.mrf.mxu0 }
 0x170   : > { %v1121_v7 = vadd.f32 %v4973_v20, %v6367_v6  ;;  %v6450_v46 = vadd.f32 %v5029_v24, %v1105_v21  ;;  %v5539_v20 = vld [vmem:[%s5804_s22 + $0xd8] sm:$0xff]  }
 0x171   : > { %v1112_v37 = vpop.f32.mrf.mxu1  ;;  %v1546_v19 = vpop.f32.mrf.mxu0 }
 0x172   : > { %v1113_v44 = vadd.f32 %v1112_v37, %v6374_v48  ;;  %v6455_v58 = vadd.f32 %v1546_v19, %v1097_v57  ;;  %v5537_v48 = vld [vmem:[%s5804_s22 + $0xd0] sm:$0xff]  }
 0x173   : > { %v4976_v53 = vpop.f32.mrf.mxu1  ;;  %v5032_v50 = vpop.f32.mrf.mxu0  ;;  %5223 = vmatmul.mubr.bf16.gmra.mxu1 %v5532_v52  ;;  %5279 = vmatmul.mubr.bf16.gmra.mxu0 %v5533_v41 }
 0x174   : > { %v6457_v36 = vadd.f32 %v5032_v50, %v1118_v40  ;;  %5226 = vmatprep.mubr.bf16.mxu1 %v5534_v38  ;;  %5282 = vmatprep.mubr.bf16.mxu0 %v5535_v25  ;;  %v1134_v52 = vadd.f32 %v4976_v53, %v6263_v2 }
 0x175   : > { %v1125_v6 = vpop.f32.mrf.mxu1  ;;  %v1559_v21 = vpop.f32.mrf.mxu0 }
 0x176   : > { %v6459_v30 = vadd.f32 %v1559_v21, %v1110_v42  ;;  %v1126_v42 = vadd.f32 %v1125_v6, %v6267_v54  ;;  %v5540_v21 = vld [vmem:[%s5804_s22 + $0xe4] sm:$0xff]  }
 0x177   : > { %v4977_v10 = vpop.f32.mrf.mxu1  ;;  %v5033_v3 = vpop.f32.mrf.mxu0 }
 0x178   : > { %v6463_v57 = vadd.f32 %v5033_v3, %v1121_v7  ;;  %v1137_v50 = vadd.f32 %v4977_v10, %v6271_v60  ;;  %v5541_v3 = vld [vmem:[%s5804_s22 + $0xe0] sm:$0xff]  }
 0x179   : > { %v1128_v24 = vpop.f32.mrf.mxu1  ;;  %v1562_v37 = vpop.f32.mrf.mxu0 }
 0x17a   : > { %v6468_v40 = vadd.f32 %v1562_v37, %v1113_v44 }
 0x17b   : > { %v4980_v41 = vpop.f32.mrf.mxu1  ;;  %v5036_v38 = vpop.f32.mrf.mxu0  ;;  %5227 = vmatmul.mubr.bf16.gmra.mxu1 %v5536_v17  ;;  %5283 = vmatmul.mubr.bf16.gmra.mxu0 %v5537_v48  ;;  %v1129_v17 = vadd.f32 %v1128_v24, %v6279_v11  ;;  %v5542_v48 = vld [vmem:[%s5804_s22 + $0xe8] sm:$0xff]  }
 0x17c   : > { %v6471_v25 = vadd.f32 %v5036_v38, %v1134_v52  ;;  %5230 = vmatprep.mubr.bf16.mxu1 %v5538_v4  ;;  %5286 = vmatprep.mubr.bf16.mxu0 %v5539_v20  ;;  %v1150_v4 = vadd.f32 %v4980_v41, %v6283_v14  ;;  %v5543_v14 = vld [vmem:[%s5804_s22 + $0xf0] sm:$0xff]  }
 0x17d   : > { %v1141_v7 = vpop.f32.mrf.mxu1  ;;  %v1575_v19 = vpop.f32.mrf.mxu0 }
 0x17e   : > { %v6474_v2 = vadd.f32 %v1575_v19, %v1126_v42  ;;  %v1142_v10 = vadd.f32 %v1141_v7, %v6287_v16 }
 0x17f   : > { %v4981_v44 = vpop.f32.mrf.mxu1  ;;  %v5037_v53 = vpop.f32.mrf.mxu0 }
 0x180   : > { %v6479_v37 = vadd.f32 %v5037_v53, %v1137_v50  ;;  %v1153_v42 = vadd.f32 %v4981_v44, %v6291_v18 }
 0x181   : > { %v1144_v54 = vpop.f32.mrf.mxu1  ;;  %v1578_v6 = vpop.f32.mrf.mxu0 }
 0x182   : > { %v6483_v20 = vadd.f32 %v1578_v6, %v1129_v17  ;;  %v1145_v41 = vadd.f32 %v1144_v54, %v6299_v28 }
 0x183   : > { %v4984_v52 = vpop.f32.mrf.mxu1  ;;  %v5040_v60 = vpop.f32.mrf.mxu0  ;;  %5231 = vmatmul.mubr.bf16.gmra.mxu1 %v5540_v21  ;;  %5287 = vmatmul.mubr.bf16.gmra.mxu0 %v5541_v3 }
 0x184   : > { %v6486_v38 = vadd.f32 %v5040_v60, %v1150_v4  ;;  %5290 = vmatprep.mubr.bf16.mxu0 %v5542_v48  ;;  %v1166_v16 = vadd.f32 %v4984_v52, %v6303_v32 }
 0x185   : > { %v1157_v11 = vpop.f32.mrf.mxu1  ;;  %v1591_v24 = vpop.f32.mrf.mxu0 }
 0x186   : > { %v6489_v19 = vadd.f32 %v1591_v24, %v1142_v10  ;;  %v1158_v18 = vadd.f32 %v1157_v11, %v6307_v34 }
 0x187   : > { %v4985_v50 = vpop.f32.mrf.mxu1  ;;  %v5041_v53 = vpop.f32.mrf.mxu0 }
 0x188   : > { %v6493_v17 = vadd.f32 %v5041_v53, %v1153_v42  ;;  %v1169_v10 = vadd.f32 %v4985_v50, %v6311_v43 }
 0x189   : > { %v1160_v21 = vpop.f32.mrf.mxu1  ;;  %v1594_v3 = vpop.f32.mrf.mxu0 }
 0x18a   : > { %v6496_v7 = vadd.f32 %v1594_v3, %v1145_v41  ;;  %v1161_v42 = vadd.f32 %v1160_v21, %v6319_v26 }
 0x18b   : > { %v4988_v48 = vpop.f32.mrf.mxu1  ;;  %v5044_v6 = vpop.f32.mrf.mxu0  ;;  %5291 = vmatmul.mubr.bf16.gmra.mxu0 %v5543_v14 }
 0x18c   : > { %v6499_v44 = vadd.f32 %v5044_v6, %v1166_v16  ;;  %v1182_v14 = vadd.f32 %v4988_v48, %v6323_v0 }
 0x18d   : > { %v1173_v4 = vpop.f32.mrf.mxu1  ;;  %v1607_v60 = vpop.f32.mrf.mxu0 }
 0x18e   : > { %v6502_v28 = vadd.f32 %v1607_v60, %v1158_v18  ;;  %v1174_v3 = vadd.f32 %v1173_v4, %v6327_v35 }
 0x18f   : > { %v4989_v54 = vpop.f32.mrf.mxu1  ;;  %v5045_v24 = vpop.f32.mrf.mxu0 }
 0x190   : > { %v6505_v32 = vadd.f32 %v5045_v24, %v1169_v10  ;;  %v1185_v6 = vadd.f32 %v4989_v54, %v6331_v45 }
 0x191   : > { %v1176_v52 = vpop.f32.mrf.mxu1  ;;  %v1610_v53 = vpop.f32.mrf.mxu0 }
 0x192   : > { %v6508_v41 = vadd.f32 %v1610_v53, %v1161_v42  ;;  %v1177_v60 = vadd.f32 %v1176_v52, %v6339_v51 }
 0x193   : > { %v4992_v34 = vpop.f32.mrf.mxu1  ;;  %v5048_v11 = vpop.f32.mrf.mxu0 }
 0x194   : > { %v6511_v16 = vadd.f32 %v5048_v11, %v1182_v14  ;;  %v1198_v24 = vadd.f32 %v4992_v34, %v6343_v8 }
 0x195   : > { %v1189_v43 = vpop.f32.mrf.mxu1  ;;  %v1623_v50 = vpop.f32.mrf.mxu0 }
 0x196   : > { %v6514_v18 = vadd.f32 %v1623_v50, %v1174_v3  ;;  %v1190_v53 = vadd.f32 %v1189_v43, %v6347_v13 }
 0x197   : > { %v4993_v26 = vpop.f32.mrf.mxu1  ;;  %v5049_v21 = vpop.f32.mrf.mxu0 }
 0x198   : > { %v6517_v10 = vadd.f32 %v5049_v21, %v1185_v6  ;;  %v1201_v51 = vadd.f32 %v4993_v26, %v6351_v59 }
 0x199   : > { %v1192_v0 = vpop.f32.mrf.mxu1  ;;  %v1626_v48 = vpop.f32.mrf.mxu0 }
 0x19a   : > { %v6520_v42 = vadd.f32 %v1626_v48, %v1177_v60  ;;  %v1193_v34 = vadd.f32 %v1192_v0, %v6359_v47 }
 0x19b   : > { %v5052_v35 = vpop.f32.mrf.mxu0  ;;  %v5072_v4 = vpop.f32.mrf.mxu1 }
 0x19c   : > { %v6523_v14 = vadd.f32 %v5052_v35, %v1198_v24  ;;  %v2150_v45 = vadd.f32 %v5072_v4, %v6378_v63 }
 0x19d   : > { %v1639_v54 = vpop.f32.mrf.mxu0  ;;  %v1973_v11 = vpop.f32.mrf.mxu1 }
 0x19e   : > { %v6527_v52 = vadd.f32 %v1639_v54, %v1190_v53  ;;  %v2148_v3 = vadd.f32 %v1973_v11, %v6381_v61 }
 0x19f   : > { %v5053_v50 = vpop.f32.mrf.mxu0  ;;  %v5073_v8 = vpop.f32.mrf.mxu1 }
 0x1a0   : > { %v6531_v6 = vadd.f32 %v5053_v50, %v1201_v51  ;;  %v2151_v13 = vadd.f32 %v5073_v8, %v6386_v39 }
 0x1a1   : > { %v1642_v43 = vpop.f32.mrf.mxu0  ;;  %v1976_v21 = vpop.f32.mrf.mxu1 }
 0x1a2   : > { %v6534_v60 = vadd.f32 %v1642_v43, %v1193_v34  ;;  %v2149_v63 = vadd.f32 %v1976_v21, %v6391_v23 }
 0x1a3   : > { %v5076_v48 = vpop.f32.mrf.mxu1  ;;  %v5132_v59 = vpop.f32.mrf.mxu0 }
 0x1a4   : > { %v2154_v26 = vadd.f32 %v5076_v48, %v6394_v22  ;;  %v6538_v24 = vadd.f32 %v5132_v59, %v2150_v45 }
 0x1a5   : > { %v1989_v61 = vpop.f32.mrf.mxu1  ;;  %v2467_v35 = vpop.f32.mrf.mxu0 }
 0x1a6   : > { %v2152_v47 = vadd.f32 %v1989_v61, %v6397_v55  ;;  %v6541_v0 = vadd.f32 %v2467_v35, %v2148_v3 }
 0x1a7   : > { %v5077_v4 = vpop.f32.mrf.mxu1  ;;  %v5133_v39 = vpop.f32.mrf.mxu0 }
 0x1a8   : > { %v2155_v53 = vadd.f32 %v5077_v4, %v6402_v62  ;;  %v6544_v54 = vadd.f32 %v5133_v39, %v2151_v13 }
 0x1a9   : > { %v1992_v11 = vpop.f32.mrf.mxu1  ;;  %v2470_v23 = vpop.f32.mrf.mxu0 }
 0x1aa   : > { %v2153_v51 = vadd.f32 %v1992_v11, %v6407_v12  ;;  %v6547_v50 = vadd.f32 %v2470_v23, %v2149_v63 }
 0x1ab   : > { %v5080_v22 = vpop.f32.mrf.mxu1  ;;  %v5136_v45 = vpop.f32.mrf.mxu0 }
 0x1ac   : > { %v2158_v8 = vadd.f32 %v5080_v22, %v6410_v31  ;;  %v6550_v34 = vadd.f32 %v5136_v45, %v2154_v26 }
 0x1ad   : > { %v2005_v55 = vpop.f32.mrf.mxu1  ;;  %v2483_v3 = vpop.f32.mrf.mxu0 }
 0x1ae   : > { %v2156_v43 = vadd.f32 %v2005_v55, %v6413_v15  ;;  %v6553_v21 = vadd.f32 %v2483_v3, %v2152_v47 }
 0x1af   : > { %v5081_v62 = vpop.f32.mrf.mxu1  ;;  %v5137_v13 = vpop.f32.mrf.mxu0 }
 0x1b0   : > { %v2159_v48 = vadd.f32 %v5081_v62, %v6418_v1  ;;  %v6556_v59 = vadd.f32 %v5137_v13, %v2155_v53 }
 0x1b1   : > { %v2008_v12 = vpop.f32.mrf.mxu1  ;;  %v2486_v63 = vpop.f32.mrf.mxu0 }
 0x1b2   : > { %v2157_v61 = vadd.f32 %v2008_v12, %v6423_v29  ;;  %v6559_v35 = vadd.f32 %v2486_v63, %v2153_v51 }
 0x1b3   : > { %v5084_v31 = vpop.f32.mrf.mxu1  ;;  %v5140_v26 = vpop.f32.mrf.mxu0 }
 0x1b4   : > { %v2162_v4 = vadd.f32 %v5084_v31, %v6426_v9  ;;  %v6562_v39 = vadd.f32 %v5140_v26, %v2158_v8 }
 0x1b5   : > { %v2021_v15 = vpop.f32.mrf.mxu1  ;;  %v2499_v47 = vpop.f32.mrf.mxu0 }
 0x1b6   : > { %v2160_v11 = vadd.f32 %v2021_v15, %v6429_v33  ;;  %v6565_v23 = vadd.f32 %v2499_v47, %v2156_v43 }
 0x1b7   : > { %v5085_v1 = vpop.f32.mrf.mxu1  ;;  %v5141_v53 = vpop.f32.mrf.mxu0 }
 0x1b8   : > { %v2163_v22 = vadd.f32 %v5085_v1, %v6434_v5  ;;  %v6568_v45 = vadd.f32 %v5141_v53, %v2159_v48 }
 0x1b9   : > { %v2024_v29 = vpop.f32.mrf.mxu1  ;;  %v2502_v51 = vpop.f32.mrf.mxu0 }
 0x1ba   : > { %v2161_v55 = vadd.f32 %v2024_v29, %v6439_v56  ;;  %v6571_v3 = vadd.f32 %v2502_v51, %v2157_v61 }
 0x1bb   : > { %v5088_v9 = vpop.f32.mrf.mxu1  ;;  %v5144_v8 = vpop.f32.mrf.mxu0 }
 0x1bc   : > { %v2166_v62 = vadd.f32 %v5088_v9, %v6442_v49  ;;  %v6574_v13 = vadd.f32 %v5144_v8, %v2162_v4 }
 0x1bd   : > { %v2037_v33 = vpop.f32.mrf.mxu1  ;;  %v2515_v43 = vpop.f32.mrf.mxu0 }
 0x1be   : > { %v2164_v12 = vadd.f32 %v2037_v33, %v6445_v27  ;;  %v6577_v63 = vadd.f32 %v2515_v43, %v2160_v11 }
 0x1bf   : > { %v5089_v5 = vpop.f32.mrf.mxu1  ;;  %v5145_v48 = vpop.f32.mrf.mxu0 }
 0x1c0   : > { %v2167_v31 = vadd.f32 %v5089_v5, %v6450_v46  ;;  %v6580_v26 = vadd.f32 %v5145_v48, %v2163_v22 }
 0x1c1   : > { %v2040_v56 = vpop.f32.mrf.mxu1  ;;  %v2518_v61 = vpop.f32.mrf.mxu0 }
 0x1c2   : > { %v2165_v15 = vadd.f32 %v2040_v56, %v6455_v58  ;;  %v6583_v47 = vadd.f32 %v2518_v61, %v2161_v55 }
 0x1c3   : > { %v5092_v49 = vpop.f32.mrf.mxu1  ;;  %v5148_v4 = vpop.f32.mrf.mxu0 }
 0x1c4   : > { %v2170_v1 = vadd.f32 %v5092_v49, %v6457_v36  ;;  %v6586_v53 = vadd.f32 %v5148_v4, %v2166_v62 }
 0x1c5   : > { %v2053_v27 = vpop.f32.mrf.mxu1  ;;  %v2531_v11 = vpop.f32.mrf.mxu0 }
 0x1c6   : > { %v2168_v29 = vadd.f32 %v2053_v27, %v6459_v30  ;;  %v6589_v51 = vadd.f32 %v2531_v11, %v2164_v12 }
 0x1c7   : > { %v5093_v46 = vpop.f32.mrf.mxu1  ;;  %v5149_v22 = vpop.f32.mrf.mxu0 }
 0x1c8   : > { %v2171_v9 = vadd.f32 %v5093_v46, %v6463_v57  ;;  %v6592_v8 = vadd.f32 %v5149_v22, %v2167_v31 }
 0x1c9   : > { %v2056_v58 = vpop.f32.mrf.mxu1  ;;  %v2534_v55 = vpop.f32.mrf.mxu0 }
 0x1ca   : > { %v2169_v33 = vadd.f32 %v2056_v58, %v6468_v40  ;;  %v6595_v43 = vadd.f32 %v2534_v55, %v2165_v15 }
 0x1cb   : > { %v5096_v36 = vpop.f32.mrf.mxu1  ;;  %v5152_v62 = vpop.f32.mrf.mxu0 }
 0x1cc   : > { %v2174_v5 = vadd.f32 %v5096_v36, %v6471_v25  ;;  %v6598_v48 = vadd.f32 %v5152_v62, %v2170_v1 }
 0x1cd   : > { %v2069_v30 = vpop.f32.mrf.mxu1  ;;  %v2547_v12 = vpop.f32.mrf.mxu0 }
 0x1ce   : > { %v2172_v56 = vadd.f32 %v2069_v30, %v6474_v2  ;;  %v6601_v61 = vadd.f32 %v2547_v12, %v2168_v29 }
 0x1cf   : > { %v5097_v57 = vpop.f32.mrf.mxu1  ;;  %v5153_v31 = vpop.f32.mrf.mxu0 }
 0x1d0   : > { %v2175_v49 = vadd.f32 %v5097_v57, %v6479_v37  ;;  %v6604_v4 = vadd.f32 %v5153_v31, %v2171_v9 }
 0x1d1   : > { %v2072_v40 = vpop.f32.mrf.mxu1  ;;  %v2550_v15 = vpop.f32.mrf.mxu0 }
 0x1d2   : > { %v2173_v27 = vadd.f32 %v2072_v40, %v6483_v20  ;;  %v6607_v11 = vadd.f32 %v2550_v15, %v2169_v33 }
 0x1d3   : > { %v5100_v25 = vpop.f32.mrf.mxu1  ;;  %v5156_v1 = vpop.f32.mrf.mxu0 }
 0x1d4   : > { %v2178_v46 = vadd.f32 %v5100_v25, %v6486_v38  ;;  %v6610_v22 = vadd.f32 %v5156_v1, %v2174_v5 }
 0x1d5   : > { %v2085_v2 = vpop.f32.mrf.mxu1  ;;  %v2563_v29 = vpop.f32.mrf.mxu0 }
 0x1d6   : > { %v2176_v58 = vadd.f32 %v2085_v2, %v6489_v19  ;;  %v6613_v55 = vadd.f32 %v2563_v29, %v2172_v56 }
 0x1d7   : > { %v5101_v37 = vpop.f32.mrf.mxu1  ;;  %v5157_v9 = vpop.f32.mrf.mxu0 }
 0x1d8   : > { %v2179_v36 = vadd.f32 %v5101_v37, %v6493_v17  ;;  %v6616_v62 = vadd.f32 %v5157_v9, %v2175_v49 }
 0x1d9   : > { %v2088_v20 = vpop.f32.mrf.mxu1  ;;  %v2566_v33 = vpop.f32.mrf.mxu0 }
 0x1da   : > { %v2177_v30 = vadd.f32 %v2088_v20, %v6496_v7  ;;  %v6619_v12 = vadd.f32 %v2566_v33, %v2173_v27 }
 0x1db   : > { %v5104_v38 = vpop.f32.mrf.mxu1  ;;  %v5160_v5 = vpop.f32.mrf.mxu0 }
 0x1dc   : > { %v2182_v57 = vadd.f32 %v5104_v38, %v6499_v44  ;;  %v6622_v31 = vadd.f32 %v5160_v5, %v2178_v46 }
 0x1dd   : > { %v2101_v19 = vpop.f32.mrf.mxu1  ;;  %v2579_v56 = vpop.f32.mrf.mxu0 }
 0x1de   : > { %v2180_v40 = vadd.f32 %v2101_v19, %v6502_v28  ;;  %v6625_v15 = vadd.f32 %v2579_v56, %v2176_v58 }
 0x1df   : > { %v5105_v17 = vpop.f32.mrf.mxu1  ;;  %v5161_v49 = vpop.f32.mrf.mxu0 }
 0x1e0   : > { %v2183_v25 = vadd.f32 %v5105_v17, %v6505_v32  ;;  %v6628_v1 = vadd.f32 %v5161_v49, %v2179_v36 }
 0x1e1   : > { %v2104_v7 = vpop.f32.mrf.mxu1  ;;  %v2582_v27 = vpop.f32.mrf.mxu0 }
 0x1e2   : > { %v2181_v2 = vadd.f32 %v2104_v7, %v6508_v41  ;;  %v6631_v29 = vadd.f32 %v2582_v27, %v2177_v30 }
 0x1e3   : > { %v5108_v44 = vpop.f32.mrf.mxu1  ;;  %v5164_v46 = vpop.f32.mrf.mxu0 }
 0x1e4   : > { %v2186_v37 = vadd.f32 %v5108_v44, %v6511_v16  ;;  %v6634_v9 = vadd.f32 %v5164_v46, %v2182_v57 }
 0x1e5   : > { %v2117_v28 = vpop.f32.mrf.mxu1  ;;  %v2595_v58 = vpop.f32.mrf.mxu0 }
 0x1e6   : > { %v2184_v20 = vadd.f32 %v2117_v28, %v6514_v18  ;;  %v6637_v33 = vadd.f32 %v2595_v58, %v2180_v40 }
 0x1e7   : > { %v5109_v32 = vpop.f32.mrf.mxu1  ;;  %v5165_v36 = vpop.f32.mrf.mxu0 }
 0x1e8   : > { %v2187_v38 = vadd.f32 %v5109_v32, %v6517_v10  ;;  %v6640_v5 = vadd.f32 %v5165_v36, %v2183_v25 }
 0x1e9   : > { %v2120_v41 = vpop.f32.mrf.mxu1  ;;  %v2598_v30 = vpop.f32.mrf.mxu0 }
 0x1ea   : > { %v2185_v19 = vadd.f32 %v2120_v41, %v6520_v42  ;;  %v6643_v56 = vadd.f32 %v2598_v30, %v2181_v2 }
 0x1eb   : > { %v5112_v16 = vpop.f32.mrf.mxu1  ;;  %v5168_v57 = vpop.f32.mrf.mxu0 }
 0x1ec   : > { %v2190_v17 = vadd.f32 %v5112_v16, %v6523_v14  ;;  %v6646_v49 = vadd.f32 %v5168_v57, %v2186_v37 }
 0x1ed   : > { %v2133_v18 = vpop.f32.mrf.mxu1  ;;  %v2611_v40 = vpop.f32.mrf.mxu0 }
 0x1ee   : > { %v2188_v7 = vadd.f32 %v2133_v18, %v6527_v52  ;;  %v6649_v27 = vadd.f32 %v2611_v40, %v2184_v20 }
 0x1ef   : > { %v5113_v10 = vpop.f32.mrf.mxu1  ;;  %v5169_v25 = vpop.f32.mrf.mxu0 }
 0x1f0   : > { %v2191_v44 = vadd.f32 %v5113_v10, %v6531_v6  ;;  %v6652_v46 = vadd.f32 %v5169_v25, %v2187_v38 }
 0x1f1   : > { %v2136_v42 = vpop.f32.mrf.mxu1  ;;  %v2614_v2 = vpop.f32.mrf.mxu0 }
 0x1f2   : > { %v2189_v28 = vadd.f32 %v2136_v42, %v6534_v60  ;;  %v6655_v58 = vadd.f32 %v2614_v2, %v2185_v19 }
 0x1f3   : > { %v5172_v14 = vpop.f32.mrf.mxu0  ;;  %v5192_v37 = vpop.f32.mrf.mxu1 }
 0x1f4   : > { %v6657_v32 = vadd.f32 %v5172_v14, %v2190_v17  ;;  %v3138_v57 = vadd.f32 %v5192_v37, %v6538_v24 }
 0x1f5   : > { %v2627_v36 = vpop.f32.mrf.mxu0  ;;  %v2961_v52 = vpop.f32.mrf.mxu1 }
 0x1f6   : > { %v6659_v20 = vadd.f32 %v2627_v36, %v2188_v7  ;;  %v3136_v40 = vadd.f32 %v2961_v52, %v6541_v0  ;;  %v6670_v7 = vld [vmem:[%s6791_s2] ss:$0 sm:$0xff] }
 0x1f7   : > { %v5173_v41 = vpop.f32.mrf.mxu0  ;;  %v5193_v30 = vpop.f32.mrf.mxu1 }
 0x1f8   : > { %v6661_v16 = vadd.f32 %v5173_v41, %v2191_v44  ;;  %v3139_v44 = vadd.f32 %v5193_v30, %v6544_v54 }
 0x1f9   : > { %v2630_v6 = vpop.f32.mrf.mxu0  ;;  %v2964_v38 = vpop.f32.mrf.mxu1 }
 0x1fa   : > { %v6664_v18 = vadd.f32 %v2630_v6, %v2189_v28  ;;  %v3137_v24 = vadd.f32 %v2964_v38, %v6547_v50 }
 0x1fb   : > { %v5196_v60 = vpop.f32.mrf.mxu1  ;;  %v5252_v19 = vpop.f32.mrf.mxu0 }
 0x1fc   : > { %v3632_v17 = vadd.f32 %v5252_v19, %v3138_v57  ;;  %v3142_v52 = vadd.f32 %v5196_v60, %v6550_v34 }
 0x1fd   : > { %v2977_v10 = vpop.f32.mrf.mxu1  ;;  %v3455_v25 = vpop.f32.mrf.mxu0 }
 0x1fe   : > { %v3630_v42 = vadd.f32 %v3455_v25, %v3136_v40  ;;  %v3683_v28 = vadd.f32 %v6670_v7, %v3632_v17  ;;  %v3140_v38 = vadd.f32 %v2977_v10, %v6553_v21 }
 0x1ff   : > { %v5197_v2 = vpop.f32.mrf.mxu1  ;;  %v5253_v14 = vpop.f32.mrf.mxu0 }
 0x200   : > { %v3633_v37 = vadd.f32 %v5253_v14, %v3139_v44  ;;  %v3681_v41 = vadd.f32 %v6670_v7, %v3630_v42  ;;  %v3727_v30 = vmax.f32 %v3683_v28, 0.0  ;;  %v3143_v34 = vadd.f32 %v5197_v2, %v6556_v59 }
 0x201   : > { %v2980_v36 = vpop.f32.mrf.mxu1  ;;  %v3458_v0 = vpop.f32.mrf.mxu0 }
 0x202   : > { %v3684_v6 = vadd.f32 %v6670_v7, %v3633_v37  ;;  %v3631_v57 = vadd.f32 %v3458_v0, %v3137_v24  ;;  %v3725_v14 = vmax.f32 %v3681_v41, 0.0  ;;  %v3141_v28 = vadd.f32 %v2980_v36, %v6559_v35 }
 0x203   : > { %v5200_v19 = vpop.f32.mrf.mxu1  ;;  %v5256_v54 = vpop.f32.mrf.mxu0 }
 0x204   : > { %v3728_v40 = vmax.f32 %v3684_v6, 0.0  ;;  %v3682_v25 = vadd.f32 %v6670_v7, %v3631_v57  ;;  %v3636_v50 = vadd.f32 %v5256_v54, %v3142_v52  ;;  %v3146_v10 = vadd.f32 %v5200_v19, %v6562_v39 }
 0x205   : > { %v2993_v17 = vpop.f32.mrf.mxu1  ;;  %v3471_v44 = vpop.f32.mrf.mxu0 }
 0x206   : > { %v4541_v60 = vpack.c.bf16 %v3728_v40, %v3727_v30  ;;  %v3726_v42 = vmax.f32 %v3682_v25, 0.0  ;;  %v3634_v37 = vadd.f32 %v3471_v44, %v3140_v38  ;;  %v3687_v57 = vadd.f32 %v6670_v7, %v3636_v50 }
 0x207   : > { %v5201_v24 = vpop.f32.mrf.mxu1  ;;  %v5257_v0 = vpop.f32.mrf.mxu0  ;;  %v3144_v50 = vadd.f32 %v2993_v17, %v6565_v23 }
 0x208   : > { %4643 = vst [vmem:[%s5618_s24 + $0x8] sm:$0xff] %v4541_v60   ;;  %v4536_v6 = vpack.c.bf16 %v3726_v42, %v3725_v14  ;;  %v3637_v52 = vadd.f32 %v5257_v0, %v3143_v34  ;;  %v3685_v41 = vadd.f32 %v6670_v7, %v3634_v37  ;;  %v3731_v25 = vmax.f32 %v3687_v57, 0.0 }
 0x209   : > { %v2996_v54 = vpop.f32.mrf.mxu1  ;;  %v3474_v21 = vpop.f32.mrf.mxu0  ;;  %v3147_v39 = vadd.f32 %v5201_v24, %v6568_v45 }
 0x20a   : > { %4537 = vst [vmem:[%s5618_s24] sm:$0xff] %v4536_v6   ;;  %v3688_v59 = vadd.f32 %v6670_v7, %v3637_v52  ;;  %v3635_v2 = vadd.f32 %v3474_v21, %v3141_v28  ;;  %v3729_v34 = vmax.f32 %v3685_v41, 0.0  ;;  %v3145_v28 = vadd.f32 %v2996_v54, %v6571_v3 }
 0x20b   : > { %v5204_v30 = vpop.f32.mrf.mxu1  ;;  %v5260_v40 = vpop.f32.mrf.mxu0 }
 0x20c   : > { %v3732_v38 = vmax.f32 %v3688_v59, 0.0  ;;  %v3686_v35 = vadd.f32 %v6670_v7, %v3635_v2  ;;  %v3640_v36 = vadd.f32 %v5260_v40, %v3146_v10  ;;  %v3150_v17 = vadd.f32 %v5204_v30, %v6574_v13 }
 0x20d   : > { %v3009_v44 = vpop.f32.mrf.mxu1  ;;  %v3487_v14 = vpop.f32.mrf.mxu0 }
 0x20e   : > { %v4551_v19 = vpack.c.bf16 %v3732_v38, %v3731_v25  ;;  %v3730_v60 = vmax.f32 %v3686_v35, 0.0  ;;  %v3638_v42 = vadd.f32 %v3487_v14, %v3144_v50  ;;  %v3691_v57 = vadd.f32 %v6670_v7, %v3640_v36 }
 0x20f   : > { %v5205_v37 = vpop.f32.mrf.mxu1  ;;  %v5261_v0 = vpop.f32.mrf.mxu0  ;;  %v3148_v25 = vadd.f32 %v3009_v44, %v6577_v63 }
 0x210   : > { %4645 = vst [vmem:[%s5618_s24 + $0x18] sm:$0xff] %v4551_v19   ;;  %v4546_v6 = vpack.c.bf16 %v3730_v60, %v3729_v34  ;;  %v3641_v52 = vadd.f32 %v5261_v0, %v3147_v39  ;;  %v3689_v10 = vadd.f32 %v6670_v7, %v3638_v42  ;;  %v3735_v2 = vmax.f32 %v3691_v57, 0.0 }
 0x211   : > { %v3012_v21 = vpop.f32.mrf.mxu1  ;;  %v3490_v23 = vpop.f32.mrf.mxu0  ;;  %v3151_v13 = vadd.f32 %v5205_v37, %v6580_v26 }
 0x212   : > { %4644 = vst [vmem:[%s5618_s24 + $0x10] sm:$0xff] %v4546_v6   ;;  %v3692_v45 = vadd.f32 %v6670_v7, %v3641_v52  ;;  %v3639_v24 = vadd.f32 %v3490_v23, %v3145_v28  ;;  %v3733_v36 = vmax.f32 %v3689_v10, 0.0  ;;  %v3149_v19 = vadd.f32 %v3012_v21, %v6583_v47 }
 0x213   : > { %v5208_v41 = vpop.f32.mrf.mxu1  ;;  %v5264_v59 = vpop.f32.mrf.mxu0 }
 0x214   : > { %v3736_v40 = vmax.f32 %v3692_v45, 0.0  ;;  %v3690_v3 = vadd.f32 %v6670_v7, %v3639_v24  ;;  %v3644_v54 = vadd.f32 %v5264_v59, %v3150_v17  ;;  %v3154_v44 = vadd.f32 %v5208_v41, %v6586_v53 }
 0x215   : > { %v3025_v38 = vpop.f32.mrf.mxu1  ;;  %v3503_v35 = vpop.f32.mrf.mxu0 }
 0x216   : > { %v4561_v30 = vpack.c.bf16 %v3736_v40, %v3735_v2  ;;  %v3734_v50 = vmax.f32 %v3690_v3, 0.0  ;;  %v3642_v14 = vadd.f32 %v3503_v35, %v3148_v25  ;;  %v3695_v42 = vadd.f32 %v6670_v7, %v3644_v54 }
 0x217   : > { %v5209_v34 = vpop.f32.mrf.mxu1  ;;  %v5265_v39 = vpop.f32.mrf.mxu0  ;;  %v3152_v10 = vadd.f32 %v3025_v38, %v6589_v51 }
 0x218   : > { %4647 = vst [vmem:[%s5618_s24 + $0x28] sm:$0xff] %v4561_v30   ;;  %v4556_v60 = vpack.c.bf16 %v3734_v50, %v3733_v36  ;;  %v3645_v0 = vadd.f32 %v5265_v39, %v3151_v13  ;;  %v3693_v6 = vadd.f32 %v6670_v7, %v3642_v14  ;;  %v3739_v23 = vmax.f32 %v3695_v42, 0.0 }
 0x219   : > { %v3028_v28 = vpop.f32.mrf.mxu1  ;;  %v3506_v63 = vpop.f32.mrf.mxu0  ;;  %v3155_v53 = vadd.f32 %v5209_v34, %v6592_v8 }
 0x21a   : > { %4646 = vst [vmem:[%s5618_s24 + $0x20] sm:$0xff] %v4556_v60   ;;  %v3696_v26 = vadd.f32 %v6670_v7, %v3645_v0  ;;  %v3643_v37 = vadd.f32 %v3506_v63, %v3149_v19  ;;  %v3737_v59 = vmax.f32 %v3693_v6, 0.0  ;;  %v3153_v25 = vadd.f32 %v3028_v28, %v6595_v43 }
 0x21b   : > { %v5212_v57 = vpop.f32.mrf.mxu1  ;;  %v5268_v52 = vpop.f32.mrf.mxu0 }
 0x21c   : > { %v3740_v17 = vmax.f32 %v3696_v26, 0.0  ;;  %v3694_v47 = vadd.f32 %v6670_v7, %v3643_v37  ;;  %v3648_v21 = vadd.f32 %v5268_v52, %v3154_v44  ;;  %v3158_v38 = vadd.f32 %v5212_v57, %v6598_v48 }
 0x21d   : > { %v3041_v45 = vpop.f32.mrf.mxu1  ;;  %v3519_v24 = vpop.f32.mrf.mxu0 }
 0x21e   : > { %v4571_v41 = vpack.c.bf16 %v3740_v17, %v3739_v23  ;;  %v3738_v2 = vmax.f32 %v3694_v47, 0.0  ;;  %v3646_v40 = vadd.f32 %v3519_v24, %v3152_v10  ;;  %v3699_v36 = vadd.f32 %v6670_v7, %v3648_v21 }
 0x21f   : > { %v5213_v3 = vpop.f32.mrf.mxu1  ;;  %v5269_v54 = vpop.f32.mrf.mxu0  ;;  %v3156_v0 = vadd.f32 %v3041_v45, %v6601_v61 }
 0x220   : > { %4649 = vst [vmem:[%s5618_s24 + $0x38] sm:$0xff] %v4571_v41   ;;  %v4566_v35 = vpack.c.bf16 %v3738_v2, %v3737_v59  ;;  %v3649_v13 = vadd.f32 %v5269_v54, %v3155_v53  ;;  %v3697_v50 = vadd.f32 %v6670_v7, %v3646_v40  ;;  %v3743_v19 = vmax.f32 %v3699_v36, 0.0 }
 0x221   : > { %v3044_v30 = vpop.f32.mrf.mxu1  ;;  %v3522_v51 = vpop.f32.mrf.mxu0  ;;  %v3159_v48 = vadd.f32 %v5213_v3, %v6604_v4 }
 0x222   : > { %4648 = vst [vmem:[%s5618_s24 + $0x30] sm:$0xff] %v4566_v35   ;;  %v3700_v8 = vadd.f32 %v6670_v7, %v3649_v13  ;;  %v3647_v14 = vadd.f32 %v3522_v51, %v3153_v25  ;;  %v3741_v44 = vmax.f32 %v3697_v50, 0.0  ;;  %v3157_v23 = vadd.f32 %v3044_v30, %v6607_v11 }
 0x223   : > { %v5216_v34 = vpop.f32.mrf.mxu1  ;;  %v5272_v39 = vpop.f32.mrf.mxu0 }
 0x224   : > { %v3744_v60 = vmax.f32 %v3700_v8, 0.0  ;;  %v3698_v43 = vadd.f32 %v6670_v7, %v3647_v14  ;;  %v3652_v42 = vadd.f32 %v5272_v39, %v3158_v38  ;;  %v3162_v45 = vadd.f32 %v5216_v34, %v6610_v22 }
 0x225   : > { %v3057_v28 = vpop.f32.mrf.mxu1  ;;  %v3535_v63 = vpop.f32.mrf.mxu0 }
 0x226   : > { %v4581_v6 = vpack.c.bf16 %v3744_v60, %v3743_v19  ;;  %v3742_v26 = vmax.f32 %v3698_v43, 0.0  ;;  %v3650_v37 = vadd.f32 %v3535_v63, %v3156_v0  ;;  %v3703_v47 = vadd.f32 %v6670_v7, %v3652_v42 }
 0x227   : > { %v5217_v57 = vpop.f32.mrf.mxu1  ;;  %v5273_v52 = vpop.f32.mrf.mxu0  ;;  %v3160_v54 = vadd.f32 %v3057_v28, %v6613_v55 }
 0x228   : > { %4651 = vst [vmem:[%s5618_s24 + $0x48] sm:$0xff] %v4581_v6   ;;  %v4576_v17 = vpack.c.bf16 %v3742_v26, %v3741_v44  ;;  %v3653_v21 = vadd.f32 %v5273_v52, %v3159_v48  ;;  %v3701_v24 = vadd.f32 %v6670_v7, %v3650_v37  ;;  %v3747_v2 = vmax.f32 %v3703_v47, 0.0 }
 0x229   : > { %v3060_v10 = vpop.f32.mrf.mxu1  ;;  %v3538_v61 = vpop.f32.mrf.mxu0  ;;  %v3163_v22 = vadd.f32 %v5217_v57, %v6616_v62 }
 0x22a   : > { %4650 = vst [vmem:[%s5618_s24 + $0x40] sm:$0xff] %v4576_v17   ;;  %v3704_v4 = vadd.f32 %v6670_v7, %v3653_v21  ;;  %v3651_v59 = vadd.f32 %v3538_v61, %v3157_v23  ;;  %v3745_v36 = vmax.f32 %v3701_v24, 0.0  ;;  %v3161_v8 = vadd.f32 %v3060_v10, %v6619_v12 }
 0x22b   : > { %v5220_v53 = vpop.f32.mrf.mxu1  ;;  %v5276_v41 = vpop.f32.mrf.mxu0 }
 0x22c   : > { %v3748_v40 = vmax.f32 %v3704_v4, 0.0  ;;  %v3702_v11 = vadd.f32 %v6670_v7, %v3651_v59  ;;  %v3656_v3 = vadd.f32 %v5276_v41, %v3162_v45  ;;  %v3166_v60 = vadd.f32 %v5220_v53, %v6622_v31 }
 0x22d   : > { %v3073_v25 = vpop.f32.mrf.mxu1  ;;  %v3551_v35 = vpop.f32.mrf.mxu0 }
 0x22e   : > { %v4591_v13 = vpack.c.bf16 %v3748_v40, %v3747_v2  ;;  %v3746_v30 = vmax.f32 %v3702_v11, 0.0  ;;  %v3654_v51 = vadd.f32 %v3551_v35, %v3160_v54  ;;  %v3707_v34 = vadd.f32 %v6670_v7, %v3656_v3 }
 0x22f   : > { %v5221_v38 = vpop.f32.mrf.mxu1  ;;  %v5277_v50 = vpop.f32.mrf.mxu0  ;;  %v3164_v6 = vadd.f32 %v3073_v25, %v6625_v15 }
 0x230   : > { %4653 = vst [vmem:[%s5618_s24 + $0x58] sm:$0xff] %v4591_v13   ;;  %v4586_v14 = vpack.c.bf16 %v3746_v30, %v3745_v36  ;;  %v3657_v39 = vadd.f32 %v5277_v50, %v3163_v22  ;;  %v3705_v43 = vadd.f32 %v6670_v7, %v3654_v51  ;;  %v3751_v63 = vmax.f32 %v3707_v34, 0.0 }
 0x231   : > { %v3076_v19 = vpop.f32.mrf.mxu1  ;;  %v3554_v55 = vpop.f32.mrf.mxu0  ;;  %v3167_v31 = vadd.f32 %v5221_v38, %v6628_v1 }
 0x232   : > { %4652 = vst [vmem:[%s5618_s24 + $0x50] sm:$0xff] %v4586_v14   ;;  %v3708_v62 = vadd.f32 %v6670_v7, %v3657_v39  ;;  %v3655_v42 = vadd.f32 %v3554_v55, %v3161_v8  ;;  %v3749_v57 = vmax.f32 %v3705_v43, 0.0  ;;  %v3165_v10 = vadd.f32 %v3076_v19, %v6631_v29 }
 0x233   : > { %v5224_v0 = vpop.f32.mrf.mxu1  ;;  %v5280_v28 = vpop.f32.mrf.mxu0 }
 0x234   : > { %v3752_v44 = vmax.f32 %v3708_v62, 0.0  ;;  %v3706_v12 = vadd.f32 %v6670_v7, %v3655_v42  ;;  %v3660_v48 = vadd.f32 %v5280_v28, %v3166_v60  ;;  %v3170_v59 = vadd.f32 %v5224_v0, %v6634_v9 }
 0x235   : > { %v3089_v26 = vpop.f32.mrf.mxu1  ;;  %v3567_v37 = vpop.f32.mrf.mxu0 }
 0x236   : > { %v4601_v52 = vpack.c.bf16 %v3752_v44, %v3751_v63  ;;  %v3750_v23 = vmax.f32 %v3706_v12, 0.0  ;;  %v3658_v17 = vadd.f32 %v3567_v37, %v3164_v6  ;;  %v3711_v45 = vadd.f32 %v6670_v7, %v3660_v48 }
 0x237   : > { %v5225_v47 = vpop.f32.mrf.mxu1  ;;  %v5281_v21 = vpop.f32.mrf.mxu0  ;;  %v3168_v25 = vadd.f32 %v3089_v26, %v6637_v33 }
 0x238   : > { %4655 = vst [vmem:[%s5618_s24 + $0x68] sm:$0xff] %v4601_v52   ;;  %v4596_v61 = vpack.c.bf16 %v3750_v23, %v3749_v57  ;;  %v3661_v24 = vadd.f32 %v5281_v21, %v3167_v31  ;;  %v3709_v53 = vadd.f32 %v6670_v7, %v3658_v17  ;;  %v3755_v11 = vmax.f32 %v3711_v45, 0.0 }
 0x239   : > { %v3092_v4 = vpop.f32.mrf.mxu1  ;;  %v3570_v15 = vpop.f32.mrf.mxu0  ;;  %v3171_v9 = vadd.f32 %v5225_v47, %v6640_v5 }
 0x23a   : > { %4654 = vst [vmem:[%s5618_s24 + $0x60] sm:$0xff] %v4596_v61   ;;  %v3712_v1 = vadd.f32 %v6670_v7, %v3661_v24  ;;  %v3659_v41 = vadd.f32 %v3570_v15, %v3165_v10  ;;  %v3753_v22 = vmax.f32 %v3709_v53, 0.0  ;;  %v3169_v8 = vadd.f32 %v3092_v4, %v6643_v56 }
 0x23b   : > { %v5228_v2 = vpop.f32.mrf.mxu1  ;;  %v5284_v40 = vpop.f32.mrf.mxu0 }
 0x23c   : > { %v3756_v3 = vmax.f32 %v3712_v1, 0.0  ;;  %v3710_v29 = vadd.f32 %v6670_v7, %v3659_v41  ;;  %v3664_v54 = vadd.f32 %v5284_v40, %v3170_v59  ;;  %v3174_v55 = vadd.f32 %v5228_v2, %v6646_v49 }
 0x23d   : > { %v3105_v35 = vpop.f32.mrf.mxu1  ;;  %v3583_v36 = vpop.f32.mrf.mxu0 }
 0x23e   : > { %v4611_v13 = vpack.c.bf16 %v3756_v3, %v3755_v11  ;;  %v3754_v30 = vmax.f32 %v3710_v29, 0.0  ;;  %v3662_v51 = vadd.f32 %v3583_v36, %v3168_v25  ;;  %v3715_v34 = vadd.f32 %v6670_v7, %v3664_v54 }
 0x23f   : > { %v5229_v38 = vpop.f32.mrf.mxu1  ;;  %v5285_v50 = vpop.f32.mrf.mxu0  ;;  %v3172_v44 = vadd.f32 %v3105_v35, %v6649_v27 }
 0x240   : > { %4657 = vst [vmem:[%s5618_s24 + $0x78] sm:$0xff] %v4611_v13   ;;  %v4606_v14 = vpack.c.bf16 %v3754_v30, %v3753_v22  ;;  %v3665_v39 = vadd.f32 %v5285_v50, %v3171_v9  ;;  %v3713_v60 = vadd.f32 %v6670_v7, %v3662_v51  ;;  %v3759_v0 = vmax.f32 %v3715_v34, 0.0 }
 0x241   : > { %v3108_v19 = vpop.f32.mrf.mxu1  ;;  %v3586_v33 = vpop.f32.mrf.mxu0  ;;  %v3175_v49 = vadd.f32 %v5229_v38, %v6652_v46 }
 0x242   : > { %4656 = vst [vmem:[%s5618_s24 + $0x70] sm:$0xff] %v4606_v14   ;;  %v3716_v5 = vadd.f32 %v6670_v7, %v3665_v39  ;;  %v3663_v43 = vadd.f32 %v3586_v33, %v3169_v8  ;;  %v3757_v6 = vmax.f32 %v3713_v60, 0.0  ;;  %v3173_v52 = vadd.f32 %v3108_v19, %v6655_v58 }
 0x243   : > { %v5232_v62 = vpop.f32.mrf.mxu1  ;;  %v5288_v42 = vpop.f32.mrf.mxu0 }
 0x244   : > { %v3760_v28 = vmax.f32 %v3716_v5, 0.0  ;;  %v3714_v56 = vadd.f32 %v6670_v7, %v3663_v43  ;;  %v3668_v63 = vadd.f32 %v5288_v42, %v3174_v55  ;;  %v3178_v27 = vadd.f32 %v5232_v62, %v6657_v32 }
 0x245   : > { %v3121_v12 = vpop.f32.mrf.mxu1  ;;  %v3599_v48 = vpop.f32.mrf.mxu0 }
 0x246   : > { %v4621_v26 = vpack.c.bf16 %v3760_v28, %v3759_v0  ;;  %v3758_v37 = vmax.f32 %v3714_v56, 0.0  ;;  %v3666_v57 = vadd.f32 %v3599_v48, %v3172_v44  ;;  %v3719_v17 = vadd.f32 %v6670_v7, %v3668_v63 }
 0x247   : > { %v5289_v31 = vpop.f32.mrf.mxu0  ;;  %v5233_v21 = vpop.f32.mrf.mxu1  ;;  %v3176_v24 = vadd.f32 %v3121_v12, %v6659_v20 }
 0x248   : > { %4659 = vst [vmem:[%s5618_s24 + $0x88] sm:$0xff] %v4621_v26   ;;  %v4616_v23 = vpack.c.bf16 %v3758_v37, %v3757_v6  ;;  %v3669_v47 = vadd.f32 %v5289_v31, %v3175_v49  ;;  %v3717_v61 = vadd.f32 %v6670_v7, %v3666_v57  ;;  %v3763_v15 = vmax.f32 %v3719_v17, 0.0 }
 0x249   : > { %v3602_v10 = vpop.f32.mrf.mxu0  ;;  %v3179_v1 = vadd.f32 %v5233_v21, %v6661_v16  ;;  %v3124_v41 = vpop.f32.mrf.mxu1 }
 0x24a   : > { %4658 = vst [vmem:[%s5618_s24 + $0x80] sm:$0xff] %v4616_v23   ;;  %v3720_v46 = vadd.f32 %v6670_v7, %v3669_v47  ;;  %v3667_v45 = vadd.f32 %v3602_v10, %v3173_v52  ;;  %v3761_v32 = vmax.f32 %v3717_v61, 0.0  ;;  %v3177_v20 = vadd.f32 %v3124_v41, %v6664_v18 }
 0x24b   : > { %v5292_v4 = vpop.f32.mrf.mxu0 }
 0x24c   : > { %v3764_v58 = vmax.f32 %v3720_v46, 0.0  ;;  %v3718_v59 = vadd.f32 %v6670_v7, %v3667_v45  ;;  %v3672_v53 = vadd.f32 %v5292_v4, %v3178_v27 }
 0x24d   : > { %v3615_v2 = vpop.f32.mrf.mxu0 }
 0x24e   : > { %v4631_v40 = vpack.c.bf16 %v3764_v58, %v3763_v15  ;;  %v3762_v11 = vmax.f32 %v3718_v59, 0.0  ;;  %v3670_v3 = vadd.f32 %v3615_v2, %v3176_v24  ;;  %v3723_v25 = vadd.f32 %v6670_v7, %v3672_v53 }
 0x24f   : > { %v5293_v29 = vpop.f32.mrf.mxu0 }
 0x250   : > { %4661 = vst [vmem:[%s5618_s24 + $0x98] sm:$0xff] %v4631_v40   ;;  %v4626_v54 = vpack.c.bf16 %v3762_v11, %v3761_v32  ;;  %v3673_v35 = vadd.f32 %v5293_v29, %v3179_v1  ;;  %v3721_v16 = vadd.f32 %v6670_v7, %v3670_v3  ;;  %v3767_v13 = vmax.f32 %v3723_v25, 0.0 }
 0x251   : > { %v3618_v36 = vpop.f32.mrf.mxu0 }
 0x252   : > { %4660 = vst [vmem:[%s5618_s24 + $0x90] sm:$0xff] %v4626_v54   ;;  %v3724_v22 = vadd.f32 %v6670_v7, %v3673_v35  ;;  %v3671_v9 = vadd.f32 %v3618_v36, %v3177_v20  ;;  %v3765_v38 = vmax.f32 %v3721_v16, 0.0 }
 0x254   : > { %v3768_v30 = vmax.f32 %v3724_v22, 0.0  ;;  %v3722_v51 = vadd.f32 %v6670_v7, %v3671_v9 }
 0x256   : > { %v4641_v50 = vpack.c.bf16 %v3768_v30, %v3767_v13  ;;  %v3766_v8 = vmax.f32 %v3722_v51, 0.0 }
 0x258   : > { %4663 = vst [vmem:[%s5618_s24 + $0xa8] sm:$0xff] %v4641_v50   ;;  %v4636_v18 = vpack.c.bf16 %v3766_v8, %v3765_v38 }
 0x25a   : > { %4662 = vst [vmem:[%s5618_s24 + $0xa0] sm:$0xff] %v4636_v18  }
 0x25b PF: > { %s13_s14 = sadd.s32 1, %s5568_s14   ;;  %s6793_s12 = smov %s5564_s13 }
 0x25c   : > { %p10_p9 = scmp.ge.s32.totalorder %s13_s14, 5   ;;  %s6794_s13 = smov %s6796_s15 }
 0x25e   :  { %12 = sbr.rel (!%p10_p9) target bundleno = 2 (0x2), region = 169 }
 0x263   :  { %4017 = vsyncmov [#allocation3] }
 0x266   :  { %s4018_s17 = vpop.sfrf %4017 }
 0x267   :  { %p4484_p10 = scmp.ne.s32.totalorder %s4018_s17, 0 }
 0x269   :  { %4022 = shalt.err (%p4484_p10)  }
 0x26a   :  { %4024 = vsyncmov [#allocation3 + $0x1] }
 0x26d   :  { %s4025_s18 = vpop.sfrf %4024 }
 0x26e   :  { %p4485_p11 = scmp.ne.s32.totalorder %s4025_s18, 0 }
 0x270   :  { %4029 = shalt.err (%p4485_p11)  }

// kernel: global_generator_forward.11
= control target key start
LH: loop header
LB: loop body
LE: loop exit
PB: predicated region body
PF: predicated region fallthrough
CT: control target
= control target key end

     0   :  { %s1812_s0 = inlined_call_operand.vmem [shape: bf16[304,128], index: 0, kind: input, shape index: {}]   ;;  %s1813_s1 = inlined_call_operand.vmem [shape: bf16[2,128,128], index: 1, kind: input, shape index: {}]   ;;  %s1814_s2 = inlined_call_operand.vmem [shape: f32[1,128], index: 2, kind: input, shape index: {}]   ;;  %s1815_s3 = inlined_call_operand.vmem [shape: bf16[288,128], index: 3, kind: output, shape index: {}]  }
   0x1   :  { %v60_v0 = vld [vmem:[%s1812_s0] sm:$0xff]  ;;  %v62_v1 = vld [vmem:[%s1812_s0 + $0x8] sm:$0xff]  ;;  %v64_v2 = vld [vmem:[%s1812_s0 + $0x10] sm:$0xff] }
   0x2   :  { %61 = vst [vmem:[#allocation2] sm:$0xff] %v60_v0  ;;  %63 = vst [vmem:[#allocation2 + $0x8] sm:$0xff] %v62_v1  ;;  %v66_v3 = vld [vmem:[%s1812_s0 + $0x18] sm:$0xff]  ;;  %v68_v4 = vld [vmem:[%s1812_s0 + $0x20] sm:$0xff] }
   0x3   :  { %65 = vst [vmem:[#allocation2 + $0x10] sm:$0xff] %v64_v2  ;;  %v70_v5 = vld [vmem:[%s1812_s0 + $0x28] sm:$0xff]  ;;  %67 = vst [vmem:[#allocation2 + $0x18] sm:$0xff] %v66_v3  ;;  %v72_v6 = vld [vmem:[%s1812_s0 + $0x30] sm:$0xff] }
   0x4   :  { %69 = vst [vmem:[#allocation2 + $0x20] sm:$0xff] %v68_v4  ;;  %71 = vst [vmem:[#allocation2 + $0x28] sm:$0xff] %v70_v5  ;;  %v74_v7 = vld [vmem:[%s1812_s0 + $0x38] sm:$0xff]  ;;  %v76_v8 = vld [vmem:[%s1812_s0 + $0x40] sm:$0xff] }
   0x5   :  { %73 = vst [vmem:[#allocation2 + $0x30] sm:$0xff] %v72_v6  ;;  %75 = vst [vmem:[#allocation2 + $0x38] sm:$0xff] %v74_v7  ;;  %v78_v9 = vld [vmem:[%s1812_s0 + $0x48] sm:$0xff]  ;;  %v80_v10 = vld [vmem:[%s1812_s0 + $0x50] sm:$0xff] }
   0x6   :  { %77 = vst [vmem:[#allocation2 + $0x40] sm:$0xff] %v76_v8  ;;  %v82_v11 = vld [vmem:[%s1812_s0 + $0x58] sm:$0xff]  ;;  %79 = vst [vmem:[#allocation2 + $0x48] sm:$0xff] %v78_v9  ;;  %v84_v12 = vld [vmem:[%s1812_s0 + $0x60] sm:$0xff] }
   0x7   :  { %81 = vst [vmem:[#allocation2 + $0x50] sm:$0xff] %v80_v10  ;;  %83 = vst [vmem:[#allocation2 + $0x58] sm:$0xff] %v82_v11  ;;  %v86_v13 = vld [vmem:[%s1812_s0 + $0x68] sm:$0xff]  ;;  %v88_v14 = vld [vmem:[%s1812_s0 + $0x70] sm:$0xff] }
   0x8   :  { %85 = vst [vmem:[#allocation2 + $0x60] sm:$0xff] %v84_v12  ;;  %87 = vst [vmem:[#allocation2 + $0x68] sm:$0xff] %v86_v13  ;;  %v90_v15 = vld [vmem:[%s1812_s0 + $0x78] sm:$0xff]  ;;  %v92_v16 = vld [vmem:[%s1812_s0 + $0x80] sm:$0xff] }
   0x9   :  { %89 = vst [vmem:[#allocation2 + $0x70] sm:$0xff] %v88_v14  ;;  %v94_v17 = vld [vmem:[%s1812_s0 + $0x88] sm:$0xff]  ;;  %91 = vst [vmem:[#allocation2 + $0x78] sm:$0xff] %v90_v15  ;;  %v96_v18 = vld [vmem:[%s1812_s0 + $0x90] sm:$0xff] }
   0xa   :  { %93 = vst [vmem:[#allocation2 + $0x80] sm:$0xff] %v92_v16  ;;  %95 = vst [vmem:[#allocation2 + $0x88] sm:$0xff] %v94_v17 }
   0xb   :  { %97 = vst [vmem:[#allocation2 + $0x90] sm:$0xff] %v96_v18 }
   0xc   :  { %105 = vsyncadd [#allocation3], 2432 }
   0xd   :  { %1590 = dma.done.wait [#allocation3], 2432 }
   0xe   :  { %1591 = vsyncadd [#allocation3], 4294964864  ;;  %v1555_v19 = vld [vmem:[%s1813_s1 + $0x78] sm:$0xff]   ;;  %v1557_v21 = vld [vmem:[%s1813_s1 + $0x70] sm:$0xff]  }
   0xf   :  { %v1556_v20 = vld [vmem:[%s1813_s1 + $0x38] sm:$0xff]   ;;  %1451 = vmatprep.subr.bf16.mxu0 %v1555_v19  ;;  %v1558_v22 = vld [vmem:[%s1813_s1 + $0x30] sm:$0xff]   ;;  %v1559_v23 = vld [vmem:[%s1813_s1 + $0x68] sm:$0xff]  }
  0x10   :  { %1503 = vmatprep.subr.bf16.mxu1 %v1556_v20  ;;  %1452 = vmatpush3.bf16.msra.mxu0 %v1555_v19  ;;  %v1560_v24 = vld [vmem:[%s1813_s1 + $0x28] sm:$0xff]   ;;  %v1561_v25 = vld [vmem:[%s1813_s1 + $0x60] sm:$0xff]   ;;  %v1563_v27 = vld [vmem:[%s1813_s1 + $0x58] sm:$0xff]  }
  0x11   :  { %1504 = vmatpush3.bf16.msra.mxu1 %v1556_v20  ;;  %1453 = vmatprep.subr.bf16.mxu0 %v1557_v21  ;;  %v1562_v26 = vld [vmem:[%s1813_s1 + $0x20] sm:$0xff]   ;;  %v1564_v28 = vld [vmem:[%s1813_s1 + $0x18] sm:$0xff]   ;;  %v1565_v29 = vld [vmem:[%s1813_s1 + $0x50] sm:$0xff]  }
  0x12   :  { %1505 = vmatprep.subr.bf16.mxu1 %v1558_v22  ;;  %v1566_v30 = vld [vmem:[%s1813_s1 + $0x10] sm:$0xff]   ;;  %v1571_v31 = vld [vmem:[#allocation2 + $0x8] sm:$0xff]   ;;  %v1572_v32 = vld [vmem:[#allocation2] sm:$0xff]  }
  0x13   :  { %1467 = vmatprep.mubr.bf16.mxu0 %v1571_v31  ;;  %1519 = vmatprep.mubr.bf16.mxu1 %v1572_v32  ;;  %v1567_v33 = vld [vmem:[%s1813_s1 + $0x48] sm:$0xff]   ;;  %v1569_v35 = vld [vmem:[%s1813_s1 + $0x40] sm:$0xff]   ;;  %v1573_v37 = vld [vmem:[#allocation2 + $0x10] sm:$0xff]  }
  0x14   :  { %1454 = vmatpush3.bf16.msra.mxu0 %v1557_v21  ;;  %v1568_v34 = vld [vmem:[%s1813_s1 + $0x8] sm:$0xff]   ;;  %v1570_v36 = vld [vmem:[%s1813_s1] sm:$0xff]   ;;  %v1574_v38 = vld [vmem:[#allocation2 + $0x18] sm:$0xff]  }
  0x15   :  { %1506 = vmatpush3.bf16.msra.mxu1 %v1558_v22  ;;  %1455 = vmatprep.subr.bf16.mxu0 %v1559_v23  ;;  %v1575_v39 = vld [vmem:[#allocation2 + $0x20] sm:$0xff]   ;;  %v1576_v40 = vld [vmem:[#allocation2 + $0x28] sm:$0xff]   ;;  %v1577_v41 = vld [vmem:[#allocation2 + $0x30] sm:$0xff]  }
  0x16   :  { %1507 = vmatprep.subr.bf16.mxu1 %v1560_v24  ;;  %v1578_v42 = vld [vmem:[#allocation2 + $0x38] sm:$0xff]   ;;  %v1579_v43 = vld [vmem:[#allocation2 + $0x40] sm:$0xff]   ;;  %v1580_v44 = vld [vmem:[#allocation2 + $0x48] sm:$0xff]  }
  0x17   :  { %v1581_v45 = vld [vmem:[#allocation2 + $0x50] sm:$0xff]   ;;  %v1582_v46 = vld [vmem:[#allocation2 + $0x58] sm:$0xff]   ;;  %v1583_v47 = vld [vmem:[#allocation2 + $0x60] sm:$0xff]  }
  0x18   :  { %1456 = vmatpush3.bf16.msra.mxu0 %v1559_v23  ;;  %v1584_v48 = vld [vmem:[#allocation2 + $0x68] sm:$0xff]   ;;  %v1585_v49 = vld [vmem:[#allocation2 + $0x70] sm:$0xff]   ;;  %v1586_v50 = vld [vmem:[#allocation2 + $0x78] sm:$0xff]  }
  0x19   :  { %1508 = vmatpush3.bf16.msra.mxu1 %v1560_v24  ;;  %1457 = vmatprep.subr.bf16.mxu0 %v1561_v25  ;;  %v1587_v51 = vld [vmem:[#allocation2 + $0x80] sm:$0xff]   ;;  %v1588_v52 = vld [vmem:[#allocation2 + $0x88] sm:$0xff]   ;;  %v1589_v53 = vld [vmem:[#allocation2 + $0x90] sm:$0xff]  }
  0x1a   :  { %1509 = vmatprep.subr.bf16.mxu1 %v1562_v26  ;;  %v1720_v58 = vld [vmem:[%s1814_s2] ss:$0 sm:$0xff] }
  0x1c   :  { %1458 = vmatpush3.bf16.msra.mxu0 %v1561_v25 }
  0x1d   :  { %1510 = vmatpush3.bf16.msra.mxu1 %v1562_v26  ;;  %1459 = vmatprep.subr.bf16.mxu0 %v1563_v27 }
  0x1e   :  { %1511 = vmatprep.subr.bf16.mxu1 %v1564_v28 }
  0x20   :  { %1460 = vmatpush3.bf16.msra.mxu0 %v1563_v27 }
  0x21   :  { %1512 = vmatpush3.bf16.msra.mxu1 %v1564_v28  ;;  %1461 = vmatprep.subr.bf16.mxu0 %v1565_v29 }
  0x22   :  { %1513 = vmatprep.subr.bf16.mxu1 %v1566_v30 }
  0x24   :  { %1462 = vmatpush3.bf16.msra.mxu0 %v1565_v29 }
  0x25   :  { %1514 = vmatpush3.bf16.msra.mxu1 %v1566_v30  ;;  %1463 = vmatprep.subr.bf16.mxu0 %v1567_v33 }
  0x26   :  { %1515 = vmatprep.subr.bf16.mxu1 %v1568_v34 }
  0x28   :  { %1464 = vmatpush3.bf16.msra.mxu0 %v1567_v33 }
  0x29   :  { %1516 = vmatpush3.bf16.msra.mxu1 %v1568_v34  ;;  %1465 = vmatprep.subr.bf16.mxu0 %v1569_v35 }
  0x2a   :  { %1517 = vmatprep.subr.bf16.mxu1 %v1570_v36 }
  0x2c   :  { %1466 = vmatpush3.bf16.msra.mxu0 %v1569_v35 }
  0x2d   :  { %1518 = vmatpush3.bf16.msra.mxu1 %v1570_v36 }
  0x2f   :  { %1468 = vmatmul.mubr.bf16.vlgmr.msra.gmra.mxu0 %v1573_v37 }
  0x30   :  { %1520 = vmatmul.mubr.bf16.vlgmr.msra.gmra.mxu1 %v1571_v31  ;;  %1471 = vmatprep.mubr.bf16.mxu0 %v1574_v38 }
  0x31   :  { %1523 = vmatprep.mubr.bf16.mxu1 %v1573_v37 }
  0x37   :  { %1472 = vmatmul.mubr.bf16.gmra.mxu0 %v1575_v39 }
  0x38   :  { %1524 = vmatmul.mubr.bf16.gmra.mxu1 %v1574_v38  ;;  %1475 = vmatprep.mubr.bf16.mxu0 %v1576_v40 }
  0x39   :  { %1527 = vmatprep.mubr.bf16.mxu1 %v1575_v39 }
  0x3f   :  { %1476 = vmatmul.mubr.bf16.gmra.mxu0 %v1577_v41 }
  0x40   :  { %1528 = vmatmul.mubr.bf16.gmra.mxu1 %v1576_v40  ;;  %1479 = vmatprep.mubr.bf16.mxu0 %v1578_v42 }
  0x41   :  { %1531 = vmatprep.mubr.bf16.mxu1 %v1577_v41 }
  0x47   :  { %1480 = vmatmul.mubr.bf16.gmra.mxu0 %v1579_v43 }
  0x48   :  { %1532 = vmatmul.mubr.bf16.gmra.mxu1 %v1578_v42  ;;  %1483 = vmatprep.mubr.bf16.mxu0 %v1580_v44 }
  0x49   :  { %1535 = vmatprep.mubr.bf16.mxu1 %v1579_v43 }
  0x4f   :  { %1484 = vmatmul.mubr.bf16.gmra.mxu0 %v1581_v45 }
  0x50   :  { %1536 = vmatmul.mubr.bf16.gmra.mxu1 %v1580_v44  ;;  %1487 = vmatprep.mubr.bf16.mxu0 %v1582_v46 }
  0x51   :  { %1539 = vmatprep.mubr.bf16.mxu1 %v1581_v45 }
  0x57   :  { %1488 = vmatmul.mubr.bf16.gmra.mxu0 %v1583_v47 }
  0x58   :  { %1540 = vmatmul.mubr.bf16.gmra.mxu1 %v1582_v46  ;;  %1491 = vmatprep.mubr.bf16.mxu0 %v1584_v48 }
  0x59   :  { %1543 = vmatprep.mubr.bf16.mxu1 %v1583_v47 }
  0x5f   :  { %1492 = vmatmul.mubr.bf16.gmra.mxu0 %v1585_v49 }
  0x60   :  { %1544 = vmatmul.mubr.bf16.gmra.mxu1 %v1584_v48  ;;  %1495 = vmatprep.mubr.bf16.mxu0 %v1586_v50 }
  0x61   :  { %1547 = vmatprep.mubr.bf16.mxu1 %v1585_v49 }
  0x67   :  { %1496 = vmatmul.mubr.bf16.gmra.mxu0 %v1587_v51 }
  0x68   :  { %1548 = vmatmul.mubr.bf16.gmra.mxu1 %v1586_v50  ;;  %1499 = vmatprep.mubr.bf16.mxu0 %v1588_v52 }
  0x69   :  { %1551 = vmatprep.mubr.bf16.mxu1 %v1587_v51 }
  0x6f   :  { %1500 = vmatmul.mubr.bf16.gmra.mxu0 %v1589_v53 }
  0x70   :  { %1552 = vmatmul.mubr.bf16.gmra.mxu1 %v1588_v52 }
  0xef   :  { %v1469_v54 = vpop.f32.mrf.mxu0 }
  0xf0   :  { %v1521_v55 = vpop.f32.mrf.mxu1 }
  0xf1   :  { %v712_v56 = vadd.f32 %v1521_v55, %v1469_v54  ;;  %v472_v57 = vpop.f32.mrf.mxu0 }
  0xf2   :  { %v703_v59 = vpop.f32.mrf.mxu1 }
  0xf3   :  { %v704_v60 = vadd.f32 %v703_v59, %v472_v57  ;;  %v1470_v61 = vpop.f32.mrf.mxu0  ;;  %v855_v63 = vadd.f32 %v1720_v58, %v712_v56 }
  0xf4   :  { %v1522_v62 = vpop.f32.mrf.mxu1 }
  0xf5   :  { %v715_v0 = vadd.f32 %v1522_v62, %v1470_v61  ;;  %v475_v1 = vpop.f32.mrf.mxu0  ;;  %v853_v3 = vadd.f32 %v1720_v58, %v704_v60  ;;  %v891_v8 = vmax.f32 %v855_v63, 0.0 }
  0xf6   :  { %v706_v2 = vpop.f32.mrf.mxu1 }
  0xf7   :  { %v856_v4 = vadd.f32 %v1720_v58, %v715_v0  ;;  %v707_v5 = vadd.f32 %v706_v2, %v475_v1  ;;  %v1473_v6 = vpop.f32.mrf.mxu0  ;;  %v889_v14 = vmax.f32 %v853_v3, 0.0 }
  0xf8   :  { %v1525_v7 = vpop.f32.mrf.mxu1 }
  0xf9   :  { %v892_v9 = vmax.f32 %v856_v4, 0.0  ;;  %v854_v10 = vadd.f32 %v1720_v58, %v707_v5  ;;  %v728_v11 = vadd.f32 %v1525_v7, %v1473_v6  ;;  %v488_v12 = vpop.f32.mrf.mxu0 }
  0xfa   :  { %v719_v13 = vpop.f32.mrf.mxu1 }
  0xfb   :  { %v1300_v15 = vpack.c.bf16 %v892_v9, %v891_v8  ;;  %v890_v16 = vmax.f32 %v854_v10, 0.0  ;;  %v720_v17 = vadd.f32 %v719_v13, %v488_v12  ;;  %v1474_v18 = vpop.f32.mrf.mxu0  ;;  %v859_v21 = vadd.f32 %v1720_v58, %v728_v11 }
  0xfc   :  { %v1526_v19 = vpop.f32.mrf.mxu1 }
  0xfd   :  { %1382 = vst [vmem:[%s1815_s3 + $0x8] sm:$0xff] %v1300_v15   ;;  %v1295_v20 = vpack.c.bf16 %v890_v16, %v889_v14  ;;  %v731_v22 = vadd.f32 %v1526_v19, %v1474_v18  ;;  %v491_v23 = vpop.f32.mrf.mxu0  ;;  %v857_v25 = vadd.f32 %v1720_v58, %v720_v17  ;;  %v895_v30 = vmax.f32 %v859_v21, 0.0 }
  0xfe   :  { %v722_v24 = vpop.f32.mrf.mxu1 }
  0xff   :  { %1296 = vst [vmem:[%s1815_s3] sm:$0xff] %v1295_v20   ;;  %v860_v26 = vadd.f32 %v1720_v58, %v731_v22  ;;  %v723_v27 = vadd.f32 %v722_v24, %v491_v23  ;;  %v1477_v28 = vpop.f32.mrf.mxu0  ;;  %v893_v36 = vmax.f32 %v857_v25, 0.0 }
 0x100   :  { %v1529_v29 = vpop.f32.mrf.mxu1 }
 0x101   :  { %v896_v31 = vmax.f32 %v860_v26, 0.0  ;;  %v858_v32 = vadd.f32 %v1720_v58, %v723_v27  ;;  %v744_v33 = vadd.f32 %v1529_v29, %v1477_v28  ;;  %v504_v34 = vpop.f32.mrf.mxu0 }
 0x102   :  { %v735_v35 = vpop.f32.mrf.mxu1 }
 0x103   :  { %v1310_v37 = vpack.c.bf16 %v896_v31, %v895_v30  ;;  %v894_v38 = vmax.f32 %v858_v32, 0.0  ;;  %v736_v39 = vadd.f32 %v735_v35, %v504_v34  ;;  %v1478_v40 = vpop.f32.mrf.mxu0  ;;  %v863_v43 = vadd.f32 %v1720_v58, %v744_v33 }
 0x104   :  { %v1530_v41 = vpop.f32.mrf.mxu1 }
 0x105   :  { %1384 = vst [vmem:[%s1815_s3 + $0x18] sm:$0xff] %v1310_v37   ;;  %v1305_v42 = vpack.c.bf16 %v894_v38, %v893_v36  ;;  %v747_v44 = vadd.f32 %v1530_v41, %v1478_v40  ;;  %v507_v45 = vpop.f32.mrf.mxu0  ;;  %v861_v47 = vadd.f32 %v1720_v58, %v736_v39  ;;  %v899_v52 = vmax.f32 %v863_v43, 0.0 }
 0x106   :  { %v738_v46 = vpop.f32.mrf.mxu1 }
 0x107   :  { %1383 = vst [vmem:[%s1815_s3 + $0x10] sm:$0xff] %v1305_v42   ;;  %v864_v48 = vadd.f32 %v1720_v58, %v747_v44  ;;  %v739_v49 = vadd.f32 %v738_v46, %v507_v45  ;;  %v1481_v50 = vpop.f32.mrf.mxu0  ;;  %v897_v59 = vmax.f32 %v861_v47, 0.0 }
 0x108   :  { %v1533_v51 = vpop.f32.mrf.mxu1 }
 0x109   :  { %v900_v53 = vmax.f32 %v864_v48, 0.0  ;;  %v862_v54 = vadd.f32 %v1720_v58, %v739_v49  ;;  %v760_v55 = vadd.f32 %v1533_v51, %v1481_v50  ;;  %v520_v56 = vpop.f32.mrf.mxu0 }
 0x10a   :  { %v751_v57 = vpop.f32.mrf.mxu1 }
 0x10b   :  { %v1320_v60 = vpack.c.bf16 %v900_v53, %v899_v52  ;;  %v898_v61 = vmax.f32 %v862_v54, 0.0  ;;  %v752_v62 = vadd.f32 %v751_v57, %v520_v56  ;;  %v1482_v63 = vpop.f32.mrf.mxu0  ;;  %v867_v2 = vadd.f32 %v1720_v58, %v760_v55 }
 0x10c   :  { %v1534_v0 = vpop.f32.mrf.mxu1 }
 0x10d   :  { %1386 = vst [vmem:[%s1815_s3 + $0x28] sm:$0xff] %v1320_v60   ;;  %v1315_v1 = vpack.c.bf16 %v898_v61, %v897_v59  ;;  %v763_v3 = vadd.f32 %v1534_v0, %v1482_v63  ;;  %v523_v4 = vpop.f32.mrf.mxu0  ;;  %v865_v6 = vadd.f32 %v1720_v58, %v752_v62  ;;  %v903_v11 = vmax.f32 %v867_v2, 0.0 }
 0x10e   :  { %v754_v5 = vpop.f32.mrf.mxu1 }
 0x10f   :  { %1385 = vst [vmem:[%s1815_s3 + $0x20] sm:$0xff] %v1315_v1   ;;  %v868_v7 = vadd.f32 %v1720_v58, %v763_v3  ;;  %v755_v8 = vadd.f32 %v754_v5, %v523_v4  ;;  %v1485_v9 = vpop.f32.mrf.mxu0  ;;  %v901_v17 = vmax.f32 %v865_v6, 0.0 }
 0x110   :  { %v1537_v10 = vpop.f32.mrf.mxu1 }
 0x111   :  { %v904_v12 = vmax.f32 %v868_v7, 0.0  ;;  %v866_v13 = vadd.f32 %v1720_v58, %v755_v8  ;;  %v776_v14 = vadd.f32 %v1537_v10, %v1485_v9  ;;  %v536_v15 = vpop.f32.mrf.mxu0 }
 0x112   :  { %v767_v16 = vpop.f32.mrf.mxu1 }
 0x113   :  { %v1330_v18 = vpack.c.bf16 %v904_v12, %v903_v11  ;;  %v902_v19 = vmax.f32 %v866_v13, 0.0  ;;  %v768_v20 = vadd.f32 %v767_v16, %v536_v15  ;;  %v1486_v21 = vpop.f32.mrf.mxu0  ;;  %v871_v24 = vadd.f32 %v1720_v58, %v776_v14 }
 0x114   :  { %v1538_v22 = vpop.f32.mrf.mxu1 }
 0x115   :  { %1388 = vst [vmem:[%s1815_s3 + $0x38] sm:$0xff] %v1330_v18   ;;  %v1325_v23 = vpack.c.bf16 %v902_v19, %v901_v17  ;;  %v779_v25 = vadd.f32 %v1538_v22, %v1486_v21  ;;  %v539_v26 = vpop.f32.mrf.mxu0  ;;  %v869_v28 = vadd.f32 %v1720_v58, %v768_v20  ;;  %v907_v33 = vmax.f32 %v871_v24, 0.0 }
 0x116   :  { %v770_v27 = vpop.f32.mrf.mxu1 }
 0x117   :  { %1387 = vst [vmem:[%s1815_s3 + $0x30] sm:$0xff] %v1325_v23   ;;  %v872_v29 = vadd.f32 %v1720_v58, %v779_v25  ;;  %v771_v30 = vadd.f32 %v770_v27, %v539_v26  ;;  %v1489_v31 = vpop.f32.mrf.mxu0  ;;  %v905_v39 = vmax.f32 %v869_v28, 0.0 }
 0x118   :  { %v1541_v32 = vpop.f32.mrf.mxu1 }
 0x119   :  { %v908_v34 = vmax.f32 %v872_v29, 0.0  ;;  %v870_v35 = vadd.f32 %v1720_v58, %v771_v30  ;;  %v792_v36 = vadd.f32 %v1541_v32, %v1489_v31  ;;  %v552_v37 = vpop.f32.mrf.mxu0 }
 0x11a   :  { %v783_v38 = vpop.f32.mrf.mxu1 }
 0x11b   :  { %v1340_v40 = vpack.c.bf16 %v908_v34, %v907_v33  ;;  %v906_v41 = vmax.f32 %v870_v35, 0.0  ;;  %v784_v42 = vadd.f32 %v783_v38, %v552_v37  ;;  %v1490_v43 = vpop.f32.mrf.mxu0  ;;  %v875_v46 = vadd.f32 %v1720_v58, %v792_v36 }
 0x11c   :  { %v1542_v44 = vpop.f32.mrf.mxu1 }
 0x11d   :  { %1390 = vst [vmem:[%s1815_s3 + $0x48] sm:$0xff] %v1340_v40   ;;  %v1335_v45 = vpack.c.bf16 %v906_v41, %v905_v39  ;;  %v795_v47 = vadd.f32 %v1542_v44, %v1490_v43  ;;  %v555_v48 = vpop.f32.mrf.mxu0  ;;  %v873_v50 = vadd.f32 %v1720_v58, %v784_v42  ;;  %v911_v55 = vmax.f32 %v875_v46, 0.0 }
 0x11e   :  { %v786_v49 = vpop.f32.mrf.mxu1 }
 0x11f   :  { %1389 = vst [vmem:[%s1815_s3 + $0x40] sm:$0xff] %v1335_v45   ;;  %v876_v51 = vadd.f32 %v1720_v58, %v795_v47  ;;  %v787_v52 = vadd.f32 %v786_v49, %v555_v48  ;;  %v1493_v53 = vpop.f32.mrf.mxu0  ;;  %v909_v62 = vmax.f32 %v873_v50, 0.0 }
 0x120   :  { %v1545_v54 = vpop.f32.mrf.mxu1 }
 0x121   :  { %v912_v56 = vmax.f32 %v876_v51, 0.0  ;;  %v874_v57 = vadd.f32 %v1720_v58, %v787_v52  ;;  %v808_v59 = vadd.f32 %v1545_v54, %v1493_v53  ;;  %v568_v60 = vpop.f32.mrf.mxu0 }
 0x122   :  { %v799_v61 = vpop.f32.mrf.mxu1 }
 0x123   :  { %v1350_v63 = vpack.c.bf16 %v912_v56, %v911_v55  ;;  %v910_v0 = vmax.f32 %v874_v57, 0.0  ;;  %v800_v1 = vadd.f32 %v799_v61, %v568_v60  ;;  %v1494_v2 = vpop.f32.mrf.mxu0  ;;  %v879_v5 = vadd.f32 %v1720_v58, %v808_v59 }
 0x124   :  { %v1546_v3 = vpop.f32.mrf.mxu1 }
 0x125   :  { %1392 = vst [vmem:[%s1815_s3 + $0x58] sm:$0xff] %v1350_v63   ;;  %v1345_v4 = vpack.c.bf16 %v910_v0, %v909_v62  ;;  %v811_v6 = vadd.f32 %v1546_v3, %v1494_v2  ;;  %v571_v7 = vpop.f32.mrf.mxu0  ;;  %v877_v9 = vadd.f32 %v1720_v58, %v800_v1  ;;  %v915_v14 = vmax.f32 %v879_v5, 0.0 }
 0x126   :  { %v802_v8 = vpop.f32.mrf.mxu1 }
 0x127   :  { %1391 = vst [vmem:[%s1815_s3 + $0x50] sm:$0xff] %v1345_v4   ;;  %v880_v10 = vadd.f32 %v1720_v58, %v811_v6  ;;  %v803_v11 = vadd.f32 %v802_v8, %v571_v7  ;;  %v1497_v12 = vpop.f32.mrf.mxu0  ;;  %v913_v20 = vmax.f32 %v877_v9, 0.0 }
 0x128   :  { %v1549_v13 = vpop.f32.mrf.mxu1 }
 0x129   :  { %v916_v15 = vmax.f32 %v880_v10, 0.0  ;;  %v878_v16 = vadd.f32 %v1720_v58, %v803_v11  ;;  %v824_v17 = vadd.f32 %v1549_v13, %v1497_v12  ;;  %v584_v18 = vpop.f32.mrf.mxu0 }
 0x12a   :  { %v815_v19 = vpop.f32.mrf.mxu1 }
 0x12b   :  { %v1360_v21 = vpack.c.bf16 %v916_v15, %v915_v14  ;;  %v914_v22 = vmax.f32 %v878_v16, 0.0  ;;  %v816_v23 = vadd.f32 %v815_v19, %v584_v18  ;;  %v1498_v24 = vpop.f32.mrf.mxu0  ;;  %v883_v27 = vadd.f32 %v1720_v58, %v824_v17 }
 0x12c   :  { %v1550_v25 = vpop.f32.mrf.mxu1 }
 0x12d   :  { %1394 = vst [vmem:[%s1815_s3 + $0x68] sm:$0xff] %v1360_v21   ;;  %v1355_v26 = vpack.c.bf16 %v914_v22, %v913_v20  ;;  %v827_v28 = vadd.f32 %v1550_v25, %v1498_v24  ;;  %v587_v29 = vpop.f32.mrf.mxu0  ;;  %v881_v31 = vadd.f32 %v1720_v58, %v816_v23  ;;  %v919_v36 = vmax.f32 %v883_v27, 0.0 }
 0x12e   :  { %v818_v30 = vpop.f32.mrf.mxu1 }
 0x12f   :  { %1393 = vst [vmem:[%s1815_s3 + $0x60] sm:$0xff] %v1355_v26   ;;  %v884_v32 = vadd.f32 %v1720_v58, %v827_v28  ;;  %v819_v33 = vadd.f32 %v818_v30, %v587_v29  ;;  %v1501_v34 = vpop.f32.mrf.mxu0  ;;  %v917_v42 = vmax.f32 %v881_v31, 0.0 }
 0x130   :  { %v1553_v35 = vpop.f32.mrf.mxu1 }
 0x131   :  { %v920_v37 = vmax.f32 %v884_v32, 0.0  ;;  %v882_v38 = vadd.f32 %v1720_v58, %v819_v33  ;;  %v840_v39 = vadd.f32 %v1553_v35, %v1501_v34  ;;  %v600_v40 = vpop.f32.mrf.mxu0 }
 0x132   :  { %v831_v41 = vpop.f32.mrf.mxu1 }
 0x133   :  { %v1370_v43 = vpack.c.bf16 %v920_v37, %v919_v36  ;;  %v918_v44 = vmax.f32 %v882_v38, 0.0  ;;  %v832_v45 = vadd.f32 %v831_v41, %v600_v40  ;;  %v1502_v46 = vpop.f32.mrf.mxu0  ;;  %v887_v49 = vadd.f32 %v1720_v58, %v840_v39 }
 0x134   :  { %v1554_v47 = vpop.f32.mrf.mxu1 }
 0x135   :  { %1396 = vst [vmem:[%s1815_s3 + $0x78] sm:$0xff] %v1370_v43   ;;  %v1365_v48 = vpack.c.bf16 %v918_v44, %v917_v42  ;;  %v843_v50 = vadd.f32 %v1554_v47, %v1502_v46  ;;  %v603_v51 = vpop.f32.mrf.mxu0  ;;  %v885_v53 = vadd.f32 %v1720_v58, %v832_v45  ;;  %v923_v56 = vmax.f32 %v887_v49, 0.0 }
 0x136   :  { %v834_v52 = vpop.f32.mrf.mxu1 }
 0x137   :  { %1395 = vst [vmem:[%s1815_s3 + $0x70] sm:$0xff] %v1365_v48   ;;  %v888_v54 = vadd.f32 %v1720_v58, %v843_v50  ;;  %v835_v55 = vadd.f32 %v834_v52, %v603_v51  ;;  %v921_v60 = vmax.f32 %v885_v53, 0.0 }
 0x139   :  { %v924_v57 = vmax.f32 %v888_v54, 0.0  ;;  %v886_v59 = vadd.f32 %v1720_v58, %v835_v55 }
 0x13b   :  { %v1380_v61 = vpack.c.bf16 %v924_v57, %v923_v56  ;;  %v922_v62 = vmax.f32 %v886_v59, 0.0 }
 0x13d   :  { %1398 = vst [vmem:[%s1815_s3 + $0x88] sm:$0xff] %v1380_v61   ;;  %v1375_v63 = vpack.c.bf16 %v922_v62, %v921_v60 }
 0x13f   :  { %1397 = vst [vmem:[%s1815_s3 + $0x80] sm:$0xff] %v1375_v63  }
 0x140   :  { %1109 = vsyncmov [#allocation3] }
 0x143   :  { %s1110_s5 = vpop.sfrf %1109 }
 0x144   :  { %p1254_p0 = scmp.ne.s32.totalorder %s1110_s5, 0 }
 0x146   :  { %1114 = shalt.err (%p1254_p0)  }
 0x147   :  { %1116 = vsyncmov [#allocation3 + $0x1] }
 0x14a   :  { %s1117_s6 = vpop.sfrf %1116 }
 0x14b   :  { %p1255_p1 = scmp.ne.s32.totalorder %s1117_s6, 0 }
 0x14d   :  { %1121 = shalt.err (%p1255_p1)  }

// kernel: global_generator_forward.12
= control target key start
LH: loop header
LB: loop body
LE: loop exit
PB: predicated region body
PF: predicated region fallthrough
CT: control target
= control target key end

     0   :  { %s988_s0 = inlined_call_operand.vmem [shape: bf16[96,128], index: 0, kind: input, shape index: {}]   ;;  %s989_s1 = inlined_call_operand.vmem [shape: bf16[2,128,128], index: 1, kind: input, shape index: {}]   ;;  %s990_s2 = inlined_call_operand.vmem [shape: f32[1,128], index: 2, kind: input, shape index: {}]   ;;  %s991_s3 = inlined_call_operand.vmem [shape: bf16[80,128], index: 3, kind: output, shape index: {}]  }
   0x1   :  { %v60_v0 = vld [vmem:[%s988_s0] sm:$0xff]  ;;  %v62_v1 = vld [vmem:[%s988_s0 + $0x8] sm:$0xff]  ;;  %v64_v2 = vld [vmem:[%s988_s0 + $0x10] sm:$0xff] }
   0x2   :  { %61 = vst [vmem:[#allocation2] sm:$0xff] %v60_v0  ;;  %63 = vst [vmem:[#allocation2 + $0x8] sm:$0xff] %v62_v1  ;;  %v66_v3 = vld [vmem:[%s988_s0 + $0x18] sm:$0xff]  ;;  %v68_v4 = vld [vmem:[%s988_s0 + $0x20] sm:$0xff] }
   0x3   :  { %65 = vst [vmem:[#allocation2 + $0x10] sm:$0xff] %v64_v2  ;;  %v70_v5 = vld [vmem:[%s988_s0 + $0x28] sm:$0xff]  ;;  %67 = vst [vmem:[#allocation2 + $0x18] sm:$0xff] %v66_v3 }
   0x4   :  { %69 = vst [vmem:[#allocation2 + $0x20] sm:$0xff] %v68_v4  ;;  %71 = vst [vmem:[#allocation2 + $0x28] sm:$0xff] %v70_v5 }
   0x5   :  { %79 = vsyncadd [#allocation3], 768 }
   0x6   :  { %832 = dma.done.wait [#allocation3], 768 }
   0x7   :  { %833 = vsyncadd [#allocation3], 4294966528  ;;  %v834_v6 = vmov 0.0   ;;  %vm835_vm0 = vmmov 0   ;;  %v806_v7 = vld [vmem:[%s989_s1 + $0x78] sm:$0xff]   ;;  %v808_v9 = vld [vmem:[%s989_s1 + $0x70] sm:$0xff]  }
   0x8   :  { %732 = vmatprep.subr.bf16.mxu0 %v834_v6  ;;  %768 = vmatprep.subr.bf16.mxu1 %v834_v6  ;;  %v807_v8 = vld [vmem:[%s989_s1 + $0x38] sm:$0xff]   ;;  %v809_v10 = vld [vmem:[%s989_s1 + $0x30] sm:$0xff]   ;;  %v810_v11 = vld [vmem:[%s989_s1 + $0x68] sm:$0xff]  }
   0x9   :  { %748 = vmatprep.mubr.msk.bf16.mxu0 %vm835_vm0, %v834_v6  ;;  %784 = vmatprep.mubr.msk.bf16.mxu1 %vm835_vm0, %v834_v6  ;;  %v811_v12 = vld [vmem:[%s989_s1 + $0x28] sm:$0xff]   ;;  %v812_v13 = vld [vmem:[%s989_s1 + $0x60] sm:$0xff]   ;;  %v814_v15 = vld [vmem:[%s989_s1 + $0x58] sm:$0xff]  }
   0xa   :  { %733 = vmatpush3.bf16.msra.mxu0 %v806_v7  ;;  %769 = vmatpush3.bf16.msra.mxu1 %v807_v8  ;;  %v813_v14 = vld [vmem:[%s989_s1 + $0x20] sm:$0xff]   ;;  %v815_v16 = vld [vmem:[%s989_s1 + $0x18] sm:$0xff]   ;;  %v816_v17 = vld [vmem:[%s989_s1 + $0x50] sm:$0xff]  }
   0xb   :  { %734 = vmatprep.subr.bf16.mxu0 %v834_v6  ;;  %770 = vmatprep.subr.bf16.mxu1 %v834_v6  ;;  %v817_v18 = vld [vmem:[%s989_s1 + $0x10] sm:$0xff]   ;;  %v818_v19 = vld [vmem:[%s989_s1 + $0x48] sm:$0xff]   ;;  %v820_v21 = vld [vmem:[%s989_s1 + $0x40] sm:$0xff]  }
   0xc   :  { %v819_v20 = vld [vmem:[%s989_s1 + $0x8] sm:$0xff]   ;;  %v160_v22 = vld [vmem:[#allocation2 + $0x4] sm:$0xf]  ;;  %v159_v25 = vld [vmem:[#allocation2] sm:$0xf] }
   0xd   :  { %v161_v23 = vld [vmem:[#allocation2 + $0x8] sm:$0xf]  ;;  %v821_v24 = vld [vmem:[%s989_s1] sm:$0xff]   ;;  %v641_v27 = vcombine.low %v159_v25, %v160_v22  ;;  %v162_v28 = vld [vmem:[#allocation2 + $0xc] sm:$0xf] }
   0xe   :  { %735 = vmatpush3.bf16.msra.mxu0 %v808_v9  ;;  %771 = vmatpush3.bf16.msra.mxu1 %v809_v10  ;;  %v628_v26 = vcombine.low %v160_v22, %v161_v23  ;;  %v163_v29 = vld [vmem:[#allocation2 + $0x10] sm:$0xf]  ;;  %v642_v31 = vcombine.low %v161_v23, %v162_v28  ;;  %v164_v32 = vld [vmem:[#allocation2 + $0x14] sm:$0xf]  ;;  %v165_v33 = vld [vmem:[#allocation2 + $0x18] sm:$0xf] }
   0xf   :  { %736 = vmatprep.subr.bf16.mxu0 %v834_v6  ;;  %772 = vmatprep.subr.bf16.mxu1 %v834_v6  ;;  %v629_v30 = vcombine.low %v162_v28, %v163_v29  ;;  %v630_v34 = vcombine.low %v164_v32, %v165_v33  ;;  %v643_v35 = vcombine.low %v163_v29, %v164_v32  ;;  %v166_v36 = vld [vmem:[#allocation2 + $0x1c] sm:$0xf]  ;;  %v167_v37 = vld [vmem:[#allocation2 + $0x20] sm:$0xf]  ;;  %v168_v40 = vld [vmem:[#allocation2 + $0x24] sm:$0xf] }
  0x10   :  { %v631_v38 = vcombine.low %v166_v36, %v167_v37  ;;  %v644_v39 = vcombine.low %v165_v33, %v166_v36  ;;  %v185_v41 = vld [vmem:[#allocation2 + $0x28] sm:$0xf]  ;;  %v645_v43 = vcombine.low %v167_v37, %v168_v40  ;;  %v961_v48 = vld [vmem:[%s990_s2] ss:$0 sm:$0xff] }
  0x11   :  { %v632_v42 = vcombine.low %v168_v40, %v185_v41 }
  0x12   :  { %737 = vmatpush3.bf16.msra.mxu0 %v810_v11  ;;  %773 = vmatpush3.bf16.msra.mxu1 %v811_v12 }
  0x13   :  { %738 = vmatprep.subr.bf16.mxu0 %v834_v6  ;;  %774 = vmatprep.subr.bf16.mxu1 %v834_v6 }
  0x16   :  { %739 = vmatpush3.bf16.msra.mxu0 %v812_v13  ;;  %775 = vmatpush3.bf16.msra.mxu1 %v813_v14 }
  0x17   :  { %740 = vmatprep.subr.bf16.mxu0 %v834_v6  ;;  %776 = vmatprep.subr.bf16.mxu1 %v834_v6 }
  0x1a   :  { %741 = vmatpush3.bf16.msra.mxu0 %v814_v15  ;;  %777 = vmatpush3.bf16.msra.mxu1 %v815_v16 }
  0x1b   :  { %742 = vmatprep.subr.bf16.mxu0 %v834_v6  ;;  %778 = vmatprep.subr.bf16.mxu1 %v834_v6 }
  0x1e   :  { %743 = vmatpush3.bf16.msra.mxu0 %v816_v17  ;;  %779 = vmatpush3.bf16.msra.mxu1 %v817_v18 }
  0x1f   :  { %744 = vmatprep.subr.bf16.mxu0 %v834_v6  ;;  %780 = vmatprep.subr.bf16.mxu1 %v834_v6 }
  0x22   :  { %745 = vmatpush3.bf16.msra.mxu0 %v818_v19  ;;  %781 = vmatpush3.bf16.msra.mxu1 %v819_v20 }
  0x23   :  { %746 = vmatprep.subr.bf16.mxu0 %v834_v6  ;;  %782 = vmatprep.subr.bf16.mxu1 %v834_v6 }
  0x26   :  { %747 = vmatpush3.bf16.msra.mxu0 %v820_v21  ;;  %783 = vmatpush3.bf16.msra.mxu1 %v821_v24 }
  0x29   :  { %749 = vmatmul.mubr.bf16.vlgmr.msra.gmra.mxu0 %v628_v26  ;;  %785 = vmatmul.mubr.bf16.vlgmr.msra.gmra.mxu1 %v641_v27 }
  0x2a   :  { %752 = vmatprep.mubr.msk.bf16.mxu0 %vm835_vm0, %v834_v6  ;;  %788 = vmatprep.mubr.msk.bf16.mxu1 %vm835_vm0, %v834_v6 }
  0x31   :  { %753 = vmatmul.mubr.bf16.gmra.mxu0 %v629_v30  ;;  %789 = vmatmul.mubr.bf16.gmra.mxu1 %v642_v31 }
  0x32   :  { %756 = vmatprep.mubr.msk.bf16.mxu0 %vm835_vm0, %v834_v6  ;;  %792 = vmatprep.mubr.msk.bf16.mxu1 %vm835_vm0, %v834_v6 }
  0x39   :  { %757 = vmatmul.mubr.bf16.gmra.mxu0 %v630_v34  ;;  %793 = vmatmul.mubr.bf16.gmra.mxu1 %v643_v35 }
  0x3a   :  { %760 = vmatprep.mubr.msk.bf16.mxu0 %vm835_vm0, %v834_v6  ;;  %796 = vmatprep.mubr.msk.bf16.mxu1 %vm835_vm0, %v834_v6 }
  0x41   :  { %761 = vmatmul.mubr.bf16.gmra.mxu0 %v631_v38  ;;  %797 = vmatmul.mubr.bf16.gmra.mxu1 %v644_v39 }
  0x42   :  { %764 = vmatprep.mubr.msk.bf16.mxu0 %vm835_vm0, %v834_v6  ;;  %800 = vmatprep.mubr.msk.bf16.mxu1 %vm835_vm0, %v834_v6 }
  0x49   :  { %765 = vmatmul.mubr.bf16.gmra.mxu0 %v632_v42  ;;  %801 = vmatmul.mubr.bf16.gmra.mxu1 %v645_v43 }
  0xe9   :  { %v315_v44 = vpop.f32.mrf.mxu0  ;;  %v448_v45 = vpop.f32.mrf.mxu1 }
  0xea   :  { %v449_v46 = vadd.f32 %v448_v45, %v315_v44 }
  0xeb   :  { %v750_v47 = vpop.f32.mrf.mxu0  ;;  %v786_v49 = vpop.f32.mrf.mxu1 }
  0xec   :  { %v494_v52 = vadd.f32 %v961_v48, %v449_v46 }
  0xed   :  { %v318_v50 = vpop.f32.mrf.mxu0  ;;  %v451_v51 = vpop.f32.mrf.mxu1 }
  0xee   :  { %v452_v53 = vadd.f32 %v451_v51, %v318_v50  ;;  %v504_v59 = vmax.f32 %v494_v52, 0.0 }
  0xef   :  { %v751_v54 = vpop.f32.mrf.mxu0  ;;  %v787_v55 = vpop.f32.mrf.mxu1 }
  0xf0   :  { %v495_v56 = vadd.f32 %v961_v48, %v452_v53 }
  0xf1   :  { %v323_v57 = vpop.f32.mrf.mxu0  ;;  %v456_v58 = vpop.f32.mrf.mxu1 }
  0xf2   :  { %v505_v60 = vmax.f32 %v495_v56, 0.0  ;;  %v457_v61 = vadd.f32 %v456_v58, %v323_v57 }
  0xf3   :  { %v754_v62 = vpop.f32.mrf.mxu0  ;;  %v790_v63 = vpop.f32.mrf.mxu1 }
  0xf4   :  { %v680_v0 = vpack.c.bf16 %v505_v60, %v504_v59  ;;  %v496_v3 = vadd.f32 %v961_v48, %v457_v61 }
  0xf5   :  { %v326_v1 = vpop.f32.mrf.mxu0  ;;  %v459_v2 = vpop.f32.mrf.mxu1 }
  0xf6   :  { %681 = vst [vmem:[%s991_s3] sm:$0xff] %v680_v0   ;;  %v460_v4 = vadd.f32 %v459_v2, %v326_v1  ;;  %v506_v10 = vmax.f32 %v496_v3, 0.0 }
  0xf7   :  { %v755_v5 = vpop.f32.mrf.mxu0  ;;  %v791_v6 = vpop.f32.mrf.mxu1 }
  0xf8   :  { %v497_v7 = vadd.f32 %v961_v48, %v460_v4 }
  0xf9   :  { %v331_v8 = vpop.f32.mrf.mxu0  ;;  %v464_v9 = vpop.f32.mrf.mxu1 }
  0xfa   :  { %v507_v11 = vmax.f32 %v497_v7, 0.0  ;;  %v465_v12 = vadd.f32 %v464_v9, %v331_v8 }
  0xfb   :  { %v758_v13 = vpop.f32.mrf.mxu0  ;;  %v794_v14 = vpop.f32.mrf.mxu1 }
  0xfc   :  { %v685_v15 = vpack.c.bf16 %v507_v11, %v506_v10  ;;  %v498_v18 = vadd.f32 %v961_v48, %v465_v12 }
  0xfd   :  { %v334_v16 = vpop.f32.mrf.mxu0  ;;  %v467_v17 = vpop.f32.mrf.mxu1 }
  0xfe   :  { %702 = vst [vmem:[%s991_s3 + $0x8] sm:$0xff] %v685_v15   ;;  %v468_v19 = vadd.f32 %v467_v17, %v334_v16  ;;  %v508_v25 = vmax.f32 %v498_v18, 0.0 }
  0xff   :  { %v759_v20 = vpop.f32.mrf.mxu0  ;;  %v795_v21 = vpop.f32.mrf.mxu1 }
 0x100   :  { %v499_v22 = vadd.f32 %v961_v48, %v468_v19 }
 0x101   :  { %v339_v23 = vpop.f32.mrf.mxu0  ;;  %v472_v24 = vpop.f32.mrf.mxu1 }
 0x102   :  { %v509_v26 = vmax.f32 %v499_v22, 0.0  ;;  %v473_v27 = vadd.f32 %v472_v24, %v339_v23 }
 0x103   :  { %v762_v28 = vpop.f32.mrf.mxu0  ;;  %v798_v29 = vpop.f32.mrf.mxu1 }
 0x104   :  { %v690_v30 = vpack.c.bf16 %v509_v26, %v508_v25  ;;  %v500_v33 = vadd.f32 %v961_v48, %v473_v27 }
 0x105   :  { %v342_v31 = vpop.f32.mrf.mxu0  ;;  %v475_v32 = vpop.f32.mrf.mxu1 }
 0x106   :  { %703 = vst [vmem:[%s991_s3 + $0x10] sm:$0xff] %v690_v30   ;;  %v476_v34 = vadd.f32 %v475_v32, %v342_v31  ;;  %v510_v40 = vmax.f32 %v500_v33, 0.0 }
 0x107   :  { %v763_v35 = vpop.f32.mrf.mxu0  ;;  %v799_v36 = vpop.f32.mrf.mxu1 }
 0x108   :  { %v501_v37 = vadd.f32 %v961_v48, %v476_v34 }
 0x109   :  { %v347_v38 = vpop.f32.mrf.mxu0  ;;  %v480_v39 = vpop.f32.mrf.mxu1 }
 0x10a   :  { %v511_v41 = vmax.f32 %v501_v37, 0.0  ;;  %v481_v42 = vadd.f32 %v480_v39, %v347_v38 }
 0x10b   :  { %v766_v43 = vpop.f32.mrf.mxu0  ;;  %v802_v44 = vpop.f32.mrf.mxu1 }
 0x10c   :  { %v695_v45 = vpack.c.bf16 %v511_v41, %v510_v40  ;;  %v502_v49 = vadd.f32 %v961_v48, %v481_v42 }
 0x10d   :  { %v350_v46 = vpop.f32.mrf.mxu0  ;;  %v483_v47 = vpop.f32.mrf.mxu1 }
 0x10e   :  { %704 = vst [vmem:[%s991_s3 + $0x18] sm:$0xff] %v695_v45   ;;  %v484_v50 = vadd.f32 %v483_v47, %v350_v46  ;;  %v512_v54 = vmax.f32 %v502_v49, 0.0 }
 0x10f   :  { %v767_v51 = vpop.f32.mrf.mxu0  ;;  %v803_v52 = vpop.f32.mrf.mxu1 }
 0x110   :  { %v503_v53 = vadd.f32 %v961_v48, %v484_v50 }
 0x112   :  { %v513_v55 = vmax.f32 %v503_v53, 0.0 }
 0x114   :  { %v700_v56 = vpack.c.bf16 %v513_v55, %v512_v54 }
 0x116   :  { %705 = vst [vmem:[%s991_s3 + $0x20] sm:$0xff] %v700_v56  }
 0x117   :  { %568 = vsyncmov [#allocation3] }
 0x11a   :  { %s569_s10 = vpop.sfrf %568 }
 0x11b   :  { %p665_p0 = scmp.ne.s32.totalorder %s569_s10, 0 }
 0x11d   :  { %573 = shalt.err (%p665_p0)  }
 0x11e   :  { %575 = vsyncmov [#allocation3 + $0x1] }
 0x121   :  { %s576_s11 = vpop.sfrf %575 }
 0x122   :  { %p666_p1 = scmp.ne.s32.totalorder %s576_s11, 0 }
 0x124   :  { %580 = shalt.err (%p666_p1)  }

// kernel: global_generator_forward.13
= control target key start
LH: loop header
LB: loop body
LE: loop exit
PB: predicated region body
PF: predicated region fallthrough
CT: control target
= control target key end

     0   :  { %s1319_s0 = inlined_call_operand.vmem [shape: bf16[112,128], index: 0, kind: input, shape index: {}]   ;;  %s1320_s1 = inlined_call_operand.vmem [shape: bf16[3,128,128], index: 1, kind: input, shape index: {}]   ;;  %s1321_s2 = inlined_call_operand.vmem [shape: f32[1,128], index: 2, kind: input, shape index: {}]   ;;  %s1322_s3 = inlined_call_operand.vmem [shape: bf16[96,128], index: 3, kind: output, shape index: {}]  }
   0x1   :  { %v60_v0 = vld [vmem:[%s1319_s0] sm:$0xff]  ;;  %v62_v1 = vld [vmem:[%s1319_s0 + $0x8] sm:$0xff]  ;;  %v64_v2 = vld [vmem:[%s1319_s0 + $0x10] sm:$0xff] }
   0x2   :  { %61 = vst [vmem:[#allocation2] sm:$0xff] %v60_v0  ;;  %63 = vst [vmem:[#allocation2 + $0x8] sm:$0xff] %v62_v1  ;;  %v66_v3 = vld [vmem:[%s1319_s0 + $0x18] sm:$0xff]  ;;  %v68_v4 = vld [vmem:[%s1319_s0 + $0x20] sm:$0xff] }
   0x3   :  { %65 = vst [vmem:[#allocation2 + $0x10] sm:$0xff] %v64_v2  ;;  %v70_v5 = vld [vmem:[%s1319_s0 + $0x28] sm:$0xff]  ;;  %67 = vst [vmem:[#allocation2 + $0x18] sm:$0xff] %v66_v3  ;;  %v72_v6 = vld [vmem:[%s1319_s0 + $0x30] sm:$0xff] }
   0x4   :  { %69 = vst [vmem:[#allocation2 + $0x20] sm:$0xff] %v68_v4  ;;  %71 = vst [vmem:[#allocation2 + $0x28] sm:$0xff] %v70_v5 }
   0x5   :  { %73 = vst [vmem:[#allocation2 + $0x30] sm:$0xff] %v72_v6 }
   0x6   :  { %81 = vsyncadd [#allocation3], 896 }
   0x7   :  { %1183 = dma.done.wait [#allocation3], 896 }
   0x8   :  { %1184 = vsyncadd [#allocation3], 4294966400  ;;  %v1141_v7 = vld [vmem:[%s1320_s1 + $0x78] sm:$0xff]   ;;  %v1143_v9 = vld [vmem:[%s1320_s1 + $0x70] sm:$0xff]  }
   0x9   :  { %v1142_v8 = vld [vmem:[%s1320_s1 + $0x38] sm:$0xff]   ;;  %1041 = vmatprep.subr.bf16.mxu0 %v1141_v7  ;;  %v1144_v10 = vld [vmem:[%s1320_s1 + $0x30] sm:$0xff]   ;;  %v1145_v11 = vld [vmem:[%s1320_s1 + $0x68] sm:$0xff]  }
   0xa   :  { %1069 = vmatprep.subr.bf16.mxu1 %v1142_v8  ;;  %1042 = vmatpush3.bf16.msra.mxu0 %v1141_v7  ;;  %v1146_v12 = vld [vmem:[%s1320_s1 + $0x28] sm:$0xff]   ;;  %v1147_v13 = vld [vmem:[%s1320_s1 + $0x60] sm:$0xff]   ;;  %v1149_v15 = vld [vmem:[%s1320_s1 + $0x58] sm:$0xff]  }
   0xb   :  { %1070 = vmatpush3.bf16.msra.mxu1 %v1142_v8  ;;  %1043 = vmatprep.subr.bf16.mxu0 %v1143_v9  ;;  %v1148_v14 = vld [vmem:[%s1320_s1 + $0x20] sm:$0xff]   ;;  %v1150_v16 = vld [vmem:[%s1320_s1 + $0x18] sm:$0xff]   ;;  %v1151_v17 = vld [vmem:[%s1320_s1 + $0x50] sm:$0xff]  }
   0xc   :  { %1071 = vmatprep.subr.bf16.mxu1 %v1144_v10  ;;  %v164_v18 = vld [vmem:[#allocation2 + $0x4] sm:$0xf]  ;;  %v165_v19 = vld [vmem:[#allocation2 + $0x8] sm:$0xf]  ;;  %v1152_v20 = vld [vmem:[%s1320_s1 + $0x10] sm:$0xff]  }
   0xd   :  { %v879_v21 = vcombine.low %v164_v18, %v165_v19  ;;  %v163_v22 = vld [vmem:[#allocation2] sm:$0xf]  ;;  %v1153_v24 = vld [vmem:[%s1320_s1 + $0x48] sm:$0xff]   ;;  %v167_v29 = vld [vmem:[#allocation2 + $0x10] sm:$0xf] }
   0xe   :  { %1044 = vmatpush3.bf16.msra.mxu0 %v1143_v9  ;;  %v893_v23 = vcombine.low %v163_v22, %v164_v18  ;;  %v1154_v25 = vld [vmem:[%s1320_s1 + $0x8] sm:$0xff]   ;;  %v1155_v26 = vld [vmem:[%s1320_s1 + $0x40] sm:$0xff]   ;;  %v1161_v30 = vld [vmem:[%s1320_s1 + $0xb8] sm:$0xff]  }
   0xf   :  { %1072 = vmatpush3.bf16.msra.mxu1 %v1144_v10  ;;  %1045 = vmatprep.subr.bf16.mxu0 %v1145_v11  ;;  %v1156_v27 = vld [vmem:[%s1320_s1] sm:$0xff]   ;;  %v166_v28 = vld [vmem:[#allocation2 + $0xc] sm:$0xf]  ;;  %v168_v31 = vld [vmem:[#allocation2 + $0x14] sm:$0xf] }
  0x10   :  { %1073 = vmatprep.subr.bf16.mxu1 %v1146_v12  ;;  %1057 = vmatprep.mubr.bf16.mxu0 %v879_v21  ;;  %v880_v32 = vcombine.low %v166_v28, %v167_v29  ;;  %v169_v33 = vld [vmem:[#allocation2 + $0x18] sm:$0xf]  ;;  %v894_v34 = vcombine.low %v165_v19, %v166_v28  ;;  %v1162_v35 = vld [vmem:[%s1320_s1 + $0xb0] sm:$0xff]   ;;  %v895_v37 = vcombine.low %v167_v29, %v168_v31  ;;  %v170_v38 = vld [vmem:[#allocation2 + $0x1c] sm:$0xf] }
  0x11   :  { %1085 = vmatprep.mubr.bf16.mxu1 %v893_v23  ;;  %v881_v36 = vcombine.low %v168_v31, %v169_v33  ;;  %v171_v39 = vld [vmem:[#allocation2 + $0x20] sm:$0xf]  ;;  %v1163_v40 = vld [vmem:[%s1320_s1 + $0xa8] sm:$0xff]   ;;  %v172_v42 = vld [vmem:[#allocation2 + $0x24] sm:$0xf]  ;;  %v896_v44 = vcombine.low %v169_v33, %v170_v38 }
  0x12   :  { %1046 = vmatpush3.bf16.msra.mxu0 %v1145_v11  ;;  %v882_v41 = vcombine.low %v170_v38, %v171_v39  ;;  %v173_v43 = vld [vmem:[#allocation2 + $0x28] sm:$0xf]  ;;  %v1168_v45 = vld [vmem:[%s1320_s1 + $0xa0] sm:$0xff]   ;;  %v897_v47 = vcombine.low %v171_v39, %v172_v42  ;;  %v174_v48 = vld [vmem:[#allocation2 + $0x2c] sm:$0xf] }
  0x13   :  { %1074 = vmatpush3.bf16.msra.mxu1 %v1146_v12  ;;  %1047 = vmatprep.subr.bf16.mxu0 %v1147_v13  ;;  %v883_v46 = vcombine.low %v172_v42, %v173_v43  ;;  %v191_v49 = vld [vmem:[#allocation2 + $0x30] sm:$0xf]  ;;  %v1169_v50 = vld [vmem:[%s1320_s1 + $0x98] sm:$0xff]   ;;  %v898_v52 = vcombine.low %v173_v43, %v174_v48  ;;  %v1177_v54 = vld [vmem:[#allocation2 + $0x8] sm:$0xff]  }
  0x14   :  { %1075 = vmatprep.subr.bf16.mxu1 %v1148_v14  ;;  %v884_v51 = vcombine.low %v174_v48, %v191_v49  ;;  %v1174_v53 = vld [vmem:[%s1320_s1 + $0x90] sm:$0xff]   ;;  %v1178_v55 = vld [vmem:[#allocation2 + $0x18] sm:$0xff]   ;;  %v1175_v56 = vld [vmem:[%s1320_s1 + $0x88] sm:$0xff]  }
  0x15   :  { %v1176_v57 = vld [vmem:[%s1320_s1 + $0x80] sm:$0xff]   ;;  %v1179_v58 = vld [vmem:[#allocation2 + $0x10] sm:$0xff]   ;;  %v1181_v60 = vld [vmem:[#allocation2 + $0x28] sm:$0xff]  }
  0x16   :  { %1048 = vmatpush3.bf16.msra.mxu0 %v1147_v13  ;;  %v1180_v59 = vld [vmem:[#allocation2 + $0x20] sm:$0xff]   ;;  %v1182_v61 = vld [vmem:[#allocation2 + $0x30] sm:$0xff]  }
  0x17   :  { %1076 = vmatpush3.bf16.msra.mxu1 %v1148_v14  ;;  %1049 = vmatprep.subr.bf16.mxu0 %v1149_v15  ;;  %v937_v29 = vld [vmem:[%s1321_s2] ss:$0 sm:$0xff] }
  0x18   :  { %1077 = vmatprep.subr.bf16.mxu1 %v1150_v16 }
  0x1a   :  { %1050 = vmatpush3.bf16.msra.mxu0 %v1149_v15 }
  0x1b   :  { %1078 = vmatpush3.bf16.msra.mxu1 %v1150_v16  ;;  %1051 = vmatprep.subr.bf16.mxu0 %v1151_v17 }
  0x1c   :  { %1079 = vmatprep.subr.bf16.mxu1 %v1152_v20 }
  0x1e   :  { %1052 = vmatpush3.bf16.msra.mxu0 %v1151_v17 }
  0x1f   :  { %1080 = vmatpush3.bf16.msra.mxu1 %v1152_v20  ;;  %1053 = vmatprep.subr.bf16.mxu0 %v1153_v24 }
  0x20   :  { %1081 = vmatprep.subr.bf16.mxu1 %v1154_v25 }
  0x22   :  { %1054 = vmatpush3.bf16.msra.mxu0 %v1153_v24 }
  0x23   :  { %1082 = vmatpush3.bf16.msra.mxu1 %v1154_v25  ;;  %1055 = vmatprep.subr.bf16.mxu0 %v1155_v26 }
  0x24   :  { %1083 = vmatprep.subr.bf16.mxu1 %v1156_v27 }
  0x26   :  { %1056 = vmatpush3.bf16.msra.mxu0 %v1155_v26 }
  0x27   :  { %1084 = vmatpush3.bf16.msra.mxu1 %v1156_v27  ;;  %1097 = vmatprep.subr.bf16.mxu0 %v1161_v30 }
  0x28   :  { %1125 = vmatprep.subr.bf16.mxu1 %v1161_v30 }
  0x29   :  { %1058 = vmatmul.mubr.bf16.vlgmr.msra.gmra.mxu0 %v880_v32 }
  0x2a   :  { %1086 = vmatmul.mubr.bf16.vlgmr.msra.gmra.mxu1 %v894_v34  ;;  %1098 = vmatpush3.bf16.msra.mxu0 %v1161_v30 }
  0x2b   :  { %1133 = vmatpush3.bf16.msra.mxu1 %v1161_v30  ;;  %1099 = vmatprep.subr.bf16.mxu0 %v1162_v35 }
  0x2c   :  { %1126 = vmatprep.subr.bf16.mxu1 %v1162_v35  ;;  %1061 = vmatprep.mubr.bf16.mxu0 %v881_v36 }
  0x2d   :  { %1089 = vmatprep.mubr.bf16.mxu1 %v895_v37 }
  0x2e   :  { %1100 = vmatpush3.bf16.msra.mxu0 %v1162_v35 }
  0x2f   :  { %1134 = vmatpush3.bf16.msra.mxu1 %v1162_v35  ;;  %1101 = vmatprep.subr.bf16.mxu0 %v1163_v40 }
  0x30   :  { %1127 = vmatprep.subr.bf16.mxu1 %v1163_v40 }
  0x31   :  { %1062 = vmatmul.mubr.bf16.gmra.mxu0 %v882_v41 }
  0x32   :  { %1102 = vmatpush3.bf16.msra.mxu0 %v1163_v40  ;;  %1090 = vmatmul.mubr.bf16.gmra.mxu1 %v896_v44 }
  0x33   :  { %1135 = vmatpush3.bf16.msra.mxu1 %v1163_v40  ;;  %1103 = vmatprep.subr.bf16.mxu0 %v1168_v45 }
  0x34   :  { %1128 = vmatprep.subr.bf16.mxu1 %v1168_v45  ;;  %1065 = vmatprep.mubr.bf16.mxu0 %v883_v46 }
  0x35   :  { %1093 = vmatprep.mubr.bf16.mxu1 %v897_v47 }
  0x36   :  { %1104 = vmatpush3.bf16.msra.mxu0 %v1168_v45 }
  0x37   :  { %1136 = vmatpush3.bf16.msra.mxu1 %v1168_v45  ;;  %1105 = vmatprep.subr.bf16.mxu0 %v1169_v50 }
  0x38   :  { %1129 = vmatprep.subr.bf16.mxu1 %v1169_v50 }
  0x39   :  { %1066 = vmatmul.mubr.bf16.gmra.mxu0 %v884_v51 }
  0x3a   :  { %1106 = vmatpush3.bf16.msra.mxu0 %v1169_v50  ;;  %1094 = vmatmul.mubr.bf16.gmra.mxu1 %v898_v52 }
  0x3b   :  { %1137 = vmatpush3.bf16.msra.mxu1 %v1169_v50  ;;  %1107 = vmatprep.subr.bf16.mxu0 %v1174_v53 }
  0x3c   :  { %1130 = vmatprep.subr.bf16.mxu1 %v1174_v53  ;;  %1113 = vmatprep.mubr.bf16.mxu0 %v1177_v54 }
  0x3d   :  { %1117 = vmatprep.mubr.bf16.mxu1 %v1178_v55 }
  0x3e   :  { %1108 = vmatpush3.bf16.msra.mxu0 %v1174_v53 }
  0x3f   :  { %1138 = vmatpush3.bf16.msra.mxu1 %v1174_v53  ;;  %1109 = vmatprep.subr.bf16.mxu0 %v1175_v56 }
  0x40   :  { %1131 = vmatprep.subr.bf16.mxu1 %v1175_v56 }
  0x42   :  { %1110 = vmatpush3.bf16.msra.mxu0 %v1175_v56 }
  0x43   :  { %1139 = vmatpush3.bf16.msra.mxu1 %v1175_v56  ;;  %1111 = vmatprep.subr.bf16.mxu0 %v1176_v57 }
  0x44   :  { %1132 = vmatprep.subr.bf16.mxu1 %v1176_v57 }
  0x46   :  { %1112 = vmatpush3.bf16.msra.mxu0 %v1176_v57 }
  0x47   :  { %1140 = vmatpush3.bf16.msra.mxu1 %v1176_v57 }
  0x49   :  { %1114 = vmatmul.mubr.bf16.vlgmr.msra.gmra.mxu0 %v1179_v58 }
  0x4a   :  { %1118 = vmatmul.mubr.bf16.vlgmr.msra.gmra.mxu1 %v1180_v59 }
  0x4b   :  { %1121 = vmatprep.mubr.bf16.mxu1 %v1181_v60 }
  0x52   :  { %1122 = vmatmul.mubr.bf16.gmra.mxu1 %v1182_v61 }
  0xe9   :  { %v1059_v62 = vpop.f32.mrf.mxu0 }
  0xea   :  { %v1087_v63 = vpop.f32.mrf.mxu1 }
  0xeb   :  { %v327_v0 = vpop.f32.mrf.mxu0  ;;  %v479_v21 = vadd.f32 %v1087_v63, %v1059_v62 }
  0xec   :  { %v470_v1 = vpop.f32.mrf.mxu1 }
  0xed   :  { %v1060_v2 = vpop.f32.mrf.mxu0  ;;  %v471_v25 = vadd.f32 %v470_v1, %v327_v0 }
  0xee   :  { %v1088_v3 = vpop.f32.mrf.mxu1 }
  0xef   :  { %v330_v4 = vpop.f32.mrf.mxu0  ;;  %v482_v32 = vadd.f32 %v1088_v3, %v1060_v2 }
  0xf0   :  { %v473_v5 = vpop.f32.mrf.mxu1 }
  0xf1   :  { %v1063_v6 = vpop.f32.mrf.mxu0  ;;  %v474_v38 = vadd.f32 %v473_v5, %v330_v4 }
  0xf2   :  { %v1091_v7 = vpop.f32.mrf.mxu1 }
  0xf3   :  { %v343_v8 = vpop.f32.mrf.mxu0  ;;  %v495_v23 = vadd.f32 %v1091_v7, %v1063_v6 }
  0xf4   :  { %v486_v9 = vpop.f32.mrf.mxu1 }
  0xf5   :  { %v1064_v10 = vpop.f32.mrf.mxu0  ;;  %v487_v28 = vadd.f32 %v486_v9, %v343_v8 }
  0xf6   :  { %v1092_v11 = vpop.f32.mrf.mxu1 }
  0xf7   :  { %v346_v12 = vpop.f32.mrf.mxu0  ;;  %v498_v35 = vadd.f32 %v1092_v11, %v1064_v10 }
  0xf8   :  { %v489_v13 = vpop.f32.mrf.mxu1 }
  0xf9   :  { %v1067_v14 = vpop.f32.mrf.mxu0  ;;  %v490_v42 = vadd.f32 %v489_v13, %v346_v12 }
  0xfa   :  { %v1095_v15 = vpop.f32.mrf.mxu1 }
  0xfb   :  { %v359_v16 = vpop.f32.mrf.mxu0  ;;  %v511_v50 = vadd.f32 %v1095_v15, %v1067_v14 }
  0xfc   :  { %v502_v17 = vpop.f32.mrf.mxu1 }
  0xfd   :  { %v1068_v18 = vpop.f32.mrf.mxu0  ;;  %v503_v54 = vadd.f32 %v502_v17, %v359_v16 }
  0xfe   :  { %v1096_v19 = vpop.f32.mrf.mxu1 }
  0xff   :  { %v362_v20 = vpop.f32.mrf.mxu0  ;;  %v514_v63 = vadd.f32 %v1096_v19, %v1068_v18 }
 0x100   :  { %v505_v22 = vpop.f32.mrf.mxu1 }
 0x101   :  { %v506_v10 = vadd.f32 %v505_v22, %v362_v20 }
 0x109   :  { %v1115_v24 = vpop.f32.mrf.mxu0 }
 0x10a   :  { %v713_v26 = vadd.f32 %v1115_v24, %v479_v21  ;;  %v1119_v27 = vpop.f32.mrf.mxu1 }
 0x10b   :  { %v717_v30 = vadd.f32 %v1119_v27, %v495_v23  ;;  %v664_v31 = vpop.f32.mrf.mxu0 }
 0x10c   :  { %v711_v33 = vadd.f32 %v664_v31, %v471_v25  ;;  %v680_v34 = vpop.f32.mrf.mxu1  ;;  %v732_v39 = vadd.f32 %v937_v29, %v713_v26 }
 0x10d   :  { %v715_v36 = vadd.f32 %v680_v34, %v487_v28  ;;  %v1116_v37 = vpop.f32.mrf.mxu0  ;;  %v736_v43 = vadd.f32 %v937_v29, %v717_v30 }
 0x10e   :  { %v714_v40 = vadd.f32 %v1116_v37, %v482_v32  ;;  %v1120_v41 = vpop.f32.mrf.mxu1  ;;  %v730_v46 = vadd.f32 %v937_v29, %v711_v33  ;;  %v744_v55 = vmax.f32 %v732_v39, 0.0 }
 0x10f   :  { %v718_v44 = vadd.f32 %v1120_v41, %v498_v35  ;;  %v667_v45 = vpop.f32.mrf.mxu0  ;;  %v734_v51 = vadd.f32 %v937_v29, %v715_v36  ;;  %v748_v59 = vmax.f32 %v736_v43, 0.0 }
 0x110   :  { %v733_v47 = vadd.f32 %v937_v29, %v714_v40  ;;  %v712_v48 = vadd.f32 %v667_v45, %v474_v38  ;;  %v683_v49 = vpop.f32.mrf.mxu1  ;;  %v742_v0 = vmax.f32 %v730_v46, 0.0 }
 0x111   :  { %v737_v52 = vadd.f32 %v937_v29, %v718_v44  ;;  %v716_v53 = vadd.f32 %v683_v49, %v490_v42  ;;  %v746_v4 = vmax.f32 %v734_v51, 0.0 }
 0x112   :  { %v745_v56 = vmax.f32 %v733_v47, 0.0  ;;  %v731_v57 = vadd.f32 %v937_v29, %v712_v48  ;;  %v1123_v58 = vpop.f32.mrf.mxu1 }
 0x113   :  { %v749_v60 = vmax.f32 %v737_v52, 0.0  ;;  %v735_v61 = vadd.f32 %v937_v29, %v716_v53  ;;  %v721_v62 = vadd.f32 %v1123_v58, %v511_v50 }
 0x114   :  { %v972_v1 = vpack.c.bf16 %v745_v56, %v744_v55  ;;  %v743_v2 = vmax.f32 %v731_v57, 0.0  ;;  %v696_v3 = vpop.f32.mrf.mxu1 }
 0x115   :  { %v982_v5 = vpack.c.bf16 %v749_v60, %v748_v59  ;;  %v747_v6 = vmax.f32 %v735_v61, 0.0  ;;  %v719_v7 = vadd.f32 %v696_v3, %v503_v54  ;;  %v740_v12 = vadd.f32 %v937_v29, %v721_v62 }
 0x116   :  { %994 = vst [vmem:[%s1322_s3 + $0x8] sm:$0xff] %v972_v1   ;;  %v967_v8 = vpack.c.bf16 %v743_v2, %v742_v0  ;;  %v1124_v9 = vpop.f32.mrf.mxu1 }
 0x117   :  { %996 = vst [vmem:[%s1322_s3 + $0x18] sm:$0xff] %v982_v5   ;;  %v977_v11 = vpack.c.bf16 %v747_v6, %v746_v4  ;;  %v722_v13 = vadd.f32 %v1124_v9, %v514_v63  ;;  %v738_v15 = vadd.f32 %v937_v29, %v719_v7  ;;  %v752_v18 = vmax.f32 %v740_v12, 0.0 }
 0x118   :  { %968 = vst [vmem:[%s1322_s3] sm:$0xff] %v967_v8   ;;  %v699_v14 = vpop.f32.mrf.mxu1 }
 0x119   :  { %995 = vst [vmem:[%s1322_s3 + $0x10] sm:$0xff] %v977_v11   ;;  %v741_v16 = vadd.f32 %v937_v29, %v722_v13  ;;  %v720_v17 = vadd.f32 %v699_v14, %v506_v10  ;;  %v750_v21 = vmax.f32 %v738_v15, 0.0 }
 0x11b   :  { %v753_v19 = vmax.f32 %v741_v16, 0.0  ;;  %v739_v20 = vadd.f32 %v937_v29, %v720_v17 }
 0x11d   :  { %v992_v22 = vpack.c.bf16 %v753_v19, %v752_v18  ;;  %v751_v23 = vmax.f32 %v739_v20, 0.0 }
 0x11f   :  { %998 = vst [vmem:[%s1322_s3 + $0x28] sm:$0xff] %v992_v22   ;;  %v987_v24 = vpack.c.bf16 %v751_v23, %v750_v21 }
 0x121   :  { %997 = vst [vmem:[%s1322_s3 + $0x20] sm:$0xff] %v987_v24  }
 0x122   :  { %818 = vsyncmov [#allocation3] }
 0x125   :  { %s819_s30 = vpop.sfrf %818 }
 0x126   :  { %p950_p0 = scmp.ne.s32.totalorder %s819_s30, 0 }
 0x128   :  { %823 = shalt.err (%p950_p0)  }
 0x129   :  { %825 = vsyncmov [#allocation3 + $0x1] }
 0x12c   :  { %s826_s4 = vpop.sfrf %825 }
 0x12d   :  { %p951_p1 = scmp.ne.s32.totalorder %s826_s4, 0 }
 0x12f   :  { %830 = shalt.err (%p951_p1)  }

// kernel: global_generator_forward.14
= control target key start
LH: loop header
LB: loop body
LE: loop exit
PB: predicated region body
PF: predicated region fallthrough
CT: control target
= control target key end

     0   :  { %s1418_s0 = inlined_call_operand.vmem [shape: bf16[112,128], index: 0, kind: input, shape index: {}]   ;;  %s1419_s1 = inlined_call_operand.vmem [shape: bf16[3,128,128], index: 1, kind: input, shape index: {}]   ;;  %s1420_s2 = inlined_call_operand.vmem [shape: f32[1,128], index: 2, kind: input, shape index: {}]   ;;  %s1421_s3 = inlined_call_operand.vmem [shape: bf16[96,128], index: 3, kind: input, shape index: {}]   ;;  %s1422_s4 = inlined_call_operand.vmem [shape: bf16[96,128], index: 4, kind: output, shape index: {}]  }
   0x1   :  { %v63_v0 = vld [vmem:[%s1418_s0] sm:$0xff]  ;;  %v65_v1 = vld [vmem:[%s1418_s0 + $0x8] sm:$0xff]  ;;  %v67_v2 = vld [vmem:[%s1418_s0 + $0x10] sm:$0xff] }
   0x2   :  { %64 = vst [vmem:[#allocation2] sm:$0xff] %v63_v0  ;;  %66 = vst [vmem:[#allocation2 + $0x8] sm:$0xff] %v65_v1  ;;  %v69_v3 = vld [vmem:[%s1418_s0 + $0x18] sm:$0xff]  ;;  %v71_v4 = vld [vmem:[%s1418_s0 + $0x20] sm:$0xff] }
   0x3   :  { %68 = vst [vmem:[#allocation2 + $0x10] sm:$0xff] %v67_v2  ;;  %v73_v5 = vld [vmem:[%s1418_s0 + $0x28] sm:$0xff]  ;;  %70 = vst [vmem:[#allocation2 + $0x18] sm:$0xff] %v69_v3  ;;  %v75_v6 = vld [vmem:[%s1418_s0 + $0x30] sm:$0xff] }
   0x4   :  { %72 = vst [vmem:[#allocation2 + $0x20] sm:$0xff] %v71_v4  ;;  %74 = vst [vmem:[#allocation2 + $0x28] sm:$0xff] %v73_v5 }
   0x5   :  { %76 = vst [vmem:[#allocation2 + $0x30] sm:$0xff] %v75_v6 }
   0x6   :  { %84 = vsyncadd [#allocation3], 896 }
   0x7   :  { %1239 = dma.done.wait [#allocation3], 896 }
   0x8   :  { %1240 = vsyncadd [#allocation3], 4294966400  ;;  %v1197_v7 = vld [vmem:[%s1419_s1 + $0x78] sm:$0xff]   ;;  %v1199_v9 = vld [vmem:[%s1419_s1 + $0x70] sm:$0xff]  }
   0x9   :  { %v1198_v8 = vld [vmem:[%s1419_s1 + $0x38] sm:$0xff]   ;;  %1097 = vmatprep.subr.bf16.mxu0 %v1197_v7  ;;  %v1200_v10 = vld [vmem:[%s1419_s1 + $0x30] sm:$0xff]   ;;  %v1201_v11 = vld [vmem:[%s1419_s1 + $0x68] sm:$0xff]  }
   0xa   :  { %1125 = vmatprep.subr.bf16.mxu1 %v1198_v8  ;;  %1098 = vmatpush3.bf16.msra.mxu0 %v1197_v7  ;;  %v1202_v12 = vld [vmem:[%s1419_s1 + $0x28] sm:$0xff]   ;;  %v1203_v13 = vld [vmem:[%s1419_s1 + $0x60] sm:$0xff]   ;;  %v1205_v15 = vld [vmem:[%s1419_s1 + $0x58] sm:$0xff]  }
   0xb   :  { %1126 = vmatpush3.bf16.msra.mxu1 %v1198_v8  ;;  %1099 = vmatprep.subr.bf16.mxu0 %v1199_v9  ;;  %v1204_v14 = vld [vmem:[%s1419_s1 + $0x20] sm:$0xff]   ;;  %v1206_v16 = vld [vmem:[%s1419_s1 + $0x18] sm:$0xff]   ;;  %v1207_v17 = vld [vmem:[%s1419_s1 + $0x50] sm:$0xff]  }
   0xc   :  { %1127 = vmatprep.subr.bf16.mxu1 %v1200_v10  ;;  %v167_v18 = vld [vmem:[#allocation2 + $0x4] sm:$0xf]  ;;  %v168_v19 = vld [vmem:[#allocation2 + $0x8] sm:$0xf]  ;;  %v1208_v20 = vld [vmem:[%s1419_s1 + $0x10] sm:$0xff]  }
   0xd   :  { %v906_v21 = vcombine.low %v167_v18, %v168_v19  ;;  %v166_v22 = vld [vmem:[#allocation2] sm:$0xf]  ;;  %v1209_v24 = vld [vmem:[%s1419_s1 + $0x48] sm:$0xff]   ;;  %v170_v29 = vld [vmem:[#allocation2 + $0x10] sm:$0xf] }
   0xe   :  { %1100 = vmatpush3.bf16.msra.mxu0 %v1199_v9  ;;  %v920_v23 = vcombine.low %v166_v22, %v167_v18  ;;  %v1210_v25 = vld [vmem:[%s1419_s1 + $0x8] sm:$0xff]   ;;  %v1211_v26 = vld [vmem:[%s1419_s1 + $0x40] sm:$0xff]   ;;  %v1217_v30 = vld [vmem:[%s1419_s1 + $0xb8] sm:$0xff]  }
   0xf   :  { %1128 = vmatpush3.bf16.msra.mxu1 %v1200_v10  ;;  %1101 = vmatprep.subr.bf16.mxu0 %v1201_v11  ;;  %v1212_v27 = vld [vmem:[%s1419_s1] sm:$0xff]   ;;  %v169_v28 = vld [vmem:[#allocation2 + $0xc] sm:$0xf]  ;;  %v171_v31 = vld [vmem:[#allocation2 + $0x14] sm:$0xf] }
  0x10   :  { %1129 = vmatprep.subr.bf16.mxu1 %v1202_v12  ;;  %1113 = vmatprep.mubr.bf16.mxu0 %v906_v21  ;;  %v907_v32 = vcombine.low %v169_v28, %v170_v29  ;;  %v172_v33 = vld [vmem:[#allocation2 + $0x18] sm:$0xf]  ;;  %v921_v34 = vcombine.low %v168_v19, %v169_v28  ;;  %v1218_v35 = vld [vmem:[%s1419_s1 + $0xb0] sm:$0xff]   ;;  %v922_v37 = vcombine.low %v170_v29, %v171_v31  ;;  %v173_v38 = vld [vmem:[#allocation2 + $0x1c] sm:$0xf] }
  0x11   :  { %1141 = vmatprep.mubr.bf16.mxu1 %v920_v23  ;;  %v908_v36 = vcombine.low %v171_v31, %v172_v33  ;;  %v174_v39 = vld [vmem:[#allocation2 + $0x20] sm:$0xf]  ;;  %v1219_v40 = vld [vmem:[%s1419_s1 + $0xa8] sm:$0xff]   ;;  %v175_v42 = vld [vmem:[#allocation2 + $0x24] sm:$0xf]  ;;  %v923_v44 = vcombine.low %v172_v33, %v173_v38 }
  0x12   :  { %1102 = vmatpush3.bf16.msra.mxu0 %v1201_v11  ;;  %v909_v41 = vcombine.low %v173_v38, %v174_v39  ;;  %v176_v43 = vld [vmem:[#allocation2 + $0x28] sm:$0xf]  ;;  %v1224_v45 = vld [vmem:[%s1419_s1 + $0xa0] sm:$0xff]   ;;  %v924_v47 = vcombine.low %v174_v39, %v175_v42  ;;  %v177_v48 = vld [vmem:[#allocation2 + $0x2c] sm:$0xf] }
  0x13   :  { %1130 = vmatpush3.bf16.msra.mxu1 %v1202_v12  ;;  %1103 = vmatprep.subr.bf16.mxu0 %v1203_v13  ;;  %v910_v46 = vcombine.low %v175_v42, %v176_v43  ;;  %v194_v49 = vld [vmem:[#allocation2 + $0x30] sm:$0xf]  ;;  %v1225_v50 = vld [vmem:[%s1419_s1 + $0x98] sm:$0xff]   ;;  %v925_v52 = vcombine.low %v176_v43, %v177_v48  ;;  %v1233_v54 = vld [vmem:[#allocation2 + $0x8] sm:$0xff]  }
  0x14   :  { %1131 = vmatprep.subr.bf16.mxu1 %v1204_v14  ;;  %v911_v51 = vcombine.low %v177_v48, %v194_v49  ;;  %v1230_v53 = vld [vmem:[%s1419_s1 + $0x90] sm:$0xff]   ;;  %v1234_v55 = vld [vmem:[#allocation2 + $0x18] sm:$0xff]   ;;  %v1231_v56 = vld [vmem:[%s1419_s1 + $0x88] sm:$0xff]  }
  0x15   :  { %v1232_v57 = vld [vmem:[%s1419_s1 + $0x80] sm:$0xff]   ;;  %v1235_v58 = vld [vmem:[#allocation2 + $0x10] sm:$0xff]   ;;  %v1237_v60 = vld [vmem:[#allocation2 + $0x28] sm:$0xff]  }
  0x16   :  { %1104 = vmatpush3.bf16.msra.mxu0 %v1203_v13  ;;  %v1236_v59 = vld [vmem:[#allocation2 + $0x20] sm:$0xff]   ;;  %v1238_v61 = vld [vmem:[#allocation2 + $0x30] sm:$0xff]   ;;  %v1045_v23 = vld [vmem:[%s1421_s3 + $0x8] sm:$0xff]  }
  0x17   :  { %1132 = vmatpush3.bf16.msra.mxu1 %v1204_v14  ;;  %1105 = vmatprep.subr.bf16.mxu0 %v1205_v15  ;;  %v1046_v31 = vld [vmem:[%s1421_s3 + $0x10] sm:$0xff]   ;;  %v1378_v33 = vld [vmem:[%s1420_s2] ss:$0 sm:$0xff] }
  0x18   :  { %1133 = vmatprep.subr.bf16.mxu1 %v1206_v16 }
  0x1a   :  { %1106 = vmatpush3.bf16.msra.mxu0 %v1205_v15 }
  0x1b   :  { %1134 = vmatpush3.bf16.msra.mxu1 %v1206_v16  ;;  %1107 = vmatprep.subr.bf16.mxu0 %v1207_v17 }
  0x1c   :  { %1135 = vmatprep.subr.bf16.mxu1 %v1208_v20 }
  0x1e   :  { %1108 = vmatpush3.bf16.msra.mxu0 %v1207_v17 }
  0x1f   :  { %1136 = vmatpush3.bf16.msra.mxu1 %v1208_v20  ;;  %1109 = vmatprep.subr.bf16.mxu0 %v1209_v24 }
  0x20   :  { %1137 = vmatprep.subr.bf16.mxu1 %v1210_v25 }
  0x22   :  { %1110 = vmatpush3.bf16.msra.mxu0 %v1209_v24 }
  0x23   :  { %1138 = vmatpush3.bf16.msra.mxu1 %v1210_v25  ;;  %1111 = vmatprep.subr.bf16.mxu0 %v1211_v26 }
  0x24   :  { %1139 = vmatprep.subr.bf16.mxu1 %v1212_v27 }
  0x26   :  { %1112 = vmatpush3.bf16.msra.mxu0 %v1211_v26  ;;  %v1047_v26 = vld [vmem:[%s1421_s3 + $0x18] sm:$0xff]  }
  0x27   :  { %1140 = vmatpush3.bf16.msra.mxu1 %v1212_v27  ;;  %1153 = vmatprep.subr.bf16.mxu0 %v1217_v30  ;;  %v992_v27 = vld [vmem:[%s1421_s3] sm:$0xff]   ;;  %v1005_v38 = vunpack.c.l.bf16 %v1047_v26 }
  0x28   :  { %1181 = vmatprep.subr.bf16.mxu1 %v1217_v30 }
  0x29   :  { %1114 = vmatmul.mubr.bf16.vlgmr.msra.gmra.mxu0 %v907_v32 }
  0x2a   :  { %1142 = vmatmul.mubr.bf16.vlgmr.msra.gmra.mxu1 %v921_v34  ;;  %1154 = vmatpush3.bf16.msra.mxu0 %v1217_v30  ;;  %v997_v34 = vunpack.c.l.bf16 %v1045_v23 }
  0x2b   :  { %1189 = vmatpush3.bf16.msra.mxu1 %v1217_v30  ;;  %1155 = vmatprep.subr.bf16.mxu0 %v1218_v35 }
  0x2c   :  { %1182 = vmatprep.subr.bf16.mxu1 %v1218_v35  ;;  %1117 = vmatprep.mubr.bf16.mxu0 %v908_v36 }
  0x2d   :  { %1145 = vmatprep.mubr.bf16.mxu1 %v922_v37 }
  0x2e   :  { %1156 = vmatpush3.bf16.msra.mxu0 %v1218_v35 }
  0x2f   :  { %1190 = vmatpush3.bf16.msra.mxu1 %v1218_v35  ;;  %1157 = vmatprep.subr.bf16.mxu0 %v1219_v40 }
  0x30   :  { %1183 = vmatprep.subr.bf16.mxu1 %v1219_v40 }
  0x31   :  { %1118 = vmatmul.mubr.bf16.gmra.mxu0 %v909_v41 }
  0x32   :  { %1158 = vmatpush3.bf16.msra.mxu0 %v1219_v40  ;;  %1146 = vmatmul.mubr.bf16.gmra.mxu1 %v923_v44  ;;  %v1001_v44 = vunpack.c.l.bf16 %v1046_v31 }
  0x33   :  { %1191 = vmatpush3.bf16.msra.mxu1 %v1219_v40  ;;  %1159 = vmatprep.subr.bf16.mxu0 %v1224_v45  ;;  %v993_v40 = vunpack.c.l.bf16 %v992_v27 }
  0x34   :  { %1184 = vmatprep.subr.bf16.mxu1 %v1224_v45  ;;  %1121 = vmatprep.mubr.bf16.mxu0 %v910_v46  ;;  %v998_v46 = vunpack.c.h.bf16 %v1045_v23 }
  0x35   :  { %1149 = vmatprep.mubr.bf16.mxu1 %v924_v47 }
  0x36   :  { %1160 = vmatpush3.bf16.msra.mxu0 %v1224_v45 }
  0x37   :  { %1192 = vmatpush3.bf16.msra.mxu1 %v1224_v45  ;;  %1161 = vmatprep.subr.bf16.mxu0 %v1225_v50 }
  0x38   :  { %1185 = vmatprep.subr.bf16.mxu1 %v1225_v50 }
  0x39   :  { %1122 = vmatmul.mubr.bf16.gmra.mxu0 %v911_v51  ;;  %v1006_v51 = vunpack.c.h.bf16 %v1047_v26 }
  0x3a   :  { %1162 = vmatpush3.bf16.msra.mxu0 %v1225_v50  ;;  %1150 = vmatmul.mubr.bf16.gmra.mxu1 %v925_v52 }
  0x3b   :  { %1193 = vmatpush3.bf16.msra.mxu1 %v1225_v50  ;;  %1163 = vmatprep.subr.bf16.mxu0 %v1230_v53 }
  0x3c   :  { %1186 = vmatprep.subr.bf16.mxu1 %v1230_v53  ;;  %1169 = vmatprep.mubr.bf16.mxu0 %v1233_v54 }
  0x3d   :  { %1173 = vmatprep.mubr.bf16.mxu1 %v1234_v55 }
  0x3e   :  { %1164 = vmatpush3.bf16.msra.mxu0 %v1230_v53 }
  0x3f   :  { %1194 = vmatpush3.bf16.msra.mxu1 %v1230_v53  ;;  %1165 = vmatprep.subr.bf16.mxu0 %v1231_v56 }
  0x40   :  { %1187 = vmatprep.subr.bf16.mxu1 %v1231_v56 }
  0x42   :  { %1166 = vmatpush3.bf16.msra.mxu0 %v1231_v56 }
  0x43   :  { %1195 = vmatpush3.bf16.msra.mxu1 %v1231_v56  ;;  %1167 = vmatprep.subr.bf16.mxu0 %v1232_v57  ;;  %v994_v56 = vunpack.c.h.bf16 %v992_v27 }
  0x44   :  { %1188 = vmatprep.subr.bf16.mxu1 %v1232_v57 }
  0x46   :  { %1168 = vmatpush3.bf16.msra.mxu0 %v1232_v57 }
  0x47   :  { %1196 = vmatpush3.bf16.msra.mxu1 %v1232_v57 }
  0x49   :  { %1170 = vmatmul.mubr.bf16.vlgmr.msra.gmra.mxu0 %v1235_v58 }
  0x4a   :  { %1174 = vmatmul.mubr.bf16.vlgmr.msra.gmra.mxu1 %v1236_v59 }
  0x4b   :  { %1177 = vmatprep.mubr.bf16.mxu1 %v1237_v60 }
  0x52   :  { %1178 = vmatmul.mubr.bf16.gmra.mxu1 %v1238_v61  ;;  %v1002_v61 = vunpack.c.h.bf16 %v1046_v31 }
  0xe9   :  { %v1115_v62 = vpop.f32.mrf.mxu0 }
  0xea   :  { %v1143_v63 = vpop.f32.mrf.mxu1 }
  0xeb   :  { %v330_v0 = vpop.f32.mrf.mxu0  ;;  %v482_v21 = vadd.f32 %v1143_v63, %v1115_v62 }
  0xec   :  { %v473_v1 = vpop.f32.mrf.mxu1 }
  0xed   :  { %v1116_v2 = vpop.f32.mrf.mxu0  ;;  %v474_v28 = vadd.f32 %v473_v1, %v330_v0 }
  0xee   :  { %v1144_v3 = vpop.f32.mrf.mxu1 }
  0xef   :  { %v333_v4 = vpop.f32.mrf.mxu0  ;;  %v485_v37 = vadd.f32 %v1144_v3, %v1116_v2 }
  0xf0   :  { %v476_v5 = vpop.f32.mrf.mxu1 }
  0xf1   :  { %v1119_v6 = vpop.f32.mrf.mxu0  ;;  %v477_v47 = vadd.f32 %v476_v5, %v333_v4 }
  0xf2   :  { %v1147_v7 = vpop.f32.mrf.mxu1 }
  0xf3   :  { %v346_v8 = vpop.f32.mrf.mxu0  ;;  %v498_v24 = vadd.f32 %v1147_v7, %v1119_v6 }
  0xf4   :  { %v489_v9 = vpop.f32.mrf.mxu1 }
  0xf5   :  { %v1120_v10 = vpop.f32.mrf.mxu0  ;;  %v490_v32 = vadd.f32 %v489_v9, %v346_v8 }
  0xf6   :  { %v1148_v11 = vpop.f32.mrf.mxu1 }
  0xf7   :  { %v349_v12 = vpop.f32.mrf.mxu0  ;;  %v501_v42 = vadd.f32 %v1148_v11, %v1120_v10  ;;  %v1049_v11 = vld [vmem:[%s1421_s3 + $0x28] sm:$0xff]  }
  0xf8   :  { %v492_v13 = vpop.f32.mrf.mxu1  ;;  %v1013_v27 = vunpack.c.l.bf16 %v1049_v11 }
  0xf9   :  { %v1123_v14 = vpop.f32.mrf.mxu0  ;;  %v493_v52 = vadd.f32 %v492_v13, %v349_v12 }
  0xfa   :  { %v1151_v15 = vpop.f32.mrf.mxu1 }
  0xfb   :  { %v362_v16 = vpop.f32.mrf.mxu0  ;;  %v514_v62 = vadd.f32 %v1151_v15, %v1123_v14 }
  0xfc   :  { %v505_v17 = vpop.f32.mrf.mxu1 }
  0xfd   :  { %v1124_v18 = vpop.f32.mrf.mxu0  ;;  %v506_v2 = vadd.f32 %v505_v17, %v362_v16 }
  0xfe   :  { %v1152_v19 = vpop.f32.mrf.mxu1 }
  0xff   :  { %v1359_v20 = vpop.f32.mrf.mxu0  ;;  %v517_v12 = vadd.f32 %v1152_v19, %v1124_v18  ;;  %v1014_v18 = vunpack.c.h.bf16 %v1049_v11 }
 0x100   :  { %v1361_v22 = vpop.f32.mrf.mxu1 }
 0x101   :  { %v509_v19 = vadd.f32 %v1361_v22, %v1359_v20 }
 0x109   :  { %v1171_v25 = vpop.f32.mrf.mxu0 }
 0x10a   :  { %v716_v29 = vadd.f32 %v1171_v25, %v482_v21  ;;  %v1175_v30 = vpop.f32.mrf.mxu1  ;;  %v1048_v25 = vld [vmem:[%s1421_s3 + $0x20] sm:$0xff]  }
 0x10b   :  { %v720_v35 = vadd.f32 %v1175_v30, %v498_v24  ;;  %v667_v36 = vpop.f32.mrf.mxu0 }
 0x10c   :  { %v714_v39 = vadd.f32 %v667_v36, %v474_v28  ;;  %v683_v41 = vpop.f32.mrf.mxu1  ;;  %v735_v48 = vadd.f32 %v1378_v33, %v716_v29  ;;  %v1010_v36 = vunpack.c.h.bf16 %v1048_v25 }
 0x10d   :  { %v718_v43 = vadd.f32 %v683_v41, %v490_v32  ;;  %v1172_v45 = vpop.f32.mrf.mxu0  ;;  %v739_v53 = vadd.f32 %v1378_v33, %v720_v35  ;;  %v1009_v32 = vunpack.c.l.bf16 %v1048_v25 }
 0x10e   :  { %v717_v49 = vadd.f32 %v1172_v45, %v485_v37  ;;  %v1176_v50 = vpop.f32.mrf.mxu1  ;;  %v733_v57 = vadd.f32 %v1378_v33, %v714_v39  ;;  %v771_v3 = vadd.f32 %v997_v34, %v735_v48 }
 0x10f   :  { %v721_v54 = vadd.f32 %v1176_v50, %v501_v42  ;;  %v670_v55 = vpop.f32.mrf.mxu0  ;;  %v737_v63 = vadd.f32 %v1378_v33, %v718_v43  ;;  %v775_v7 = vadd.f32 %v1005_v38, %v739_v53 }
 0x110   :  { %v736_v58 = vadd.f32 %v1378_v33, %v717_v49  ;;  %v715_v59 = vadd.f32 %v670_v55, %v477_v47  ;;  %v686_v60 = vpop.f32.mrf.mxu1  ;;  %v769_v13 = vadd.f32 %v993_v40, %v733_v57 }
 0x111   :  { %v740_v0 = vadd.f32 %v1378_v33, %v721_v54  ;;  %v719_v1 = vadd.f32 %v686_v60, %v493_v52  ;;  %v773_v16 = vadd.f32 %v1001_v44, %v737_v63 }
 0x112   :  { %v772_v4 = vadd.f32 %v998_v46, %v736_v58  ;;  %v734_v5 = vadd.f32 %v1378_v33, %v715_v59  ;;  %v1179_v6 = vpop.f32.mrf.mxu1 }
 0x113   :  { %v776_v8 = vadd.f32 %v1006_v51, %v740_v0  ;;  %v738_v9 = vadd.f32 %v1378_v33, %v719_v1  ;;  %v724_v10 = vadd.f32 %v1179_v6, %v514_v62 }
 0x114   :  { %v1023_v14 = vpack.c.bf16 %v772_v4, %v771_v3  ;;  %v770_v15 = vadd.f32 %v994_v56, %v734_v5  ;;  %v699_v21 = vpop.f32.mrf.mxu1 }
 0x115   :  { %v1033_v17 = vpack.c.bf16 %v776_v8, %v775_v7  ;;  %v774_v23 = vadd.f32 %v1002_v61, %v738_v9  ;;  %v722_v24 = vadd.f32 %v699_v21, %v506_v2  ;;  %v743_v30 = vadd.f32 %v1378_v33, %v724_v10 }
 0x116   :  { %1050 = vst [vmem:[%s1422_s4 + $0x8] sm:$0xff] %v1023_v14   ;;  %v1018_v26 = vpack.c.bf16 %v770_v15, %v769_v13  ;;  %v1180_v28 = vpop.f32.mrf.mxu1 }
 0x117   :  { %1052 = vst [vmem:[%s1422_s4 + $0x18] sm:$0xff] %v1033_v17   ;;  %v1028_v29 = vpack.c.bf16 %v774_v23, %v773_v16  ;;  %v725_v31 = vadd.f32 %v1180_v28, %v517_v12  ;;  %v741_v20 = vadd.f32 %v1378_v33, %v722_v24  ;;  %v779_v37 = vadd.f32 %v1013_v27, %v743_v30 }
 0x118   :  { %1019 = vst [vmem:[%s1422_s4] sm:$0xff] %v1018_v26   ;;  %v702_v34 = vpop.f32.mrf.mxu1 }
 0x119   :  { %1051 = vst [vmem:[%s1422_s4 + $0x10] sm:$0xff] %v1028_v29   ;;  %v744_v22 = vadd.f32 %v1378_v33, %v725_v31  ;;  %v723_v35 = vadd.f32 %v702_v34, %v509_v19  ;;  %v777_v40 = vadd.f32 %v1009_v32, %v741_v20 }
 0x11b   :  { %v780_v38 = vadd.f32 %v1014_v18, %v744_v22  ;;  %v742_v39 = vadd.f32 %v1378_v33, %v723_v35 }
 0x11d   :  { %v1043_v41 = vpack.c.bf16 %v780_v38, %v779_v37  ;;  %v778_v42 = vadd.f32 %v1010_v36, %v742_v39 }
 0x11f   :  { %1054 = vst [vmem:[%s1422_s4 + $0x28] sm:$0xff] %v1043_v41   ;;  %v1038_v43 = vpack.c.bf16 %v778_v42, %v777_v40 }
 0x121   :  { %1053 = vst [vmem:[%s1422_s4 + $0x20] sm:$0xff] %v1038_v43  }
 0x122   :  { %845 = vsyncmov [#allocation3] }
 0x125   :  { %s846_s19 = vpop.sfrf %845 }
 0x126   :  { %p977_p0 = scmp.ne.s32.totalorder %s846_s19, 0 }
 0x128   :  { %850 = shalt.err (%p977_p0)  }
 0x129   :  { %852 = vsyncmov [#allocation3 + $0x1] }
 0x12c   :  { %s853_s20 = vpop.sfrf %852 }
 0x12d   :  { %p978_p1 = scmp.ne.s32.totalorder %s853_s20, 0 }
 0x12f   :  { %857 = shalt.err (%p978_p1)  }

// kernel: global_generator_forward.19
= control target key start
LH: loop header
LB: loop body
LE: loop exit
PB: predicated region body
PF: predicated region fallthrough
CT: control target
= control target key end

     0   :  { %s5678_s12 = smov 0   ;;  %s5680_s13 = smov 0   ;;  %s6877_s0 = inlined_call_operand.vmem [shape: bf16[1200,128], index: 0, kind: input, shape index: {}]   ;;  %s6878_s1 = inlined_call_operand.vmem [shape: bf16[7,128,128], index: 1, kind: input, shape index: {}]   ;;  %s6879_s2 = inlined_call_operand.vmem [shape: f32[1,128], index: 2, kind: input, shape index: {}]   ;;  %s6880_s3 = inlined_call_operand.vmem [shape: bf16[1056,128], index: 3, kind: output, shape index: {}]  }
   0x1   :  { %s5682_s14 = smov 0  }
   0x2 LB: > { %s25_s15 = sadd.s32 1, %s5652_s13  ;;  %p4121_p0 = scmp.ge.s32.totalorder %s5656_s14, 1  ;;  %s5656_s14 = sphi %s5682_s14, %s13_s14   ;;  %s5652_s13 = sphi %s5680_s13, %s6882_s13   ;;  %s5648_s12 = sphi %s5678_s12, %s6881_s12  }
   0x3   : > { %p27_p1 = scmp.ge.s32.totalorder %s25_s15, 3  ;;  %p134_p2 = scmp.lt.s32.totalorder %s5656_s14, 4 }
   0x5   : > { %s6884_s15 = smov (%p27_p1, %s25_s15), 0  ;;  %p135_p3 = pnand %p4121_p0, %p134_p2 }
   0x6   : > { %s168_s16 = smul.u32 (!%p135_p3), 44, %s5648_s12  ;;  %s179_s17 = ssub.s32 (!%p135_p3), 0, %s5648_s12 }
   0x7   : > { %138 = sbr.rel (%p135_p3) target bundleno = 616 (0x268), region = 28  ;;  %p190_p4 = scmp.eq.s32.totalorder (!%p135_p3), %s5648_s12, 0 }
   0x8   : > { %p169_p5 = scmp.lt.s32.totalorder (!%p135_p3), %s168_s16, 131  ;;  %s4123_s18 = smin.u32 (!%p135_p3), %s5648_s12, %s179_s17 }
   0x9   : > { %p178_p6 = scmp.lt.s32.totalorder (!%p135_p3), %s5648_s12, 0  ;;  %s181_s19 = sand.u32 (!%p135_p3), 1, %s4123_s18  }
   0xa   : > { %s182_s20 = ssub.s32 (!%p135_p3), 0, %s181_s19 }
   0xc   : > { %s6886_s16 = smov (!%p169_p5, %s168_s16), 131  ;;  %s6888_s20 = smov (!%p178_p6, %s182_s20), %s181_s19  ;;  %v229_v0 = vld [vmem:[%s6877_s0] sm:$0xff] (%p190_p4)  ;;  %v231_v1 = vld [vmem:[%s6877_s0 + $0x8] sm:$0xff] (%p190_p4)  ;;  %v233_v2 = vld [vmem:[%s6877_s0 + $0x10] sm:$0xff] (%p190_p4) }
   0xd   : > { %s4122_s21 = sshll.u32 %s6886_s16, 2  ;;  %p4125_p7 = scmp.lt.s32.totalorder %s6888_s20, 0  ;;  %230 = vst [vmem:[#allocation2] sm:$0xff] (%p190_p4), %v229_v0  ;;  %232 = vst [vmem:[#allocation2 + $0x8] sm:$0xff] (%p190_p4), %v231_v1  ;;  %v235_v3 = vld [vmem:[%s6877_s0 + $0x18] sm:$0xff] (%p190_p4)  ;;  %v237_v4 = vld [vmem:[%s6877_s0 + $0x20] sm:$0xff] (%p190_p4) }
   0xe   : > { %s5706_s24 = scalar_lea.vmem %s6880_s3, %s4122_s21  ;;  %s188_s25 = sadd.s32 2, %s6888_s20  ;;  %234 = vst [vmem:[#allocation2 + $0x10] sm:$0xff] (%p190_p4), %v233_v2  ;;  %v239_v5 = vld [vmem:[%s6877_s0 + $0x28] sm:$0xff] (%p190_p4)  ;;  %236 = vst [vmem:[#allocation2 + $0x18] sm:$0xff] (%p190_p4), %v235_v3  ;;  %v241_v6 = vld [vmem:[%s6877_s0 + $0x30] sm:$0xff] (%p190_p4) }
   0xf   : > { %s6890_s25 = smov (!%p4125_p7, %s188_s25), %s6888_s20  ;;  %195 = sbr.rel (!%p190_p4) target bundleno = 30 (0x1e), region = 32  ;;  %238 = vst [vmem:[#allocation2 + $0x20] sm:$0xff] (%p190_p4), %v237_v4  ;;  %240 = vst [vmem:[#allocation2 + $0x28] sm:$0xff] (%p190_p4), %v239_v5  ;;  %v243_v7 = vld [vmem:[%s6877_s0 + $0x38] sm:$0xff] (%p190_p4)  ;;  %v245_v8 = vld [vmem:[%s6877_s0 + $0x40] sm:$0xff] (%p190_p4) }
  0x10   : > { %242 = vst [vmem:[#allocation2 + $0x30] sm:$0xff] (%p190_p4), %v241_v6  ;;  %244 = vst [vmem:[#allocation2 + $0x38] sm:$0xff] (%p190_p4), %v243_v7  ;;  %v247_v9 = vld [vmem:[%s6877_s0 + $0x48] sm:$0xff] (%p190_p4)  ;;  %v249_v10 = vld [vmem:[%s6877_s0 + $0x50] sm:$0xff] (%p190_p4) }
  0x11   : > { %246 = vst [vmem:[#allocation2 + $0x40] sm:$0xff] (%p190_p4), %v245_v8  ;;  %v251_v11 = vld [vmem:[%s6877_s0 + $0x58] sm:$0xff] (%p190_p4)  ;;  %248 = vst [vmem:[#allocation2 + $0x48] sm:$0xff] (%p190_p4), %v247_v9  ;;  %v253_v12 = vld [vmem:[%s6877_s0 + $0x60] sm:$0xff] (%p190_p4) }
  0x12   : > { %250 = vst [vmem:[#allocation2 + $0x50] sm:$0xff] (%p190_p4), %v249_v10  ;;  %252 = vst [vmem:[#allocation2 + $0x58] sm:$0xff] (%p190_p4), %v251_v11  ;;  %v255_v13 = vld [vmem:[%s6877_s0 + $0x68] sm:$0xff] (%p190_p4)  ;;  %v257_v14 = vld [vmem:[%s6877_s0 + $0x70] sm:$0xff] (%p190_p4) }
  0x13   : > { %254 = vst [vmem:[#allocation2 + $0x60] sm:$0xff] (%p190_p4), %v253_v12  ;;  %256 = vst [vmem:[#allocation2 + $0x68] sm:$0xff] (%p190_p4), %v255_v13  ;;  %v259_v15 = vld [vmem:[%s6877_s0 + $0x78] sm:$0xff] (%p190_p4)  ;;  %v261_v16 = vld [vmem:[%s6877_s0 + $0x80] sm:$0xff] (%p190_p4) }
  0x14   : > { %258 = vst [vmem:[#allocation2 + $0x70] sm:$0xff] %v257_v14  ;;  %v263_v17 = vld [vmem:[%s6877_s0 + $0x88] sm:$0xff]  ;;  %260 = vst [vmem:[#allocation2 + $0x78] sm:$0xff] %v259_v15  ;;  %v265_v18 = vld [vmem:[%s6877_s0 + $0x90] sm:$0xff] }
  0x15   : > { %262 = vst [vmem:[#allocation2 + $0x80] sm:$0xff] %v261_v16  ;;  %264 = vst [vmem:[#allocation2 + $0x88] sm:$0xff] %v263_v17  ;;  %v267_v19 = vld [vmem:[%s6877_s0 + $0x98] sm:$0xff]  ;;  %v269_v20 = vld [vmem:[%s6877_s0 + $0xa0] sm:$0xff] }
  0x16   : > { %266 = vst [vmem:[#allocation2 + $0x90] sm:$0xff] %v265_v18  ;;  %268 = vst [vmem:[#allocation2 + $0x98] sm:$0xff] %v267_v19  ;;  %v271_v21 = vld [vmem:[%s6877_s0 + $0xa8] sm:$0xff]  ;;  %v273_v22 = vld [vmem:[%s6877_s0 + $0xb0] sm:$0xff] }
  0x17   : > { %270 = vst [vmem:[#allocation2 + $0xa0] sm:$0xff] %v269_v20  ;;  %v275_v23 = vld [vmem:[%s6877_s0 + $0xb8] sm:$0xff]  ;;  %272 = vst [vmem:[#allocation2 + $0xa8] sm:$0xff] %v271_v21  ;;  %v277_v24 = vld [vmem:[%s6877_s0 + $0xc0] sm:$0xff] }
  0x18   : > { %274 = vst [vmem:[#allocation2 + $0xb0] sm:$0xff] %v273_v22  ;;  %276 = vst [vmem:[#allocation2 + $0xb8] sm:$0xff] %v275_v23  ;;  %v279_v25 = vld [vmem:[%s6877_s0 + $0xc8] sm:$0xff]  ;;  %v281_v26 = vld [vmem:[%s6877_s0 + $0xd0] sm:$0xff] }
  0x19   : > { %278 = vst [vmem:[#allocation2 + $0xc0] sm:$0xff] %v277_v24  ;;  %280 = vst [vmem:[#allocation2 + $0xc8] sm:$0xff] %v279_v25  ;;  %v283_v27 = vld [vmem:[%s6877_s0 + $0xd8] sm:$0xff]  ;;  %v285_v28 = vld [vmem:[%s6877_s0 + $0xe0] sm:$0xff] }
  0x1a   : > { %282 = vst [vmem:[#allocation2 + $0xd0] sm:$0xff] %v281_v26  ;;  %v287_v29 = vld [vmem:[%s6877_s0 + $0xe8] sm:$0xff]  ;;  %284 = vst [vmem:[#allocation2 + $0xd8] sm:$0xff] %v283_v27  ;;  %v289_v30 = vld [vmem:[%s6877_s0 + $0xf0] sm:$0xff] }
  0x1b   : > { %286 = vst [vmem:[#allocation2 + $0xe0] sm:$0xff] %v285_v28  ;;  %288 = vst [vmem:[#allocation2 + $0xe8] sm:$0xff] %v287_v29 }
  0x1c   : > { %290 = vst [vmem:[#allocation2 + $0xf0] sm:$0xff] %v289_v30 }
  0x1d   : > { %298 = vsyncadd [#allocation3], 3968 }
  0x1e PF: > { %s302_s23 = scalar_lea.sflag [#allocation3], %s6890_s25 }
  0x1f   : > { %5644 = dma.done.wait %s302_s23, 3968 }
  0x20   : > { %5645 = vsyncadd %s302_s23, 4294963328  ;;  %s307_s26 = sadd.s32 1, %s5648_s12 }
  0x21   : > { %p4127_p8 = scmp.ge.s32.totalorder %s307_s26, 3 }
  0x22   : > { %s312_s27 = smul.u32 (!%p4127_p8), 352, %s307_s26  ;;  %s313_s28 = ssub.s32 (!%p4127_p8), 1, %s6890_s25 }
  0x23   : > { %311 = sbr.rel (%p4127_p8) target bundleno = 58 (0x3a), region = 74  ;;  %s321_s8 = scalar_lea.sflag (!%p4127_p8), [#allocation3], %s313_s28 }
  0x24   : > { %s4487_s29 = smul.u32 (!%p4127_p8), 248, %s313_s28  ;;  %s314_s30 = sshra.s32 (!%p4127_p8), %s312_s27, 3 }
  0x25   : > { %s4128_s4 = sshll.u32 (!%p4127_p8), %s314_s30, 2 }
  0x26   : > { %s5811_s7 = scalar_lea.vmem (!%p4127_p8), %s6877_s0, %s4128_s4  ;;  %s5816_s12 = scalar_lea.vmem (!%p4127_p8), [#allocation2], %s4487_s29 }
  0x28   : > { %v355_v31 = vld [vmem:[%s5811_s7] sm:$0xff]  ;;  %v357_v32 = vld [vmem:[%s5811_s7 + $0x8] sm:$0xff]  ;;  %v359_v33 = vld [vmem:[%s5811_s7 + $0x10] sm:$0xff] }
  0x29   : > { %356 = vst [vmem:[%s5816_s12] sm:$0xff] %v355_v31  ;;  %358 = vst [vmem:[%s5816_s12 + $0x8] sm:$0xff] %v357_v32  ;;  %v361_v34 = vld [vmem:[%s5811_s7 + $0x18] sm:$0xff]  ;;  %v363_v35 = vld [vmem:[%s5811_s7 + $0x20] sm:$0xff] }
  0x2a   : > { %360 = vst [vmem:[%s5816_s12 + $0x10] sm:$0xff] %v359_v33  ;;  %v365_v36 = vld [vmem:[%s5811_s7 + $0x28] sm:$0xff]  ;;  %362 = vst [vmem:[%s5816_s12 + $0x18] sm:$0xff] %v361_v34  ;;  %v367_v37 = vld [vmem:[%s5811_s7 + $0x30] sm:$0xff] }
  0x2b   : > { %364 = vst [vmem:[%s5816_s12 + $0x20] sm:$0xff] %v363_v35  ;;  %366 = vst [vmem:[%s5816_s12 + $0x28] sm:$0xff] %v365_v36  ;;  %v369_v38 = vld [vmem:[%s5811_s7 + $0x38] sm:$0xff]  ;;  %v371_v39 = vld [vmem:[%s5811_s7 + $0x40] sm:$0xff] }
  0x2c   : > { %368 = vst [vmem:[%s5816_s12 + $0x30] sm:$0xff] %v367_v37  ;;  %370 = vst [vmem:[%s5816_s12 + $0x38] sm:$0xff] %v369_v38  ;;  %v373_v40 = vld [vmem:[%s5811_s7 + $0x48] sm:$0xff]  ;;  %v375_v41 = vld [vmem:[%s5811_s7 + $0x50] sm:$0xff] }
  0x2d   : > { %372 = vst [vmem:[%s5816_s12 + $0x40] sm:$0xff] %v371_v39  ;;  %v377_v42 = vld [vmem:[%s5811_s7 + $0x58] sm:$0xff]  ;;  %374 = vst [vmem:[%s5816_s12 + $0x48] sm:$0xff] %v373_v40  ;;  %v379_v43 = vld [vmem:[%s5811_s7 + $0x60] sm:$0xff] }
  0x2e   : > { %376 = vst [vmem:[%s5816_s12 + $0x50] sm:$0xff] %v375_v41  ;;  %378 = vst [vmem:[%s5816_s12 + $0x58] sm:$0xff] %v377_v42  ;;  %v381_v44 = vld [vmem:[%s5811_s7 + $0x68] sm:$0xff]  ;;  %v383_v45 = vld [vmem:[%s5811_s7 + $0x70] sm:$0xff] }
  0x2f   : > { %380 = vst [vmem:[%s5816_s12 + $0x60] sm:$0xff] %v379_v43  ;;  %382 = vst [vmem:[%s5816_s12 + $0x68] sm:$0xff] %v381_v44  ;;  %v385_v46 = vld [vmem:[%s5811_s7 + $0x78] sm:$0xff]  ;;  %v387_v47 = vld [vmem:[%s5811_s7 + $0x80] sm:$0xff] }
  0x30   : > { %384 = vst [vmem:[%s5816_s12 + $0x70] sm:$0xff] %v383_v45  ;;  %v389_v48 = vld [vmem:[%s5811_s7 + $0x88] sm:$0xff]  ;;  %386 = vst [vmem:[%s5816_s12 + $0x78] sm:$0xff] %v385_v46  ;;  %v391_v49 = vld [vmem:[%s5811_s7 + $0x90] sm:$0xff] }
  0x31   : > { %388 = vst [vmem:[%s5816_s12 + $0x80] sm:$0xff] %v387_v47  ;;  %390 = vst [vmem:[%s5816_s12 + $0x88] sm:$0xff] %v389_v48  ;;  %v393_v50 = vld [vmem:[%s5811_s7 + $0x98] sm:$0xff]  ;;  %v395_v51 = vld [vmem:[%s5811_s7 + $0xa0] sm:$0xff] }
  0x32   : > { %392 = vst [vmem:[%s5816_s12 + $0x90] sm:$0xff] %v391_v49  ;;  %394 = vst [vmem:[%s5816_s12 + $0x98] sm:$0xff] %v393_v50  ;;  %v397_v52 = vld [vmem:[%s5811_s7 + $0xa8] sm:$0xff]  ;;  %v399_v53 = vld [vmem:[%s5811_s7 + $0xb0] sm:$0xff] }
  0x33   : > { %396 = vst [vmem:[%s5816_s12 + $0xa0] sm:$0xff] %v395_v51  ;;  %v401_v54 = vld [vmem:[%s5811_s7 + $0xb8] sm:$0xff]  ;;  %398 = vst [vmem:[%s5816_s12 + $0xa8] sm:$0xff] %v397_v52  ;;  %v403_v55 = vld [vmem:[%s5811_s7 + $0xc0] sm:$0xff] }
  0x34   : > { %400 = vst [vmem:[%s5816_s12 + $0xb0] sm:$0xff] %v399_v53  ;;  %402 = vst [vmem:[%s5816_s12 + $0xb8] sm:$0xff] %v401_v54  ;;  %v405_v56 = vld [vmem:[%s5811_s7 + $0xc8] sm:$0xff]  ;;  %v407_v57 = vld [vmem:[%s5811_s7 + $0xd0] sm:$0xff] }
  0x35   : > { %404 = vst [vmem:[%s5816_s12 + $0xc0] sm:$0xff] %v403_v55  ;;  %406 = vst [vmem:[%s5816_s12 + $0xc8] sm:$0xff] %v405_v56  ;;  %v409_v58 = vld [vmem:[%s5811_s7 + $0xd8] sm:$0xff]  ;;  %v411_v59 = vld [vmem:[%s5811_s7 + $0xe0] sm:$0xff] }
  0x36   : > { %408 = vst [vmem:[%s5816_s12 + $0xd0] sm:$0xff] %v407_v57  ;;  %v413_v60 = vld [vmem:[%s5811_s7 + $0xe8] sm:$0xff]  ;;  %410 = vst [vmem:[%s5816_s12 + $0xd8] sm:$0xff] %v409_v58  ;;  %v415_v61 = vld [vmem:[%s5811_s7 + $0xf0] sm:$0xff] }
  0x37   : > { %412 = vst [vmem:[%s5816_s12 + $0xe0] sm:$0xff] %v411_v59  ;;  %414 = vst [vmem:[%s5816_s12 + $0xe8] sm:$0xff] %v413_v60 }
  0x38   : > { %416 = vst [vmem:[%s5816_s12 + $0xf0] sm:$0xff] %v415_v61 }
  0x39   : > { %424 = vsyncadd %s321_s8, 3968 }
  0x3a PF: > { %v5334_v62 = vld [vmem:[%s6878_s1 + $0x78] sm:$0xff]   ;;  %v5335_v63 = vld [vmem:[%s6878_s1 + $0x70] sm:$0xff]   ;;  %s4488_s17 = smul.u32 248, %s6890_s25  ;;  %v5336_v0 = vld [vmem:[%s6878_s1 + $0x68] sm:$0xff]  }
  0x3b   : > { %4874 = vmatprep.subr.bf16.mxu0 %v5334_v62  ;;  %5294 = vmatprep.subr.bf16.mxu1 %v5334_v62  ;;  %v5337_v1 = vld [vmem:[%s6878_s1 + $0x60] sm:$0xff]   ;;  %v5338_v10 = vld [vmem:[%s6878_s1 + $0x58] sm:$0xff]   ;;  %v5339_v13 = vld [vmem:[%s6878_s1 + $0x50] sm:$0xff]  }
  0x3c   : > { %4875 = vmatpush3.bf16.msra.mxu0 %v5334_v62  ;;  %5302 = vmatpush3.bf16.msra.mxu1 %v5334_v62  ;;  %s5892_s22 = scalar_lea.vmem [#allocation2], %s4488_s17  ;;  %v5340_v20 = vld [vmem:[%s6878_s1 + $0x48] sm:$0xff]   ;;  %v5341_v25 = vld [vmem:[%s6878_s1 + $0x40] sm:$0xff]   ;;  %v5350_v30 = vld [vmem:[%s6878_s1 + $0xb8] sm:$0xff]  }
  0x3d   : > { %4876 = vmatprep.subr.bf16.mxu0 %v5335_v63  ;;  %5295 = vmatprep.subr.bf16.mxu1 %v5335_v63  ;;  %v5351_v31 = vld [vmem:[%s6878_s1 + $0x38] sm:$0xff]   ;;  %v5352_v41 = vld [vmem:[%s6878_s1 + $0xb0] sm:$0xff]   ;;  %v5358_v49 = vld [vmem:[%s6878_s1 + $0xa8] sm:$0xff]  }
  0x3e   : > { %v5357_v47 = vld [vmem:[%s6878_s1 + $0x30] sm:$0xff]   ;;  %v5363_v55 = vld [vmem:[%s6878_s1 + $0x28] sm:$0xff]   ;;  %v5364_v57 = vld [vmem:[%s6878_s1 + $0xa0] sm:$0xff]  }
  0x3f   : > { %v5895_v2 = vld [vmem:[%s5892_s22 + $0xc] sm:$0xf]  ;;  %v5898_v3 = vld [vmem:[%s5892_s22 + $0x10] sm:$0xf]  ;;  %v5909_v7 = vld [vmem:[%s5892_s22 + $0x74] sm:$0xf] }
  0x40   : > { %4877 = vmatpush3.bf16.msra.mxu0 %v5335_v63  ;;  %5303 = vmatpush3.bf16.msra.mxu1 %v5335_v63  ;;  %v4147_v4 = vcombine.low %v5895_v2, %v5898_v3  ;;  %v5903_v5 = vld [vmem:[%s5892_s22 + $0x6c] sm:$0xf]  ;;  %v5906_v6 = vld [vmem:[%s5892_s22 + $0x70] sm:$0xf]  ;;  %v5919_v11 = vld [vmem:[%s5892_s22 + $0x78] sm:$0xf] }
  0x41   : > { %4878 = vmatprep.subr.bf16.mxu0 %v5336_v0  ;;  %5296 = vmatprep.subr.bf16.mxu1 %v5336_v0  ;;  %v4159_v8 = vcombine.low %v5903_v5, %v5906_v6  ;;  %v4191_v9 = vcombine.low %v5906_v6, %v5909_v7  ;;  %v5922_v12 = vld [vmem:[%s5892_s22 + $0x7c] sm:$0xf]  ;;  %v5928_v14 = vld [vmem:[%s5892_s22 + $0x80] sm:$0xf]  ;;  %v5931_v15 = vld [vmem:[%s5892_s22 + $0x84] sm:$0xf]  ;;  %v4160_v39 = vcombine.low %v5909_v7, %v5919_v11 }
  0x42   : > { %4890 = vmatprep.mubr.bf16.mxu0 %v4147_v4  ;;  %v4192_v16 = vcombine.low %v5919_v11, %v5922_v12  ;;  %v4193_v17 = vcombine.low %v5928_v14, %v5931_v15  ;;  %v5938_v18 = vld [vmem:[%s5892_s22 + $0x88] sm:$0xf]  ;;  %v5941_v19 = vld [vmem:[%s5892_s22 + $0x8c] sm:$0xf]  ;;  %v5949_v22 = vld [vmem:[%s5892_s22 + $0x90] sm:$0xf]  ;;  %v4161_v42 = vcombine.low %v5922_v12, %v5928_v14 }
  0x43   : > { %4914 = vmatprep.mubr.bf16.mxu1 %v4159_v8  ;;  %v4194_v21 = vcombine.low %v5938_v18, %v5941_v19  ;;  %v5952_v23 = vld [vmem:[%s5892_s22 + $0x94] sm:$0xf]  ;;  %v5963_v27 = vld [vmem:[%s5892_s22 + $0x18] sm:$0xf]  ;;  %v5969_v29 = vld [vmem:[%s5892_s22 + $0x9c] sm:$0xf]  ;;  %v4162_v53 = vcombine.low %v5931_v15, %v5938_v18  ;;  %v4163_v56 = vcombine.low %v5941_v19, %v5949_v22 }
  0x44   : > { %4879 = vmatpush3.bf16.msra.mxu0 %v5336_v0  ;;  %5304 = vmatpush3.bf16.msra.mxu1 %v5336_v0  ;;  %v4195_v24 = vcombine.low %v5949_v22, %v5952_v23  ;;  %v5960_v26 = vld [vmem:[%s5892_s22 + $0x14] sm:$0xf]  ;;  %v5966_v28 = vld [vmem:[%s5892_s22 + $0x98] sm:$0xf]  ;;  %v5978_v32 = vld [vmem:[%s5892_s22 + $0xa0] sm:$0xf] }
  0x45   : > { %4880 = vmatprep.subr.bf16.mxu0 %v5337_v1  ;;  %5297 = vmatprep.subr.bf16.mxu1 %v5337_v1  ;;  %v5981_v33 = vld [vmem:[%s5892_s22 + $0xa4] sm:$0xf]  ;;  %v4196_v34 = vcombine.low %v5966_v28, %v5969_v29  ;;  %v5986_v35 = vld [vmem:[%s5892_s22 + $0x1c] sm:$0xf]  ;;  %v5991_v37 = vld [vmem:[%s5892_s22 + $0x20] sm:$0xf]  ;;  %v4148_v38 = vcombine.low %v5960_v26, %v5963_v27  ;;  %v4165_v8 = vcombine.low %v5969_v29, %v5978_v32 }
  0x46   : > { %v4197_v36 = vcombine.low %v5978_v32, %v5981_v33  ;;  %v4149_v40 = vcombine.low %v5986_v35, %v5991_v37  ;;  %v6005_v43 = vld [vmem:[%s5892_s22 + $0xa8] sm:$0xf]  ;;  %v6008_v44 = vld [vmem:[%s5892_s22 + $0xac] sm:$0xf]  ;;  %v6011_v45 = vld [vmem:[%s5892_s22 + $0x24] sm:$0xf] }
  0x47   : > { %v6014_v46 = vld [vmem:[%s5892_s22 + $0x28] sm:$0xf]  ;;  %v4198_v48 = vcombine.low %v6005_v43, %v6008_v44  ;;  %v6025_v50 = vld [vmem:[%s5892_s22 + $0x2c] sm:$0xf]  ;;  %v6028_v51 = vld [vmem:[%s5892_s22 + $0x30] sm:$0xf] }
  0x48   : > { %4881 = vmatpush3.bf16.msra.mxu0 %v5337_v1  ;;  %5305 = vmatpush3.bf16.msra.mxu1 %v5337_v1  ;;  %v4150_v52 = vcombine.low %v6011_v45, %v6014_v46  ;;  %v4151_v54 = vcombine.low %v6025_v50, %v6028_v51  ;;  %v6045_v58 = vld [vmem:[%s5892_s22 + $0x34] sm:$0xf]  ;;  %v6048_v59 = vld [vmem:[%s5892_s22 + $0x38] sm:$0xf]  ;;  %v5365_v60 = vld [vmem:[%s6878_s1 + $0x20] sm:$0xff]   ;;  %v4164_v1 = vcombine.low %v5952_v23, %v5966_v28 }
  0x49   : > { %4882 = vmatprep.subr.bf16.mxu0 %v5338_v10  ;;  %5298 = vmatprep.subr.bf16.mxu1 %v5338_v10  ;;  %v6054_v61 = vld [vmem:[%s5892_s22 + $0x3c] sm:$0xf]  ;;  %v6057_v62 = vld [vmem:[%s5892_s22 + $0x40] sm:$0xf]  ;;  %v4152_v0 = vcombine.low %v6045_v58, %v6048_v59  ;;  %v5435_v11 = vld [vmem:[%s5892_s22 + $0xb0] sm:$0xff]  }
  0x4a   : > { %v5371_v63 = vld [vmem:[%s6878_s1 + $0x98] sm:$0xff]   ;;  %v4153_v4 = vcombine.low %v6054_v61, %v6057_v62  ;;  %v5444_v18 = vld [vmem:[%s5892_s22 + $0x30] sm:$0xff]   ;;  %v5466_v32 = vld [vmem:[%s6878_s1 + $0x160] sm:$0xff]  }
  0x4b   : > { %v5427_v6 = vld [vmem:[%s5892_s22 + $0x98] sm:$0xff]   ;;  %v5429_v7 = vld [vmem:[%s5892_s22 + $0xa0] sm:$0xff]  }
  0x4c   : > { %4883 = vmatpush3.bf16.msra.mxu0 %v5338_v10  ;;  %5306 = vmatpush3.bf16.msra.mxu1 %v5338_v10  ;;  %v5370_v10 = vld [vmem:[%s6878_s1 + $0x18] sm:$0xff]   ;;  %v5452_v19 = vld [vmem:[%s6878_s1 + $0x170] sm:$0xff]  }
  0x4d   : > { %4884 = vmatprep.subr.bf16.mxu0 %v5339_v13  ;;  %5299 = vmatprep.subr.bf16.mxu1 %v5339_v13  ;;  %v5438_v12 = vld [vmem:[%s5892_s22 + $0xb8] sm:$0xff]   ;;  %v5439_v14 = vld [vmem:[%s5892_s22 + $0x24] sm:$0xff]  }
  0x4e   : > { %v5440_v15 = vld [vmem:[%s5892_s22 + $0xc0] sm:$0xff]   ;;  %v5446_v23 = vld [vmem:[%s5892_s22 + $0x38] sm:$0xff]  }
  0x4f   : > { %v5445_v22 = vld [vmem:[%s5892_s22 + $0x3c] sm:$0xff]  }
  0x50   : > { %4885 = vmatpush3.bf16.msra.mxu0 %v5339_v13  ;;  %5307 = vmatpush3.bf16.msra.mxu1 %v5339_v13  ;;  %v5372_v13 = vld [vmem:[%s6878_s1 + $0x10] sm:$0xff]   ;;  %v5449_v28 = vld [vmem:[%s5892_s22 + $0x40] sm:$0xff]  }
  0x51   : > { %4886 = vmatprep.subr.bf16.mxu0 %v5340_v20  ;;  %5300 = vmatprep.subr.bf16.mxu1 %v5340_v20  ;;  %v5453_v29 = vld [vmem:[%s6878_s1 + $0x1b0] sm:$0xff]  }
  0x54   : > { %4887 = vmatpush3.bf16.msra.mxu0 %v5340_v20  ;;  %5308 = vmatpush3.bf16.msra.mxu1 %v5340_v20  ;;  %v6077_v20 = vld [vmem:[%s5892_s22 + $0x44] sm:$0xf] }
  0x55   : > { %4888 = vmatprep.subr.bf16.mxu0 %v5341_v25  ;;  %5301 = vmatprep.subr.bf16.mxu1 %v5341_v25 }
  0x58   : > { %4889 = vmatpush3.bf16.msra.mxu0 %v5341_v25  ;;  %5309 = vmatpush3.bf16.msra.mxu1 %v5341_v25  ;;  %v6080_v25 = vld [vmem:[%s5892_s22 + $0x48] sm:$0xf] }
  0x59   : > { %4994 = vmatprep.subr.bf16.mxu0 %v5350_v30  ;;  %4934 = vmatprep.subr.bf16.mxu1 %v5351_v31 }
  0x5b   : > { %4891 = vmatmul.mubr.bf16.vlgmr.msra.gmra.mxu0 %v4148_v38  ;;  %4915 = vmatmul.mubr.bf16.vlgmr.msra.gmra.mxu1 %v4160_v39  ;;  %v6089_v38 = vld [vmem:[%s5892_s22 + $0x50] sm:$0xf] }
  0x5c   : > { %4995 = vmatpush3.bf16.msra.mxu0 %v5350_v30  ;;  %4894 = vmatprep.mubr.bf16.mxu0 %v4149_v40  ;;  %v5373_v30 = vld [vmem:[%s6878_s1 + $0x90] sm:$0xff]   ;;  %v5380_v40 = vld [vmem:[%s6878_s1 + $0x88] sm:$0xff]  }
  0x5d   : > { %4996 = vmatprep.subr.bf16.mxu0 %v5352_v41  ;;  %4918 = vmatprep.mubr.bf16.mxu1 %v4161_v42  ;;  %v488_v39 = vld [vmem:[%s5892_s22 + $0xb0] sm:$0xf]  ;;  %v4166_v42 = vcombine.low %v5981_v33, %v6005_v43  ;;  %v5454_v43 = vld [vmem:[%s5892_s22 + $0x54] sm:$0xff]  }
  0x5e   : > { %4935 = vmatpush3.bf16.msra.mxu1 %v5351_v31  ;;  %v6086_v31 = vld [vmem:[%s5892_s22 + $0x4c] sm:$0xf] }
  0x5f   : > { %4936 = vmatprep.subr.bf16.mxu1 %v5357_v47  ;;  %v5459_v33 = vld [vmem:[%s6878_s1 + $0x1a8] sm:$0xff]  }
  0x60   : > { %4997 = vmatpush3.bf16.msra.mxu0 %v5352_v41  ;;  %v4154_v41 = vcombine.low %v6077_v20, %v6080_v25 }
  0x61   : > { %4998 = vmatprep.subr.bf16.mxu0 %v5358_v49 }
  0x62   : > { %4937 = vmatpush3.bf16.msra.mxu1 %v5357_v47  ;;  %v4155_v47 = vcombine.low %v6086_v31, %v6089_v38 }
  0x63   : > { %4895 = vmatmul.mubr.bf16.gmra.mxu0 %v4150_v52  ;;  %4919 = vmatmul.mubr.bf16.gmra.mxu1 %v4162_v53  ;;  %v5378_v52 = vld [vmem:[%s6878_s1 + $0x8] sm:$0xff]  }
  0x64   : > { %4999 = vmatpush3.bf16.msra.mxu0 %v5358_v49  ;;  %4898 = vmatprep.mubr.bf16.mxu0 %v4151_v54  ;;  %v4167_v49 = vcombine.low %v6008_v44, %v488_v39  ;;  %v6106_v53 = vld [vmem:[%s5892_s22 + $0x54] sm:$0xf]  ;;  %v6109_v54 = vld [vmem:[%s5892_s22 + $0x58] sm:$0xf]  ;;  %v6140_v39 = vld [vmem:[%s5892_s22 + $0x64] sm:$0xf] }
  0x65   : > { %4922 = vmatprep.mubr.bf16.mxu1 %v4163_v56  ;;  %4938 = vmatprep.subr.bf16.mxu1 %v5363_v55  ;;  %v5379_v56 = vld [vmem:[%s6878_s1] sm:$0xff]   ;;  %v5455_v44 = vld [vmem:[%s5892_s22 + $0x50] sm:$0xff]  }
  0x66   : > { %4939 = vmatpush3.bf16.msra.mxu1 %v5363_v55  ;;  %5000 = vmatprep.subr.bf16.mxu0 %v5364_v57  ;;  %v5384_v55 = vld [vmem:[%s6878_s1 + $0x80] sm:$0xff]  }
  0x67   : > { %4940 = vmatprep.subr.bf16.mxu1 %v5365_v60 }
  0x68   : > { %5001 = vmatpush3.bf16.msra.mxu0 %v5364_v57  ;;  %v6118_v57 = vld [vmem:[%s5892_s22 + $0x5c] sm:$0xf] }
  0x69   : > { %5002 = vmatprep.subr.bf16.mxu0 %v5371_v63 }
  0x6a   : > { %4941 = vmatpush3.bf16.msra.mxu1 %v5365_v60  ;;  %v6121_v60 = vld [vmem:[%s5892_s22 + $0x60] sm:$0xf] }
  0x6b   : > { %4899 = vmatmul.mubr.bf16.gmra.mxu0 %v4152_v0  ;;  %4923 = vmatmul.mubr.bf16.gmra.mxu1 %v4164_v1  ;;  %v4156_v0 = vcombine.low %v6106_v53, %v6109_v54  ;;  %v5377_v1 = vld [vmem:[%s5892_s22 + $0xb4] sm:$0xff]  }
  0x6c   : > { %4902 = vmatprep.mubr.bf16.mxu0 %v4153_v4  ;;  %4926 = vmatprep.mubr.bf16.mxu1 %v4165_v8  ;;  %v4157_v4 = vcombine.low %v6118_v57, %v6121_v60  ;;  %v5382_v8 = vld [vmem:[%s5892_s22] sm:$0xff]  }
  0x6d   : > { %4942 = vmatprep.subr.bf16.mxu1 %v5370_v10  ;;  %5003 = vmatpush3.bf16.msra.mxu0 %v5371_v63  ;;  %v5389_v63 = vld [vmem:[%s6878_s1 + $0x138] sm:$0xff]  }
  0x6e   : > { %4943 = vmatpush3.bf16.msra.mxu1 %v5370_v10  ;;  %5004 = vmatprep.subr.bf16.mxu0 %v5373_v30  ;;  %v5385_v10 = vld [vmem:[%s6878_s1 + $0xf8] sm:$0xff]  }
  0x6f   : > { %4944 = vmatprep.subr.bf16.mxu1 %v5372_v13 }
  0x71   : > { %5005 = vmatpush3.bf16.msra.mxu0 %v5373_v30  ;;  %v6137_v30 = vld [vmem:[%s5892_s22 + $0x68] sm:$0xf] }
  0x72   : > { %4945 = vmatpush3.bf16.msra.mxu1 %v5372_v13  ;;  %5006 = vmatprep.subr.bf16.mxu0 %v5380_v40  ;;  %v430_v13 = vld [vmem:[%s5892_s22 + $0x8] sm:$0xf] }
  0x73   : > { %4903 = vmatmul.mubr.bf16.gmra.mxu0 %v4154_v41  ;;  %4927 = vmatmul.mubr.bf16.gmra.mxu1 %v4166_v42  ;;  %v4158_v41 = vcombine.low %v6140_v39, %v6137_v30  ;;  %v4179_v42 = vcombine.low %v5898_v3, %v5960_v26  ;;  %v4181_v3 = vcombine.low %v5991_v37, %v6011_v45  ;;  %v5391_v26 = vld [vmem:[%s5892_s22 + $0x28] sm:$0xff]   ;;  %v5393_v37 = vld [vmem:[%s5892_s22 + $0x30] sm:$0xff]  }
  0x74   : > { %4906 = vmatprep.mubr.bf16.mxu0 %v4155_v47  ;;  %4930 = vmatprep.mubr.bf16.mxu1 %v4167_v49  ;;  %v5386_v47 = vld [vmem:[%s5892_s22 + $0x18] sm:$0xff]   ;;  %v4183_v45 = vcombine.low %v6028_v51, %v6045_v58  ;;  %v4184_v51 = vcombine.low %v6048_v59, %v6054_v61  ;;  %v5399_v58 = vld [vmem:[%s5892_s22 + $0x40] sm:$0xff]   ;;  %v5431_v61 = vld [vmem:[%s6878_s1 + $0x108] sm:$0xff]  }
  0x75   : > { %4946 = vmatprep.subr.bf16.mxu1 %v5378_v52  ;;  %5007 = vmatpush3.bf16.msra.mxu0 %v5380_v40  ;;  %v4178_v40 = vcombine.low %v430_v13, %v5895_v2  ;;  %v5394_v49 = vld [vmem:[%s6878_s1 + $0xf0] sm:$0xff]   ;;  %v5400_v2 = vld [vmem:[%s6878_s1 + $0xe8] sm:$0xff]   ;;  %v5436_v59 = vld [vmem:[%s6878_s1 + $0xc0] sm:$0xff]  }
  0x76   : > { %4947 = vmatpush3.bf16.msra.mxu1 %v5378_v52  ;;  %5008 = vmatprep.subr.bf16.mxu0 %v5384_v55  ;;  %v4180_v52 = vcombine.low %v5963_v27, %v5986_v35  ;;  %v5401_v27 = vld [vmem:[%s6878_s1 + $0x128] sm:$0xff]   ;;  %v4182_v35 = vcombine.low %v6014_v46, %v6025_v50  ;;  %v5420_v46 = vld [vmem:[%s6878_s1 + $0xd0] sm:$0xff]   ;;  %v5416_v50 = vld [vmem:[%s6878_s1 + $0x118] sm:$0xff]  }
  0x77   : > { %4948 = vmatprep.subr.bf16.mxu1 %v5379_v56  ;;  %v5430_v13 = vld [vmem:[%s6878_s1 + $0xc8] sm:$0xff]  }
  0x79   : > { %5009 = vmatpush3.bf16.msra.mxu0 %v5384_v55  ;;  %v5388_v55 = vld [vmem:[%s5892_s22 + $0x20] sm:$0xff]  }
  0x7a   : > { %4949 = vmatpush3.bf16.msra.mxu1 %v5379_v56  ;;  %5114 = vmatprep.subr.bf16.mxu0 %v5389_v63  ;;  %v5395_v56 = vld [vmem:[%s6878_s1 + $0x130] sm:$0xff]  }
  0x7b   : > { %4907 = vmatmul.mubr.bf16.gmra.mxu0 %v4156_v0  ;;  %4931 = vmatmul.mubr.bf16.gmra.mxu1 %v5377_v1  ;;  %v5408_v0 = vld [vmem:[%s6878_s1 + $0xe0] sm:$0xff]   ;;  %v5397_v1 = vld [vmem:[%s5892_s22 + $0x38] sm:$0xff]  }
  0x7c   : > { %4910 = vmatprep.mubr.bf16.mxu0 %v4157_v4  ;;  %4950 = vmatprep.mubr.bf16.mxu1 %v5382_v8  ;;  %v5411_v4 = vld [vmem:[%s6878_s1 + $0x120] sm:$0xff]   ;;  %v4185_v8 = vcombine.low %v6057_v62, %v6077_v20  ;;  %v4186_v62 = vcombine.low %v6080_v25, %v6086_v31  ;;  %v5405_v20 = vld [vmem:[%s5892_s22 + $0x50] sm:$0xff]   ;;  %v6223_v31 = vld [vmem:[%s6878_s1 + $0x1b8] sm:$0xff]  }
  0x7d   : > { %5054 = vmatprep.subr.bf16.mxu1 %v5385_v10  ;;  %v5437_v25 = vld [vmem:[%s6878_s1 + $0x100] sm:$0xff]  }
  0x83   : > { %4911 = vmatmul.mubr.bf16.gmra.mxu0 %v4158_v41  ;;  %4951 = vmatmul.mubr.bf16.vlgmr.msra.gmra.mxu1 %v4178_v40  ;;  %v5423_v40 = vld [vmem:[%s6878_s1 + $0x110] sm:$0xff]   ;;  %v4187_v41 = vcombine.low %v6089_v38, %v6106_v53  ;;  %v4188_v38 = vcombine.low %v6109_v54, %v6118_v57  ;;  %v5410_v53 = vld [vmem:[%s5892_s22 + $0x60] sm:$0xff]  }
  0x84   : > { %4954 = vmatprep.mubr.bf16.mxu1 %v4179_v42  ;;  %5010 = vmatprep.mubr.bf16.mxu0 %v5386_v47  ;;  %v5407_v42 = vld [vmem:[%s5892_s22 + $0x58] sm:$0xff]   ;;  %v5414_v54 = vld [vmem:[%s5892_s22 + $0x70] sm:$0xff]  }
  0x85   : > { %5055 = vmatpush3.bf16.msra.mxu1 %v5385_v10  ;;  %v5403_v10 = vld [vmem:[%s5892_s22 + $0x48] sm:$0xff]   ;;  %v6214_v47 = vld [vmem:[%s6878_s1 + $0x178] sm:$0xff]  }
  0x86   : > { %5056 = vmatprep.subr.bf16.mxu1 %v5394_v49  ;;  %v5417_v57 = vld [vmem:[%s5892_s22 + $0x78] sm:$0xff]  }
  0x89   : > { %5057 = vmatpush3.bf16.msra.mxu1 %v5394_v49  ;;  %v4189_v49 = vcombine.low %v6121_v60, %v6140_v39  ;;  %v5419_v60 = vld [vmem:[%s5892_s22 + $0x80] sm:$0xff]   ;;  %v5422_v39 = vld [vmem:[%s5892_s22 + $0x88] sm:$0xff]  }
  0x8a   : > { %5058 = vmatprep.subr.bf16.mxu1 %v5400_v2 }
  0x8b   : > { %4955 = vmatmul.mubr.bf16.gmra.mxu1 %v4180_v52  ;;  %5011 = vmatmul.mubr.bf16.vlgmr.msra.gmra.mxu0 %v5388_v55  ;;  %v4190_v52 = vcombine.low %v6137_v30, %v5903_v5  ;;  %v5425_v5 = vld [vmem:[%s5892_s22 + $0x90] sm:$0xff]   ;;  %v5469_v30 = vld [vmem:[%s6878_s1 + $0x1a0] sm:$0xff]  }
  0x8c   : > { %5115 = vmatpush3.bf16.msra.mxu0 %v5389_v63  ;;  %4958 = vmatprep.mubr.bf16.mxu1 %v4181_v3  ;;  %v5415_v63 = vld [vmem:[%s6878_s1 + $0xd8] sm:$0xff]   ;;  %v5480_v55 = vld [vmem:[%s6878_s1 + $0x150] sm:$0xff]  }
  0x8d   : > { %5014 = vmatprep.mubr.bf16.mxu0 %v5391_v26  ;;  %5116 = vmatprep.subr.bf16.mxu0 %v5395_v56  ;;  %v5475_v3 = vld [vmem:[%s6878_s1 + $0x198] sm:$0xff]  }
  0x8e   : > { %5059 = vmatpush3.bf16.msra.mxu1 %v5400_v2  ;;  %v5413_v2 = vld [vmem:[%s5892_s22 + $0x68] sm:$0xff]   ;;  %v5456_v26 = vld [vmem:[%s5892_s22 + $0x5c] sm:$0xff]  }
  0x8f   : > { %5060 = vmatprep.subr.bf16.mxu1 %v5408_v0 }
  0x90   : > { %5117 = vmatpush3.bf16.msra.mxu0 %v5395_v56  ;;  %v5457_v56 = vld [vmem:[%s5892_s22 + $0x58] sm:$0xff]  }
  0x91   : > { %5118 = vmatprep.subr.bf16.mxu0 %v5401_v27 }
  0x92   : > { %5061 = vmatpush3.bf16.msra.mxu1 %v5408_v0  ;;  %v5460_v0 = vld [vmem:[%s5892_s22 + $0x64] sm:$0xff]  }
  0x93   : > { %4959 = vmatmul.mubr.bf16.gmra.mxu1 %v4182_v35  ;;  %5015 = vmatmul.mubr.bf16.gmra.mxu0 %v5393_v37  ;;  %v5490_v35 = vld [vmem:[%s6878_s1 + $0x148] sm:$0xff]   ;;  %v5483_v37 = vld [vmem:[%s6878_s1 + $0x190] sm:$0xff]  }
  0x94   : > { %4962 = vmatprep.mubr.bf16.mxu1 %v4183_v45  ;;  %5018 = vmatprep.mubr.bf16.mxu0 %v5397_v1  ;;  %v5496_v45 = vld [vmem:[%s6878_s1 + $0x140] sm:$0xff]   ;;  %v5491_v1 = vld [vmem:[%s6878_s1 + $0x188] sm:$0xff]  }
  0x95   : > { %5119 = vmatpush3.bf16.msra.mxu0 %v5401_v27  ;;  %5062 = vmatprep.subr.bf16.mxu1 %v5415_v63  ;;  %v5461_v27 = vld [vmem:[%s5892_s22 + $0x60] sm:$0xff]  }
  0x96   : > { %5120 = vmatprep.subr.bf16.mxu0 %v5411_v4  ;;  %5063 = vmatpush3.bf16.msra.mxu1 %v5415_v63  ;;  %v5462_v63 = vld [vmem:[%s5892_s22 + $0x6c] sm:$0xff]  }
  0x97   : > { %5064 = vmatprep.subr.bf16.mxu1 %v5420_v46 }
  0x99   : > { %5121 = vmatpush3.bf16.msra.mxu0 %v5411_v4  ;;  %v5463_v4 = vld [vmem:[%s5892_s22 + $0x68] sm:$0xff]  }
  0x9a   : > { %5122 = vmatprep.subr.bf16.mxu0 %v5416_v50  ;;  %5065 = vmatpush3.bf16.msra.mxu1 %v5420_v46  ;;  %v5464_v46 = vld [vmem:[%s5892_s22 + $0x74] sm:$0xff]  }
  0x9b   : > { %4963 = vmatmul.mubr.bf16.gmra.mxu1 %v4184_v51  ;;  %5019 = vmatmul.mubr.bf16.gmra.mxu0 %v5399_v58  ;;  %v5497_v51 = vld [vmem:[%s6878_s1 + $0x180] sm:$0xff]  }
  0x9c   : > { %4966 = vmatprep.mubr.bf16.mxu1 %v4185_v8  ;;  %5022 = vmatprep.mubr.bf16.mxu0 %v5403_v10  ;;  %v5467_v58 = vld [vmem:[%s5892_s22 + $0x7c] sm:$0xff]   ;;  %v5470_v10 = vld [vmem:[%s5892_s22 + $0x84] sm:$0xff]  }
  0x9d   : > { %5123 = vmatpush3.bf16.msra.mxu0 %v5416_v50  ;;  %5066 = vmatprep.subr.bf16.mxu1 %v5430_v13  ;;  %v5465_v50 = vld [vmem:[%s5892_s22 + $0x70] sm:$0xff]   ;;  %v5468_v8 = vld [vmem:[%s5892_s22 + $0x78] sm:$0xff]  }
  0x9e   : > { %5124 = vmatprep.subr.bf16.mxu0 %v5423_v40  ;;  %5067 = vmatpush3.bf16.msra.mxu1 %v5430_v13  ;;  %v5471_v13 = vld [vmem:[%s5892_s22 + $0x80] sm:$0xff]  }
  0x9f   : > { %5068 = vmatprep.subr.bf16.mxu1 %v5436_v59 }
  0xa1   : > { %5125 = vmatpush3.bf16.msra.mxu0 %v5423_v40  ;;  %v5472_v40 = vld [vmem:[%s5892_s22 + $0x8c] sm:$0xff]  }
  0xa2   : > { %5126 = vmatprep.subr.bf16.mxu0 %v5431_v61  ;;  %5069 = vmatpush3.bf16.msra.mxu1 %v5436_v59  ;;  %v5473_v59 = vld [vmem:[%s5892_s22 + $0x88] sm:$0xff]  }
  0xa3   : > { %4967 = vmatmul.mubr.bf16.gmra.mxu1 %v4186_v62  ;;  %5023 = vmatmul.mubr.bf16.gmra.mxu0 %v5405_v20  ;;  %v5477_v62 = vld [vmem:[%s5892_s22 + $0x90] sm:$0xff]   ;;  %v5478_v20 = vld [vmem:[%s5892_s22 + $0x9c] sm:$0xff]  }
  0xa4   : > { %4970 = vmatprep.mubr.bf16.mxu1 %v4187_v41  ;;  %5026 = vmatprep.mubr.bf16.mxu0 %v5407_v42  ;;  %v5479_v41 = vld [vmem:[%s5892_s22 + $0x98] sm:$0xff]   ;;  %v5481_v42 = vld [vmem:[%s5892_s22 + $0xa4] sm:$0xff]  }
  0xa5   : > { %5127 = vmatpush3.bf16.msra.mxu0 %v5431_v61  ;;  %5174 = vmatprep.subr.bf16.mxu1 %v6214_v47  ;;  %v5476_v61 = vld [vmem:[%s5892_s22 + $0x94] sm:$0xff]  }
  0xa6   : > { %5128 = vmatprep.subr.bf16.mxu0 %v5437_v25 }
  0xa9   : > { %5129 = vmatpush3.bf16.msra.mxu0 %v5437_v25  ;;  %v5484_v25 = vld [vmem:[%s5892_s22 + $0xac] sm:$0xff]  }
  0xaa   : > { %5234 = vmatprep.subr.bf16.mxu0 %v6223_v31 }
  0xab   : > { %4971 = vmatmul.mubr.bf16.gmra.mxu1 %v4188_v38  ;;  %5027 = vmatmul.mubr.bf16.gmra.mxu0 %v5410_v53  ;;  %v5486_v38 = vld [vmem:[%s5892_s22 + $0xb4] sm:$0xff]  }
  0xac   : > { %4974 = vmatprep.mubr.bf16.mxu1 %v4189_v49  ;;  %5030 = vmatprep.mubr.bf16.mxu0 %v5413_v2  ;;  %v5487_v53 = vld [vmem:[%s5892_s22 + $0xb0] sm:$0xff]  }
  0xb3   : > { %4975 = vmatmul.mubr.bf16.gmra.mxu1 %v4190_v52  ;;  %5031 = vmatmul.mubr.bf16.gmra.mxu0 %v5414_v54 }
  0xb4   : > { %4978 = vmatprep.mubr.bf16.mxu1 %v4191_v9  ;;  %5034 = vmatprep.mubr.bf16.mxu0 %v5417_v57  ;;  %v5433_v9 = vld [vmem:[%s5892_s22 + $0xa8] sm:$0xff]  }
  0xbb   : > { %4979 = vmatmul.mubr.bf16.gmra.mxu1 %v4192_v16  ;;  %5035 = vmatmul.mubr.bf16.gmra.mxu0 %v5419_v60  ;;  %v5441_v16 = vld [vmem:[%s5892_s22 + $0x2c] sm:$0xff]  }
  0xbc   : > { %4982 = vmatprep.mubr.bf16.mxu1 %v4193_v17  ;;  %5038 = vmatprep.mubr.bf16.mxu0 %v5422_v39  ;;  %v5443_v17 = vld [vmem:[%s5892_s22 + $0x34] sm:$0xff]   ;;  %v5488_v39 = vld [vmem:[%s5892_s22 + $0xbc] sm:$0xff]  }
  0xc3   : > { %4983 = vmatmul.mubr.bf16.gmra.mxu1 %v4194_v21  ;;  %5039 = vmatmul.mubr.bf16.gmra.mxu0 %v5425_v5  ;;  %v5458_v21 = vld [vmem:[%s6878_s1 + $0x168] sm:$0xff]   ;;  %v5489_v5 = vld [vmem:[%s5892_s22 + $0xb8] sm:$0xff]  }
  0xc4   : > { %4986 = vmatprep.mubr.bf16.mxu1 %v4195_v24  ;;  %5042 = vmatprep.mubr.bf16.mxu0 %v5427_v6  ;;  %v5448_v24 = vld [vmem:[%s5892_s22 + $0x44] sm:$0xff]  }
  0xc5   : > { %v5492_v6 = vld [vmem:[%s5892_s22 + $0xc4] sm:$0xff]  }
  0xcb   : > { %4987 = vmatmul.mubr.bf16.gmra.mxu1 %v4196_v34  ;;  %5043 = vmatmul.mubr.bf16.gmra.mxu0 %v5429_v7  ;;  %v5450_v34 = vld [vmem:[%s5892_s22 + $0x4c] sm:$0xff]   ;;  %v5493_v7 = vld [vmem:[%s5892_s22 + $0xc0] sm:$0xff]  }
  0xcc   : > { %4990 = vmatprep.mubr.bf16.mxu1 %v4197_v36  ;;  %5046 = vmatprep.mubr.bf16.mxu0 %v5433_v9  ;;  %v5451_v36 = vld [vmem:[%s5892_s22 + $0x48] sm:$0xff]  }
  0xd3   : > { %4991 = vmatmul.mubr.bf16.gmra.mxu1 %v4198_v48  ;;  %5047 = vmatmul.mubr.bf16.gmra.mxu0 %v5435_v11  ;;  %v5474_v48 = vld [vmem:[%s6878_s1 + $0x158] sm:$0xff]  }
  0xd4   : > { %5050 = vmatprep.mubr.bf16.mxu0 %v5438_v12  ;;  %5070 = vmatprep.mubr.bf16.mxu1 %v5439_v14 }
  0xdb   : > { %5051 = vmatmul.mubr.bf16.gmra.mxu0 %v5440_v15  ;;  %5071 = vmatmul.mubr.bf16.vlgmr.msra.gmra.mxu1 %v5441_v16 }
  0xdc   : > { %5074 = vmatprep.mubr.bf16.mxu1 %v5443_v17  ;;  %5130 = vmatprep.mubr.bf16.mxu0 %v5444_v18 }
  0xdd   : > { %5175 = vmatpush3.bf16.msra.mxu1 %v6214_v47  ;;  %v5482_v47 = vld [vmem:[%s5892_s22 + $0xa0] sm:$0xff]  }
  0xde   : > { %5176 = vmatprep.subr.bf16.mxu1 %v5452_v19 }
  0xe1   : > { %5177 = vmatpush3.bf16.msra.mxu1 %v5452_v19  ;;  %v5494_v19 = vld [vmem:[%s5892_s22 + $0xcc] sm:$0xff]  }
  0xe2   : > { %5178 = vmatprep.subr.bf16.mxu1 %v5458_v21 }
  0xe3   : > { %5075 = vmatmul.mubr.bf16.gmra.mxu1 %v5445_v22  ;;  %5131 = vmatmul.mubr.bf16.vlgmr.msra.gmra.mxu0 %v5446_v23  ;;  %v5498_v22 = vld [vmem:[%s5892_s22 + $0xd0] sm:$0xff]   ;;  %v5499_v23 = vld [vmem:[%s5892_s22 + $0x3c] sm:$0xff]  }
  0xe4   : > { %5235 = vmatpush3.bf16.msra.mxu0 %v6223_v31  ;;  %5078 = vmatprep.mubr.bf16.mxu1 %v5448_v24  ;;  %v5485_v31 = vld [vmem:[%s5892_s22 + $0xa8] sm:$0xff]  }
  0xe5   : > { %5134 = vmatprep.mubr.bf16.mxu0 %v5449_v28  ;;  %5236 = vmatprep.subr.bf16.mxu0 %v5453_v29 }
  0xe6   : > { %5179 = vmatpush3.bf16.msra.mxu1 %v5458_v21  ;;  %v5495_v21 = vld [vmem:[%s5892_s22 + $0xc8] sm:$0xff]  }
  0xe7   : > { %5180 = vmatprep.subr.bf16.mxu1 %v5466_v32 }
  0xe8   : > { %5237 = vmatpush3.bf16.msra.mxu0 %v5453_v29 }
  0xe9   : > { %5238 = vmatprep.subr.bf16.mxu0 %v5459_v33 }
  0xea   : > { %5181 = vmatpush3.bf16.msra.mxu1 %v5466_v32 }
  0xeb   : > { %5079 = vmatmul.mubr.bf16.gmra.mxu1 %v5450_v34  ;;  %5135 = vmatmul.mubr.bf16.gmra.mxu0 %v5451_v36 }
  0xec   : > { %5082 = vmatprep.mubr.bf16.mxu1 %v5454_v43  ;;  %5138 = vmatprep.mubr.bf16.mxu0 %v5455_v44  ;;  %v5500_v44 = vld [vmem:[%s5892_s22 + $0xd8] sm:$0xff]  }
  0xed   : > { %5239 = vmatpush3.bf16.msra.mxu0 %v5459_v33  ;;  %5182 = vmatprep.subr.bf16.mxu1 %v5474_v48 }
  0xee   : > { %5240 = vmatprep.subr.bf16.mxu0 %v5469_v30  ;;  %5183 = vmatpush3.bf16.msra.mxu1 %v5474_v48  ;;  %v5501_v48 = vld [vmem:[%s5892_s22 + $0x44] sm:$0xff]  }
  0xef   : > { %5184 = vmatprep.subr.bf16.mxu1 %v5480_v55 }
  0xf1   : > { %5241 = vmatpush3.bf16.msra.mxu0 %v5469_v30  ;;  %v5502_v30 = vld [vmem:[%s5892_s22 + $0x4c] sm:$0xff]  }
  0xf2   : > { %5242 = vmatprep.subr.bf16.mxu0 %v5475_v3  ;;  %5185 = vmatpush3.bf16.msra.mxu1 %v5480_v55  ;;  %v5503_v55 = vld [vmem:[%s5892_s22 + $0x48] sm:$0xff]  }
  0xf3   : > { %5083 = vmatmul.mubr.bf16.gmra.mxu1 %v5456_v26  ;;  %5139 = vmatmul.mubr.bf16.gmra.mxu0 %v5457_v56 }
  0xf4   : > { %5086 = vmatprep.mubr.bf16.mxu1 %v5460_v0  ;;  %5142 = vmatprep.mubr.bf16.mxu0 %v5461_v27 }
  0xf5   : > { %5243 = vmatpush3.bf16.msra.mxu0 %v5475_v3  ;;  %5186 = vmatprep.subr.bf16.mxu1 %v5490_v35 }
  0xf6   : > { %5244 = vmatprep.subr.bf16.mxu0 %v5483_v37  ;;  %5187 = vmatpush3.bf16.msra.mxu1 %v5490_v35 }
  0xf7   : > { %5188 = vmatprep.subr.bf16.mxu1 %v5496_v45 }
  0xf9   : > { %5245 = vmatpush3.bf16.msra.mxu0 %v5483_v37 }
  0xfa   : > { %5246 = vmatprep.subr.bf16.mxu0 %v5491_v1  ;;  %5189 = vmatpush3.bf16.msra.mxu1 %v5496_v45 }
  0xfb   : > { %5087 = vmatmul.mubr.bf16.gmra.mxu1 %v5462_v63  ;;  %5143 = vmatmul.mubr.bf16.gmra.mxu0 %v5463_v4  ;;  %v5505_v63 = vld [vmem:[%s5892_s22 + $0x50] sm:$0xff]   ;;  %v5506_v4 = vld [vmem:[%s5892_s22 + $0x5c] sm:$0xff]  }
  0xfc   : > { %5090 = vmatprep.mubr.bf16.mxu1 %v5464_v46  ;;  %5146 = vmatprep.mubr.bf16.mxu0 %v5465_v50  ;;  %v5507_v46 = vld [vmem:[%s5892_s22 + $0x58] sm:$0xff]  }
  0xfd   : > { %5247 = vmatpush3.bf16.msra.mxu0 %v5491_v1  ;;  %v5504_v1 = vld [vmem:[%s5892_s22 + $0x54] sm:$0xff]  }
  0xfe   : > { %5248 = vmatprep.subr.bf16.mxu0 %v5497_v51 }
 0x101   : > { %5249 = vmatpush3.bf16.msra.mxu0 %v5497_v51 }
 0x103   : > { %5091 = vmatmul.mubr.bf16.gmra.mxu1 %v5467_v58  ;;  %5147 = vmatmul.mubr.bf16.gmra.mxu0 %v5468_v8 }
 0x104   : > { %5094 = vmatprep.mubr.bf16.mxu1 %v5470_v10  ;;  %5150 = vmatprep.mubr.bf16.mxu0 %v5471_v13 }
 0x10b   : > { %5095 = vmatmul.mubr.bf16.gmra.mxu1 %v5472_v40  ;;  %5151 = vmatmul.mubr.bf16.gmra.mxu0 %v5473_v59 }
 0x10c   : > { %5098 = vmatprep.mubr.bf16.mxu1 %v5476_v61  ;;  %5154 = vmatprep.mubr.bf16.mxu0 %v5477_v62  ;;  %v5508_v61 = vld [vmem:[%s5892_s22 + $0x64] sm:$0xff]  }
 0x10d   : > { %v5509_v62 = vld [vmem:[%s5892_s22 + $0x60] sm:$0xff]  }
 0x113   : > { %5099 = vmatmul.mubr.bf16.gmra.mxu1 %v5478_v20  ;;  %5155 = vmatmul.mubr.bf16.gmra.mxu0 %v5479_v41  ;;  %v5510_v20 = vld [vmem:[%s5892_s22 + $0x6c] sm:$0xff]  }
 0x114   : > { %5102 = vmatprep.mubr.bf16.mxu1 %v5481_v42  ;;  %5158 = vmatprep.mubr.bf16.mxu0 %v5482_v47  ;;  %v5511_v41 = vld [vmem:[%s5892_s22 + $0x68] sm:$0xff]  }
 0x11b   : > { %v6349_v49 = vpop.f32.mrf.mxu0  ;;  %v6351_v2 = vpop.f32.mrf.mxu1  ;;  %5103 = vmatmul.mubr.bf16.gmra.mxu1 %v5484_v25  ;;  %5159 = vmatmul.mubr.bf16.gmra.mxu0 %v5485_v31 }
 0x11c   : > { %5106 = vmatprep.mubr.bf16.mxu1 %v5486_v38  ;;  %5162 = vmatprep.mubr.bf16.mxu0 %v5487_v53 }
 0x11d   : > { %v6353_v52 = vpop.f32.mrf.mxu0  ;;  %v6355_v54 = vpop.f32.mrf.mxu1 }
 0x11f   : > { %v6357_v57 = vpop.f32.mrf.mxu0  ;;  %v6359_v60 = vpop.f32.mrf.mxu1 }
 0x121   : > { %v6365_v9 = vpop.f32.mrf.mxu0  ;;  %v6367_v11 = vpop.f32.mrf.mxu1 }
 0x123   : > { %v6369_v12 = vpop.f32.mrf.mxu0  ;;  %v6371_v14 = vpop.f32.mrf.mxu1  ;;  %5107 = vmatmul.mubr.bf16.gmra.mxu1 %v5488_v39  ;;  %5163 = vmatmul.mubr.bf16.gmra.mxu0 %v5489_v5 }
 0x124   : > { %5110 = vmatprep.mubr.bf16.mxu1 %v5492_v6  ;;  %5166 = vmatprep.mubr.bf16.mxu0 %v5493_v7 }
 0x125   : > { %v6373_v15 = vpop.f32.mrf.mxu0  ;;  %v6375_v16 = vpop.f32.mrf.mxu1 }
 0x127   : > { %v6377_v17 = vpop.f32.mrf.mxu0  ;;  %v6379_v18 = vpop.f32.mrf.mxu1 }
 0x129   : > { %v6385_v24 = vpop.f32.mrf.mxu0  ;;  %v6387_v28 = vpop.f32.mrf.mxu1 }
 0x12b   : > { %v6389_v29 = vpop.f32.mrf.mxu0  ;;  %v6391_v32 = vpop.f32.mrf.mxu1  ;;  %5111 = vmatmul.mubr.bf16.gmra.mxu1 %v5494_v19  ;;  %5167 = vmatmul.mubr.bf16.gmra.mxu0 %v5495_v21  ;;  %v5512_v19 = vld [vmem:[%s5892_s22 + $0x74] sm:$0xff]  }
 0x12c   : > { %5170 = vmatprep.mubr.bf16.mxu0 %v5498_v22  ;;  %5190 = vmatprep.mubr.bf16.mxu1 %v5499_v23  ;;  %v5513_v21 = vld [vmem:[%s5892_s22 + $0x70] sm:$0xff]   ;;  %v5514_v23 = vld [vmem:[%s5892_s22 + $0x7c] sm:$0xff]  }
 0x12d   : > { %v6393_v33 = vpop.f32.mrf.mxu0  ;;  %v6395_v34 = vpop.f32.mrf.mxu1 }
 0x12f   : > { %v6397_v36 = vpop.f32.mrf.mxu0  ;;  %v6399_v43 = vpop.f32.mrf.mxu1 }
 0x131   : > { %v6405_v3 = vpop.f32.mrf.mxu0  ;;  %v6407_v26 = vpop.f32.mrf.mxu1 }
 0x133   : > { %v6409_v56 = vpop.f32.mrf.mxu0  ;;  %v6411_v0 = vpop.f32.mrf.mxu1  ;;  %5171 = vmatmul.mubr.bf16.gmra.mxu0 %v5500_v44  ;;  %5191 = vmatmul.mubr.bf16.vlgmr.msra.gmra.mxu1 %v5501_v48  ;;  %v5515_v44 = vld [vmem:[%s5892_s22 + $0x78] sm:$0xff]  }
 0x134   : > { %5194 = vmatprep.mubr.bf16.mxu1 %v5502_v30  ;;  %5250 = vmatprep.mubr.bf16.mxu0 %v5503_v55 }
 0x135   : > { %v6413_v27 = vpop.f32.mrf.mxu0  ;;  %v6415_v35 = vpop.f32.mrf.mxu1 }
 0x137   : > { %v6417_v37 = vpop.f32.mrf.mxu0  ;;  %v6419_v45 = vpop.f32.mrf.mxu1 }
 0x139   : > { %v6425_v50 = vpop.f32.mrf.mxu0  ;;  %v6427_v51 = vpop.f32.mrf.mxu1 }
 0x13b   : > { %v6429_v58 = vpop.f32.mrf.mxu0  ;;  %v6431_v8 = vpop.f32.mrf.mxu1  ;;  %5195 = vmatmul.mubr.bf16.gmra.mxu1 %v5504_v1  ;;  %5251 = vmatmul.mubr.bf16.vlgmr.msra.gmra.mxu0 %v5505_v63 }
 0x13c   : > { %5198 = vmatprep.mubr.bf16.mxu1 %v5506_v4  ;;  %5254 = vmatprep.mubr.bf16.mxu0 %v5507_v46 }
 0x13d   : > { %v6433_v10 = vpop.f32.mrf.mxu0  ;;  %v6435_v13 = vpop.f32.mrf.mxu1 }
 0x13f   : > { %v6437_v40 = vpop.f32.mrf.mxu0  ;;  %v6439_v59 = vpop.f32.mrf.mxu1 }
 0x141   : > { %v6445_v42 = vpop.f32.mrf.mxu0  ;;  %v6447_v47 = vpop.f32.mrf.mxu1 }
 0x143   : > { %v6449_v25 = vpop.f32.mrf.mxu0  ;;  %v4952_v31 = vpop.f32.mrf.mxu1  ;;  %5199 = vmatmul.mubr.bf16.gmra.mxu1 %v5508_v61  ;;  %5255 = vmatmul.mubr.bf16.gmra.mxu0 %v5509_v62 }
 0x144   : > { %v1038_v38 = vadd.f32 %v4952_v31, %v6349_v49  ;;  %5202 = vmatprep.mubr.bf16.mxu1 %v5510_v20  ;;  %5258 = vmatprep.mubr.bf16.mxu0 %v5511_v41  ;;  %v5516_v20 = vld [vmem:[%s5892_s22 + $0x84] sm:$0xff]  }
 0x145   : > { %v6452_v53 = vpop.f32.mrf.mxu0  ;;  %v1029_v39 = vpop.f32.mrf.mxu1  ;;  %v5517_v41 = vld [vmem:[%s5892_s22 + $0x80] sm:$0xff]  }
 0x146   : > { %v1030_v5 = vadd.f32 %v1029_v39, %v6353_v52 }
 0x147   : > { %v6455_v6 = vpop.f32.mrf.mxu0  ;;  %v4953_v7 = vpop.f32.mrf.mxu1 }
 0x148   : > { %v1041_v22 = vadd.f32 %v4953_v7, %v6357_v57  ;;  %v5518_v7 = vld [vmem:[%s5892_s22 + $0x8c] sm:$0xff]  }
 0x149   : > { %v6462_v48 = vpop.f32.mrf.mxu0  ;;  %v1032_v30 = vpop.f32.mrf.mxu1 }
 0x14a   : > { %v1033_v49 = vadd.f32 %v1032_v30, %v6365_v9 }
 0x14b   : > { %v4956_v55 = vpop.f32.mrf.mxu1  ;;  %v5012_v1 = vpop.f32.mrf.mxu0  ;;  %5203 = vmatmul.mubr.bf16.gmra.mxu1 %v5512_v19  ;;  %5259 = vmatmul.mubr.bf16.gmra.mxu0 %v5513_v21 }
 0x14c   : > { %v1054_v52 = vadd.f32 %v4956_v55, %v6369_v12  ;;  %v6466_v63 = vadd.f32 %v5012_v1, %v1038_v38  ;;  %5206 = vmatprep.mubr.bf16.mxu1 %v5514_v23  ;;  %5262 = vmatprep.mubr.bf16.mxu0 %v5515_v44  ;;  %v5519_v12 = vld [vmem:[%s5892_s22 + $0x88] sm:$0xff]  }
 0x14d   : > { %v1045_v57 = vpop.f32.mrf.mxu1  ;;  %v1479_v4 = vpop.f32.mrf.mxu0 }
 0x14e   : > { %v1046_v46 = vadd.f32 %v1045_v57, %v6373_v15  ;;  %v6469_v61 = vadd.f32 %v1479_v4, %v1030_v5  ;;  %v5520_v57 = vld [vmem:[%s5892_s22 + $0x94] sm:$0xff]  }
 0x14f   : > { %v4957_v9 = vpop.f32.mrf.mxu1  ;;  %v5013_v62 = vpop.f32.mrf.mxu0  ;;  %v5521_v4 = vld [vmem:[%s5892_s22 + $0x90] sm:$0xff]  }
 0x150   : > { %v1057_v31 = vadd.f32 %v4957_v9, %v6377_v17  ;;  %v6474_v39 = vadd.f32 %v5013_v62, %v1041_v22 }
 0x151   : > { %v1048_v38 = vpop.f32.mrf.mxu1  ;;  %v1482_v19 = vpop.f32.mrf.mxu0 }
 0x152   : > { %v1049_v21 = vadd.f32 %v1048_v38, %v6385_v24  ;;  %v6479_v23 = vadd.f32 %v1482_v19, %v1033_v49 }
 0x153   : > { %v4960_v15 = vpop.f32.mrf.mxu1  ;;  %v5016_v5 = vpop.f32.mrf.mxu0  ;;  %5207 = vmatmul.mubr.bf16.gmra.mxu1 %v5516_v20  ;;  %5263 = vmatmul.mubr.bf16.gmra.mxu0 %v5517_v41  ;;  %v5522_v20 = vld [vmem:[%s5892_s22 + $0x9c] sm:$0xff]  }
 0x154   : > { %v1070_v17 = vadd.f32 %v4960_v15, %v6389_v29  ;;  %v6482_v22 = vadd.f32 %v5016_v5, %v1054_v52  ;;  %5210 = vmatprep.mubr.bf16.mxu1 %v5518_v7  ;;  %5266 = vmatprep.mubr.bf16.mxu0 %v5519_v12  ;;  %v5523_v29 = vld [vmem:[%s5892_s22 + $0x98] sm:$0xff]  }
 0x155   : > { %v1061_v44 = vpop.f32.mrf.mxu1  ;;  %v1495_v30 = vpop.f32.mrf.mxu0 }
 0x156   : > { %v1062_v24 = vadd.f32 %v1061_v44, %v6393_v33  ;;  %v6485_v55 = vadd.f32 %v1495_v30, %v1046_v46  ;;  %v5524_v44 = vld [vmem:[%s5892_s22 + $0xa4] sm:$0xff]  }
 0x157   : > { %v4961_v49 = vpop.f32.mrf.mxu1  ;;  %v5017_v1 = vpop.f32.mrf.mxu0  ;;  %v5525_v30 = vld [vmem:[%s5892_s22 + $0xa0] sm:$0xff]  }
 0x158   : > { %v1073_v9 = vadd.f32 %v4961_v49, %v6397_v36  ;;  %v6490_v62 = vadd.f32 %v5017_v1, %v1057_v31 }
 0x159   : > { %v1064_v52 = vpop.f32.mrf.mxu1  ;;  %v1498_v41 = vpop.f32.mrf.mxu0 }
 0x15a   : > { %v1065_v7 = vadd.f32 %v1064_v52, %v6405_v3  ;;  %v6495_v12 = vadd.f32 %v1498_v41, %v1049_v21 }
 0x15b   : > { %v4964_v33 = vpop.f32.mrf.mxu1  ;;  %v5020_v46 = vpop.f32.mrf.mxu0  ;;  %5211 = vmatmul.mubr.bf16.gmra.mxu1 %v5520_v57  ;;  %5267 = vmatmul.mubr.bf16.gmra.mxu0 %v5521_v4  ;;  %v5526_v57 = vld [vmem:[%s5892_s22 + $0xac] sm:$0xff]  }
 0x15c   : > { %v1086_v36 = vadd.f32 %v4964_v33, %v6409_v56  ;;  %v6498_v31 = vadd.f32 %v5020_v46, %v1070_v17  ;;  %5214 = vmatprep.mubr.bf16.mxu1 %v5522_v20  ;;  %5270 = vmatprep.mubr.bf16.mxu0 %v5523_v29  ;;  %v5527_v56 = vld [vmem:[%s5892_s22 + $0xa8] sm:$0xff]  }
 0x15d   : > { %v1077_v38 = vpop.f32.mrf.mxu1  ;;  %v1511_v19 = vpop.f32.mrf.mxu0 }
 0x15e   : > { %v1078_v3 = vadd.f32 %v1077_v38, %v6413_v27  ;;  %v6501_v15 = vadd.f32 %v1511_v19, %v1062_v24  ;;  %v5528_v38 = vld [vmem:[%s5892_s22 + $0xb4] sm:$0xff]  }
 0x15f   : > { %v4965_v21 = vpop.f32.mrf.mxu1  ;;  %v5021_v5 = vpop.f32.mrf.mxu0  ;;  %v5529_v19 = vld [vmem:[%s5892_s22 + $0xb0] sm:$0xff]  }
 0x160   : > { %v1089_v49 = vadd.f32 %v4965_v21, %v6417_v37  ;;  %v6506_v1 = vadd.f32 %v5021_v5, %v1073_v9 }
 0x161   : > { %v1080_v17 = vpop.f32.mrf.mxu1  ;;  %v1514_v4 = vpop.f32.mrf.mxu0 }
 0x162   : > { %v1081_v20 = vadd.f32 %v1080_v17, %v6425_v50  ;;  %v6511_v29 = vadd.f32 %v1514_v4, %v1065_v7 }
 0x163   : > { %v4968_v27 = vpop.f32.mrf.mxu1  ;;  %v5024_v24 = vpop.f32.mrf.mxu0  ;;  %5215 = vmatmul.mubr.bf16.gmra.mxu1 %v5524_v44  ;;  %5271 = vmatmul.mubr.bf16.gmra.mxu0 %v5525_v30  ;;  %v5530_v44 = vld [vmem:[%s5892_s22 + $0xbc] sm:$0xff]  }
 0x164   : > { %v1102_v37 = vadd.f32 %v4968_v27, %v6429_v58  ;;  %v6514_v9 = vadd.f32 %v5024_v24, %v1086_v36  ;;  %5218 = vmatprep.mubr.bf16.mxu1 %v5526_v57  ;;  %5274 = vmatprep.mubr.bf16.mxu0 %v5527_v56  ;;  %v5531_v58 = vld [vmem:[%s5892_s22 + $0xb8] sm:$0xff]  }
 0x165   : > { %v1093_v52 = vpop.f32.mrf.mxu1  ;;  %v1527_v41 = vpop.f32.mrf.mxu0 }
 0x166   : > { %v1094_v50 = vadd.f32 %v1093_v52, %v6433_v10  ;;  %v6517_v33 = vadd.f32 %v1527_v41, %v1078_v3  ;;  %v5532_v52 = vld [vmem:[%s5892_s22 + $0xc4] sm:$0xff]  }
 0x167   : > { %v4969_v7 = vpop.f32.mrf.mxu1  ;;  %v5025_v46 = vpop.f32.mrf.mxu0  ;;  %v5533_v41 = vld [vmem:[%s5892_s22 + $0xc0] sm:$0xff]  }
 0x168   : > { %v1105_v21 = vadd.f32 %v4969_v7, %v6437_v40  ;;  %v6522_v5 = vadd.f32 %v5025_v46, %v1089_v49 }
 0x169   : > { %v1096_v36 = vpop.f32.mrf.mxu1  ;;  %v1530_v30 = vpop.f32.mrf.mxu0 }
 0x16a   : > { %v1097_v57 = vadd.f32 %v1096_v36, %v6445_v42  ;;  %v6527_v56 = vadd.f32 %v1530_v30, %v1081_v20 }
 0x16b   : > { %v4972_v10 = vpop.f32.mrf.mxu1  ;;  %v5028_v3 = vpop.f32.mrf.mxu0  ;;  %5219 = vmatmul.mubr.bf16.gmra.mxu1 %v5528_v38  ;;  %5275 = vmatmul.mubr.bf16.gmra.mxu0 %v5529_v19  ;;  %v5534_v38 = vld [vmem:[%s5892_s22 + $0xcc] sm:$0xff]  }
 0x16c   : > { %v1118_v40 = vadd.f32 %v4972_v10, %v6449_v25  ;;  %v6530_v49 = vadd.f32 %v5028_v3, %v1102_v37  ;;  %5222 = vmatprep.mubr.bf16.mxu1 %v5530_v44  ;;  %5278 = vmatprep.mubr.bf16.mxu0 %v5531_v58  ;;  %v5535_v25 = vld [vmem:[%s5892_s22 + $0xc8] sm:$0xff]  }
 0x16d   : > { %v1109_v17 = vpop.f32.mrf.mxu1  ;;  %v1543_v4 = vpop.f32.mrf.mxu0 }
 0x16e   : > { %v1110_v42 = vadd.f32 %v1109_v17, %v6452_v53  ;;  %v6533_v27 = vadd.f32 %v1543_v4, %v1094_v50  ;;  %v5536_v17 = vld [vmem:[%s5892_s22 + $0xd4] sm:$0xff]   ;;  %v5538_v4 = vld [vmem:[%s5892_s22 + $0xdc] sm:$0xff]  }
 0x16f   : > { %v4973_v20 = vpop.f32.mrf.mxu1  ;;  %v5029_v24 = vpop.f32.mrf.mxu0 }
 0x170   : > { %v1121_v7 = vadd.f32 %v4973_v20, %v6455_v6  ;;  %v6538_v46 = vadd.f32 %v5029_v24, %v1105_v21  ;;  %v5539_v20 = vld [vmem:[%s5892_s22 + $0xd8] sm:$0xff]  }
 0x171   : > { %v1112_v37 = vpop.f32.mrf.mxu1  ;;  %v1546_v19 = vpop.f32.mrf.mxu0 }
 0x172   : > { %v1113_v44 = vadd.f32 %v1112_v37, %v6462_v48  ;;  %v6543_v58 = vadd.f32 %v1546_v19, %v1097_v57  ;;  %v5537_v48 = vld [vmem:[%s5892_s22 + $0xd0] sm:$0xff]  }
 0x173   : > { %v4976_v53 = vpop.f32.mrf.mxu1  ;;  %v5032_v50 = vpop.f32.mrf.mxu0  ;;  %5223 = vmatmul.mubr.bf16.gmra.mxu1 %v5532_v52  ;;  %5279 = vmatmul.mubr.bf16.gmra.mxu0 %v5533_v41 }
 0x174   : > { %v6545_v36 = vadd.f32 %v5032_v50, %v1118_v40  ;;  %5226 = vmatprep.mubr.bf16.mxu1 %v5534_v38  ;;  %5282 = vmatprep.mubr.bf16.mxu0 %v5535_v25  ;;  %v1134_v52 = vadd.f32 %v4976_v53, %v6351_v2 }
 0x175   : > { %v1125_v6 = vpop.f32.mrf.mxu1  ;;  %v1559_v21 = vpop.f32.mrf.mxu0 }
 0x176   : > { %v6547_v30 = vadd.f32 %v1559_v21, %v1110_v42  ;;  %v1126_v42 = vadd.f32 %v1125_v6, %v6355_v54  ;;  %v5540_v21 = vld [vmem:[%s5892_s22 + $0xe4] sm:$0xff]  }
 0x177   : > { %v4977_v10 = vpop.f32.mrf.mxu1  ;;  %v5033_v3 = vpop.f32.mrf.mxu0 }
 0x178   : > { %v6551_v57 = vadd.f32 %v5033_v3, %v1121_v7  ;;  %v1137_v50 = vadd.f32 %v4977_v10, %v6359_v60  ;;  %v5541_v3 = vld [vmem:[%s5892_s22 + $0xe0] sm:$0xff]  }
 0x179   : > { %v1128_v24 = vpop.f32.mrf.mxu1  ;;  %v1562_v37 = vpop.f32.mrf.mxu0 }
 0x17a   : > { %v6556_v40 = vadd.f32 %v1562_v37, %v1113_v44 }
 0x17b   : > { %v4980_v41 = vpop.f32.mrf.mxu1  ;;  %v5036_v38 = vpop.f32.mrf.mxu0  ;;  %5227 = vmatmul.mubr.bf16.gmra.mxu1 %v5536_v17  ;;  %5283 = vmatmul.mubr.bf16.gmra.mxu0 %v5537_v48  ;;  %v1129_v17 = vadd.f32 %v1128_v24, %v6367_v11  ;;  %v5542_v48 = vld [vmem:[%s5892_s22 + $0xe8] sm:$0xff]  }
 0x17c   : > { %v6559_v25 = vadd.f32 %v5036_v38, %v1134_v52  ;;  %5230 = vmatprep.mubr.bf16.mxu1 %v5538_v4  ;;  %5286 = vmatprep.mubr.bf16.mxu0 %v5539_v20  ;;  %v1150_v4 = vadd.f32 %v4980_v41, %v6371_v14  ;;  %v5543_v14 = vld [vmem:[%s5892_s22 + $0xf0] sm:$0xff]  }
 0x17d   : > { %v1141_v7 = vpop.f32.mrf.mxu1  ;;  %v1575_v19 = vpop.f32.mrf.mxu0 }
 0x17e   : > { %v6562_v2 = vadd.f32 %v1575_v19, %v1126_v42  ;;  %v1142_v10 = vadd.f32 %v1141_v7, %v6375_v16 }
 0x17f   : > { %v4981_v44 = vpop.f32.mrf.mxu1  ;;  %v5037_v53 = vpop.f32.mrf.mxu0 }
 0x180   : > { %v6567_v37 = vadd.f32 %v5037_v53, %v1137_v50  ;;  %v1153_v42 = vadd.f32 %v4981_v44, %v6379_v18 }
 0x181   : > { %v1144_v54 = vpop.f32.mrf.mxu1  ;;  %v1578_v6 = vpop.f32.mrf.mxu0 }
 0x182   : > { %v6571_v20 = vadd.f32 %v1578_v6, %v1129_v17  ;;  %v1145_v41 = vadd.f32 %v1144_v54, %v6387_v28 }
 0x183   : > { %v4984_v52 = vpop.f32.mrf.mxu1  ;;  %v5040_v60 = vpop.f32.mrf.mxu0  ;;  %5231 = vmatmul.mubr.bf16.gmra.mxu1 %v5540_v21  ;;  %5287 = vmatmul.mubr.bf16.gmra.mxu0 %v5541_v3 }
 0x184   : > { %v6574_v38 = vadd.f32 %v5040_v60, %v1150_v4  ;;  %5290 = vmatprep.mubr.bf16.mxu0 %v5542_v48  ;;  %v1166_v16 = vadd.f32 %v4984_v52, %v6391_v32 }
 0x185   : > { %v1157_v11 = vpop.f32.mrf.mxu1  ;;  %v1591_v24 = vpop.f32.mrf.mxu0 }
 0x186   : > { %v6577_v19 = vadd.f32 %v1591_v24, %v1142_v10  ;;  %v1158_v18 = vadd.f32 %v1157_v11, %v6395_v34 }
 0x187   : > { %v4985_v50 = vpop.f32.mrf.mxu1  ;;  %v5041_v53 = vpop.f32.mrf.mxu0 }
 0x188   : > { %v6581_v17 = vadd.f32 %v5041_v53, %v1153_v42  ;;  %v1169_v10 = vadd.f32 %v4985_v50, %v6399_v43 }
 0x189   : > { %v1160_v21 = vpop.f32.mrf.mxu1  ;;  %v1594_v3 = vpop.f32.mrf.mxu0 }
 0x18a   : > { %v6584_v7 = vadd.f32 %v1594_v3, %v1145_v41  ;;  %v1161_v42 = vadd.f32 %v1160_v21, %v6407_v26 }
 0x18b   : > { %v4988_v48 = vpop.f32.mrf.mxu1  ;;  %v5044_v6 = vpop.f32.mrf.mxu0  ;;  %5291 = vmatmul.mubr.bf16.gmra.mxu0 %v5543_v14 }
 0x18c   : > { %v6587_v44 = vadd.f32 %v5044_v6, %v1166_v16  ;;  %v1182_v14 = vadd.f32 %v4988_v48, %v6411_v0 }
 0x18d   : > { %v1173_v4 = vpop.f32.mrf.mxu1  ;;  %v1607_v60 = vpop.f32.mrf.mxu0 }
 0x18e   : > { %v6590_v28 = vadd.f32 %v1607_v60, %v1158_v18  ;;  %v1174_v3 = vadd.f32 %v1173_v4, %v6415_v35 }
 0x18f   : > { %v4989_v54 = vpop.f32.mrf.mxu1  ;;  %v5045_v24 = vpop.f32.mrf.mxu0 }
 0x190   : > { %v6593_v32 = vadd.f32 %v5045_v24, %v1169_v10  ;;  %v1185_v6 = vadd.f32 %v4989_v54, %v6419_v45 }
 0x191   : > { %v1176_v52 = vpop.f32.mrf.mxu1  ;;  %v1610_v53 = vpop.f32.mrf.mxu0 }
 0x192   : > { %v6596_v41 = vadd.f32 %v1610_v53, %v1161_v42  ;;  %v1177_v60 = vadd.f32 %v1176_v52, %v6427_v51 }
 0x193   : > { %v4992_v34 = vpop.f32.mrf.mxu1  ;;  %v5048_v11 = vpop.f32.mrf.mxu0 }
 0x194   : > { %v6599_v16 = vadd.f32 %v5048_v11, %v1182_v14  ;;  %v1198_v24 = vadd.f32 %v4992_v34, %v6431_v8 }
 0x195   : > { %v1189_v43 = vpop.f32.mrf.mxu1  ;;  %v1623_v50 = vpop.f32.mrf.mxu0 }
 0x196   : > { %v6602_v18 = vadd.f32 %v1623_v50, %v1174_v3  ;;  %v1190_v53 = vadd.f32 %v1189_v43, %v6435_v13 }
 0x197   : > { %v4993_v26 = vpop.f32.mrf.mxu1  ;;  %v5049_v21 = vpop.f32.mrf.mxu0 }
 0x198   : > { %v6605_v10 = vadd.f32 %v5049_v21, %v1185_v6  ;;  %v1201_v51 = vadd.f32 %v4993_v26, %v6439_v59 }
 0x199   : > { %v1192_v0 = vpop.f32.mrf.mxu1  ;;  %v1626_v48 = vpop.f32.mrf.mxu0 }
 0x19a   : > { %v6608_v42 = vadd.f32 %v1626_v48, %v1177_v60  ;;  %v1193_v34 = vadd.f32 %v1192_v0, %v6447_v47 }
 0x19b   : > { %v5052_v35 = vpop.f32.mrf.mxu0  ;;  %v5072_v4 = vpop.f32.mrf.mxu1 }
 0x19c   : > { %v6611_v14 = vadd.f32 %v5052_v35, %v1198_v24  ;;  %v2150_v45 = vadd.f32 %v5072_v4, %v6466_v63 }
 0x19d   : > { %v1639_v54 = vpop.f32.mrf.mxu0  ;;  %v1973_v11 = vpop.f32.mrf.mxu1 }
 0x19e   : > { %v6615_v52 = vadd.f32 %v1639_v54, %v1190_v53  ;;  %v2148_v3 = vadd.f32 %v1973_v11, %v6469_v61 }
 0x19f   : > { %v5053_v50 = vpop.f32.mrf.mxu0  ;;  %v5073_v8 = vpop.f32.mrf.mxu1 }
 0x1a0   : > { %v6619_v6 = vadd.f32 %v5053_v50, %v1201_v51  ;;  %v2151_v13 = vadd.f32 %v5073_v8, %v6474_v39 }
 0x1a1   : > { %v1642_v43 = vpop.f32.mrf.mxu0  ;;  %v1976_v21 = vpop.f32.mrf.mxu1 }
 0x1a2   : > { %v6622_v60 = vadd.f32 %v1642_v43, %v1193_v34  ;;  %v2149_v63 = vadd.f32 %v1976_v21, %v6479_v23 }
 0x1a3   : > { %v5076_v48 = vpop.f32.mrf.mxu1  ;;  %v5132_v59 = vpop.f32.mrf.mxu0 }
 0x1a4   : > { %v2154_v26 = vadd.f32 %v5076_v48, %v6482_v22  ;;  %v6626_v24 = vadd.f32 %v5132_v59, %v2150_v45 }
 0x1a5   : > { %v1989_v61 = vpop.f32.mrf.mxu1  ;;  %v2467_v35 = vpop.f32.mrf.mxu0 }
 0x1a6   : > { %v2152_v47 = vadd.f32 %v1989_v61, %v6485_v55  ;;  %v6629_v0 = vadd.f32 %v2467_v35, %v2148_v3 }
 0x1a7   : > { %v5077_v4 = vpop.f32.mrf.mxu1  ;;  %v5133_v39 = vpop.f32.mrf.mxu0 }
 0x1a8   : > { %v2155_v53 = vadd.f32 %v5077_v4, %v6490_v62  ;;  %v6632_v54 = vadd.f32 %v5133_v39, %v2151_v13 }
 0x1a9   : > { %v1992_v11 = vpop.f32.mrf.mxu1  ;;  %v2470_v23 = vpop.f32.mrf.mxu0 }
 0x1aa   : > { %v2153_v51 = vadd.f32 %v1992_v11, %v6495_v12  ;;  %v6635_v50 = vadd.f32 %v2470_v23, %v2149_v63 }
 0x1ab   : > { %v5080_v22 = vpop.f32.mrf.mxu1  ;;  %v5136_v45 = vpop.f32.mrf.mxu0 }
 0x1ac   : > { %v2158_v8 = vadd.f32 %v5080_v22, %v6498_v31  ;;  %v6638_v34 = vadd.f32 %v5136_v45, %v2154_v26 }
 0x1ad   : > { %v2005_v55 = vpop.f32.mrf.mxu1  ;;  %v2483_v3 = vpop.f32.mrf.mxu0 }
 0x1ae   : > { %v2156_v43 = vadd.f32 %v2005_v55, %v6501_v15  ;;  %v6641_v21 = vadd.f32 %v2483_v3, %v2152_v47 }
 0x1af   : > { %v5081_v62 = vpop.f32.mrf.mxu1  ;;  %v5137_v13 = vpop.f32.mrf.mxu0 }
 0x1b0   : > { %v2159_v48 = vadd.f32 %v5081_v62, %v6506_v1  ;;  %v6644_v59 = vadd.f32 %v5137_v13, %v2155_v53 }
 0x1b1   : > { %v2008_v12 = vpop.f32.mrf.mxu1  ;;  %v2486_v63 = vpop.f32.mrf.mxu0 }
 0x1b2   : > { %v2157_v61 = vadd.f32 %v2008_v12, %v6511_v29  ;;  %v6647_v35 = vadd.f32 %v2486_v63, %v2153_v51 }
 0x1b3   : > { %v5084_v31 = vpop.f32.mrf.mxu1  ;;  %v5140_v26 = vpop.f32.mrf.mxu0 }
 0x1b4   : > { %v2162_v4 = vadd.f32 %v5084_v31, %v6514_v9  ;;  %v6650_v39 = vadd.f32 %v5140_v26, %v2158_v8 }
 0x1b5   : > { %v2021_v15 = vpop.f32.mrf.mxu1  ;;  %v2499_v47 = vpop.f32.mrf.mxu0 }
 0x1b6   : > { %v2160_v11 = vadd.f32 %v2021_v15, %v6517_v33  ;;  %v6653_v23 = vadd.f32 %v2499_v47, %v2156_v43 }
 0x1b7   : > { %v5085_v1 = vpop.f32.mrf.mxu1  ;;  %v5141_v53 = vpop.f32.mrf.mxu0 }
 0x1b8   : > { %v2163_v22 = vadd.f32 %v5085_v1, %v6522_v5  ;;  %v6656_v45 = vadd.f32 %v5141_v53, %v2159_v48 }
 0x1b9   : > { %v2024_v29 = vpop.f32.mrf.mxu1  ;;  %v2502_v51 = vpop.f32.mrf.mxu0 }
 0x1ba   : > { %v2161_v55 = vadd.f32 %v2024_v29, %v6527_v56  ;;  %v6659_v3 = vadd.f32 %v2502_v51, %v2157_v61 }
 0x1bb   : > { %v5088_v9 = vpop.f32.mrf.mxu1  ;;  %v5144_v8 = vpop.f32.mrf.mxu0 }
 0x1bc   : > { %v2166_v62 = vadd.f32 %v5088_v9, %v6530_v49  ;;  %v6662_v13 = vadd.f32 %v5144_v8, %v2162_v4 }
 0x1bd   : > { %v2037_v33 = vpop.f32.mrf.mxu1  ;;  %v2515_v43 = vpop.f32.mrf.mxu0 }
 0x1be   : > { %v2164_v12 = vadd.f32 %v2037_v33, %v6533_v27  ;;  %v6665_v63 = vadd.f32 %v2515_v43, %v2160_v11 }
 0x1bf   : > { %v5089_v5 = vpop.f32.mrf.mxu1  ;;  %v5145_v48 = vpop.f32.mrf.mxu0 }
 0x1c0   : > { %v2167_v31 = vadd.f32 %v5089_v5, %v6538_v46  ;;  %v6668_v26 = vadd.f32 %v5145_v48, %v2163_v22 }
 0x1c1   : > { %v2040_v56 = vpop.f32.mrf.mxu1  ;;  %v2518_v61 = vpop.f32.mrf.mxu0 }
 0x1c2   : > { %v2165_v15 = vadd.f32 %v2040_v56, %v6543_v58  ;;  %v6671_v47 = vadd.f32 %v2518_v61, %v2161_v55 }
 0x1c3   : > { %v5092_v49 = vpop.f32.mrf.mxu1  ;;  %v5148_v4 = vpop.f32.mrf.mxu0 }
 0x1c4   : > { %v2170_v1 = vadd.f32 %v5092_v49, %v6545_v36  ;;  %v6674_v53 = vadd.f32 %v5148_v4, %v2166_v62 }
 0x1c5   : > { %v2053_v27 = vpop.f32.mrf.mxu1  ;;  %v2531_v11 = vpop.f32.mrf.mxu0 }
 0x1c6   : > { %v2168_v29 = vadd.f32 %v2053_v27, %v6547_v30  ;;  %v6677_v51 = vadd.f32 %v2531_v11, %v2164_v12 }
 0x1c7   : > { %v5093_v46 = vpop.f32.mrf.mxu1  ;;  %v5149_v22 = vpop.f32.mrf.mxu0 }
 0x1c8   : > { %v2171_v9 = vadd.f32 %v5093_v46, %v6551_v57  ;;  %v6680_v8 = vadd.f32 %v5149_v22, %v2167_v31 }
 0x1c9   : > { %v2056_v58 = vpop.f32.mrf.mxu1  ;;  %v2534_v55 = vpop.f32.mrf.mxu0 }
 0x1ca   : > { %v2169_v33 = vadd.f32 %v2056_v58, %v6556_v40  ;;  %v6683_v43 = vadd.f32 %v2534_v55, %v2165_v15 }
 0x1cb   : > { %v5096_v36 = vpop.f32.mrf.mxu1  ;;  %v5152_v62 = vpop.f32.mrf.mxu0 }
 0x1cc   : > { %v2174_v5 = vadd.f32 %v5096_v36, %v6559_v25  ;;  %v6686_v48 = vadd.f32 %v5152_v62, %v2170_v1 }
 0x1cd   : > { %v2069_v30 = vpop.f32.mrf.mxu1  ;;  %v2547_v12 = vpop.f32.mrf.mxu0 }
 0x1ce   : > { %v2172_v56 = vadd.f32 %v2069_v30, %v6562_v2  ;;  %v6689_v61 = vadd.f32 %v2547_v12, %v2168_v29 }
 0x1cf   : > { %v5097_v57 = vpop.f32.mrf.mxu1  ;;  %v5153_v31 = vpop.f32.mrf.mxu0 }
 0x1d0   : > { %v2175_v49 = vadd.f32 %v5097_v57, %v6567_v37  ;;  %v6692_v4 = vadd.f32 %v5153_v31, %v2171_v9 }
 0x1d1   : > { %v2072_v40 = vpop.f32.mrf.mxu1  ;;  %v2550_v15 = vpop.f32.mrf.mxu0 }
 0x1d2   : > { %v2173_v27 = vadd.f32 %v2072_v40, %v6571_v20  ;;  %v6695_v11 = vadd.f32 %v2550_v15, %v2169_v33 }
 0x1d3   : > { %v5100_v25 = vpop.f32.mrf.mxu1  ;;  %v5156_v1 = vpop.f32.mrf.mxu0 }
 0x1d4   : > { %v2178_v46 = vadd.f32 %v5100_v25, %v6574_v38  ;;  %v6698_v22 = vadd.f32 %v5156_v1, %v2174_v5 }
 0x1d5   : > { %v2085_v2 = vpop.f32.mrf.mxu1  ;;  %v2563_v29 = vpop.f32.mrf.mxu0 }
 0x1d6   : > { %v2176_v58 = vadd.f32 %v2085_v2, %v6577_v19  ;;  %v6701_v55 = vadd.f32 %v2563_v29, %v2172_v56 }
 0x1d7   : > { %v5101_v37 = vpop.f32.mrf.mxu1  ;;  %v5157_v9 = vpop.f32.mrf.mxu0 }
 0x1d8   : > { %v2179_v36 = vadd.f32 %v5101_v37, %v6581_v17  ;;  %v6704_v62 = vadd.f32 %v5157_v9, %v2175_v49 }
 0x1d9   : > { %v2088_v20 = vpop.f32.mrf.mxu1  ;;  %v2566_v33 = vpop.f32.mrf.mxu0 }
 0x1da   : > { %v2177_v30 = vadd.f32 %v2088_v20, %v6584_v7  ;;  %v6707_v12 = vadd.f32 %v2566_v33, %v2173_v27 }
 0x1db   : > { %v5104_v38 = vpop.f32.mrf.mxu1  ;;  %v5160_v5 = vpop.f32.mrf.mxu0 }
 0x1dc   : > { %v2182_v57 = vadd.f32 %v5104_v38, %v6587_v44  ;;  %v6710_v31 = vadd.f32 %v5160_v5, %v2178_v46 }
 0x1dd   : > { %v2101_v19 = vpop.f32.mrf.mxu1  ;;  %v2579_v56 = vpop.f32.mrf.mxu0 }
 0x1de   : > { %v2180_v40 = vadd.f32 %v2101_v19, %v6590_v28  ;;  %v6713_v15 = vadd.f32 %v2579_v56, %v2176_v58 }
 0x1df   : > { %v5105_v17 = vpop.f32.mrf.mxu1  ;;  %v5161_v49 = vpop.f32.mrf.mxu0 }
 0x1e0   : > { %v2183_v25 = vadd.f32 %v5105_v17, %v6593_v32  ;;  %v6716_v1 = vadd.f32 %v5161_v49, %v2179_v36 }
 0x1e1   : > { %v2104_v7 = vpop.f32.mrf.mxu1  ;;  %v2582_v27 = vpop.f32.mrf.mxu0 }
 0x1e2   : > { %v2181_v2 = vadd.f32 %v2104_v7, %v6596_v41  ;;  %v6719_v29 = vadd.f32 %v2582_v27, %v2177_v30 }
 0x1e3   : > { %v5108_v44 = vpop.f32.mrf.mxu1  ;;  %v5164_v46 = vpop.f32.mrf.mxu0 }
 0x1e4   : > { %v2186_v37 = vadd.f32 %v5108_v44, %v6599_v16  ;;  %v6722_v9 = vadd.f32 %v5164_v46, %v2182_v57 }
 0x1e5   : > { %v2117_v28 = vpop.f32.mrf.mxu1  ;;  %v2595_v58 = vpop.f32.mrf.mxu0 }
 0x1e6   : > { %v2184_v20 = vadd.f32 %v2117_v28, %v6602_v18  ;;  %v6725_v33 = vadd.f32 %v2595_v58, %v2180_v40 }
 0x1e7   : > { %v5109_v32 = vpop.f32.mrf.mxu1  ;;  %v5165_v36 = vpop.f32.mrf.mxu0 }
 0x1e8   : > { %v2187_v38 = vadd.f32 %v5109_v32, %v6605_v10  ;;  %v6728_v5 = vadd.f32 %v5165_v36, %v2183_v25 }
 0x1e9   : > { %v2120_v41 = vpop.f32.mrf.mxu1  ;;  %v2598_v30 = vpop.f32.mrf.mxu0 }
 0x1ea   : > { %v2185_v19 = vadd.f32 %v2120_v41, %v6608_v42  ;;  %v6731_v56 = vadd.f32 %v2598_v30, %v2181_v2 }
 0x1eb   : > { %v5112_v16 = vpop.f32.mrf.mxu1  ;;  %v5168_v57 = vpop.f32.mrf.mxu0 }
 0x1ec   : > { %v2190_v17 = vadd.f32 %v5112_v16, %v6611_v14  ;;  %v6734_v49 = vadd.f32 %v5168_v57, %v2186_v37 }
 0x1ed   : > { %v2133_v18 = vpop.f32.mrf.mxu1  ;;  %v2611_v40 = vpop.f32.mrf.mxu0 }
 0x1ee   : > { %v2188_v7 = vadd.f32 %v2133_v18, %v6615_v52  ;;  %v6737_v27 = vadd.f32 %v2611_v40, %v2184_v20 }
 0x1ef   : > { %v5113_v10 = vpop.f32.mrf.mxu1  ;;  %v5169_v25 = vpop.f32.mrf.mxu0 }
 0x1f0   : > { %v2191_v44 = vadd.f32 %v5113_v10, %v6619_v6  ;;  %v6740_v46 = vadd.f32 %v5169_v25, %v2187_v38 }
 0x1f1   : > { %v2136_v42 = vpop.f32.mrf.mxu1  ;;  %v2614_v2 = vpop.f32.mrf.mxu0 }
 0x1f2   : > { %v2189_v28 = vadd.f32 %v2136_v42, %v6622_v60  ;;  %v6743_v58 = vadd.f32 %v2614_v2, %v2185_v19 }
 0x1f3   : > { %v5172_v14 = vpop.f32.mrf.mxu0  ;;  %v5192_v37 = vpop.f32.mrf.mxu1 }
 0x1f4   : > { %v6745_v32 = vadd.f32 %v5172_v14, %v2190_v17  ;;  %v3138_v57 = vadd.f32 %v5192_v37, %v6626_v24 }
 0x1f5   : > { %v2627_v36 = vpop.f32.mrf.mxu0  ;;  %v2961_v52 = vpop.f32.mrf.mxu1 }
 0x1f6   : > { %v6747_v20 = vadd.f32 %v2627_v36, %v2188_v7  ;;  %v3136_v40 = vadd.f32 %v2961_v52, %v6629_v0  ;;  %v6758_v7 = vld [vmem:[%s6879_s2] ss:$0 sm:$0xff] }
 0x1f7   : > { %v5173_v41 = vpop.f32.mrf.mxu0  ;;  %v5193_v30 = vpop.f32.mrf.mxu1 }
 0x1f8   : > { %v6749_v16 = vadd.f32 %v5173_v41, %v2191_v44  ;;  %v3139_v44 = vadd.f32 %v5193_v30, %v6632_v54 }
 0x1f9   : > { %v2630_v6 = vpop.f32.mrf.mxu0  ;;  %v2964_v38 = vpop.f32.mrf.mxu1 }
 0x1fa   : > { %v6752_v18 = vadd.f32 %v2630_v6, %v2189_v28  ;;  %v3137_v14 = vadd.f32 %v2964_v38, %v6635_v50 }
 0x1fb   : > { %v5196_v60 = vpop.f32.mrf.mxu1  ;;  %v5252_v19 = vpop.f32.mrf.mxu0 }
 0x1fc   : > { %v3632_v17 = vadd.f32 %v5252_v19, %v3138_v57  ;;  %v3142_v41 = vadd.f32 %v5196_v60, %v6638_v34 }
 0x1fd   : > { %v2977_v10 = vpop.f32.mrf.mxu1  ;;  %v3455_v25 = vpop.f32.mrf.mxu0 }
 0x1fe   : > { %v3630_v42 = vadd.f32 %v3455_v25, %v3136_v40  ;;  %v3683_v2 = vadd.f32 %v6758_v7, %v3632_v17  ;;  %v3140_v30 = vadd.f32 %v2977_v10, %v6641_v21 }
 0x1ff   : > { %v5197_v24 = vpop.f32.mrf.mxu1  ;;  %v5253_v28 = vpop.f32.mrf.mxu0 }
 0x200   : > { %v3633_v37 = vadd.f32 %v5253_v28, %v3139_v44  ;;  %v3681_v0 = vadd.f32 %v6758_v7, %v3630_v42  ;;  %5544 = vtanh.f32 %v3683_v2  ;;  %v3143_v25 = vadd.f32 %v5197_v24, %v6644_v59 }
 0x201   : > { %v2980_v36 = vpop.f32.mrf.mxu1  ;;  %v3458_v52 = vpop.f32.mrf.mxu0 }
 0x202   : > { %v3684_v6 = vadd.f32 %v6758_v7, %v3633_v37  ;;  %v3631_v57 = vadd.f32 %v3458_v52, %v3137_v14  ;;  %v3141_v2 = vadd.f32 %v2980_v36, %v6647_v35 }
 0x203   : > { %v5200_v19 = vpop.f32.mrf.mxu1  ;;  %v5256_v54 = vpop.f32.mrf.mxu0 }
 0x204   : > { %5546 = vtanh.f32 %v3684_v6  ;;  %v3682_v40 = vadd.f32 %v6758_v7, %v3631_v57  ;;  %v3636_v17 = vadd.f32 %v5256_v54, %v3142_v41  ;;  %v3146_v37 = vadd.f32 %v5200_v19, %v6650_v39 }
 0x205   : > { %5548 = vtanh.f32 %v3681_v0  ;;  %v2993_v50 = vpop.f32.mrf.mxu1  ;;  %v3471_v38 = vpop.f32.mrf.mxu0 }
 0x206   : > { %5550 = vtanh.f32 %v3682_v40  ;;  %v3634_v44 = vadd.f32 %v3471_v38, %v3140_v30  ;;  %v3687_v34 = vadd.f32 %v6758_v7, %v3636_v17  ;;  %v3144_v41 = vadd.f32 %v2993_v50, %v6653_v23 }
 0x207   : > { %v5201_v60 = vpop.f32.mrf.mxu1  ;;  %v5257_v42 = vpop.f32.mrf.mxu0 }
 0x208   : > { %v3637_v28 = vadd.f32 %v5257_v42, %v3143_v25  ;;  %v3685_v21 = vadd.f32 %v6758_v7, %v3634_v44  ;;  %5552 = vtanh.f32 %v3687_v34  ;;  %v3147_v54 = vadd.f32 %v5201_v60, %v6656_v45 }
 0x209   : > { %v2996_v10 = vpop.f32.mrf.mxu1  ;;  %v3474_v14 = vpop.f32.mrf.mxu0 }
 0x20a   : > { %v3688_v0 = vadd.f32 %v6758_v7, %v3637_v28  ;;  %v3635_v52 = vadd.f32 %v3474_v14, %v3141_v2  ;;  %v3145_v23 = vadd.f32 %v2996_v10, %v6659_v3 }
 0x20b   : > { %v5204_v59 = vpop.f32.mrf.mxu1  ;;  %v5260_v24 = vpop.f32.mrf.mxu0 }
 0x20c   : > { %5554 = vtanh.f32 %v3688_v0  ;;  %v3686_v6 = vadd.f32 %v6758_v7, %v3635_v52  ;;  %v3640_v57 = vadd.f32 %v5260_v24, %v3146_v37  ;;  %v3150_v2 = vadd.f32 %v5204_v59, %v6662_v13 }
 0x20d   : > { %5556 = vtanh.f32 %v3685_v21  ;;  %v3009_v35 = vpop.f32.mrf.mxu1  ;;  %v3487_v36 = vpop.f32.mrf.mxu0 }
 0x20e   : > { %5558 = vtanh.f32 %v3686_v6  ;;  %v3638_v30 = vadd.f32 %v3487_v36, %v3144_v41  ;;  %v3691_v39 = vadd.f32 %v6758_v7, %v3640_v57  ;;  %v5545_v17 = vpop.eup %5544  ;;  %v3148_v3 = vadd.f32 %v3009_v35, %v6665_v63 }
 0x20f   : > { %v5205_v19 = vpop.f32.mrf.mxu1  ;;  %v5261_v40 = vpop.f32.mrf.mxu0 }
 0x210   : > { %v3641_v38 = vadd.f32 %v5261_v40, %v3147_v54  ;;  %v3689_v45 = vadd.f32 %v6758_v7, %v3638_v30  ;;  %5560 = vtanh.f32 %v3691_v39  ;;  %v3151_v59 = vadd.f32 %v5205_v19, %v6668_v26 }
 0x211   : > { %v5547_v25 = vpop.eup %5546  ;;  %v3012_v50 = vpop.f32.mrf.mxu1 }
 0x212   : > { %v3490_v44 = vpop.f32.mrf.mxu0  ;;  %v5549_v34 = vpop.eup %5548  ;;  %v4541_v42 = vpack.c.bf16 %v5547_v25, %v5545_v17  ;;  %v3692_v60 = vadd.f32 %v6758_v7, %v3641_v38  ;;  %v3149_v35 = vadd.f32 %v3012_v50, %v6671_v47 }
 0x213   : > { %v5551_v28 = vpop.eup %5550  ;;  %v3639_v21 = vadd.f32 %v3490_v44, %v3145_v23  ;;  %v5208_v14 = vpop.f32.mrf.mxu1 }
 0x214   : > { %v5264_v37 = vpop.f32.mrf.mxu0  ;;  %4643 = vst [vmem:[%s5706_s24 + $0x8] sm:$0xff] %v4541_v42   ;;  %v4536_v0 = vpack.c.bf16 %v5551_v28, %v5549_v34  ;;  %5562 = vtanh.f32 %v3692_v60  ;;  %v3154_v25 = vadd.f32 %v5208_v14, %v6674_v53 }
 0x215   : > { %v3644_v10 = vadd.f32 %v5264_v37, %v3150_v2  ;;  %v3690_v52 = vadd.f32 %v6758_v7, %v3639_v21  ;;  %v3025_v24 = vpop.f32.mrf.mxu1  ;;  %5564 = vtanh.f32 %v3689_v45  ;;  %v5553_v54 = vpop.eup %5552 }
 0x216   : > { %v3503_v13 = vpop.f32.mrf.mxu0  ;;  %4537 = vst [vmem:[%s5706_s24] sm:$0xff] %v4536_v0   ;;  %v3152_v47 = vadd.f32 %v3025_v24, %v6677_v51 }
 0x217   : > { %v3642_v41 = vadd.f32 %v3503_v13, %v3148_v3  ;;  %5566 = vtanh.f32 %v3690_v52  ;;  %v3695_v6 = vadd.f32 %v6758_v7, %v3644_v10  ;;  %v5209_v57 = vpop.f32.mrf.mxu1 }
 0x218   : > { %v5265_v36 = vpop.f32.mrf.mxu0  ;;  %v3155_v28 = vadd.f32 %v5209_v57, %v6680_v8 }
 0x219   : > { %v3645_v30 = vadd.f32 %v5265_v36, %v3151_v59  ;;  %v5555_v63 = vpop.eup %5554  ;;  %v3028_v39 = vpop.f32.mrf.mxu1  ;;  %v3693_v26 = vadd.f32 %v6758_v7, %v3642_v41  ;;  %5568 = vtanh.f32 %v3695_v6 }
 0x21a   : > { %v3506_v40 = vpop.f32.mrf.mxu0  ;;  %v5557_v17 = vpop.eup %5556  ;;  %v4551_v38 = vpack.c.bf16 %v5555_v63, %v5553_v54  ;;  %v3153_v52 = vadd.f32 %v3028_v39, %v6683_v43 }
 0x21b   : > { %v3696_v19 = vadd.f32 %v6758_v7, %v3645_v30  ;;  %v5559_v23 = vpop.eup %5558  ;;  %v3643_v44 = vadd.f32 %v3506_v40, %v3149_v35  ;;  %v5212_v34 = vpop.f32.mrf.mxu1 }
 0x21c   : > { %v5268_v42 = vpop.f32.mrf.mxu0  ;;  %4645 = vst [vmem:[%s5706_s24 + $0x18] sm:$0xff] %v4551_v38   ;;  %v4546_v2 = vpack.c.bf16 %v5559_v23, %v5557_v17  ;;  %v3158_v41 = vadd.f32 %v5212_v34, %v6686_v48 }
 0x21d   : > { %5570 = vtanh.f32 %v3696_v19  ;;  %v3648_v50 = vadd.f32 %v5268_v42, %v3154_v25  ;;  %v3694_v45 = vadd.f32 %v6758_v7, %v3643_v44  ;;  %v3041_v60 = vpop.f32.mrf.mxu1  ;;  %v5561_v3 = vpop.eup %5560 }
 0x21e   : > { %v3519_v53 = vpop.f32.mrf.mxu0  ;;  %4644 = vst [vmem:[%s5706_s24 + $0x10] sm:$0xff] %v4546_v2   ;;  %5572 = vtanh.f32 %v3693_v26  ;;  %v3156_v35 = vadd.f32 %v3041_v60, %v6689_v61 }
 0x21f   : > { %v3646_v21 = vadd.f32 %v3519_v53, %v3152_v47  ;;  %5574 = vtanh.f32 %v3694_v45  ;;  %v3699_v14 = vadd.f32 %v6758_v7, %v3648_v50  ;;  %v5213_v37 = vpop.f32.mrf.mxu1 }
 0x220   : > { %v5269_v0 = vpop.f32.mrf.mxu0  ;;  %v3159_v38 = vadd.f32 %v5213_v37, %v6692_v4 }
 0x221   : > { %v3649_v10 = vadd.f32 %v5269_v0, %v3155_v28  ;;  %v5563_v51 = vpop.eup %5562  ;;  %v3044_v24 = vpop.f32.mrf.mxu1  ;;  %v3697_v6 = vadd.f32 %v6758_v7, %v3646_v21  ;;  %5576 = vtanh.f32 %v3699_v14 }
 0x222   : > { %v3522_v13 = vpop.f32.mrf.mxu0  ;;  %v4561_v59 = vpack.c.bf16 %v5563_v51, %v5561_v3  ;;  %v5565_v57 = vpop.eup %5564  ;;  %v3157_v42 = vadd.f32 %v3044_v24, %v6695_v11 }
 0x223   : > { %v3700_v8 = vadd.f32 %v6758_v7, %v3649_v10  ;;  %v3647_v36 = vadd.f32 %v3522_v13, %v3153_v52  ;;  %v5216_v54 = vpop.f32.mrf.mxu1 }
 0x224   : > { %v5272_v30 = vpop.f32.mrf.mxu0  ;;  %v5567_v63 = vpop.eup %5566  ;;  %4647 = vst [vmem:[%s5706_s24 + $0x28] sm:$0xff] %v4561_v59   ;;  %v3162_v45 = vadd.f32 %v5216_v54, %v6698_v22 }
 0x225   : > { %5578 = vtanh.f32 %v3700_v8  ;;  %v3652_v43 = vadd.f32 %v5272_v30, %v3158_v41  ;;  %v4556_v39 = vpack.c.bf16 %v5567_v63, %v5565_v57  ;;  %v3698_v40 = vadd.f32 %v6758_v7, %v3647_v36  ;;  %v3057_v48 = vpop.f32.mrf.mxu1 }
 0x226   : > { %v3535_v17 = vpop.f32.mrf.mxu0  ;;  %5580 = vtanh.f32 %v3697_v6  ;;  %v5569_v44 = vpop.eup %5568  ;;  %v3160_v0 = vadd.f32 %v3057_v48, %v6701_v55 }
 0x227   : > { %v3650_v25 = vadd.f32 %v3535_v17, %v3156_v35  ;;  %4646 = vst [vmem:[%s5706_s24 + $0x20] sm:$0xff] %v4556_v39   ;;  %5582 = vtanh.f32 %v3698_v40  ;;  %v3703_v26 = vadd.f32 %v6758_v7, %v3652_v43  ;;  %v5217_v19 = vpop.f32.mrf.mxu1 }
 0x228   : > { %v5273_v23 = vpop.f32.mrf.mxu0  ;;  %v3163_v52 = vadd.f32 %v5217_v19, %v6704_v62 }
 0x229   : > { %v3653_v61 = vadd.f32 %v5273_v23, %v3159_v38  ;;  %v3060_v2 = vpop.f32.mrf.mxu1  ;;  %v3701_v4 = vadd.f32 %v6758_v7, %v3650_v25  ;;  %5584 = vtanh.f32 %v3703_v26 }
 0x22a   : > { %v5571_v34 = vpop.eup %5570  ;;  %v3538_v47 = vpop.f32.mrf.mxu0  ;;  %v3161_v57 = vadd.f32 %v3060_v2, %v6707_v12 }
 0x22b   : > { %v4571_v50 = vpack.c.bf16 %v5571_v34, %v5569_v44  ;;  %v3704_v60 = vadd.f32 %v6758_v7, %v3653_v61  ;;  %v5573_v53 = vpop.eup %5572  ;;  %v3651_v28 = vadd.f32 %v3538_v47, %v3157_v42  ;;  %v5220_v21 = vpop.f32.mrf.mxu1 }
 0x22c   : > { %v5276_v14 = vpop.f32.mrf.mxu0  ;;  %v5575_v37 = vpop.eup %5574  ;;  %v3166_v63 = vadd.f32 %v5220_v21, %v6710_v31 }
 0x22d   : > { %4649 = vst [vmem:[%s5706_s24 + $0x38] sm:$0xff] %v4571_v50   ;;  %5586 = vtanh.f32 %v3704_v60  ;;  %v3656_v11 = vadd.f32 %v5276_v14, %v3162_v45  ;;  %v4566_v3 = vpack.c.bf16 %v5575_v37, %v5573_v53  ;;  %v3702_v10 = vadd.f32 %v6758_v7, %v3651_v28  ;;  %v3073_v22 = vpop.f32.mrf.mxu1 }
 0x22e   : > { %v3551_v51 = vpop.f32.mrf.mxu0  ;;  %5588 = vtanh.f32 %v3701_v4  ;;  %v5577_v6 = vpop.eup %5576  ;;  %v3164_v38 = vadd.f32 %v3073_v22, %v6713_v15 }
 0x22f   : > { %v3654_v24 = vadd.f32 %v3551_v51, %v3160_v0  ;;  %4648 = vst [vmem:[%s5706_s24 + $0x30] sm:$0xff] %v4566_v3   ;;  %5590 = vtanh.f32 %v3702_v10  ;;  %v3707_v13 = vadd.f32 %v6758_v7, %v3656_v11  ;;  %v5221_v59 = vpop.f32.mrf.mxu1 }
 0x230   : > { %v5277_v41 = vpop.f32.mrf.mxu0  ;;  %v3167_v23 = vadd.f32 %v5221_v59, %v6716_v1 }
 0x231   : > { %v3657_v55 = vadd.f32 %v5277_v41, %v3163_v52  ;;  %v3076_v36 = vpop.f32.mrf.mxu1  ;;  %v3705_v62 = vadd.f32 %v6758_v7, %v3654_v24  ;;  %5592 = vtanh.f32 %v3707_v13 }
 0x232   : > { %v5579_v8 = vpop.eup %5578  ;;  %v3554_v54 = vpop.f32.mrf.mxu0  ;;  %v3165_v50 = vadd.f32 %v3076_v36, %v6719_v29 }
 0x233   : > { %v4581_v30 = vpack.c.bf16 %v5579_v8, %v5577_v6  ;;  %v3708_v35 = vadd.f32 %v6758_v7, %v3657_v55  ;;  %v5581_v43 = vpop.eup %5580  ;;  %v3655_v39 = vadd.f32 %v3554_v54, %v3161_v57  ;;  %v5224_v40 = vpop.f32.mrf.mxu1 }
 0x234   : > { %v5280_v48 = vpop.f32.mrf.mxu0  ;;  %v5583_v17 = vpop.eup %5582  ;;  %v3170_v53 = vadd.f32 %v5224_v40, %v6722_v9 }
 0x235   : > { %4651 = vst [vmem:[%s5706_s24 + $0x48] sm:$0xff] %v4581_v30   ;;  %5594 = vtanh.f32 %v3708_v35  ;;  %v3660_v12 = vadd.f32 %v5280_v48, %v3166_v63  ;;  %v4576_v25 = vpack.c.bf16 %v5583_v17, %v5581_v43  ;;  %v3706_v26 = vadd.f32 %v6758_v7, %v3655_v39  ;;  %v3089_v31 = vpop.f32.mrf.mxu1 }
 0x236   : > { %v3567_v19 = vpop.f32.mrf.mxu0  ;;  %5596 = vtanh.f32 %v3705_v62  ;;  %v5585_v2 = vpop.eup %5584  ;;  %v3168_v3 = vadd.f32 %v3089_v31, %v6725_v33 }
 0x237   : > { %v3658_v44 = vadd.f32 %v3567_v19, %v3164_v38  ;;  %4650 = vst [vmem:[%s5706_s24 + $0x40] sm:$0xff] %v4576_v25   ;;  %5598 = vtanh.f32 %v3706_v26  ;;  %v3711_v61 = vadd.f32 %v6758_v7, %v3660_v12  ;;  %v5225_v34 = vpop.f32.mrf.mxu1 }
 0x238   : > { %v5281_v42 = vpop.f32.mrf.mxu0  ;;  %v3171_v52 = vadd.f32 %v5225_v34, %v6728_v5 }
 0x239   : > { %v3661_v15 = vadd.f32 %v5281_v42, %v3167_v23  ;;  %v3092_v45 = vpop.f32.mrf.mxu1  ;;  %v3709_v1 = vadd.f32 %v6758_v7, %v3658_v44  ;;  %5600 = vtanh.f32 %v3711_v61 }
 0x23a   : > { %v5587_v47 = vpop.eup %5586  ;;  %v3570_v4 = vpop.f32.mrf.mxu0  ;;  %v3169_v8 = vadd.f32 %v3092_v45, %v6731_v56 }
 0x23b   : > { %v4591_v60 = vpack.c.bf16 %v5587_v47, %v5585_v2  ;;  %v3712_v28 = vadd.f32 %v6758_v7, %v3661_v15  ;;  %v5589_v21 = vpop.eup %5588  ;;  %v3659_v14 = vadd.f32 %v3570_v4, %v3165_v50  ;;  %v5228_v37 = vpop.f32.mrf.mxu1 }
 0x23c   : > { %v5284_v0 = vpop.f32.mrf.mxu0  ;;  %v5591_v11 = vpop.eup %5590  ;;  %v3174_v30 = vadd.f32 %v5228_v37, %v6734_v49 }
 0x23d   : > { %4653 = vst [vmem:[%s5706_s24 + $0x58] sm:$0xff] %v4591_v60   ;;  %5602 = vtanh.f32 %v3712_v28  ;;  %v3664_v29 = vadd.f32 %v5284_v0, %v3170_v53  ;;  %v4586_v10 = vpack.c.bf16 %v5591_v11, %v5589_v21  ;;  %v3710_v22 = vadd.f32 %v6758_v7, %v3659_v14  ;;  %v3105_v9 = vpop.f32.mrf.mxu1 }
 0x23e   : > { %v3583_v51 = vpop.f32.mrf.mxu0  ;;  %5604 = vtanh.f32 %v3709_v1  ;;  %v5593_v6 = vpop.eup %5592  ;;  %v3172_v48 = vadd.f32 %v3105_v9, %v6737_v27 }
 0x23f   : > { %v3662_v24 = vadd.f32 %v3583_v51, %v3168_v3  ;;  %4652 = vst [vmem:[%s5706_s24 + $0x50] sm:$0xff] %v4586_v10   ;;  %5606 = vtanh.f32 %v3710_v22  ;;  %v3715_v13 = vadd.f32 %v6758_v7, %v3664_v29  ;;  %v5229_v59 = vpop.f32.mrf.mxu1 }
 0x240   : > { %v5285_v41 = vpop.f32.mrf.mxu0  ;;  %v3175_v25 = vadd.f32 %v5229_v59, %v6740_v46 }
 0x241   : > { %v3665_v33 = vadd.f32 %v5285_v41, %v3171_v52  ;;  %v3108_v57 = vpop.f32.mrf.mxu1  ;;  %v3713_v5 = vadd.f32 %v6758_v7, %v3662_v24  ;;  %5608 = vtanh.f32 %v3715_v13 }
 0x242   : > { %v5595_v55 = vpop.eup %5594  ;;  %v3586_v36 = vpop.f32.mrf.mxu0  ;;  %v3173_v61 = vadd.f32 %v3108_v57, %v6743_v58 }
 0x243   : > { %v4601_v54 = vpack.c.bf16 %v5595_v55, %v5593_v6  ;;  %v3716_v63 = vadd.f32 %v6758_v7, %v3665_v33  ;;  %v5597_v62 = vpop.eup %5596  ;;  %v3663_v35 = vadd.f32 %v3586_v36, %v3169_v8  ;;  %v5232_v43 = vpop.f32.mrf.mxu1 }
 0x244   : > { %v5288_v39 = vpop.f32.mrf.mxu0  ;;  %v5599_v40 = vpop.eup %5598  ;;  %v3178_v15 = vadd.f32 %v5232_v43, %v6745_v32 }
 0x245   : > { %4655 = vst [vmem:[%s5706_s24 + $0x68] sm:$0xff] %v4601_v54   ;;  %5610 = vtanh.f32 %v3716_v63  ;;  %v3668_v56 = vadd.f32 %v5288_v39, %v3174_v30  ;;  %v4596_v17 = vpack.c.bf16 %v5599_v40, %v5597_v62  ;;  %v3714_v38 = vadd.f32 %v6758_v7, %v3663_v35  ;;  %v3121_v49 = vpop.f32.mrf.mxu1 }
 0x246   : > { %v3599_v12 = vpop.f32.mrf.mxu0  ;;  %5612 = vtanh.f32 %v3713_v5  ;;  %v5601_v23 = vpop.eup %5600  ;;  %v3176_v53 = vadd.f32 %v3121_v49, %v6747_v20 }
 0x247   : > { %v3666_v26 = vadd.f32 %v3599_v12, %v3172_v48  ;;  %4654 = vst [vmem:[%s5706_s24 + $0x60] sm:$0xff] %v4596_v17   ;;  %5614 = vtanh.f32 %v3714_v38  ;;  %v3719_v31 = vadd.f32 %v6758_v7, %v3668_v56  ;;  %v5233_v34 = vpop.f32.mrf.mxu1 }
 0x248   : > { %v5289_v19 = vpop.f32.mrf.mxu0  ;;  %v3179_v14 = vadd.f32 %v5233_v34, %v6749_v16 }
 0x249   : > { %v3669_v44 = vadd.f32 %v5289_v19, %v3175_v25  ;;  %v3717_v47 = vadd.f32 %v6758_v7, %v3666_v26  ;;  %5616 = vtanh.f32 %v3719_v31  ;;  %v3124_v28 = vpop.f32.mrf.mxu1 }
 0x24a   : > { %v5603_v27 = vpop.eup %5602  ;;  %v3602_v42 = vpop.f32.mrf.mxu0  ;;  %v3177_v20 = vadd.f32 %v3124_v28, %v6752_v18 }
 0x24b   : > { %v4611_v2 = vpack.c.bf16 %v5603_v27, %v5601_v23  ;;  %v3720_v46 = vadd.f32 %v6758_v7, %v3669_v44  ;;  %v5605_v50 = vpop.eup %5604  ;;  %v3667_v45 = vadd.f32 %v3602_v42, %v3173_v61 }
 0x24c   : > { %v5292_v4 = vpop.f32.mrf.mxu0  ;;  %v5607_v60 = vpop.eup %5606 }
 0x24d   : > { %4657 = vst [vmem:[%s5706_s24 + $0x78] sm:$0xff] %v4611_v2   ;;  %5618 = vtanh.f32 %v3720_v46  ;;  %v3672_v58 = vadd.f32 %v5292_v4, %v3178_v15  ;;  %v4606_v1 = vpack.c.bf16 %v5607_v60, %v5605_v50  ;;  %v3718_v21 = vadd.f32 %v6758_v7, %v3667_v45 }
 0x24e   : > { %v3615_v32 = vpop.f32.mrf.mxu0  ;;  %5620 = vtanh.f32 %v3717_v47  ;;  %v5609_v3 = vpop.eup %5608 }
 0x24f   : > { %v3670_v37 = vadd.f32 %v3615_v32, %v3176_v53  ;;  %4656 = vst [vmem:[%s5706_s24 + $0x70] sm:$0xff] %v4606_v1   ;;  %5622 = vtanh.f32 %v3718_v21  ;;  %v3723_v0 = vadd.f32 %v6758_v7, %v3672_v58 }
 0x250   : > { %v5293_v11 = vpop.f32.mrf.mxu0 }
 0x251   : > { %v3673_v29 = vadd.f32 %v5293_v11, %v3179_v14  ;;  %v3721_v22 = vadd.f32 %v6758_v7, %v3670_v37  ;;  %5624 = vtanh.f32 %v3723_v0 }
 0x252   : > { %v5611_v10 = vpop.eup %5610  ;;  %v3618_v9 = vpop.f32.mrf.mxu0 }
 0x253   : > { %v4621_v51 = vpack.c.bf16 %v5611_v10, %v5609_v3  ;;  %v3724_v52 = vadd.f32 %v6758_v7, %v3673_v29  ;;  %v3671_v16 = vadd.f32 %v3618_v9, %v3177_v20  ;;  %v5613_v24 = vpop.eup %5612 }
 0x254   : > { %v5615_v13 = vpop.eup %5614 }
 0x255   : > { %4659 = vst [vmem:[%s5706_s24 + $0x88] sm:$0xff] %v4621_v51   ;;  %5626 = vtanh.f32 %v3724_v52  ;;  %v3722_v59 = vadd.f32 %v6758_v7, %v3671_v16  ;;  %v4616_v18 = vpack.c.bf16 %v5615_v13, %v5613_v24 }
 0x256   : > { %5628 = vtanh.f32 %v3721_v22  ;;  %v5617_v41 = vpop.eup %5616 }
 0x257   : > { %5630 = vtanh.f32 %v3722_v59  ;;  %4658 = vst [vmem:[%s5706_s24 + $0x80] sm:$0xff] %v4616_v18  }
 0x25a   : > { %v5619_v6 = vpop.eup %5618 }
 0x25b   : > { %v4631_v33 = vpack.c.bf16 %v5619_v6, %v5617_v41  ;;  %v5621_v55 = vpop.eup %5620 }
 0x25c   : > { %v5623_v8 = vpop.eup %5622 }
 0x25d   : > { %4661 = vst [vmem:[%s5706_s24 + $0x98] sm:$0xff] %v4631_v33   ;;  %v4626_v57 = vpack.c.bf16 %v5623_v8, %v5621_v55 }
 0x25e   : > { %v5625_v36 = vpop.eup %5624 }
 0x25f   : > { %4660 = vst [vmem:[%s5706_s24 + $0x90] sm:$0xff] %v4626_v57  }
 0x262   : > { %v5627_v54 = vpop.eup %5626 }
 0x263   : > { %v5629_v30 = vpop.eup %5628  ;;  %v4641_v5 = vpack.c.bf16 %v5627_v54, %v5625_v36 }
 0x264   : > { %v5631_v63 = vpop.eup %5630 }
 0x265   : > { %4663 = vst [vmem:[%s5706_s24 + $0xa8] sm:$0xff] %v4641_v5   ;;  %v4636_v7 = vpack.c.bf16 %v5631_v63, %v5629_v30 }
 0x267   : > { %4662 = vst [vmem:[%s5706_s24 + $0xa0] sm:$0xff] %v4636_v7  }
 0x268 PF: > { %s13_s14 = sadd.s32 1, %s5656_s14   ;;  %s6881_s12 = smov %s5652_s13 }
 0x269   : > { %p10_p9 = scmp.ge.s32.totalorder %s13_s14, 5   ;;  %s6882_s13 = smov %s6884_s15 }
 0x26b   :  { %12 = sbr.rel (!%p10_p9) target bundleno = 2 (0x2), region = 169 }
 0x270   :  { %4017 = vsyncmov [#allocation3] }
 0x273   :  { %s4018_s17 = vpop.sfrf %4017 }
 0x274   :  { %p4484_p10 = scmp.ne.s32.totalorder %s4018_s17, 0 }
 0x276   :  { %4022 = shalt.err (%p4484_p10)  }
 0x277   :  { %4024 = vsyncmov [#allocation3 + $0x1] }
 0x27a   :  { %s4025_s18 = vpop.sfrf %4024 }
 0x27b   :  { %p4485_p11 = scmp.ne.s32.totalorder %s4025_s18, 0 }
 0x27d   :  { %4029 = shalt.err (%p4485_p11)  }

</bundles_post_ra>
